<compile_context>
chip_gen: v7x
topology: tpu7x:2x2x1
jax: 0.10.0
libtpu: 0.0.40
codegen_flags: <defaults>
</compile_context>

<pallas_src>
import jax
import jax.numpy as jnp
from jax.experimental import pallas as pl
from jax.experimental.pallas import tpu as pltpu

# ---- small synthetic config (module defaults are 300/640/512/8) ----
WORD = 128       # word embedding size
SENT = 128       # sentence embedding size (also GAT out_channels per head)
SECT = 128       # section embedding size
HEADS = 4        # attention heads
HC = HEADS * SENT
N_SENT = 8
N_WORD = 16
N_SECT = 4
DROPOUT_P = 0.1


# ---------------------------------------------------------------------------
# in-kernel helpers (traced inside the single fused kernel)
# ---------------------------------------------------------------------------
def _head_scores(h_lin, att):
    # h_lin: [N, H*C] f32, att: [H, C] f32 -> [N, H]   (VPU multiply + lane reduce, no MXU)
    n = h_lin.shape[0]
    h3 = h_lin.reshape(n, HEADS, SENT)
    return jnp.sum(h3 * att[None, :, :], axis=-1)


def _elu(x):
    # ELU written with exp (avoids expm1 lowering edge cases)
    return jnp.where(x > 0.0, x, jnp.exp(jnp.minimum(x, 0.0)) - 1.0)


def _gat_attend(hs_lin, hd_lin, att_src, att_dst, bias, adj):
    """PyG GATConv aggregation (concat heads) fused with the downstream ELU.

    hs_lin / hd_lin: linearly transformed source / destination features, [*, H*C] f32.
    adj: dense adjacency mask [Nd, Ns], 1.0 where edge src->dst exists.
    """
    a_src = _head_scores(hs_lin, att_src)                 # [Ns, H]
    a_dst = _head_scores(hd_lin, att_dst)                 # [Nd, H]

    # all-heads logits at once, heads leading: e[h, d, s] = a_dst[d,h] + a_src[s,h]
    e = a_dst.T[:, :, None] + a_src.T[:, None, :]         # [H, Nd, Ns]
    e = jnp.where(e > 0.0, e, 0.2 * e)                    # LeakyReLU(0.2)

    mask = adj > 0.0                                      # [Nd, Ns]
    logits = jnp.where(mask[None, :, :], e, -1e30)
    m = jnp.max(logits, axis=-1, keepdims=True)
    p = jnp.exp(logits - m)                               # non-edges underflow to 0 when row has edges
    denom = jnp.sum(p, axis=-1, keepdims=True)
    # rows with no in-edge get zero attention (PyG: isolated dst -> bias only)
    has_edge = jnp.sum(adj, axis=-1, keepdims=True) > 0.0             # [Nd, 1]
    inv = jnp.where(has_edge[None, :, :], 1.0 / denom, 0.0)           # [H, Nd, 1]
    attn = (p * inv).astype(jnp.bfloat16)

    vals = hs_lin.astype(jnp.bfloat16)
    outs = [
        jnp.dot(attn[h], vals[:, h * SENT:(h + 1) * SENT],
                preferred_element_type=jnp.float32)
        for h in range(HEADS)                             # H is small; MXU loop stays static
    ]
    out = jnp.concatenate(outs, axis=-1) + bias           # hoisted bias, single wide add
    return _elu(out)


def _fusion(a, b, wa, wb, bias):
    # TODO(synk): Fusion module definition not given in the source; gated fusion assumed:
    #             z = sigmoid(a @ Wa + b @ Wb + c);  out = z*a + (1-z)*b
    pre = (jnp.dot(a.astype(jnp.bfloat16), wa, preferred_element_type=jnp.float32)
           + jnp.dot(b.astype(jnp.bfloat16), wb, preferred_element_type=jnp.float32)
           + bias)
    z = 1.0 / (1.0 + jnp.exp(-pre))
    return z * a + (1.0 - z) * b


# ---------------------------------------------------------------------------
# single fused kernel: 3x GATConv+ELU, 2x Fusion, dropout, FFN (+residual)
# ---------------------------------------------------------------------------
def _sentence_net_kernel(
        hs_ref, hw_ref, hS_ref, adj_w_ref, adj_s_ref, adj_S_ref,
        gw_ws_ref, gw_wd_ref, gw_as_ref, gw_ad_ref, gw_b_ref,
        gs_w_ref, gs_as_ref, gs_ad_ref, gs_b_ref,
        gS_ws_ref, gS_wd_ref, gS_as_ref, gS_ad_ref, gS_b_ref,
        f1_wa_ref, f1_wb_ref, f1_b_ref,
        f2_wa_ref, f2_wb_ref, f2_b_ref,
        w1_ref, b1_ref, w2_ref, b2_ref,
        drop1_ref, drop2_ref,
        out_ref):
    hs_f32 = hs_ref[...]
    hs16 = hs_f32.astype(jnp.bfloat16)
    hw16 = hw_ref[...].astype(jnp.bfloat16)
    hS16 = hS_ref[...].astype(jnp.bfloat16)

    # ---- GAT linear transforms (bf16 MXU, f32 accumulate) ----
    src_w = jnp.dot(hw16, gw_ws_ref[...], preferred_element_type=jnp.float32)   # [Nw, HC]
    dst_w = jnp.dot(hs16, gw_wd_ref[...], preferred_element_type=jnp.float32)   # [Ns, HC]
    lin_s = jnp.dot(hs16, gs_w_ref[...], preferred_element_type=jnp.float32)    # [Ns, HC] shared src/dst
    src_S = jnp.dot(hS16, gS_ws_ref[...], preferred_element_type=jnp.float32)   # [NS, HC]
    dst_S = jnp.dot(hs16, gS_wd_ref[...], preferred_element_type=jnp.float32)   # [Ns, HC]

    Uw = _gat_attend(src_w, dst_w, gw_as_ref[...], gw_ad_ref[...], gw_b_ref[...], adj_w_ref[...])
    Us = _gat_attend(lin_s, lin_s, gs_as_ref[...], gs_ad_ref[...], gs_b_ref[...], adj_s_ref[...])
    US = _gat_attend(src_S, dst_S, gS_as_ref[...], gS_ad_ref[...], gS_b_ref[...], adj_S_ref[...])

    # ---- feature fusions ----
    U1 = _fusion(Uw, Us, f1_wa_ref[...], f1_wb_ref[...], f1_b_ref[...])
    U2 = _fusion(U1, US, f2_wa_ref[...], f2_wb_ref[...], f2_b_ref[...])

    # ---- dropout + FFN (residual on Hs) ----
    # TODO(synk): FFN module definition not given in the source; implemented as
    #             Hs + dropout(relu(x @ W1 + b1)) @ W2 + b2
    x = U2 * drop1_ref[...]                                # module-level F.dropout on U2
    h = jnp.dot(x.astype(jnp.bfloat16), w1_ref[...],
                preferred_element_type=jnp.float32) + b1_ref[...]
    h = jnp.maximum(h, 0.0)
    h = h * drop2_ref[...]                                 # FFN-internal dropout
    out = hs_f32 + jnp.dot(h.astype(jnp.bfloat16), w2_ref[...],
                           preferred_element_type=jnp.float32) + b2_ref[...]
    out_ref[...] = out.astype(out_ref.dtype)


def sentence_net_forward(Hs, Hw, HS, adj_w2s, adj_s2s, adj_S2s, params,
                         dropout_key=None, training=True):
    n_sent = Hs.shape[0]
    if training and DROPOUT_P and dropout_key is not None:
        k1, k2 = jax.random.split(dropout_key)
        keep = 1.0 - DROPOUT_P
        drop1 = jax.random.bernoulli(k1, keep, (n_sent, HC)).astype(jnp.float32) / keep
        drop2 = jax.random.bernoulli(k2, keep, (n_sent, SENT)).astype(jnp.float32) / keep
    else:
        drop1 = jnp.ones((n_sent, HC), jnp.float32)
        drop2 = jnp.ones((n_sent, SENT), jnp.float32)

    args = (
        Hs, Hw, HS, adj_w2s, adj_s2s, adj_S2s,
        params["gat_w"]["w_src"], params["gat_w"]["w_dst"],
        params["gat_w"]["att_src"], params["gat_w"]["att_dst"], params["gat_w"]["bias"],
        params["gat_s"]["w_src"],
        params["gat_s"]["att_src"], params["gat_s"]["att_dst"], params["gat_s"]["bias"],
        params["gat_S"]["w_src"], params["gat_S"]["w_dst"],
        params["gat_S"]["att_src"], params["gat_S"]["att_dst"], params["gat_S"]["bias"],
        params["fusion1"]["w_a"], params["fusion1"]["w_b"], params["fusion1"]["bias"],
        params["fusion2"]["w_a"], params["fusion2"]["w_b"], params["fusion2"]["bias"],
        params["ffn"]["w1"], params["ffn"]["b1"], params["ffn"]["w2"], params["ffn"]["b2"],
        drop1, drop2,
    )
    # Everything (weights + activations) is ~3 MiB at these sizes -> whole-array VMEM blocks,
    # no grid.  At module-default sizes (HC=5120) the fusion weights would need grid-tiled,
    # double-buffered BlockSpecs instead; TODO(synk): add K/N-tiled grid for large configs.
    return pl.pallas_call(
        _sentence_net_kernel,
        out_shape=jax.ShapeDtypeStruct((n_sent, SENT), jnp.float32),
        in_specs=[pl.BlockSpec(memory_space=pltpu.MemorySpace.VMEM)] * len(args),
        out_specs=pl.BlockSpec(memory_space=pltpu.MemorySpace.VMEM),
    )(*args)


# ---------------------------------------------------------------------------
# parameter / input construction (deterministic, synthetic)
# ---------------------------------------------------------------------------
def _glorot(key, shape, dtype=jnp.float32):
    w = jax.random.normal(key, shape, jnp.float32) / jnp.sqrt(jnp.float32(shape[0]))
    return w.astype(dtype)


def _make_gat_params(key, in_src, in_dst=None):
    k1, k2, k3, k4 = jax.random.split(key, 4)
    p = dict(
        w_src=_glorot(k1, (in_src, HC), jnp.bfloat16),
        att_src=_glorot(k3, (HEADS, SENT)),
        att_dst=_glorot(k4, (HEADS, SENT)),
        bias=jnp.zeros((1, HC), jnp.float32),
    )
    if in_dst is not None:                 # bipartite GAT: separate dst linear
        p["w_dst"] = _glorot(k2, (in_dst, HC), jnp.bfloat16)
    return p


def _make_fusion_params(key):
    k1, k2 = jax.random.split(key)
    return dict(w_a=_glorot(k1, (HC, HC), jnp.bfloat16),
                w_b=_glorot(k2, (HC, HC), jnp.bfloat16),
                bias=jnp.zeros((1, HC), jnp.float32))


def _make_ffn_params(key):
    k1, k2 = jax.random.split(key)
    return dict(w1=_glorot(k1, (HC, SENT), jnp.bfloat16),
                b1=jnp.zeros((1, SENT), jnp.float32),
                w2=_glorot(k2, (SENT, SENT), jnp.bfloat16),
                b2=jnp.zeros((1, SENT), jnp.float32))


def _make_adj(key, n_dst, n_src, density=0.4):
    adj = jax.random.bernoulli(key, density, (n_dst, n_src)).astype(jnp.float32)
    m = min(n_dst, n_src)
    idx = jnp.arange(m)
    # PyG GATConv default: remove_self_loops + add_self_loops over min(N_src, N_dst)
    adj = adj.at[idx, idx].set(1.0)
    return adj


if __name__ == "__main__":
    root = jax.random.PRNGKey(0)
    keys = jax.random.split(root, 13)

    # node features
    Hs = jax.random.normal(keys[0], (N_SENT, SENT), jnp.float32)
    Hw = jax.random.normal(keys[1], (N_WORD, WORD), jnp.float32)
    HS = jax.random.normal(keys[2], (N_SECT, SECT), jnp.float32)

    # dense adjacency masks adj[dst, src]
    adj_w2s = _make_adj(keys[3], N_SENT, N_WORD)
    adj_s2s = _make_adj(keys[4], N_SENT, N_SENT)
    adj_S2s = _make_adj(keys[5], N_SENT, N_SECT)

    params = dict(
        gat_w=_make_gat_params(keys[6], WORD, SENT),
        gat_s=_make_gat_params(keys[7], SENT),          # shared linear (x_src == x_dst)
        gat_S=_make_gat_params(keys[8], SECT, SENT),
        fusion1=_make_fusion_params(keys[9]),
        fusion2=_make_fusion_params(keys[10]),
        ffn=_make_ffn_params(keys[11]),
    )

    out = sentence_net_forward(Hs, Hw, HS, adj_w2s, adj_s2s, adj_S2s, params,
                               dropout_key=keys[12], training=True)
    out = jax.block_until_ready(out)
    assert out.shape == (N_SENT, SENT) and out.dtype == jnp.float32
    assert bool(jnp.all(jnp.isfinite(out)))
    print("KERNEL_OK")
</pallas_src>

<mosaic_0001>
module attributes {stable_mosaic.version = 11 : i64} {
  func.func @_sentence_net_kernel(%arg0: memref<8x128xf32, #tpu.memory_space<vmem>>, %arg1: memref<16x128xf32, #tpu.memory_space<vmem>>, %arg2: memref<4x128xf32, #tpu.memory_space<vmem>>, %arg3: memref<8x16xf32, #tpu.memory_space<vmem>>, %arg4: memref<8x8xf32, #tpu.memory_space<vmem>>, %arg5: memref<8x4xf32, #tpu.memory_space<vmem>>, %arg6: memref<128x512xbf16, #tpu.memory_space<vmem>>, %arg7: memref<128x512xbf16, #tpu.memory_space<vmem>>, %arg8: memref<4x128xf32, #tpu.memory_space<vmem>>, %arg9: memref<4x128xf32, #tpu.memory_space<vmem>>, %arg10: memref<1x512xf32, #tpu.memory_space<vmem>>, %arg11: memref<128x512xbf16, #tpu.memory_space<vmem>>, %arg12: memref<4x128xf32, #tpu.memory_space<vmem>>, %arg13: memref<4x128xf32, #tpu.memory_space<vmem>>, %arg14: memref<1x512xf32, #tpu.memory_space<vmem>>, %arg15: memref<128x512xbf16, #tpu.memory_space<vmem>>, %arg16: memref<128x512xbf16, #tpu.memory_space<vmem>>, %arg17: memref<4x128xf32, #tpu.memory_space<vmem>>, %arg18: memref<4x128xf32, #tpu.memory_space<vmem>>, %arg19: memref<1x512xf32, #tpu.memory_space<vmem>>, %arg20: memref<512x512xbf16, #tpu.memory_space<vmem>>, %arg21: memref<512x512xbf16, #tpu.memory_space<vmem>>, %arg22: memref<1x512xf32, #tpu.memory_space<vmem>>, %arg23: memref<512x512xbf16, #tpu.memory_space<vmem>>, %arg24: memref<512x512xbf16, #tpu.memory_space<vmem>>, %arg25: memref<1x512xf32, #tpu.memory_space<vmem>>, %arg26: memref<512x128xbf16, #tpu.memory_space<vmem>>, %arg27: memref<1x128xf32, #tpu.memory_space<vmem>>, %arg28: memref<128x128xbf16, #tpu.memory_space<vmem>>, %arg29: memref<1x128xf32, #tpu.memory_space<vmem>>, %arg30: memref<8x512xf32, #tpu.memory_space<vmem>>, %arg31: memref<8x128xf32, #tpu.memory_space<vmem>>, %arg32: memref<8x128xf32, #tpu.memory_space<vmem>>) attributes {dimension_semantics = [], scalar_prefetch = 0 : i64, scratch_operands = 0 : i64, tpu.core_type = #tpu.core_type<tc>} {
    %c0 = arith.constant 0 : index
    %c0_0 = arith.constant 0 : index
    %0 = vector.load %arg0[%c0, %c0_0] : memref<8x128xf32, #tpu.memory_space<vmem>>, vector<8x128xf32>
    %1 = arith.truncf %0 : vector<8x128xf32> to vector<8x128xbf16>
    %c0_1 = arith.constant 0 : index
    %c0_2 = arith.constant 0 : index
    %2 = vector.load %arg1[%c0_1, %c0_2] : memref<16x128xf32, #tpu.memory_space<vmem>>, vector<16x128xf32>
    %3 = arith.truncf %2 : vector<16x128xf32> to vector<16x128xbf16>
    %c0_3 = arith.constant 0 : index
    %c0_4 = arith.constant 0 : index
    %4 = vector.load %arg2[%c0_3, %c0_4] : memref<4x128xf32, #tpu.memory_space<vmem>>, vector<4x128xf32>
    %5 = arith.truncf %4 : vector<4x128xf32> to vector<4x128xbf16>
    %c0_5 = arith.constant 0 : index
    %c0_6 = arith.constant 0 : index
    %6 = vector.load %arg6[%c0_5, %c0_6] : memref<128x512xbf16, #tpu.memory_space<vmem>>, vector<128x512xbf16>
    %cst = arith.constant dense<0.000000e+00> : vector<16x512xf32>
    %7 = tpu.matmul %3, %6, %cst {dimension_numbers = #tpu.dot_dimension_numbers<[1], [0], [0], [1], [0, 0, 1, 1], [], []>} : vector<16x128xbf16>, vector<128x512xbf16>, vector<16x512xf32> -> vector<16x512xf32>
    %c0_7 = arith.constant 0 : index
    %c0_8 = arith.constant 0 : index
    %8 = vector.load %arg7[%c0_7, %c0_8] : memref<128x512xbf16, #tpu.memory_space<vmem>>, vector<128x512xbf16>
    %cst_9 = arith.constant dense<0.000000e+00> : vector<8x512xf32>
    %9 = tpu.matmul %1, %8, %cst_9 {dimension_numbers = #tpu.dot_dimension_numbers<[1], [0], [0], [1], [0, 0, 1, 1], [], []>} : vector<8x128xbf16>, vector<128x512xbf16>, vector<8x512xf32> -> vector<8x512xf32>
    %c0_10 = arith.constant 0 : index
    %c0_11 = arith.constant 0 : index
    %10 = vector.load %arg11[%c0_10, %c0_11] : memref<128x512xbf16, #tpu.memory_space<vmem>>, vector<128x512xbf16>
    %cst_12 = arith.constant dense<0.000000e+00> : vector<8x512xf32>
    %11 = tpu.matmul %1, %10, %cst_12 {dimension_numbers = #tpu.dot_dimension_numbers<[1], [0], [0], [1], [0, 0, 1, 1], [], []>} : vector<8x128xbf16>, vector<128x512xbf16>, vector<8x512xf32> -> vector<8x512xf32>
    %c0_13 = arith.constant 0 : index
    %c0_14 = arith.constant 0 : index
    %12 = vector.load %arg15[%c0_13, %c0_14] : memref<128x512xbf16, #tpu.memory_space<vmem>>, vector<128x512xbf16>
    %cst_15 = arith.constant dense<0.000000e+00> : vector<4x512xf32>
    %13 = tpu.matmul %5, %12, %cst_15 {dimension_numbers = #tpu.dot_dimension_numbers<[1], [0], [0], [1], [0, 0, 1, 1], [], []>} : vector<4x128xbf16>, vector<128x512xbf16>, vector<4x512xf32> -> vector<4x512xf32>
    %c0_16 = arith.constant 0 : index
    %c0_17 = arith.constant 0 : index
    %14 = vector.load %arg16[%c0_16, %c0_17] : memref<128x512xbf16, #tpu.memory_space<vmem>>, vector<128x512xbf16>
    %cst_18 = arith.constant dense<0.000000e+00> : vector<8x512xf32>
    %15 = tpu.matmul %1, %14, %cst_18 {dimension_numbers = #tpu.dot_dimension_numbers<[1], [0], [0], [1], [0, 0, 1, 1], [], []>} : vector<8x128xbf16>, vector<128x512xbf16>, vector<8x512xf32> -> vector<8x512xf32>
    %c0_19 = arith.constant 0 : index
    %c0_20 = arith.constant 0 : index
    %16 = vector.load %arg8[%c0_19, %c0_20] : memref<4x128xf32, #tpu.memory_space<vmem>>, vector<4x128xf32>
    %c0_21 = arith.constant 0 : index
    %c0_22 = arith.constant 0 : index
    %17 = vector.load %arg9[%c0_21, %c0_22] : memref<4x128xf32, #tpu.memory_space<vmem>>, vector<4x128xf32>
    %c0_23 = arith.constant 0 : index
    %c0_24 = arith.constant 0 : index
    %18 = vector.load %arg10[%c0_23, %c0_24] : memref<1x512xf32, #tpu.memory_space<vmem>>, vector<1x512xf32>
    %c0_25 = arith.constant 0 : index
    %c0_26 = arith.constant 0 : index
    %19 = vector.load %arg3[%c0_25, %c0_26] : memref<8x16xf32, #tpu.memory_space<vmem>>, vector<8x16xf32>
    %20 = vector.shape_cast %7 : vector<16x512xf32> to vector<16x4x128xf32>
    %21 = vector.shape_cast %16 : vector<4x128xf32> to vector<1x4x128xf32>
    %22 = vector.broadcast %21 : vector<1x4x128xf32> to vector<16x4x128xf32>
    %23 = arith.mulf %20, %22 : vector<16x4x128xf32>
    %cst_27 = arith.constant dense<0.000000e+00> : vector<16x4xf32>
    %24 = vector.multi_reduction <add>, %23, %cst_27 [2] : vector<16x4x128xf32> to vector<16x4xf32>
    %25 = vector.shape_cast %9 : vector<8x512xf32> to vector<8x4x128xf32>
    %26 = vector.shape_cast %17 : vector<4x128xf32> to vector<1x4x128xf32>
    %27 = vector.broadcast %26 : vector<1x4x128xf32> to vector<8x4x128xf32>
    %28 = arith.mulf %25, %27 : vector<8x4x128xf32>
    %cst_28 = arith.constant dense<0.000000e+00> : vector<8x4xf32>
    %29 = vector.multi_reduction <add>, %28, %cst_28 [2] : vector<8x4x128xf32> to vector<8x4xf32>
    %30 = tpu.transpose %29, [1, 0] : vector<8x4xf32> -> vector<4x8xf32>
    %31 = vector.shape_cast %30 : vector<4x8xf32> to vector<4x8x1xf32>
    %32 = tpu.transpose %24, [1, 0] : vector<16x4xf32> -> vector<4x16xf32>
    %33 = vector.shape_cast %32 : vector<4x16xf32> to vector<4x1x16xf32>
    %34 = vector.broadcast %31 : vector<4x8x1xf32> to vector<4x8x16xf32>
    %35 = vector.broadcast %33 : vector<4x1x16xf32> to vector<4x8x16xf32>
    %36 = arith.addf %34, %35 : vector<4x8x16xf32>
    %cst_29 = arith.constant 0.000000e+00 : f32
    %37 = vector.broadcast %cst_29 : f32 to vector<4x8x16xf32>
    %38 = arith.cmpf ogt, %36, %37 : vector<4x8x16xf32>
    %cst_30 = arith.constant 2.000000e-01 : f32
    %39 = vector.broadcast %cst_30 : f32 to vector<4x8x16xf32>
    %40 = arith.mulf %39, %36 : vector<4x8x16xf32>
    %41 = arith.select %38, %36, %40 : vector<4x8x16xi1>, vector<4x8x16xf32>
    %cst_31 = arith.constant 0.000000e+00 : f32
    %42 = vector.broadcast %cst_31 : f32 to vector<8x16xf32>
    %43 = arith.cmpf ogt, %19, %42 : vector<8x16xf32>
    %44 = vector.shape_cast %43 : vector<8x16xi1> to vector<1x8x16xi1>
    %cst_32 = arith.constant -1.000000e+30 : f32
    %45 = vector.shape_cast %44 : vector<1x8x16xi1> to vector<1x8x16xi1>
    %46 = vector.broadcast %45 : vector<1x8x16xi1> to vector<4x8x16xi1>
    %47 = vector.broadcast %cst_32 : f32 to vector<4x8x16xf32>
    %48 = arith.select %46, %41, %47 : vector<4x8x16xi1>, vector<4x8x16xf32>
    %cst_33 = arith.constant dense<0xFF800000> : vector<4x8xf32>
    %49 = vector.multi_reduction <maximumf>, %48, %cst_33 [2] : vector<4x8x16xf32> to vector<4x8xf32>
    %50 = vector.shape_cast %49 : vector<4x8xf32> to vector<4x8x1xf32>
    %51 = vector.broadcast %50 : vector<4x8x1xf32> to vector<4x8x16xf32>
    %52 = arith.subf %48, %51 : vector<4x8x16xf32>
    %53 = math.exp %52 : vector<4x8x16xf32>
    %cst_34 = arith.constant dense<0.000000e+00> : vector<4x8xf32>
    %54 = vector.multi_reduction <add>, %53, %cst_34 [2] : vector<4x8x16xf32> to vector<4x8xf32>
    %55 = vector.shape_cast %54 : vector<4x8xf32> to vector<4x8x1xf32>
    %cst_35 = arith.constant dense<0.000000e+00> : vector<8xf32>
    %56 = vector.multi_reduction <add>, %19, %cst_35 [1] : vector<8x16xf32> to vector<8xf32>
    %57 = vector.shape_cast %56 : vector<8xf32> to vector<8x1xf32>
    %cst_36 = arith.constant 0.000000e+00 : f32
    %58 = vector.broadcast %cst_36 : f32 to vector<8x1xf32>
    %59 = arith.cmpf ogt, %57, %58 : vector<8x1xf32>
    %60 = vector.shape_cast %59 : vector<8x1xi1> to vector<1x8x1xi1>
    %cst_37 = arith.constant 1.000000e+00 : f32
    %61 = vector.broadcast %cst_37 : f32 to vector<4x8x1xf32>
    %62 = arith.divf %61, %55 : vector<4x8x1xf32>
    %cst_38 = arith.constant 0.000000e+00 : f32
    %63 = vector.shape_cast %60 : vector<1x8x1xi1> to vector<1x8x1xi1>
    %64 = vector.broadcast %63 : vector<1x8x1xi1> to vector<4x8x1xi1>
    %65 = vector.broadcast %cst_38 : f32 to vector<4x8x1xf32>
    %66 = arith.select %64, %62, %65 : vector<4x8x1xi1>, vector<4x8x1xf32>
    %67 = vector.broadcast %66 : vector<4x8x1xf32> to vector<4x8x16xf32>
    %68 = arith.mulf %53, %67 : vector<4x8x16xf32>
    %69 = arith.truncf %68 : vector<4x8x16xf32> to vector<4x8x16xbf16>
    %70 = arith.truncf %7 : vector<16x512xf32> to vector<16x512xbf16>
    %71 = vector.extract_strided_slice %69 {offsets = [0, 0, 0], sizes = [1, 8, 16], strides = [1, 1, 1]} : vector<4x8x16xbf16> to vector<1x8x16xbf16>
    %72 = vector.shape_cast %71 : vector<1x8x16xbf16> to vector<8x16xbf16>
    %73 = vector.extract_strided_slice %70 {offsets = [0, 0], sizes = [16, 128], strides = [1, 1]} : vector<16x512xbf16> to vector<16x128xbf16>
    %cst_39 = arith.constant dense<0.000000e+00> : vector<8x128xf32>
    %74 = tpu.matmul %72, %73, %cst_39 {dimension_numbers = #tpu.dot_dimension_numbers<[1], [0], [0], [1], [0, 0, 1, 1], [], []>} : vector<8x16xbf16>, vector<16x128xbf16>, vector<8x128xf32> -> vector<8x128xf32>
    %75 = vector.extract_strided_slice %69 {offsets = [1, 0, 0], sizes = [1, 8, 16], strides = [1, 1, 1]} : vector<4x8x16xbf16> to vector<1x8x16xbf16>
    %76 = vector.shape_cast %75 : vector<1x8x16xbf16> to vector<8x16xbf16>
    %77 = vector.extract_strided_slice %70 {offsets = [0, 128], sizes = [16, 128], strides = [1, 1]} : vector<16x512xbf16> to vector<16x128xbf16>
    %cst_40 = arith.constant dense<0.000000e+00> : vector<8x128xf32>
    %78 = tpu.matmul %76, %77, %cst_40 {dimension_numbers = #tpu.dot_dimension_numbers<[1], [0], [0], [1], [0, 0, 1, 1], [], []>} : vector<8x16xbf16>, vector<16x128xbf16>, vector<8x128xf32> -> vector<8x128xf32>
    %79 = vector.extract_strided_slice %69 {offsets = [2, 0, 0], sizes = [1, 8, 16], strides = [1, 1, 1]} : vector<4x8x16xbf16> to vector<1x8x16xbf16>
    %80 = vector.shape_cast %79 : vector<1x8x16xbf16> to vector<8x16xbf16>
    %81 = vector.extract_strided_slice %70 {offsets = [0, 256], sizes = [16, 128], strides = [1, 1]} : vector<16x512xbf16> to vector<16x128xbf16>
    %cst_41 = arith.constant dense<0.000000e+00> : vector<8x128xf32>
    %82 = tpu.matmul %80, %81, %cst_41 {dimension_numbers = #tpu.dot_dimension_numbers<[1], [0], [0], [1], [0, 0, 1, 1], [], []>} : vector<8x16xbf16>, vector<16x128xbf16>, vector<8x128xf32> -> vector<8x128xf32>
    %83 = vector.extract_strided_slice %69 {offsets = [3, 0, 0], sizes = [1, 8, 16], strides = [1, 1, 1]} : vector<4x8x16xbf16> to vector<1x8x16xbf16>
    %84 = vector.shape_cast %83 : vector<1x8x16xbf16> to vector<8x16xbf16>
    %85 = vector.extract_strided_slice %70 {offsets = [0, 384], sizes = [16, 128], strides = [1, 1]} : vector<16x512xbf16> to vector<16x128xbf16>
    %cst_42 = arith.constant dense<0.000000e+00> : vector<8x128xf32>
    %86 = tpu.matmul %84, %85, %cst_42 {dimension_numbers = #tpu.dot_dimension_numbers<[1], [0], [0], [1], [0, 0, 1, 1], [], []>} : vector<8x16xbf16>, vector<16x128xbf16>, vector<8x128xf32> -> vector<8x128xf32>
    %87 = tpu.concatenate %74, %78, %82, %86 in 1 : vector<8x128xf32>, vector<8x128xf32>, vector<8x128xf32>, vector<8x128xf32> -> vector<8x512xf32>
    %88 = vector.broadcast %18 : vector<1x512xf32> to vector<8x512xf32>
    %89 = arith.addf %87, %88 : vector<8x512xf32>
    %cst_43 = arith.constant 0.000000e+00 : f32
    %90 = vector.broadcast %cst_43 : f32 to vector<8x512xf32>
    %91 = arith.cmpf ogt, %89, %90 : vector<8x512xf32>
    %cst_44 = arith.constant 0.000000e+00 : f32
    %92 = vector.broadcast %cst_44 : f32 to vector<8x512xf32>
    %93 = arith.minimumf %89, %92 : vector<8x512xf32>
    %94 = math.exp %93 : vector<8x512xf32>
    %cst_45 = arith.constant 1.000000e+00 : f32
    %95 = vector.broadcast %cst_45 : f32 to vector<8x512xf32>
    %96 = arith.subf %94, %95 : vector<8x512xf32>
    %97 = arith.select %91, %89, %96 : vector<8x512xi1>, vector<8x512xf32>
    %c0_46 = arith.constant 0 : index
    %c0_47 = arith.constant 0 : index
    %98 = vector.load %arg12[%c0_46, %c0_47] : memref<4x128xf32, #tpu.memory_space<vmem>>, vector<4x128xf32>
    %c0_48 = arith.constant 0 : index
    %c0_49 = arith.constant 0 : index
    %99 = vector.load %arg13[%c0_48, %c0_49] : memref<4x128xf32, #tpu.memory_space<vmem>>, vector<4x128xf32>
    %c0_50 = arith.constant 0 : index
    %c0_51 = arith.constant 0 : index
    %100 = vector.load %arg14[%c0_50, %c0_51] : memref<1x512xf32, #tpu.memory_space<vmem>>, vector<1x512xf32>
    %c0_52 = arith.constant 0 : index
    %c0_53 = arith.constant 0 : index
    %101 = vector.load %arg4[%c0_52, %c0_53] : memref<8x8xf32, #tpu.memory_space<vmem>>, vector<8x8xf32>
    %102 = vector.shape_cast %11 : vector<8x512xf32> to vector<8x4x128xf32>
    %103 = vector.shape_cast %98 : vector<4x128xf32> to vector<1x4x128xf32>
    %104 = vector.broadcast %103 : vector<1x4x128xf32> to vector<8x4x128xf32>
    %105 = arith.mulf %102, %104 : vector<8x4x128xf32>
    %cst_54 = arith.constant dense<0.000000e+00> : vector<8x4xf32>
    %106 = vector.multi_reduction <add>, %105, %cst_54 [2] : vector<8x4x128xf32> to vector<8x4xf32>
    %107 = vector.shape_cast %11 : vector<8x512xf32> to vector<8x4x128xf32>
    %108 = vector.shape_cast %99 : vector<4x128xf32> to vector<1x4x128xf32>
    %109 = vector.broadcast %108 : vector<1x4x128xf32> to vector<8x4x128xf32>
    %110 = arith.mulf %107, %109 : vector<8x4x128xf32>
    %cst_55 = arith.constant dense<0.000000e+00> : vector<8x4xf32>
    %111 = vector.multi_reduction <add>, %110, %cst_55 [2] : vector<8x4x128xf32> to vector<8x4xf32>
    %112 = tpu.transpose %111, [1, 0] : vector<8x4xf32> -> vector<4x8xf32>
    %113 = vector.shape_cast %112 : vector<4x8xf32> to vector<4x8x1xf32>
    %114 = tpu.transpose %106, [1, 0] : vector<8x4xf32> -> vector<4x8xf32>
    %115 = vector.shape_cast %114 : vector<4x8xf32> to vector<4x1x8xf32>
    %116 = vector.broadcast %113 : vector<4x8x1xf32> to vector<4x8x8xf32>
    %117 = vector.broadcast %115 : vector<4x1x8xf32> to vector<4x8x8xf32>
    %118 = arith.addf %116, %117 : vector<4x8x8xf32>
    %cst_56 = arith.constant 0.000000e+00 : f32
    %119 = vector.broadcast %cst_56 : f32 to vector<4x8x8xf32>
    %120 = arith.cmpf ogt, %118, %119 : vector<4x8x8xf32>
    %cst_57 = arith.constant 2.000000e-01 : f32
    %121 = vector.broadcast %cst_57 : f32 to vector<4x8x8xf32>
    %122 = arith.mulf %121, %118 : vector<4x8x8xf32>
    %123 = arith.select %120, %118, %122 : vector<4x8x8xi1>, vector<4x8x8xf32>
    %cst_58 = arith.constant 0.000000e+00 : f32
    %124 = vector.broadcast %cst_58 : f32 to vector<8x8xf32>
    %125 = arith.cmpf ogt, %101, %124 : vector<8x8xf32>
    %126 = vector.shape_cast %125 : vector<8x8xi1> to vector<1x8x8xi1>
    %cst_59 = arith.constant -1.000000e+30 : f32
    %127 = vector.shape_cast %126 : vector<1x8x8xi1> to vector<1x8x8xi1>
    %128 = vector.broadcast %127 : vector<1x8x8xi1> to vector<4x8x8xi1>
    %129 = vector.broadcast %cst_59 : f32 to vector<4x8x8xf32>
    %130 = arith.select %128, %123, %129 : vector<4x8x8xi1>, vector<4x8x8xf32>
    %cst_60 = arith.constant dense<0xFF800000> : vector<4x8xf32>
    %131 = vector.multi_reduction <maximumf>, %130, %cst_60 [2] : vector<4x8x8xf32> to vector<4x8xf32>
    %132 = vector.shape_cast %131 : vector<4x8xf32> to vector<4x8x1xf32>
    %133 = vector.broadcast %132 : vector<4x8x1xf32> to vector<4x8x8xf32>
    %134 = arith.subf %130, %133 : vector<4x8x8xf32>
    %135 = math.exp %134 : vector<4x8x8xf32>
    %cst_61 = arith.constant dense<0.000000e+00> : vector<4x8xf32>
    %136 = vector.multi_reduction <add>, %135, %cst_61 [2] : vector<4x8x8xf32> to vector<4x8xf32>
    %137 = vector.shape_cast %136 : vector<4x8xf32> to vector<4x8x1xf32>
    %cst_62 = arith.constant dense<0.000000e+00> : vector<8xf32>
    %138 = vector.multi_reduction <add>, %101, %cst_62 [1] : vector<8x8xf32> to vector<8xf32>
    %139 = vector.shape_cast %138 : vector<8xf32> to vector<8x1xf32>
    %cst_63 = arith.constant 0.000000e+00 : f32
    %140 = vector.broadcast %cst_63 : f32 to vector<8x1xf32>
    %141 = arith.cmpf ogt, %139, %140 : vector<8x1xf32>
    %142 = vector.shape_cast %141 : vector<8x1xi1> to vector<1x8x1xi1>
    %cst_64 = arith.constant 1.000000e+00 : f32
    %143 = vector.broadcast %cst_64 : f32 to vector<4x8x1xf32>
    %144 = arith.divf %143, %137 : vector<4x8x1xf32>
    %cst_65 = arith.constant 0.000000e+00 : f32
    %145 = vector.shape_cast %142 : vector<1x8x1xi1> to vector<1x8x1xi1>
    %146 = vector.broadcast %145 : vector<1x8x1xi1> to vector<4x8x1xi1>
    %147 = vector.broadcast %cst_65 : f32 to vector<4x8x1xf32>
    %148 = arith.select %146, %144, %147 : vector<4x8x1xi1>, vector<4x8x1xf32>
    %149 = vector.broadcast %148 : vector<4x8x1xf32> to vector<4x8x8xf32>
    %150 = arith.mulf %135, %149 : vector<4x8x8xf32>
    %151 = arith.truncf %150 : vector<4x8x8xf32> to vector<4x8x8xbf16>
    %152 = arith.truncf %11 : vector<8x512xf32> to vector<8x512xbf16>
    %153 = vector.extract_strided_slice %151 {offsets = [0, 0, 0], sizes = [1, 8, 8], strides = [1, 1, 1]} : vector<4x8x8xbf16> to vector<1x8x8xbf16>
    %154 = vector.shape_cast %153 : vector<1x8x8xbf16> to vector<8x8xbf16>
    %155 = vector.extract_strided_slice %152 {offsets = [0, 0], sizes = [8, 128], strides = [1, 1]} : vector<8x512xbf16> to vector<8x128xbf16>
    %cst_66 = arith.constant dense<0.000000e+00> : vector<8x128xf32>
    %156 = tpu.matmul %154, %155, %cst_66 {dimension_numbers = #tpu.dot_dimension_numbers<[1], [0], [0], [1], [0, 0, 1, 1], [], []>} : vector<8x8xbf16>, vector<8x128xbf16>, vector<8x128xf32> -> vector<8x128xf32>
    %157 = vector.extract_strided_slice %151 {offsets = [1, 0, 0], sizes = [1, 8, 8], strides = [1, 1, 1]} : vector<4x8x8xbf16> to vector<1x8x8xbf16>
    %158 = vector.shape_cast %157 : vector<1x8x8xbf16> to vector<8x8xbf16>
    %159 = vector.extract_strided_slice %152 {offsets = [0, 128], sizes = [8, 128], strides = [1, 1]} : vector<8x512xbf16> to vector<8x128xbf16>
    %cst_67 = arith.constant dense<0.000000e+00> : vector<8x128xf32>
    %160 = tpu.matmul %158, %159, %cst_67 {dimension_numbers = #tpu.dot_dimension_numbers<[1], [0], [0], [1], [0, 0, 1, 1], [], []>} : vector<8x8xbf16>, vector<8x128xbf16>, vector<8x128xf32> -> vector<8x128xf32>
    %161 = vector.extract_strided_slice %151 {offsets = [2, 0, 0], sizes = [1, 8, 8], strides = [1, 1, 1]} : vector<4x8x8xbf16> to vector<1x8x8xbf16>
    %162 = vector.shape_cast %161 : vector<1x8x8xbf16> to vector<8x8xbf16>
    %163 = vector.extract_strided_slice %152 {offsets = [0, 256], sizes = [8, 128], strides = [1, 1]} : vector<8x512xbf16> to vector<8x128xbf16>
    %cst_68 = arith.constant dense<0.000000e+00> : vector<8x128xf32>
    %164 = tpu.matmul %162, %163, %cst_68 {dimension_numbers = #tpu.dot_dimension_numbers<[1], [0], [0], [1], [0, 0, 1, 1], [], []>} : vector<8x8xbf16>, vector<8x128xbf16>, vector<8x128xf32> -> vector<8x128xf32>
    %165 = vector.extract_strided_slice %151 {offsets = [3, 0, 0], sizes = [1, 8, 8], strides = [1, 1, 1]} : vector<4x8x8xbf16> to vector<1x8x8xbf16>
    %166 = vector.shape_cast %165 : vector<1x8x8xbf16> to vector<8x8xbf16>
    %167 = vector.extract_strided_slice %152 {offsets = [0, 384], sizes = [8, 128], strides = [1, 1]} : vector<8x512xbf16> to vector<8x128xbf16>
    %cst_69 = arith.constant dense<0.000000e+00> : vector<8x128xf32>
    %168 = tpu.matmul %166, %167, %cst_69 {dimension_numbers = #tpu.dot_dimension_numbers<[1], [0], [0], [1], [0, 0, 1, 1], [], []>} : vector<8x8xbf16>, vector<8x128xbf16>, vector<8x128xf32> -> vector<8x128xf32>
    %169 = tpu.concatenate %156, %160, %164, %168 in 1 : vector<8x128xf32>, vector<8x128xf32>, vector<8x128xf32>, vector<8x128xf32> -> vector<8x512xf32>
    %170 = vector.broadcast %100 : vector<1x512xf32> to vector<8x512xf32>
    %171 = arith.addf %169, %170 : vector<8x512xf32>
    %cst_70 = arith.constant 0.000000e+00 : f32
    %172 = vector.broadcast %cst_70 : f32 to vector<8x512xf32>
    %173 = arith.cmpf ogt, %171, %172 : vector<8x512xf32>
    %cst_71 = arith.constant 0.000000e+00 : f32
    %174 = vector.broadcast %cst_71 : f32 to vector<8x512xf32>
    %175 = arith.minimumf %171, %174 : vector<8x512xf32>
    %176 = math.exp %175 : vector<8x512xf32>
    %cst_72 = arith.constant 1.000000e+00 : f32
    %177 = vector.broadcast %cst_72 : f32 to vector<8x512xf32>
    %178 = arith.subf %176, %177 : vector<8x512xf32>
    %179 = arith.select %173, %171, %178 : vector<8x512xi1>, vector<8x512xf32>
    %c0_73 = arith.constant 0 : index
    %c0_74 = arith.constant 0 : index
    %180 = vector.load %arg17[%c0_73, %c0_74] : memref<4x128xf32, #tpu.memory_space<vmem>>, vector<4x128xf32>
    %c0_75 = arith.constant 0 : index
    %c0_76 = arith.constant 0 : index
    %181 = vector.load %arg18[%c0_75, %c0_76] : memref<4x128xf32, #tpu.memory_space<vmem>>, vector<4x128xf32>
    %c0_77 = arith.constant 0 : index
    %c0_78 = arith.constant 0 : index
    %182 = vector.load %arg19[%c0_77, %c0_78] : memref<1x512xf32, #tpu.memory_space<vmem>>, vector<1x512xf32>
    %c0_79 = arith.constant 0 : index
    %c0_80 = arith.constant 0 : index
    %183 = vector.load %arg5[%c0_79, %c0_80] : memref<8x4xf32, #tpu.memory_space<vmem>>, vector<8x4xf32>
    %184 = vector.shape_cast %13 : vector<4x512xf32> to vector<4x4x128xf32>
    %185 = vector.shape_cast %180 : vector<4x128xf32> to vector<1x4x128xf32>
    %186 = vector.broadcast %185 : vector<1x4x128xf32> to vector<4x4x128xf32>
    %187 = arith.mulf %184, %186 : vector<4x4x128xf32>
    %cst_81 = arith.constant dense<0.000000e+00> : vector<4x4xf32>
    %188 = vector.multi_reduction <add>, %187, %cst_81 [2] : vector<4x4x128xf32> to vector<4x4xf32>
    %189 = vector.shape_cast %15 : vector<8x512xf32> to vector<8x4x128xf32>
    %190 = vector.shape_cast %181 : vector<4x128xf32> to vector<1x4x128xf32>
    %191 = vector.broadcast %190 : vector<1x4x128xf32> to vector<8x4x128xf32>
    %192 = arith.mulf %189, %191 : vector<8x4x128xf32>
    %cst_82 = arith.constant dense<0.000000e+00> : vector<8x4xf32>
    %193 = vector.multi_reduction <add>, %192, %cst_82 [2] : vector<8x4x128xf32> to vector<8x4xf32>
    %194 = tpu.transpose %193, [1, 0] : vector<8x4xf32> -> vector<4x8xf32>
    %195 = vector.shape_cast %194 : vector<4x8xf32> to vector<4x8x1xf32>
    %196 = tpu.transpose %188, [1, 0] : vector<4x4xf32> -> vector<4x4xf32>
    %197 = vector.shape_cast %196 : vector<4x4xf32> to vector<4x1x4xf32>
    %198 = vector.broadcast %195 : vector<4x8x1xf32> to vector<4x8x4xf32>
    %199 = vector.broadcast %197 : vector<4x1x4xf32> to vector<4x8x4xf32>
    %200 = arith.addf %198, %199 : vector<4x8x4xf32>
    %cst_83 = arith.constant 0.000000e+00 : f32
    %201 = vector.broadcast %cst_83 : f32 to vector<4x8x4xf32>
    %202 = arith.cmpf ogt, %200, %201 : vector<4x8x4xf32>
    %cst_84 = arith.constant 2.000000e-01 : f32
    %203 = vector.broadcast %cst_84 : f32 to vector<4x8x4xf32>
    %204 = arith.mulf %203, %200 : vector<4x8x4xf32>
    %205 = arith.select %202, %200, %204 : vector<4x8x4xi1>, vector<4x8x4xf32>
    %cst_85 = arith.constant 0.000000e+00 : f32
    %206 = vector.broadcast %cst_85 : f32 to vector<8x4xf32>
    %207 = arith.cmpf ogt, %183, %206 : vector<8x4xf32>
    %208 = vector.shape_cast %207 : vector<8x4xi1> to vector<1x8x4xi1>
    %cst_86 = arith.constant -1.000000e+30 : f32
    %209 = vector.shape_cast %208 : vector<1x8x4xi1> to vector<1x8x4xi1>
    %210 = vector.broadcast %209 : vector<1x8x4xi1> to vector<4x8x4xi1>
    %211 = vector.broadcast %cst_86 : f32 to vector<4x8x4xf32>
    %212 = arith.select %210, %205, %211 : vector<4x8x4xi1>, vector<4x8x4xf32>
    %cst_87 = arith.constant dense<0xFF800000> : vector<4x8xf32>
    %213 = vector.multi_reduction <maximumf>, %212, %cst_87 [2] : vector<4x8x4xf32> to vector<4x8xf32>
    %214 = vector.shape_cast %213 : vector<4x8xf32> to vector<4x8x1xf32>
    %215 = vector.broadcast %214 : vector<4x8x1xf32> to vector<4x8x4xf32>
    %216 = arith.subf %212, %215 : vector<4x8x4xf32>
    %217 = math.exp %216 : vector<4x8x4xf32>
    %cst_88 = arith.constant dense<0.000000e+00> : vector<4x8xf32>
    %218 = vector.multi_reduction <add>, %217, %cst_88 [2] : vector<4x8x4xf32> to vector<4x8xf32>
    %219 = vector.shape_cast %218 : vector<4x8xf32> to vector<4x8x1xf32>
    %cst_89 = arith.constant dense<0.000000e+00> : vector<8xf32>
    %220 = vector.multi_reduction <add>, %183, %cst_89 [1] : vector<8x4xf32> to vector<8xf32>
    %221 = vector.shape_cast %220 : vector<8xf32> to vector<8x1xf32>
    %cst_90 = arith.constant 0.000000e+00 : f32
    %222 = vector.broadcast %cst_90 : f32 to vector<8x1xf32>
    %223 = arith.cmpf ogt, %221, %222 : vector<8x1xf32>
    %224 = vector.shape_cast %223 : vector<8x1xi1> to vector<1x8x1xi1>
    %cst_91 = arith.constant 1.000000e+00 : f32
    %225 = vector.broadcast %cst_91 : f32 to vector<4x8x1xf32>
    %226 = arith.divf %225, %219 : vector<4x8x1xf32>
    %cst_92 = arith.constant 0.000000e+00 : f32
    %227 = vector.shape_cast %224 : vector<1x8x1xi1> to vector<1x8x1xi1>
    %228 = vector.broadcast %227 : vector<1x8x1xi1> to vector<4x8x1xi1>
    %229 = vector.broadcast %cst_92 : f32 to vector<4x8x1xf32>
    %230 = arith.select %228, %226, %229 : vector<4x8x1xi1>, vector<4x8x1xf32>
    %231 = vector.broadcast %230 : vector<4x8x1xf32> to vector<4x8x4xf32>
    %232 = arith.mulf %217, %231 : vector<4x8x4xf32>
    %233 = arith.truncf %232 : vector<4x8x4xf32> to vector<4x8x4xbf16>
    %234 = arith.truncf %13 : vector<4x512xf32> to vector<4x512xbf16>
    %235 = vector.extract_strided_slice %233 {offsets = [0, 0, 0], sizes = [1, 8, 4], strides = [1, 1, 1]} : vector<4x8x4xbf16> to vector<1x8x4xbf16>
    %236 = vector.shape_cast %235 : vector<1x8x4xbf16> to vector<8x4xbf16>
    %237 = vector.extract_strided_slice %234 {offsets = [0, 0], sizes = [4, 128], strides = [1, 1]} : vector<4x512xbf16> to vector<4x128xbf16>
    %cst_93 = arith.constant dense<0.000000e+00> : vector<8x128xf32>
    %238 = tpu.matmul %236, %237, %cst_93 {dimension_numbers = #tpu.dot_dimension_numbers<[1], [0], [0], [1], [0, 0, 1, 1], [], []>} : vector<8x4xbf16>, vector<4x128xbf16>, vector<8x128xf32> -> vector<8x128xf32>
    %239 = vector.extract_strided_slice %233 {offsets = [1, 0, 0], sizes = [1, 8, 4], strides = [1, 1, 1]} : vector<4x8x4xbf16> to vector<1x8x4xbf16>
    %240 = vector.shape_cast %239 : vector<1x8x4xbf16> to vector<8x4xbf16>
    %241 = vector.extract_strided_slice %234 {offsets = [0, 128], sizes = [4, 128], strides = [1, 1]} : vector<4x512xbf16> to vector<4x128xbf16>
    %cst_94 = arith.constant dense<0.000000e+00> : vector<8x128xf32>
    %242 = tpu.matmul %240, %241, %cst_94 {dimension_numbers = #tpu.dot_dimension_numbers<[1], [0], [0], [1], [0, 0, 1, 1], [], []>} : vector<8x4xbf16>, vector<4x128xbf16>, vector<8x128xf32> -> vector<8x128xf32>
    %243 = vector.extract_strided_slice %233 {offsets = [2, 0, 0], sizes = [1, 8, 4], strides = [1, 1, 1]} : vector<4x8x4xbf16> to vector<1x8x4xbf16>
    %244 = vector.shape_cast %243 : vector<1x8x4xbf16> to vector<8x4xbf16>
    %245 = vector.extract_strided_slice %234 {offsets = [0, 256], sizes = [4, 128], strides = [1, 1]} : vector<4x512xbf16> to vector<4x128xbf16>
    %cst_95 = arith.constant dense<0.000000e+00> : vector<8x128xf32>
    %246 = tpu.matmul %244, %245, %cst_95 {dimension_numbers = #tpu.dot_dimension_numbers<[1], [0], [0], [1], [0, 0, 1, 1], [], []>} : vector<8x4xbf16>, vector<4x128xbf16>, vector<8x128xf32> -> vector<8x128xf32>
    %247 = vector.extract_strided_slice %233 {offsets = [3, 0, 0], sizes = [1, 8, 4], strides = [1, 1, 1]} : vector<4x8x4xbf16> to vector<1x8x4xbf16>
    %248 = vector.shape_cast %247 : vector<1x8x4xbf16> to vector<8x4xbf16>
    %249 = vector.extract_strided_slice %234 {offsets = [0, 384], sizes = [4, 128], strides = [1, 1]} : vector<4x512xbf16> to vector<4x128xbf16>
    %cst_96 = arith.constant dense<0.000000e+00> : vector<8x128xf32>
    %250 = tpu.matmul %248, %249, %cst_96 {dimension_numbers = #tpu.dot_dimension_numbers<[1], [0], [0], [1], [0, 0, 1, 1], [], []>} : vector<8x4xbf16>, vector<4x128xbf16>, vector<8x128xf32> -> vector<8x128xf32>
    %251 = tpu.concatenate %238, %242, %246, %250 in 1 : vector<8x128xf32>, vector<8x128xf32>, vector<8x128xf32>, vector<8x128xf32> -> vector<8x512xf32>
    %252 = vector.broadcast %182 : vector<1x512xf32> to vector<8x512xf32>
    %253 = arith.addf %251, %252 : vector<8x512xf32>
    %cst_97 = arith.constant 0.000000e+00 : f32
    %254 = vector.broadcast %cst_97 : f32 to vector<8x512xf32>
    %255 = arith.cmpf ogt, %253, %254 : vector<8x512xf32>
    %cst_98 = arith.constant 0.000000e+00 : f32
    %256 = vector.broadcast %cst_98 : f32 to vector<8x512xf32>
    %257 = arith.minimumf %253, %256 : vector<8x512xf32>
    %258 = math.exp %257 : vector<8x512xf32>
    %cst_99 = arith.constant 1.000000e+00 : f32
    %259 = vector.broadcast %cst_99 : f32 to vector<8x512xf32>
    %260 = arith.subf %258, %259 : vector<8x512xf32>
    %261 = arith.select %255, %253, %260 : vector<8x512xi1>, vector<8x512xf32>
    %c0_100 = arith.constant 0 : index
    %c0_101 = arith.constant 0 : index
    %262 = vector.load %arg20[%c0_100, %c0_101] : memref<512x512xbf16, #tpu.memory_space<vmem>>, vector<512x512xbf16>
    %c0_102 = arith.constant 0 : index
    %c0_103 = arith.constant 0 : index
    %263 = vector.load %arg21[%c0_102, %c0_103] : memref<512x512xbf16, #tpu.memory_space<vmem>>, vector<512x512xbf16>
    %c0_104 = arith.constant 0 : index
    %c0_105 = arith.constant 0 : index
    %264 = vector.load %arg22[%c0_104, %c0_105] : memref<1x512xf32, #tpu.memory_space<vmem>>, vector<1x512xf32>
    %265 = arith.truncf %97 : vector<8x512xf32> to vector<8x512xbf16>
    %cst_106 = arith.constant dense<0.000000e+00> : vector<8x512xf32>
    %266 = tpu.matmul %265, %262, %cst_106 {dimension_numbers = #tpu.dot_dimension_numbers<[1], [0], [0], [1], [0, 0, 1, 1], [], []>} : vector<8x512xbf16>, vector<512x512xbf16>, vector<8x512xf32> -> vector<8x512xf32>
    %267 = arith.truncf %179 : vector<8x512xf32> to vector<8x512xbf16>
    %cst_107 = arith.constant dense<0.000000e+00> : vector<8x512xf32>
    %268 = tpu.matmul %267, %263, %cst_107 {dimension_numbers = #tpu.dot_dimension_numbers<[1], [0], [0], [1], [0, 0, 1, 1], [], []>} : vector<8x512xbf16>, vector<512x512xbf16>, vector<8x512xf32> -> vector<8x512xf32>
    %269 = arith.addf %266, %268 : vector<8x512xf32>
    %270 = vector.broadcast %264 : vector<1x512xf32> to vector<8x512xf32>
    %271 = arith.addf %269, %270 : vector<8x512xf32>
    %cst_108 = arith.constant 0.000000e+00 : f32
    %272 = vector.broadcast %cst_108 : f32 to vector<8x512xf32>
    %273 = arith.subf %272, %271 : vector<8x512xf32>
    %274 = math.exp %273 : vector<8x512xf32>
    %cst_109 = arith.constant 1.000000e+00 : f32
    %275 = vector.broadcast %cst_109 : f32 to vector<8x512xf32>
    %276 = arith.addf %275, %274 : vector<8x512xf32>
    %cst_110 = arith.constant 1.000000e+00 : f32
    %277 = vector.broadcast %cst_110 : f32 to vector<8x512xf32>
    %278 = arith.divf %277, %276 : vector<8x512xf32>
    %279 = arith.mulf %278, %97 : vector<8x512xf32>
    %cst_111 = arith.constant 1.000000e+00 : f32
    %280 = vector.broadcast %cst_111 : f32 to vector<8x512xf32>
    %281 = arith.subf %280, %278 : vector<8x512xf32>
    %282 = arith.mulf %281, %179 : vector<8x512xf32>
    %283 = arith.addf %279, %282 : vector<8x512xf32>
    %c0_112 = arith.constant 0 : index
    %c0_113 = arith.constant 0 : index
    %284 = vector.load %arg23[%c0_112, %c0_113] : memref<512x512xbf16, #tpu.memory_space<vmem>>, vector<512x512xbf16>
    %c0_114 = arith.constant 0 : index
    %c0_115 = arith.constant 0 : index
    %285 = vector.load %arg24[%c0_114, %c0_115] : memref<512x512xbf16, #tpu.memory_space<vmem>>, vector<512x512xbf16>
    %c0_116 = arith.constant 0 : index
    %c0_117 = arith.constant 0 : index
    %286 = vector.load %arg25[%c0_116, %c0_117] : memref<1x512xf32, #tpu.memory_space<vmem>>, vector<1x512xf32>
    %287 = arith.truncf %283 : vector<8x512xf32> to vector<8x512xbf16>
    %cst_118 = arith.constant dense<0.000000e+00> : vector<8x512xf32>
    %288 = tpu.matmul %287, %284, %cst_118 {dimension_numbers = #tpu.dot_dimension_numbers<[1], [0], [0], [1], [0, 0, 1, 1], [], []>} : vector<8x512xbf16>, vector<512x512xbf16>, vector<8x512xf32> -> vector<8x512xf32>
    %289 = arith.truncf %261 : vector<8x512xf32> to vector<8x512xbf16>
    %cst_119 = arith.constant dense<0.000000e+00> : vector<8x512xf32>
    %290 = tpu.matmul %289, %285, %cst_119 {dimension_numbers = #tpu.dot_dimension_numbers<[1], [0], [0], [1], [0, 0, 1, 1], [], []>} : vector<8x512xbf16>, vector<512x512xbf16>, vector<8x512xf32> -> vector<8x512xf32>
    %291 = arith.addf %288, %290 : vector<8x512xf32>
    %292 = vector.broadcast %286 : vector<1x512xf32> to vector<8x512xf32>
    %293 = arith.addf %291, %292 : vector<8x512xf32>
    %cst_120 = arith.constant 0.000000e+00 : f32
    %294 = vector.broadcast %cst_120 : f32 to vector<8x512xf32>
    %295 = arith.subf %294, %293 : vector<8x512xf32>
    %296 = math.exp %295 : vector<8x512xf32>
    %cst_121 = arith.constant 1.000000e+00 : f32
    %297 = vector.broadcast %cst_121 : f32 to vector<8x512xf32>
    %298 = arith.addf %297, %296 : vector<8x512xf32>
    %cst_122 = arith.constant 1.000000e+00 : f32
    %299 = vector.broadcast %cst_122 : f32 to vector<8x512xf32>
    %300 = arith.divf %299, %298 : vector<8x512xf32>
    %301 = arith.mulf %300, %283 : vector<8x512xf32>
    %cst_123 = arith.constant 1.000000e+00 : f32
    %302 = vector.broadcast %cst_123 : f32 to vector<8x512xf32>
    %303 = arith.subf %302, %300 : vector<8x512xf32>
    %304 = arith.mulf %303, %261 : vector<8x512xf32>
    %305 = arith.addf %301, %304 : vector<8x512xf32>
    %c0_124 = arith.constant 0 : index
    %c0_125 = arith.constant 0 : index
    %306 = vector.load %arg30[%c0_124, %c0_125] : memref<8x512xf32, #tpu.memory_space<vmem>>, vector<8x512xf32>
    %307 = arith.mulf %305, %306 : vector<8x512xf32>
    %308 = arith.truncf %307 : vector<8x512xf32> to vector<8x512xbf16>
    %c0_126 = arith.constant 0 : index
    %c0_127 = arith.constant 0 : index
    %309 = vector.load %arg26[%c0_126, %c0_127] : memref<512x128xbf16, #tpu.memory_space<vmem>>, vector<512x128xbf16>
    %cst_128 = arith.constant dense<0.000000e+00> : vector<8x128xf32>
    %310 = tpu.matmul %308, %309, %cst_128 {dimension_numbers = #tpu.dot_dimension_numbers<[1], [0], [0], [1], [0, 0, 1, 1], [], []>} : vector<8x512xbf16>, vector<512x128xbf16>, vector<8x128xf32> -> vector<8x128xf32>
    %c0_129 = arith.constant 0 : index
    %c0_130 = arith.constant 0 : index
    %311 = vector.load %arg27[%c0_129, %c0_130] : memref<1x128xf32, #tpu.memory_space<vmem>>, vector<1x128xf32>
    %312 = vector.broadcast %311 : vector<1x128xf32> to vector<8x128xf32>
    %313 = arith.addf %310, %312 : vector<8x128xf32>
    %cst_131 = arith.constant 0.000000e+00 : f32
    %314 = vector.broadcast %cst_131 : f32 to vector<8x128xf32>
    %315 = arith.maximumf %313, %314 : vector<8x128xf32>
    %c0_132 = arith.constant 0 : index
    %c0_133 = arith.constant 0 : index
    %316 = vector.load %arg31[%c0_132, %c0_133] : memref<8x128xf32, #tpu.memory_space<vmem>>, vector<8x128xf32>
    %317 = arith.mulf %315, %316 : vector<8x128xf32>
    %318 = arith.truncf %317 : vector<8x128xf32> to vector<8x128xbf16>
    %c0_134 = arith.constant 0 : index
    %c0_135 = arith.constant 0 : index
    %319 = vector.load %arg28[%c0_134, %c0_135] : memref<128x128xbf16, #tpu.memory_space<vmem>>, vector<128x128xbf16>
    %cst_136 = arith.constant dense<0.000000e+00> : vector<8x128xf32>
    %320 = tpu.matmul %318, %319, %cst_136 {dimension_numbers = #tpu.dot_dimension_numbers<[1], [0], [0], [1], [0, 0, 1, 1], [], []>} : vector<8x128xbf16>, vector<128x128xbf16>, vector<8x128xf32> -> vector<8x128xf32>
    %321 = arith.addf %0, %320 : vector<8x128xf32>
    %c0_137 = arith.constant 0 : index
    %c0_138 = arith.constant 0 : index
    %322 = vector.load %arg29[%c0_137, %c0_138] : memref<1x128xf32, #tpu.memory_space<vmem>>, vector<1x128xf32>
    %323 = vector.broadcast %322 : vector<1x128xf32> to vector<8x128xf32>
    %324 = arith.addf %321, %323 : vector<8x128xf32>
    %c0_139 = arith.constant 0 : index
    %c0_140 = arith.constant 0 : index
    %325 = vector.load %arg32[%c0_139, %c0_140] : memref<8x128xf32, #tpu.memory_space<vmem>>, vector<8x128xf32>
    tpu.vector_store %arg32[%c0_139, %c0_140], %324 {strides = array<i32>} : memref<8x128xf32, #tpu.memory_space<vmem>>, vector<8x128xf32>,
    return
  }
}

</mosaic_0001>

<bundles_post_ra>
// kernel: tpu_custom_call.1
= control target key start
LH: loop header
LB: loop body
LE: loop exit
PB: predicated region body
PF: predicated region fallthrough
CT: control target
= control target key end

     0   :  { %s11250_s6 = smov 1   ;;  %s11251_s10 = smov 2   ;;  %s12587_s0 = inlined_call_operand.smem [shape: u32[33], index: -1, kind: input, shape index: {}] }
   0x1   :  { %s11328_s5 = sld [smem:[%s12587_s0]]   ;;  %s11252_s14 = smov 3  }
   0x2   :  { %s11333_s9 = sld [smem:[%s12587_s0 + %s11250_s6]]   ;;  %s11253_s18 = smov 4  }
   0x3   :  { %s11338_s13 = sld [smem:[%s12587_s0 + %s11251_s10]]   ;;  %s11254_s22 = smov 5  }
   0x4   :  { %s11343_s17 = sld [smem:[%s12587_s0 + %s11252_s14]]   ;;  %s11255_s26 = smov 6  }
   0x5   :  { %s11348_s21 = sld [smem:[%s12587_s0 + %s11253_s18]]   ;;  %s11256_s30 = smov 7  }
   0x6   :  { %s11353_s25 = sld [smem:[%s12587_s0 + %s11254_s22]]   ;;  %s11257_s4 = smov 8  }
   0x7   :  { %12600 = sst [smem:[#allocation56_spill]] %s11328_s5  ;;  %s11258_s10 = smov 9  }
   0x8   :  { %s11358_s29 = sld [smem:[%s12587_s0 + %s11255_s26]]   ;;  %s11259_s15 = smov 10  }
   0x9   :  { %s11363_s3 = sld [smem:[%s12587_s0 + %s11256_s30]]   ;;  %s11260_s20 = smov 11  }
   0xa   :  { %12601 = sst [smem:[#allocation57_spill]] %s11343_s17  ;;  %s11261_s26 = smov 12  }
   0xb   :  { %s11368_s8 = sld [smem:[%s12587_s0 + %s11257_s4]]   ;;  %s11262_s1 = smov 13  }
   0xc   :  { %12602 = sst [smem:[#allocation58_spill]] %s11353_s25  ;;  %s11263_s7 = smov 14  }
   0xd   :  { %s11373_s14 = sld [smem:[%s12587_s0 + %s11258_s10]]   ;;  %s11265_s22 = smov 16  }
   0xe   :  { %s11378_s19 = sld [smem:[%s12587_s0 + %s11259_s15]]   ;;  %s11264_s15 = smov 15  }
   0xf   :  { %12603 = sst [smem:[#allocation59_spill]] %s11363_s3  ;;  %s11266_s28 = smov 17  }
  0x10   :  { %s11383_s24 = sld [smem:[%s12587_s0 + %s11260_s20]]  }
  0x11   :  { %s11388_s30 = sld [smem:[%s12587_s0 + %s11261_s26]]  }
  0x12   :  { %s11393_s6 = sld [smem:[%s12587_s0 + %s11262_s1]]  }
  0x13   :  { %12604 = sst [smem:[#allocation60_spill]] %s11373_s14 }
  0x14   :  { %s11398_s12 = sld [smem:[%s12587_s0 + %s11263_s7]]   ;;  %s11267_s7 = smov 18  }
  0x15   :  { %s11403_s20 = sld [smem:[%s12587_s0 + %s11264_s15]]   ;;  %s11268_s15 = smov 19  }
  0x16   :  { %12605 = sst [smem:[#allocation61_spill]] %s11383_s24 }
  0x17   :  { %s11408_s27 = sld [smem:[%s12587_s0 + %s11265_s22]]   ;;  %s11269_s22 = smov 20  }
  0x18   :  { %12606 = sst [smem:[#allocation62_spill]] %s11393_s6 }
  0x19   :  { %s11413_s4 = sld [smem:[%s12587_s0 + %s11266_s28]]   ;;  %s11270_s28 = smov 21  }
  0x1a   :  { %s11418_s25 = sld [smem:[%s12587_s0 + %s11267_s7]]   ;;  %s11271_s7 = smov 22  }
  0x1b   :  { %12607 = sst [smem:[#allocation63_spill]] %s11403_s20 }
  0x1c   :  { %s11423_s17 = sld [smem:[%s12587_s0 + %s11268_s15]]   ;;  %s11272_s15 = smov 23  }
  0x1d   :  { %s11428_s5 = sld [smem:[%s12587_s0 + %s11269_s22]]   ;;  %s11273_s22 = smov 24  }
  0x1e   :  { %s11438_s20 = sld [smem:[%s12587_s0 + %s11271_s7]]   ;;  %s11275_s7 = smov 26  }
  0x1f   :  { %12608 = sst [smem:[#allocation64_spill]] %s11413_s4 }
  0x20   :  { %s11433_s4 = sld [smem:[%s12587_s0 + %s11270_s28]]   ;;  %s11274_s28 = smov 25  }
  0x21   :  { %s11448_s6 = sld [smem:[%s12587_s0 + %s11273_s22]]   ;;  %s11277_s22 = smov 28  }
  0x22   :  { %12609 = sst [smem:[#allocation65_spill]] %s11423_s17 }
  0x23   :  { %s11443_s17 = sld [smem:[%s12587_s0 + %s11272_s15]]   ;;  %s11276_s15 = smov 27  }
  0x24   :  { %s11458_s24 = sld [smem:[%s12587_s0 + %s11275_s7]]   ;;  %s11279_s7 = smov 30  }
  0x25   :  { %s11468_s14 = sld [smem:[%s12587_s0 + %s11277_s22]]   ;;  %s11281_s22 = smov 32  }
  0x26   :  { %12610 = sst [smem:[#allocation66_spill]] %s11433_s4 }
  0x27   :  { %s11453_s4 = sld [smem:[%s12587_s0 + %s11274_s28]]   ;;  %s11278_s28 = smov 29  }
  0x28   :  { %s11478_s3 = sld [smem:[%s12587_s0 + %s11279_s7]]  }
  0x29   :  { %12611 = sst [smem:[#allocation67_spill]] %s11443_s17 }
  0x2a   :  { %s11463_s17 = sld [smem:[%s12587_s0 + %s11276_s15]]   ;;  %s11280_s15 = smov 31  }
  0x2b   :  { %12614 = sst [smem:[#allocation70_spill]] %s11468_s14 }
  0x2c   :  { %s11488_s14 = sld [smem:[%s12587_s0 + %s11281_s22]]  }
  0x2d   :  { %12612 = sst [smem:[#allocation68_spill]] %s11453_s4 }
  0x2e   :  { %s11473_s4 = sld [smem:[%s12587_s0 + %s11278_s28]]  }
  0x30   :  { %12613 = sst [smem:[#allocation69_spill]] %s11463_s17 }
  0x31   :  { %s11483_s17 = sld [smem:[%s12587_s0 + %s11280_s15]]  }
  0x32   :  { %70 = vsyncpa [#allocation3], 0 }
  0x33   :  { %71 = vsyncpa [#allocation6], 0 }
  0x34   :  { %72 = vsyncpa [#allocation9], 0 }
  0x35   :  { %73 = vsyncpa [#allocation12], 0 }
  0x36   :  { %74 = vsyncpa [#allocation15], 0 }
  0x37   :  { %75 = vsyncpa [#allocation18], 0 }
  0x38   :  { %76 = vsyncpa [#allocation21], 0 }
  0x39   :  { %77 = vsyncpa [#allocation24], 0 }
  0x3a   :  { %78 = vsyncpa [#allocation27], 0 }
  0x3b   :  { %79 = vsyncpa [#allocation30], 0 }
  0x3c   :  { %80 = vsyncpa [#allocation33], 0 }
  0x3d   :  { %81 = vsyncpa [#allocation36], 0 }
  0x3e   :  { %82 = vsyncpa [#allocation39], 0 }
  0x3f   :  { %83 = vsyncpa [#allocation4], 0  ;;  %s11282_s28 = smov [#allocation5]   ;;  %s11283_s1 = smov [#allocation8]  }
  0x40   :  { %s104_s0 = sshll.u32 %s11282_s28, 4  ;;  %s127_s2 = sshll.u32 %s11283_s1, 4  ;;  %s105_s0 = int_to_ptr.vmem [resolvable:$true] %s104_s0  ;;  %s11490_s2 = int_to_ptr.vmem [resolvable:$true] %s127_s2 }
  0x41   :  { %s10650_s7 = scalar_lea.hbm %s11338_s13, 64 }
  0x42   :  { %p10651_p0 = scmp.ne.s32.totalorder %s11338_s13, %s10650_s7  ;;  %p10654_p1 = scmp.lt.u32.totalorder %s10650_s7, %s11338_s13 }
  0x44   :  { %p10656_p2 = pnand %p10654_p1, %p10651_p0 }
  0x46   :  { %10659 = shalt.err (!%p10656_p2)
}
  0x47   :  { %s10660_s10 = scalar_lea.vmem %s105_s0, 64  ;;  %p10665_p4 = scmp.lt.s32.totalorder %s105_s0, %s105_s0 }
  0x48   :  { %p10661_p3 = scmp.ne.s32.totalorder %s105_s0, %s10660_s10  ;;  %p10666_p5 = scmp.lt.s32.totalorder %s10660_s10, %s10660_s10 }
  0x4a   :  { %p10667_p6 = por %p10666_p5, %p10665_p4 }
  0x4c   :  { %p10668_p7 = pnand %p10667_p6, %p10661_p3 }
  0x4e   :  { %10671 = shalt.err (!%p10668_p7)
}
  0x4f   :  { %107 = dma.hbm_to_vmem [thread:$0]  %s11338_s13, 64, %s105_s0, [#allocation6]  }
  0x50   :  { %s10672_s11 = scalar_lea.hbm %s11358_s29, 4096 }
  0x51   :  { %p10673_p8 = scmp.ne.s32.totalorder %s11358_s29, %s10672_s11  ;;  %p10676_p9 = scmp.lt.u32.totalorder %s10672_s11, %s11358_s29 }
  0x53   :  { %p10678_p10 = pnand %p10676_p9, %p10673_p8 }
  0x55   :  { %10681 = shalt.err (!%p10678_p10)
}
  0x56   :  { %s10682_s15 = scalar_lea.vmem %s11490_s2, 4096  ;;  %p10687_p12 = scmp.lt.s32.totalorder %s11490_s2, %s11490_s2 }
  0x57   :  { %p10683_p11 = scmp.ne.s32.totalorder %s11490_s2, %s10682_s15  ;;  %p10688_p13 = scmp.lt.s32.totalorder %s10682_s15, %s10682_s15 }
  0x59   :  { %p10689_p0 = por %p10688_p13, %p10687_p12 }
  0x5b   :  { %p10690_p1 = pnand %p10689_p0, %p10683_p11 }
  0x5d   :  { %10693 = shalt.err (!%p10690_p1)
}
  0x5e   :  { %s11284_s16 = smov 256   ;;  %s11285_s13 = smov 16  }
  0x5f   :  { %133 = dma.hbm_to_vmem [thread:$0]  %s11358_s29, 4096, %s11490_s2, [#allocation9], %s11284_s16, %s11284_s16, %s11285_s13  }
  0x60   :  { %s11286_s18 = smov [#allocation11]   ;;  %s11287_s23 = smov [#allocation14]  }
  0x61   :  { %s152_s22 = sshll.u32 %s11286_s18, 4  ;;  %s172_s26 = sshll.u32 %s11287_s23, 4  ;;  %s153_s22 = int_to_ptr.vmem [resolvable:$true] %s152_s22  ;;  %s173_s26 = int_to_ptr.vmem [resolvable:$true] %s172_s26 }
  0x62   :  { %s10694_s28 = scalar_lea.hbm %s11368_s8, 64 }
  0x63   :  { %p10695_p2 = scmp.ne.s32.totalorder %s11368_s8, %s10694_s28  ;;  %p10698_p3 = scmp.lt.u32.totalorder %s10694_s28, %s11368_s8 }
  0x65   :  { %p10700_p4 = pnand %p10698_p3, %p10695_p2 }
  0x67   :  { %10703 = shalt.err (!%p10700_p4)
}
  0x68   :  { %s10704_s0 = scalar_lea.vmem %s153_s22, 64  ;;  %p10709_p6 = scmp.lt.s32.totalorder %s153_s22, %s153_s22 }
  0x69   :  { %p10705_p5 = scmp.ne.s32.totalorder %s153_s22, %s10704_s0  ;;  %p10710_p7 = scmp.lt.s32.totalorder %s10704_s0, %s10704_s0 }
  0x6b   :  { %p10711_p8 = por %p10710_p7, %p10709_p6 }
  0x6d   :  { %p10712_p9 = pnand %p10711_p8, %p10705_p5 }
  0x6f   :  { %10715 = shalt.err (!%p10712_p9)
}
  0x70   :  { %155 = dma.hbm_to_vmem [thread:$0]  %s11368_s8, 64, %s153_s22, [#allocation12]  }
  0x71   :  { %s10716_s29 = scalar_lea.hbm %s11378_s19, 64 }
  0x72   :  { %p10717_p10 = scmp.ne.s32.totalorder %s11378_s19, %s10716_s29  ;;  %p10720_p11 = scmp.lt.u32.totalorder %s10716_s29, %s11378_s19 }
  0x74   :  { %p10722_p12 = pnand %p10720_p11, %p10717_p10 }
  0x76   :  { %10725 = shalt.err (!%p10722_p12)
}
  0x77   :  { %s10726_s1 = scalar_lea.vmem %s173_s26, 64  ;;  %p10731_p0 = scmp.lt.s32.totalorder %s173_s26, %s173_s26 }
  0x78   :  { %p10727_p13 = scmp.ne.s32.totalorder %s173_s26, %s10726_s1  ;;  %p10732_p1 = scmp.lt.s32.totalorder %s10726_s1, %s10726_s1 }
  0x7a   :  { %p10733_p2 = por %p10732_p1, %p10731_p0 }
  0x7c   :  { %p10734_p3 = pnand %p10733_p2, %p10727_p13 }
  0x7e   :  { %10737 = shalt.err (!%p10734_p3)
}
  0x7f   :  { %175 = dma.hbm_to_vmem [thread:$0]  %s11378_s19, 64, %s173_s26, [#allocation15]  }
  0x80   :  { %s11288_s2 = smov [#allocation17]   ;;  %s11289_s8 = smov [#allocation20]  }
  0x81   :  { %s194_s7 = sshll.u32 %s11288_s2, 4  ;;  %s214_s10 = sshll.u32 %s11289_s8, 4  ;;  %s195_s7 = int_to_ptr.vmem [resolvable:$true] %s194_s7  ;;  %s215_s10 = int_to_ptr.vmem [resolvable:$true] %s214_s10 }
  0x82   :  { %s10738_s11 = scalar_lea.hbm %s11388_s30, 64 }
  0x83   :  { %p10739_p4 = scmp.ne.s32.totalorder %s11388_s30, %s10738_s11  ;;  %p10742_p5 = scmp.lt.u32.totalorder %s10738_s11, %s11388_s30 }
  0x85   :  { %p10744_p6 = pnand %p10742_p5, %p10739_p4 }
  0x87   :  { %10747 = shalt.err (!%p10744_p6)
}
  0x88   :  { %s10748_s15 = scalar_lea.vmem %s195_s7, 64  ;;  %p10753_p8 = scmp.lt.s32.totalorder %s195_s7, %s195_s7 }
  0x89   :  { %p10749_p7 = scmp.ne.s32.totalorder %s195_s7, %s10748_s15  ;;  %p10754_p9 = scmp.lt.s32.totalorder %s10748_s15, %s10748_s15 }
  0x8b   :  { %p10755_p10 = por %p10754_p9, %p10753_p8 }
  0x8d   :  { %p10756_p11 = pnand %p10755_p10, %p10749_p7 }
  0x8f   :  { %10759 = shalt.err (!%p10756_p11)
}
  0x90   :  { %197 = dma.hbm_to_vmem [thread:$0]  %s11388_s30, 64, %s195_s7, [#allocation18]  }
  0x91   :  { %s10760_s19 = scalar_lea.hbm %s11398_s12, 64 }
  0x92   :  { %p10761_p12 = scmp.ne.s32.totalorder %s11398_s12, %s10760_s19  ;;  %p10764_p13 = scmp.lt.u32.totalorder %s10760_s19, %s11398_s12 }
  0x94   :  { %p10766_p0 = pnand %p10764_p13, %p10761_p12 }
  0x96   :  { %10769 = shalt.err (!%p10766_p0)
}
  0x97   :  { %s10770_s18 = scalar_lea.vmem %s215_s10, 64  ;;  %p10775_p2 = scmp.lt.s32.totalorder %s215_s10, %s215_s10 }
  0x98   :  { %p10771_p1 = scmp.ne.s32.totalorder %s215_s10, %s10770_s18  ;;  %p10776_p3 = scmp.lt.s32.totalorder %s10770_s18, %s10770_s18 }
  0x9a   :  { %p10777_p4 = por %p10776_p3, %p10775_p2 }
  0x9c   :  { %p10778_p5 = pnand %p10777_p4, %p10771_p1 }
  0x9e   :  { %10781 = shalt.err (!%p10778_p5)
}
  0x9f   :  { %217 = dma.hbm_to_vmem [thread:$0]  %s11398_s12, 64, %s215_s10, [#allocation21]  }
  0xa0   :  { %s11290_s22 = smov [#allocation23]   ;;  %s11291_s30 = smov [#allocation26]  }
  0xa1   :  { %s235_s23 = sshll.u32 %s11290_s22, 4  ;;  %s258_s26 = sshll.u32 %s11291_s30, 4  ;;  %s236_s23 = int_to_ptr.vmem [resolvable:$true] %s235_s23  ;;  %s259_s26 = int_to_ptr.vmem [resolvable:$true] %s258_s26 }
  0xa2   :  { %s10782_s28 = scalar_lea.hbm %s11408_s27, 4096 }
  0xa3   :  { %p10783_p6 = scmp.ne.s32.totalorder %s11408_s27, %s10782_s28  ;;  %p10786_p7 = scmp.lt.u32.totalorder %s10782_s28, %s11408_s27 }
  0xa5   :  { %p10788_p8 = pnand %p10786_p7, %p10783_p6 }
  0xa7   :  { %10791 = shalt.err (!%p10788_p8)
}
  0xa8   :  { %s10792_s0 = scalar_lea.vmem %s236_s23, 4096  ;;  %p10797_p10 = scmp.lt.s32.totalorder %s236_s23, %s236_s23 }
  0xa9   :  { %p10793_p9 = scmp.ne.s32.totalorder %s236_s23, %s10792_s0  ;;  %p10798_p11 = scmp.lt.s32.totalorder %s10792_s0, %s10792_s0 }
  0xab   :  { %p10799_p12 = por %p10798_p11, %p10797_p10 }
  0xad   :  { %p10800_p13 = pnand %p10799_p12, %p10793_p9 }
  0xaf   :  { %10803 = shalt.err (!%p10800_p13)
}
  0xb0   :  { %241 = dma.hbm_to_vmem [thread:$0]  %s11408_s27, 4096, %s236_s23, [#allocation24], %s11284_s16, %s11284_s16, %s11285_s13  }
  0xb1   :  { %s10804_s12 = scalar_lea.hbm %s11418_s25, 64 }
  0xb2   :  { %p10805_p0 = scmp.ne.s32.totalorder %s11418_s25, %s10804_s12  ;;  %p10808_p1 = scmp.lt.u32.totalorder %s10804_s12, %s11418_s25 }
  0xb4   :  { %p10810_p2 = pnand %p10808_p1, %p10805_p0 }
  0xb6   :  { %10813 = shalt.err (!%p10810_p2)
}
  0xb7   :  { %s10814_s29 = scalar_lea.vmem %s259_s26, 64  ;;  %p10819_p4 = scmp.lt.s32.totalorder %s259_s26, %s259_s26 }
  0xb8   :  { %p10815_p3 = scmp.ne.s32.totalorder %s259_s26, %s10814_s29  ;;  %p10820_p5 = scmp.lt.s32.totalorder %s10814_s29, %s10814_s29 }
  0xba   :  { %p10821_p6 = por %p10820_p5, %p10819_p4 }
  0xbc   :  { %p10822_p7 = pnand %p10821_p6, %p10815_p3 }
  0xbe   :  { %10825 = shalt.err (!%p10822_p7)
}
  0xbf   :  { %261 = dma.hbm_to_vmem [thread:$0]  %s11418_s25, 64, %s259_s26, [#allocation27]  }
  0xc0   :  { %s11292_s1 = smov [#allocation29]   ;;  %s11293_s27 = smov [#allocation32]  }
  0xc1   :  { %s277_s2 = sshll.u32 %s11292_s1, 4  ;;  %s302_s7 = sshll.u32 %s11293_s27, 4  ;;  %s278_s2 = int_to_ptr.vmem [resolvable:$true] %s277_s2  ;;  %s303_s7 = int_to_ptr.vmem [resolvable:$true] %s302_s7 }
  0xc2   :  { %s10826_s8 = scalar_lea.hbm %s11428_s5, 16384 }
  0xc3   :  { %p10827_p8 = scmp.ne.s32.totalorder %s11428_s5, %s10826_s8  ;;  %p10830_p9 = scmp.lt.u32.totalorder %s10826_s8, %s11428_s5 }
  0xc5   :  { %p10832_p10 = pnand %p10830_p9, %p10827_p8 }
  0xc7   :  { %10835 = shalt.err (!%p10832_p10)
}
  0xc8   :  { %s10836_s10 = scalar_lea.vmem %s278_s2, 16384  ;;  %p10841_p12 = scmp.lt.s32.totalorder %s278_s2, %s278_s2 }
  0xc9   :  { %p10837_p11 = scmp.ne.s32.totalorder %s278_s2, %s10836_s10  ;;  %p10842_p13 = scmp.lt.s32.totalorder %s10836_s10, %s10836_s10 }
  0xcb   :  { %p10843_p0 = por %p10842_p13, %p10841_p12 }
  0xcd   :  { %p10844_p1 = pnand %p10843_p0, %p10837_p11 }
  0xcf   :  { %10847 = shalt.err (!%p10844_p1)
}
  0xd0   :  { %283 = dma.hbm_to_vmem [thread:$0]  %s11428_s5, 16384, %s278_s2, [#allocation30], %s11284_s16, %s11284_s16, %s11285_s13  }
  0xd1   :  { %s10848_s25 = scalar_lea.hbm %s11438_s20, 64 }
  0xd2   :  { %p10849_p2 = scmp.ne.s32.totalorder %s11438_s20, %s10848_s25  ;;  %p10852_p3 = scmp.lt.u32.totalorder %s10848_s25, %s11438_s20 }
  0xd4   :  { %p10854_p4 = pnand %p10852_p3, %p10849_p2 }
  0xd6   :  { %10857 = shalt.err (!%p10854_p4)
}
  0xd7   :  { %s10858_s11 = scalar_lea.vmem %s303_s7, 64  ;;  %p10863_p6 = scmp.lt.s32.totalorder %s303_s7, %s303_s7 }
  0xd8   :  { %p10859_p5 = scmp.ne.s32.totalorder %s303_s7, %s10858_s11  ;;  %p10864_p7 = scmp.lt.s32.totalorder %s10858_s11, %s10858_s11 }
  0xda   :  { %p10865_p8 = por %p10864_p7, %p10863_p6 }
  0xdc   :  { %p10866_p9 = pnand %p10865_p8, %p10859_p5 }
  0xde   :  { %10869 = shalt.err (!%p10866_p9)
}
  0xdf   :  { %305 = dma.hbm_to_vmem [thread:$0]  %s11438_s20, 64, %s303_s7, [#allocation33]  }
  0xe0   :  { %s11294_s15 = smov [#allocation35]   ;;  %s11295_s5 = smov [#allocation38]  }
  0xe1   :  { %s323_s19 = sshll.u32 %s11294_s15, 4  ;;  %s345_s18 = sshll.u32 %s11295_s5, 4  ;;  %s324_s19 = int_to_ptr.vmem [resolvable:$true] %s323_s19  ;;  %s11546_s18 = int_to_ptr.vmem [resolvable:$true] %s345_s18 }
  0xe2   :  { %s10870_s22 = scalar_lea.hbm %s11448_s6, 16384 }
  0xe3   :  { %p10871_p10 = scmp.ne.s32.totalorder %s11448_s6, %s10870_s22  ;;  %p10874_p11 = scmp.lt.u32.totalorder %s10870_s22, %s11448_s6 }
  0xe5   :  { %p10876_p12 = pnand %p10874_p11, %p10871_p10 }
  0xe7   :  { %10879 = shalt.err (!%p10876_p12)
}
  0xe8   :  { %s10880_s23 = scalar_lea.vmem %s324_s19, 16384  ;;  %p10885_p0 = scmp.lt.s32.totalorder %s324_s19, %s324_s19 }
  0xe9   :  { %p10881_p13 = scmp.ne.s32.totalorder %s324_s19, %s10880_s23  ;;  %p10886_p1 = scmp.lt.s32.totalorder %s10880_s23, %s10880_s23 }
  0xeb   :  { %p10887_p2 = por %p10886_p1, %p10885_p0 }
  0xed   :  { %p10888_p3 = pnand %p10887_p2, %p10881_p13 }
  0xef   :  { %10891 = shalt.err (!%p10888_p3)
}
  0xf0   :  { %329 = dma.hbm_to_vmem [thread:$0]  %s11448_s6, 16384, %s324_s19, [#allocation36], %s11284_s16, %s11284_s16, %s11285_s13  }
  0xf1   :  { %s10892_s20 = scalar_lea.hbm %s11458_s24, 4096 }
  0xf2   :  { %p10893_p4 = scmp.ne.s32.totalorder %s11458_s24, %s10892_s20  ;;  %p10896_p5 = scmp.lt.u32.totalorder %s10892_s20, %s11458_s24 }
  0xf4   :  { %p10898_p6 = pnand %p10896_p5, %p10893_p4 }
  0xf6   :  { %10901 = shalt.err (!%p10898_p6)
}
  0xf7   :  { %s10902_s30 = scalar_lea.vmem %s11546_s18, 4096  ;;  %p10907_p8 = scmp.lt.s32.totalorder %s11546_s18, %s11546_s18 }
  0xf8   :  { %p10903_p7 = scmp.ne.s32.totalorder %s11546_s18, %s10902_s30  ;;  %p10908_p9 = scmp.lt.s32.totalorder %s10902_s30, %s10902_s30 }
  0xfa   :  { %p10909_p10 = por %p10908_p9, %p10907_p8 }
  0xfc   :  { %p10910_p11 = pnand %p10909_p10, %p10903_p7 }
  0xfe   :  { %10913 = shalt.err (!%p10910_p11)
}
  0xff   :  { %s11296_s26 = smov 64   ;;  %s11297_s6 = smov 4  }
 0x100   :  { %351 = dma.hbm_to_vmem [thread:$0]  %s11458_s24, 4096, %s11546_s18, [#allocation39], %s11296_s26, %s11296_s26, %s11297_s6  }
 0x101   :  { %s11298_s28 = smov [#allocation2]   ;;  %s10914_s12 = scalar_lea.hbm %s11333_s9, 256 }
 0x102   :  { %s91_s0 = sshll.u32 %s11298_s28, 4  ;;  %p10915_p12 = scmp.ne.s32.totalorder %s11333_s9, %s10914_s12  ;;  %s92_s0 = int_to_ptr.vmem [resolvable:$true] %s91_s0 }
 0x103   :  { %p10918_p13 = scmp.lt.u32.totalorder %s10914_s12, %s11333_s9 }
 0x105   :  { %p10920_p0 = pnand %p10918_p13, %p10915_p12 }
 0x107   :  { %10923 = shalt.err (!%p10920_p0)
}
 0x108   :  { %s10924_s29 = scalar_lea.vmem %s92_s0, 256  ;;  %p10929_p2 = scmp.lt.s32.totalorder %s92_s0, %s92_s0 }
 0x109   :  { %p10925_p1 = scmp.ne.s32.totalorder %s92_s0, %s10924_s29  ;;  %p10930_p3 = scmp.lt.s32.totalorder %s10924_s29, %s10924_s29 }
 0x10b   :  { %p10931_p4 = por %p10930_p3, %p10929_p2 }
 0x10d   :  { %p10932_p5 = pnand %p10931_p4, %p10925_p1 }
 0x10f   :  { %10935 = shalt.err (!%p10932_p5)
}
 0x110   :  { %s11299_s1 = smov 128   ;;  %s11300_s24 = smov 8  }
 0x111   :  { %97 = dma.hbm_to_vmem [thread:$0]  %s11333_s9, 256, %s92_s0, [#allocation3], %s11299_s1, %s11299_s1, %s11300_s24  }
 0x112   :  { %s11301_s2 = smov [#allocation7]   ;;  %s11302_s7 = smov [#allocation10]  }
 0x113   :  { %s116_s27 = sshll.u32 %s11301_s2, 4  ;;  %s139_s8 = sshll.u32 %s11302_s7, 4  ;;  %s117_s27 = int_to_ptr.vmem [resolvable:$true] %s116_s27  ;;  %s140_s8 = int_to_ptr.vmem [resolvable:$true] %s139_s8 }
 0x114   :  { %s10936_s10 = scalar_lea.hbm %s11348_s21, 128 }
 0x115   :  { %p10937_p6 = scmp.ne.s32.totalorder %s11348_s21, %s10936_s10  ;;  %p10940_p7 = scmp.lt.u32.totalorder %s10936_s10, %s11348_s21 }
 0x117   :  { %p10942_p8 = pnand %p10940_p7, %p10937_p6 }
 0x119   :  { %10945 = shalt.err (!%p10942_p8)
}
 0x11a   :  { %s10946_s25 = scalar_lea.vmem %s117_s27, 128  ;;  %p10951_p10 = scmp.lt.s32.totalorder %s117_s27, %s117_s27 }
 0x11b   :  { %p10947_p9 = scmp.ne.s32.totalorder %s117_s27, %s10946_s25  ;;  %p10952_p11 = scmp.lt.s32.totalorder %s10946_s25, %s10946_s25 }
 0x11d   :  { %p10953_p12 = por %p10952_p11, %p10951_p10 }
 0x11f   :  { %p10954_p13 = pnand %p10953_p12, %p10947_p9 }
 0x121   :  { %10957 = shalt.err (!%p10954_p13)
}
 0x122   :  { %s12615_s11 = sld [smem:[#allocation59_spill]] }
 0x123   :  { %119 = dma.hbm_to_vmem [thread:$0]  %s11348_s21, 128, %s117_s27, [#allocation6]  }
 0x128   :  { %s10958_s9 = scalar_lea.hbm %s12615_s11, 4096 }
 0x129   :  { %p10959_p0 = scmp.ne.s32.totalorder %s12615_s11, %s10958_s9  ;;  %p10962_p1 = scmp.lt.u32.totalorder %s10958_s9, %s12615_s11 }
 0x12b   :  { %p10964_p2 = pnand %p10962_p1, %p10959_p0 }
 0x12d   :  { %10967 = shalt.err (!%p10964_p2)
}
 0x12e   :  { %s10968_s15 = scalar_lea.vmem %s140_s8, 4096  ;;  %p10973_p4 = scmp.lt.s32.totalorder %s140_s8, %s140_s8 }
 0x12f   :  { %p10969_p3 = scmp.ne.s32.totalorder %s140_s8, %s10968_s15  ;;  %p10974_p5 = scmp.lt.s32.totalorder %s10968_s15, %s10968_s15 }
 0x131   :  { %p10975_p6 = por %p10974_p5, %p10973_p4 }
 0x133   :  { %p10976_p7 = pnand %p10975_p6, %p10969_p3 }
 0x135   :  { %10979 = shalt.err (!%p10976_p7)
}
 0x136   :  { %s12616_s19 = sld [smem:[#allocation60_spill]]  ;;  %s11303_s21 = smov [#allocation13]  }
 0x137   :  { %145 = dma.hbm_to_vmem [thread:$0]  %s12615_s11, 4096, %s140_s8, [#allocation9], %s11284_s16, %s11284_s16, %s11285_s13  }
 0x138   :  { %s162_s5 = sshll.u32 %s11303_s21, 4  ;;  %s11304_s18 = smov [#allocation16]   ;;  %s163_s5 = int_to_ptr.vmem [resolvable:$true] %s162_s5 }
 0x139   :  { %s181_s22 = sshll.u32 %s11304_s18, 4  ;;  %s182_s22 = int_to_ptr.vmem [resolvable:$true] %s181_s22 }
 0x13c   :  { %s10980_s23 = scalar_lea.hbm %s12616_s19, 64 }
 0x13d   :  { %p10981_p8 = scmp.ne.s32.totalorder %s12616_s19, %s10980_s23  ;;  %p10984_p9 = scmp.lt.u32.totalorder %s10980_s23, %s12616_s19 }
 0x13f   :  { %p10986_p10 = pnand %p10984_p9, %p10981_p8 }
 0x141   :  { %10989 = shalt.err (!%p10986_p10)
}
 0x142   :  { %s10990_s20 = scalar_lea.vmem %s163_s5, 64  ;;  %p10995_p12 = scmp.lt.s32.totalorder %s163_s5, %s163_s5 }
 0x143   :  { %p10991_p11 = scmp.ne.s32.totalorder %s163_s5, %s10990_s20  ;;  %p10996_p13 = scmp.lt.s32.totalorder %s10990_s20, %s10990_s20 }
 0x145   :  { %p10997_p0 = por %p10996_p13, %p10995_p12 }
 0x147   :  { %p10998_p1 = pnand %p10997_p0, %p10991_p11 }
 0x149   :  { %11001 = shalt.err (!%p10998_p1)
}
 0x14a   :  { %s12617_s30 = sld [smem:[#allocation61_spill]] }
 0x14b   :  { %165 = dma.hbm_to_vmem [thread:$0]  %s12616_s19, 64, %s163_s5, [#allocation12]  }
 0x150   :  { %s11002_s26 = scalar_lea.hbm %s12617_s30, 4096 }
 0x151   :  { %p11003_p2 = scmp.ne.s32.totalorder %s12617_s30, %s11002_s26  ;;  %p11006_p3 = scmp.lt.u32.totalorder %s11002_s26, %s12617_s30 }
 0x153   :  { %p11008_p4 = pnand %p11006_p3, %p11003_p2 }
 0x155   :  { %11011 = shalt.err (!%p11008_p4)
}
 0x156   :  { %s11012_s6 = scalar_lea.vmem %s182_s22, 4096  ;;  %p11017_p6 = scmp.lt.s32.totalorder %s182_s22, %s182_s22 }
 0x157   :  { %p11013_p5 = scmp.ne.s32.totalorder %s182_s22, %s11012_s6  ;;  %p11018_p7 = scmp.lt.s32.totalorder %s11012_s6, %s11012_s6 }
 0x159   :  { %p11019_p8 = por %p11018_p7, %p11017_p6 }
 0x15b   :  { %p11020_p9 = pnand %p11019_p8, %p11013_p5 }
 0x15d   :  { %11023 = shalt.err (!%p11020_p9)
}
 0x15e   :  { %s12618_s28 = sld [smem:[#allocation62_spill]]  ;;  %s11305_s0 = smov [#allocation19]  }
 0x15f   :  { %187 = dma.hbm_to_vmem [thread:$0]  %s12617_s30, 4096, %s182_s22, [#allocation15], %s11284_s16, %s11284_s16, %s11285_s13  }
 0x160   :  { %s204_s12 = sshll.u32 %s11305_s0, 4  ;;  %s11306_s29 = smov [#allocation22]   ;;  %s205_s12 = int_to_ptr.vmem [resolvable:$true] %s204_s12 }
 0x161   :  { %s223_s1 = sshll.u32 %s11306_s29, 4  ;;  %s224_s1 = int_to_ptr.vmem [resolvable:$true] %s223_s1 }
 0x164   :  { %s11024_s24 = scalar_lea.hbm %s12618_s28, 64 }
 0x165   :  { %p11025_p10 = scmp.ne.s32.totalorder %s12618_s28, %s11024_s24  ;;  %p11028_p11 = scmp.lt.u32.totalorder %s11024_s24, %s12618_s28 }
 0x167   :  { %p11030_p12 = pnand %p11028_p11, %p11025_p10 }
 0x169   :  { %11033 = shalt.err (!%p11030_p12)
}
 0x16a   :  { %s11034_s2 = scalar_lea.vmem %s205_s12, 64  ;;  %p11039_p0 = scmp.lt.s32.totalorder %s205_s12, %s205_s12 }
 0x16b   :  { %p11035_p13 = scmp.ne.s32.totalorder %s205_s12, %s11034_s2  ;;  %p11040_p1 = scmp.lt.s32.totalorder %s11034_s2, %s11034_s2 }
 0x16d   :  { %p11041_p2 = por %p11040_p1, %p11039_p0 }
 0x16f   :  { %p11042_p3 = pnand %p11041_p2, %p11035_p13 }
 0x171   :  { %11045 = shalt.err (!%p11042_p3)
}
 0x172   :  { %s12619_s27 = sld [smem:[#allocation63_spill]] }
 0x173   :  { %207 = dma.hbm_to_vmem [thread:$0]  %s12618_s28, 64, %s205_s12, [#allocation18]  }
 0x178   :  { %s11046_s7 = scalar_lea.hbm %s12619_s27, 4096 }
 0x179   :  { %p11047_p4 = scmp.ne.s32.totalorder %s12619_s27, %s11046_s7  ;;  %p11050_p5 = scmp.lt.u32.totalorder %s11046_s7, %s12619_s27 }
 0x17b   :  { %p11052_p6 = pnand %p11050_p5, %p11047_p4 }
 0x17d   :  { %11055 = shalt.err (!%p11052_p6)
}
 0x17e   :  { %s11056_s8 = scalar_lea.vmem %s224_s1, 4096  ;;  %p11061_p8 = scmp.lt.s32.totalorder %s224_s1, %s224_s1 }
 0x17f   :  { %p11057_p7 = scmp.ne.s32.totalorder %s224_s1, %s11056_s8  ;;  %p11062_p9 = scmp.lt.s32.totalorder %s11056_s8, %s11056_s8 }
 0x181   :  { %p11063_p10 = por %p11062_p9, %p11061_p8 }
 0x183   :  { %p11064_p11 = pnand %p11063_p10, %p11057_p7 }
 0x185   :  { %11067 = shalt.err (!%p11064_p11)
}
 0x186   :  { %s12620_s10 = sld [smem:[#allocation64_spill]]  ;;  %s11307_s25 = smov [#allocation25]  }
 0x187   :  { %229 = dma.hbm_to_vmem [thread:$0]  %s12619_s27, 4096, %s224_s1, [#allocation21], %s11284_s16, %s11284_s16, %s11285_s13  }
 0x188   :  { %s248_s11 = sshll.u32 %s11307_s25, 4  ;;  %s11308_s9 = smov [#allocation28]   ;;  %s249_s11 = int_to_ptr.vmem [resolvable:$true] %s248_s11 }
 0x189   :  { %s268_s15 = sshll.u32 %s11308_s9, 4  ;;  %s269_s15 = int_to_ptr.vmem [resolvable:$true] %s268_s15 }
 0x18c   :  { %s11068_s19 = scalar_lea.hbm %s12620_s10, 64 }
 0x18d   :  { %p11069_p12 = scmp.ne.s32.totalorder %s12620_s10, %s11068_s19  ;;  %p11072_p13 = scmp.lt.u32.totalorder %s11068_s19, %s12620_s10 }
 0x18f   :  { %p11074_p0 = pnand %p11072_p13, %p11069_p12 }
 0x191   :  { %11077 = shalt.err (!%p11074_p0)
}
 0x192   :  { %s11078_s21 = scalar_lea.vmem %s249_s11, 64  ;;  %p11083_p2 = scmp.lt.s32.totalorder %s249_s11, %s249_s11 }
 0x193   :  { %p11079_p1 = scmp.ne.s32.totalorder %s249_s11, %s11078_s21  ;;  %p11084_p3 = scmp.lt.s32.totalorder %s11078_s21, %s11078_s21 }
 0x195   :  { %p11085_p4 = por %p11084_p3, %p11083_p2 }
 0x197   :  { %p11086_p5 = pnand %p11085_p4, %p11079_p1 }
 0x199   :  { %11089 = shalt.err (!%p11086_p5)
}
 0x19a   :  { %s12621_s5 = sld [smem:[#allocation65_spill]] }
 0x19b   :  { %251 = dma.hbm_to_vmem [thread:$0]  %s12620_s10, 64, %s249_s11, [#allocation24]  }
 0x1a0   :  { %s11090_s18 = scalar_lea.hbm %s12621_s5, 64 }
 0x1a1   :  { %p11091_p6 = scmp.ne.s32.totalorder %s12621_s5, %s11090_s18  ;;  %p11094_p7 = scmp.lt.u32.totalorder %s11090_s18, %s12621_s5 }
 0x1a3   :  { %p11096_p8 = pnand %p11094_p7, %p11091_p6 }
 0x1a5   :  { %11099 = shalt.err (!%p11096_p8)
}
 0x1a6   :  { %s11100_s22 = scalar_lea.vmem %s269_s15, 64  ;;  %p11105_p10 = scmp.lt.s32.totalorder %s269_s15, %s269_s15 }
 0x1a7   :  { %p11101_p9 = scmp.ne.s32.totalorder %s269_s15, %s11100_s22  ;;  %p11106_p11 = scmp.lt.s32.totalorder %s11100_s22, %s11100_s22 }
 0x1a9   :  { %p11107_p12 = por %p11106_p11, %p11105_p10 }
 0x1ab   :  { %p11108_p13 = pnand %p11107_p12, %p11101_p9 }
 0x1ad   :  { %11111 = shalt.err (!%p11108_p13)
}
 0x1ae   :  { %s12622_s23 = sld [smem:[#allocation66_spill]]  ;;  %s11309_s20 = smov [#allocation31]  }
 0x1af   :  { %271 = dma.hbm_to_vmem [thread:$0]  %s12621_s5, 64, %s269_s15, [#allocation27]  }
 0x1b0   :  { %s289_s30 = sshll.u32 %s11309_s20, 4  ;;  %s11310_s26 = smov [#allocation34]   ;;  %s290_s30 = int_to_ptr.vmem [resolvable:$true] %s289_s30 }
 0x1b1   :  { %s311_s6 = sshll.u32 %s11310_s26, 4  ;;  %s312_s6 = int_to_ptr.vmem [resolvable:$true] %s311_s6 }
 0x1b4   :  { %s11112_s28 = scalar_lea.hbm %s12622_s23, 16384 }
 0x1b5   :  { %p11113_p0 = scmp.ne.s32.totalorder %s12622_s23, %s11112_s28  ;;  %p11116_p1 = scmp.lt.u32.totalorder %s11112_s28, %s12622_s23 }
 0x1b7   :  { %p11118_p2 = pnand %p11116_p1, %p11113_p0 }
 0x1b9   :  { %11121 = shalt.err (!%p11118_p2)
}
 0x1ba   :  { %s11122_s0 = scalar_lea.vmem %s290_s30, 16384  ;;  %p11127_p4 = scmp.lt.s32.totalorder %s290_s30, %s290_s30 }
 0x1bb   :  { %p11123_p3 = scmp.ne.s32.totalorder %s290_s30, %s11122_s0  ;;  %p11128_p5 = scmp.lt.s32.totalorder %s11122_s0, %s11122_s0 }
 0x1bd   :  { %p11129_p6 = por %p11128_p5, %p11127_p4 }
 0x1bf   :  { %p11130_p7 = pnand %p11129_p6, %p11123_p3 }
 0x1c1   :  { %11133 = shalt.err (!%p11130_p7)
}
 0x1c2   :  { %s12623_s12 = sld [smem:[#allocation67_spill]] }
 0x1c3   :  { %295 = dma.hbm_to_vmem [thread:$0]  %s12622_s23, 16384, %s290_s30, [#allocation30], %s11284_s16, %s11284_s16, %s11285_s13  }
 0x1c8   :  { %s11134_s29 = scalar_lea.hbm %s12623_s12, 16384 }
 0x1c9   :  { %p11135_p8 = scmp.ne.s32.totalorder %s12623_s12, %s11134_s29  ;;  %p11138_p9 = scmp.lt.u32.totalorder %s11134_s29, %s12623_s12 }
 0x1cb   :  { %p11140_p10 = pnand %p11138_p9, %p11135_p8 }
 0x1cd   :  { %11143 = shalt.err (!%p11140_p10)
}
 0x1ce   :  { %s11144_s1 = scalar_lea.vmem %s312_s6, 16384  ;;  %p11149_p12 = scmp.lt.s32.totalorder %s312_s6, %s312_s6 }
 0x1cf   :  { %p11145_p11 = scmp.ne.s32.totalorder %s312_s6, %s11144_s1  ;;  %p11150_p13 = scmp.lt.s32.totalorder %s11144_s1, %s11144_s1 }
 0x1d1   :  { %p11151_p0 = por %p11150_p13, %p11149_p12 }
 0x1d3   :  { %p11152_p1 = pnand %p11151_p0, %p11145_p11 }
 0x1d5   :  { %11155 = shalt.err (!%p11152_p1)
}
 0x1d6   :  { %s12624_s24 = sld [smem:[#allocation68_spill]]  ;;  %s11311_s2 = smov [#allocation37]  }
 0x1d7   :  { %317 = dma.hbm_to_vmem [thread:$0]  %s12623_s12, 16384, %s312_s6, [#allocation33], %s11284_s16, %s11284_s16, %s11285_s13  }
 0x1d8   :  { %s336_s27 = sshll.u32 %s11311_s2, 4  ;;  %s11312_s7 = smov [#allocation40]   ;;  %s337_s27 = int_to_ptr.vmem [resolvable:$true] %s336_s27 }
 0x1d9   :  { %s362_s8 = sshll.u32 %s11312_s7, 4  ;;  %s363_s8 = int_to_ptr.vmem [resolvable:$true] %s362_s8 }
 0x1dc   :  { %s11156_s10 = scalar_lea.hbm %s12624_s24, 64 }
 0x1dd   :  { %p11157_p2 = scmp.ne.s32.totalorder %s12624_s24, %s11156_s10  ;;  %p11160_p3 = scmp.lt.u32.totalorder %s11156_s10, %s12624_s24 }
 0x1df   :  { %p11162_p4 = pnand %p11160_p3, %p11157_p2 }
 0x1e1   :  { %11165 = shalt.err (!%p11162_p4)
}
 0x1e2   :  { %s11166_s25 = scalar_lea.vmem %s337_s27, 64  ;;  %p11171_p6 = scmp.lt.s32.totalorder %s337_s27, %s337_s27 }
 0x1e3   :  { %p11167_p5 = scmp.ne.s32.totalorder %s337_s27, %s11166_s25  ;;  %p11172_p7 = scmp.lt.s32.totalorder %s11166_s25, %s11166_s25 }
 0x1e5   :  { %p11173_p8 = por %p11172_p7, %p11171_p6 }
 0x1e7   :  { %p11174_p9 = pnand %p11173_p8, %p11167_p5 }
 0x1e9   :  { %11177 = shalt.err (!%p11174_p9)
}
 0x1ea   :  { %339 = dma.hbm_to_vmem [thread:$0]  %s12624_s24, 64, %s337_s27, [#allocation36]  }
 0x1eb   :  { %s11178_s16 = scalar_lea.hbm %s11473_s4, 16 }
 0x1ec   :  { %p11179_p10 = scmp.ne.s32.totalorder %s11473_s4, %s11178_s16  ;;  %p11182_p11 = scmp.lt.u32.totalorder %s11178_s16, %s11473_s4 }
 0x1ee   :  { %p11184_p12 = pnand %p11182_p11, %p11179_p10 }
 0x1f0   :  { %11187 = shalt.err (!%p11184_p12)
}
 0x1f1   :  { %s11188_s13 = scalar_lea.vmem %s363_s8, 16  ;;  %s11192_s11 = scalar_lea.vmem %s363_s8, 32 }
 0x1f2   :  { %p11189_p13 = scmp.ne.s32.totalorder %s363_s8, %s11188_s13  ;;  %p11193_p0 = scmp.lt.s32.totalorder %s363_s8, %s363_s8 }
 0x1f3   :  { %p11194_p1 = scmp.lt.s32.totalorder %s11192_s11, %s11188_s13 }
 0x1f5   :  { %p11195_p2 = por %p11194_p1, %p11193_p0 }
 0x1f7   :  { %p11196_p3 = pnand %p11195_p2, %p11189_p13 }
 0x1f9   :  { %11199 = shalt.err (!%p11196_p3)
}
 0x1fa   :  { %365 = dma.hbm_to_vmem [thread:$0]  %s11473_s4, 16, %s363_s8, [#allocation39]  }
 0x1fb   :  { %11222 = dma.done.wait [#allocation3], 256  }
 0x1fc   :  { %11223 = vsyncadd [#allocation3], 4294967040 }
 0x1fd   :  { %11224 = dma.done.wait [#allocation6], 192  }
 0x1fe   :  { %11225 = vsyncadd [#allocation6], 4294967104 }
 0x1ff   :  { %11226 = dma.done.wait [#allocation9], 8192  }
 0x200   :  { %11227 = vsyncadd [#allocation9], 4294959104 }
 0x201   :  { %11228 = dma.done.wait [#allocation12], 128  }
 0x202   :  { %11229 = vsyncadd [#allocation12], 4294967168 }
 0x203   :  { %11230 = dma.done.wait [#allocation15], 4160  }
 0x204   :  { %11231 = vsyncadd [#allocation15], 4294963136 }
 0x205   :  { %11232 = dma.done.wait [#allocation18], 128  }
 0x206   :  { %11233 = vsyncadd [#allocation18], 4294967168 }
 0x207   :  { %11234 = dma.done.wait [#allocation21], 4160  }
 0x208   :  { %11235 = vsyncadd [#allocation21], 4294963136 }
 0x209   :  { %11236 = dma.done.wait [#allocation24], 4160  }
 0x20a   :  { %11237 = vsyncadd [#allocation24], 4294963136 }
 0x20b   :  { %11238 = dma.done.wait [#allocation27], 128  }
 0x20c   :  { %11239 = vsyncadd [#allocation27], 4294967168 }
 0x20d   :  { %11240 = dma.done.wait [#allocation30], 32768  }
 0x20e   :  { %11241 = vsyncadd [#allocation30], 4294934528 }
 0x20f   :  { %11242 = dma.done.wait [#allocation33], 16448  }
 0x210   :  { %11243 = vsyncadd [#allocation33], 4294950848 }
 0x211   :  { %11244 = dma.done.wait [#allocation36], 16448  }
 0x212   :  { %11245 = vsyncadd [#allocation36], 4294950848 }
 0x213   :  { %11246 = dma.done.wait [#allocation39], 4112  }
 0x214   :  { %11247 = vsyncadd [#allocation39], 4294963184  ;;  %v11313_v0 = vmov 0   ;;  %v9497_v1 = vld [vmem:[#allocation8 + $0x4] ss:$16 sps:$4 sm:$0xff]   ;;  %v449_v34 = vld [vmem:[#allocation2 + $0x8] sm:$0xff] }
 0x215   :  { %677 = vmatprep.mubr.bf16.mxu0 %v11313_v0  ;;  %720 = vmatprep.mubr.bf16.mxu1 %v11313_v0  ;;  %v9499_v2 = vld [vmem:[#allocation8 + $0xc] ss:$16 sps:$4 sm:$0xff]   ;;  %v9501_v3 = vld [vmem:[#allocation8] ss:$16 sps:$4 sm:$0xff]   ;;  %v9502_v4 = vld [vmem:[#allocation8 + $0x8] ss:$16 sps:$4 sm:$0xff]  }
 0x216   :  { %645 = vmatprep.subr.bf16.mxu0 %v9497_v1  ;;  %688 = vmatprep.subr.bf16.mxu1 %v9499_v2  ;;  %v9503_v5 = vld [vmem:[#allocation8 + $0x24] ss:$16 sps:$4 sm:$0xff]   ;;  %v9505_v6 = vld [vmem:[#allocation8 + $0x2c] ss:$16 sps:$4 sm:$0xff]   ;;  %v9507_v7 = vld [vmem:[#allocation8 + $0x20] ss:$16 sps:$4 sm:$0xff]  }
 0x217   :  { %646 = vmatpush1.bf16.msra.mxu0 %v9501_v3  ;;  %689 = vmatpush1.bf16.msra.mxu1 %v9502_v4  ;;  %v9508_v8 = vld [vmem:[#allocation8 + $0x28] ss:$16 sps:$4 sm:$0xff]   ;;  %v9509_v9 = vld [vmem:[#allocation8 + $0x44] ss:$16 sps:$4 sm:$0xff]   ;;  %v9511_v10 = vld [vmem:[#allocation8 + $0x4c] ss:$16 sps:$4 sm:$0xff]  }
 0x218   :  { %647 = vmatprep.subr.bf16.mxu0 %v9503_v5  ;;  %690 = vmatprep.subr.bf16.mxu1 %v9505_v6  ;;  %v9513_v11 = vld [vmem:[#allocation8 + $0x40] ss:$16 sps:$4 sm:$0xff]   ;;  %v9514_v12 = vld [vmem:[#allocation8 + $0x48] ss:$16 sps:$4 sm:$0xff]   ;;  %v9515_v13 = vld [vmem:[#allocation8 + $0x64] ss:$16 sps:$4 sm:$0xff]  }
 0x219   :  { %v9517_v14 = vld [vmem:[#allocation8 + $0x6c] ss:$16 sps:$4 sm:$0xff]   ;;  %v9519_v15 = vld [vmem:[#allocation8 + $0x60] ss:$16 sps:$4 sm:$0xff]   ;;  %v9520_v16 = vld [vmem:[#allocation8 + $0x68] ss:$16 sps:$4 sm:$0xff]  }
 0x21a   :  { %v9521_v17 = vld [vmem:[#allocation8 + $0x84] ss:$16 sps:$4 sm:$0xff]   ;;  %v9523_v18 = vld [vmem:[#allocation8 + $0x8c] ss:$16 sps:$4 sm:$0xff]   ;;  %v9525_v19 = vld [vmem:[#allocation8 + $0x80] ss:$16 sps:$4 sm:$0xff]  }
 0x21b   :  { %648 = vmatpush1.bf16.msra.mxu0 %v9507_v7  ;;  %691 = vmatpush1.bf16.msra.mxu1 %v9508_v8  ;;  %v9526_v20 = vld [vmem:[#allocation8 + $0x88] ss:$16 sps:$4 sm:$0xff]   ;;  %v9527_v21 = vld [vmem:[#allocation8 + $0xa4] ss:$16 sps:$4 sm:$0xff]   ;;  %v9529_v22 = vld [vmem:[#allocation8 + $0xac] ss:$16 sps:$4 sm:$0xff]  }
 0x21c   :  { %649 = vmatprep.subr.bf16.mxu0 %v9509_v9  ;;  %692 = vmatprep.subr.bf16.mxu1 %v9511_v10  ;;  %v9531_v23 = vld [vmem:[#allocation8 + $0xa0] ss:$16 sps:$4 sm:$0xff]   ;;  %v9532_v24 = vld [vmem:[#allocation8 + $0xa8] ss:$16 sps:$4 sm:$0xff]   ;;  %v9533_v25 = vld [vmem:[#allocation8 + $0xc4] ss:$16 sps:$4 sm:$0xff]  }
 0x21d   :  { %v9535_v26 = vld [vmem:[#allocation8 + $0xcc] ss:$16 sps:$4 sm:$0xff]   ;;  %v9537_v27 = vld [vmem:[#allocation8 + $0xc0] ss:$16 sps:$4 sm:$0xff]   ;;  %v9538_v28 = vld [vmem:[#allocation8 + $0xc8] ss:$16 sps:$4 sm:$0xff]  }
 0x21e   :  { %v9539_v29 = vld [vmem:[#allocation8 + $0xe4] ss:$16 sps:$4 sm:$0xff]   ;;  %v9541_v30 = vld [vmem:[#allocation8 + $0xec] ss:$16 sps:$4 sm:$0xff]   ;;  %v9543_v31 = vld [vmem:[#allocation8 + $0xe0] ss:$16 sps:$4 sm:$0xff]  }
 0x21f   :  { %650 = vmatpush1.bf16.msra.mxu0 %v9513_v11  ;;  %693 = vmatpush1.bf16.msra.mxu1 %v9514_v12  ;;  %v9544_v32 = vld [vmem:[#allocation8 + $0xe8] ss:$16 sps:$4 sm:$0xff]   ;;  %v9547_v35 = vld [vmem:[#allocation10 + $0x4] ss:$16 sps:$4 sm:$0xff]   ;;  %v9550_v36 = vld [vmem:[#allocation10 + $0xc] ss:$16 sps:$4 sm:$0xff]  }
 0x220   :  { %651 = vmatprep.subr.bf16.mxu0 %v9515_v13  ;;  %694 = vmatprep.subr.bf16.mxu1 %v9517_v14  ;;  %v448_v33 = vld [vmem:[#allocation2] sm:$0xff]  ;;  %v9545_v38 = vld [vmem:[#allocation10] ss:$16 sps:$4 sm:$0xff]   ;;  %v9556_v41 = vld [vmem:[#allocation10 + $0x2c] ss:$16 sps:$4 sm:$0xff]   ;;  %s12625_s4 = sld [smem:[#allocation56_spill]] }
 0x221   :  { %v450_v37 = vpack.c.bf16 %v449_v34, %v448_v33  ;;  %v9548_v39 = vld [vmem:[#allocation10 + $0x8] ss:$16 sps:$4 sm:$0xff]   ;;  %v9553_v40 = vld [vmem:[#allocation10 + $0x24] ss:$16 sps:$4 sm:$0xff]   ;;  %v9551_v42 = vld [vmem:[#allocation10 + $0x20] ss:$16 sps:$4 sm:$0xff]  }
 0x222   :  { %v9554_v43 = vld [vmem:[#allocation10 + $0x28] ss:$16 sps:$4 sm:$0xff]   ;;  %v9559_v44 = vld [vmem:[#allocation10 + $0x44] ss:$16 sps:$4 sm:$0xff]   ;;  %v9562_v45 = vld [vmem:[#allocation10 + $0x4c] ss:$16 sps:$4 sm:$0xff]  }
 0x223   :  { %652 = vmatpush1.bf16.msra.mxu0 %v9519_v15  ;;  %695 = vmatpush1.bf16.msra.mxu1 %v9520_v16  ;;  %v9557_v46 = vld [vmem:[#allocation10 + $0x40] ss:$16 sps:$4 sm:$0xff]   ;;  %v9560_v47 = vld [vmem:[#allocation10 + $0x48] ss:$16 sps:$4 sm:$0xff]   ;;  %v9565_v48 = vld [vmem:[#allocation10 + $0x64] ss:$16 sps:$4 sm:$0xff]  }
 0x224   :  { %653 = vmatprep.subr.bf16.mxu0 %v9521_v17  ;;  %696 = vmatprep.subr.bf16.mxu1 %v9523_v18  ;;  %v9568_v49 = vld [vmem:[#allocation10 + $0x6c] ss:$16 sps:$4 sm:$0xff]   ;;  %v9563_v50 = vld [vmem:[#allocation10 + $0x60] ss:$16 sps:$4 sm:$0xff]   ;;  %v9566_v51 = vld [vmem:[#allocation10 + $0x68] ss:$16 sps:$4 sm:$0xff]  }
 0x225   :  { %v9571_v52 = vld [vmem:[#allocation10 + $0x84] ss:$16 sps:$4 sm:$0xff]   ;;  %v9574_v53 = vld [vmem:[#allocation10 + $0x8c] ss:$16 sps:$4 sm:$0xff]   ;;  %v9569_v54 = vld [vmem:[#allocation10 + $0x80] ss:$16 sps:$4 sm:$0xff]  }
 0x226   :  { %v9572_v55 = vld [vmem:[#allocation10 + $0x88] ss:$16 sps:$4 sm:$0xff]   ;;  %v9577_v56 = vld [vmem:[#allocation10 + $0xa4] ss:$16 sps:$4 sm:$0xff]   ;;  %v9580_v57 = vld [vmem:[#allocation10 + $0xac] ss:$16 sps:$4 sm:$0xff]  }
 0x227   :  { %654 = vmatpush1.bf16.msra.mxu0 %v9525_v19  ;;  %697 = vmatpush1.bf16.msra.mxu1 %v9526_v20  ;;  %v9575_v58 = vld [vmem:[#allocation10 + $0xa0] ss:$16 sps:$4 sm:$0xff]   ;;  %v9578_v59 = vld [vmem:[#allocation10 + $0xa8] ss:$16 sps:$4 sm:$0xff]   ;;  %v9583_v60 = vld [vmem:[#allocation10 + $0xc4] ss:$16 sps:$4 sm:$0xff]  }
 0x228   :  { %655 = vmatprep.subr.bf16.mxu0 %v9527_v21  ;;  %698 = vmatprep.subr.bf16.mxu1 %v9529_v22  ;;  %v9586_v61 = vld [vmem:[#allocation10 + $0xcc] ss:$16 sps:$4 sm:$0xff]   ;;  %v9581_v62 = vld [vmem:[#allocation10 + $0xc0] ss:$16 sps:$4 sm:$0xff]   ;;  %v9584_v63 = vld [vmem:[#allocation10 + $0xc8] ss:$16 sps:$4 sm:$0xff]  }
 0x229   :  { %v9589_v1 = vld [vmem:[#allocation10 + $0xe4] ss:$16 sps:$4 sm:$0xff]   ;;  %v9592_v2 = vld [vmem:[#allocation10 + $0xec] ss:$16 sps:$4 sm:$0xff]   ;;  %v9587_v3 = vld [vmem:[#allocation10 + $0xe0] ss:$16 sps:$4 sm:$0xff]  }
 0x22a   :  { %v9590_v4 = vld [vmem:[#allocation10 + $0xe8] ss:$16 sps:$4 sm:$0xff]   ;;  %v9595_v6 = vld [vmem:[#allocation16 + $0x4] ss:$16 sps:$4 sm:$0xff]   ;;  %v9593_v9 = vld [vmem:[#allocation16] ss:$16 sps:$4 sm:$0xff]  }
 0x22b   :  { %656 = vmatpush1.bf16.msra.mxu0 %v9531_v23  ;;  %699 = vmatpush1.bf16.msra.mxu1 %v9532_v24  ;;  %v446_v5 = vld [vmem:[%s12625_s4] sm:$0xff]  ;;  %v9601_v11 = vld [vmem:[#allocation16 + $0x24] ss:$16 sps:$4 sm:$0xff]   ;;  %v9599_v13 = vld [vmem:[#allocation16 + $0x20] ss:$16 sps:$4 sm:$0xff]   ;;  %vm1983_vm0 = vcmask 1043456  }
 0x22c   :  { %657 = vmatprep.subr.bf16.mxu0 %v9533_v25  ;;  %700 = vmatprep.subr.bf16.mxu1 %v9535_v26  ;;  %v9598_v7 = vld [vmem:[#allocation16 + $0xc] ss:$16 sps:$4 sm:$0xff]   ;;  %v11636_v8 = vpack.c.bf16 %v446_v5, %v446_v5  ;;  %v9596_v10 = vld [vmem:[#allocation16 + $0x8] ss:$16 sps:$4 sm:$0xff]   ;;  %v9607_v15 = vld [vmem:[#allocation16 + $0x44] ss:$16 sps:$4 sm:$0xff]  }
 0x22d   :  { %v9604_v12 = vld [vmem:[#allocation16 + $0x2c] ss:$16 sps:$4 sm:$0xff]   ;;  %v9602_v14 = vld [vmem:[#allocation16 + $0x28] ss:$16 sps:$4 sm:$0xff]   ;;  %v9605_v17 = vld [vmem:[#allocation16 + $0x40] ss:$16 sps:$4 sm:$0xff]  }
 0x22e   :  { %v9610_v16 = vld [vmem:[#allocation16 + $0x4c] ss:$16 sps:$4 sm:$0xff]   ;;  %v9608_v18 = vld [vmem:[#allocation16 + $0x48] ss:$16 sps:$4 sm:$0xff]   ;;  %v9613_v19 = vld [vmem:[#allocation16 + $0x64] ss:$16 sps:$4 sm:$0xff]  }
 0x22f   :  { %658 = vmatpush1.bf16.msra.mxu0 %v9537_v27  ;;  %701 = vmatpush1.bf16.msra.mxu1 %v9538_v28  ;;  %v9616_v20 = vld [vmem:[#allocation16 + $0x6c] ss:$16 sps:$4 sm:$0xff]   ;;  %v9611_v21 = vld [vmem:[#allocation16 + $0x60] ss:$16 sps:$4 sm:$0xff]   ;;  %v9614_v22 = vld [vmem:[#allocation16 + $0x68] ss:$16 sps:$4 sm:$0xff]  }
 0x230   :  { %659 = vmatprep.subr.bf16.mxu0 %v9539_v29  ;;  %702 = vmatprep.subr.bf16.mxu1 %v9541_v30  ;;  %v9619_v23 = vld [vmem:[#allocation16 + $0x84] ss:$16 sps:$4 sm:$0xff]   ;;  %v9622_v24 = vld [vmem:[#allocation16 + $0x8c] ss:$16 sps:$4 sm:$0xff]   ;;  %v9617_v25 = vld [vmem:[#allocation16 + $0x80] ss:$16 sps:$4 sm:$0xff]  }
 0x231   :  { %v9620_v26 = vld [vmem:[#allocation16 + $0x88] ss:$16 sps:$4 sm:$0xff]   ;;  %v9625_v27 = vld [vmem:[#allocation16 + $0xa4] ss:$16 sps:$4 sm:$0xff]   ;;  %v9628_v28 = vld [vmem:[#allocation16 + $0xac] ss:$16 sps:$4 sm:$0xff]  }
 0x232   :  { %v9623_v29 = vld [vmem:[#allocation16 + $0xa0] ss:$16 sps:$4 sm:$0xff]   ;;  %v9626_v30 = vld [vmem:[#allocation16 + $0xa8] ss:$16 sps:$4 sm:$0xff]   ;;  %v9680_v5 = vld [vmem:[#allocation23 + $0xa8] ss:$16 sps:$4 sm:$0xff]  }
 0x233   :  { %660 = vmatpush1.bf16.msra.mxu0 %v9543_v31  ;;  %703 = vmatpush1.bf16.msra.mxu1 %v9544_v32  ;;  %v9631_v31 = vld [vmem:[#allocation16 + $0xc4] ss:$16 sps:$4 sm:$0xff]   ;;  %v9634_v32 = vld [vmem:[#allocation16 + $0xcc] ss:$16 sps:$4 sm:$0xff]   ;;  %v9629_v33 = vld [vmem:[#allocation16 + $0xc0] ss:$16 sps:$4 sm:$0xff]  }
 0x234   :  { %923 = vmatprep.subr.bf16.mxu0 %v9547_v35  ;;  %964 = vmatprep.subr.bf16.mxu1 %v9550_v36  ;;  %v9632_v34 = vld [vmem:[#allocation16 + $0xc8] ss:$16 sps:$4 sm:$0xff]   ;;  %v9637_v35 = vld [vmem:[#allocation16 + $0xe4] ss:$16 sps:$4 sm:$0xff]   ;;  %v9640_v36 = vld [vmem:[#allocation16 + $0xec] ss:$16 sps:$4 sm:$0xff]  }
 0x235   :  { %vm2174_vm1 = vcmask 1041409   ;;  %vm2176_vm2 = vcmask 1042434   ;;  %vm2178_vm3 = vcmask 1043459   ;;  %vm2180_vm4 = vcmask 1044484   ;;  %s12626_s9 = sld [smem:[#allocation57_spill]]  ;;  %s12627_s15 = sld [smem:[#allocation58_spill]] }
 0x236   :  { %678 = vmatmul.mubr.bf16.vlgmr.msra.gmra.mrb[0].mxu0 %v450_v37  ;;  %721 = vmatmul.mubr.bf16.vlgmr.msra.gmra.mrb[0].mxu1 %v450_v37  ;;  %v9635_v37 = vld [vmem:[#allocation16 + $0xe0] ss:$16 sps:$4 sm:$0xff]   ;;  %vm2182_vm5 = vcmask 1045509   ;;  %vm2184_vm6 = vcmask 1046534   ;;  %vm2186_vm7 = vcmask 1047559   ;;  %vm3881_vm8 = vcmask 1041408  }
 0x237   :  { %924 = vmatpush1.bf16.msra.mxu0 %v9545_v38  ;;  %965 = vmatpush1.bf16.msra.mxu1 %v9548_v39  ;;  %v9638_v38 = vld [vmem:[#allocation16 + $0xe8] ss:$16 sps:$4 sm:$0xff]   ;;  %vm2445_vm11 = vcmask 130048   ;;  %s12628_s19 = sld [smem:[#allocation70_spill]]  ;;  %s11319_s21 = smov [#allocation41]  }
 0x238   :  { %925 = vmatprep.subr.bf16.mxu0 %v9553_v40  ;;  %966 = vmatprep.subr.bf16.mxu1 %v9556_v41  ;;  %v9643_v39 = vld [vmem:[#allocation22 + $0xc] ss:$16 sps:$4 sm:$0xff]   ;;  %v9641_v40 = vld [vmem:[#allocation22 + $0x8] ss:$16 sps:$4 sm:$0xff]   ;;  %s8467_s5 = sshll.u32 %s11319_s21, 4  ;;  %s8468_s5 = int_to_ptr.vmem [resolvable:$true] %s8467_s5 }
 0x239   :  { %955 = vmatprep.mubr.bf16.mxu0 %v11313_v0  ;;  %996 = vmatprep.mubr.bf16.mxu1 %v11313_v0  ;;  %v9646_v41 = vld [vmem:[#allocation22 + $0x2c] ss:$16 sps:$4 sm:$0xff]   ;;  %s11200_s18 = scalar_lea.vmem %s8468_s5, 128  ;;  %p11205_p5 = scmp.lt.s32.totalorder %s8468_s5, %s8468_s5 }
 0x23a   :  { %p11201_p4 = scmp.ne.s32.totalorder %s8468_s5, %s11200_s18  ;;  %p11206_p6 = scmp.lt.s32.totalorder %s11200_s18, %s11200_s18 }
 0x23b   :  { %926 = vmatpush1.bf16.msra.mxu0 %v9551_v42  ;;  %967 = vmatpush1.bf16.msra.mxu1 %v9554_v43  ;;  %v9644_v42 = vld [vmem:[#allocation22 + $0x28] ss:$16 sps:$4 sm:$0xff]   ;;  %v9649_v43 = vld [vmem:[#allocation22 + $0x4c] ss:$16 sps:$4 sm:$0xff]  }
 0x23c   :  { %927 = vmatprep.subr.bf16.mxu0 %v9559_v44  ;;  %968 = vmatprep.subr.bf16.mxu1 %v9562_v45  ;;  %v9647_v44 = vld [vmem:[#allocation22 + $0x48] ss:$16 sps:$4 sm:$0xff]   ;;  %v9652_v45 = vld [vmem:[#allocation22 + $0x6c] ss:$16 sps:$4 sm:$0xff]   ;;  %p11207_p7 = por %p11206_p6, %p11205_p5 }
 0x23e   :  { %p11208_p8 = pnand %p11207_p7, %p11201_p4 }
 0x23f   :  { %928 = vmatpush1.bf16.msra.mxu0 %v9557_v46  ;;  %969 = vmatpush1.bf16.msra.mxu1 %v9560_v47  ;;  %v9650_v46 = vld [vmem:[#allocation22 + $0x68] ss:$16 sps:$4 sm:$0xff]   ;;  %v9655_v47 = vld [vmem:[#allocation22 + $0x8c] ss:$16 sps:$4 sm:$0xff]  }
 0x240   :  { %929 = vmatprep.subr.bf16.mxu0 %v9565_v48  ;;  %970 = vmatprep.subr.bf16.mxu1 %v9568_v49  ;;  %v9653_v48 = vld [vmem:[#allocation22 + $0x88] ss:$16 sps:$4 sm:$0xff]   ;;  %v9658_v49 = vld [vmem:[#allocation22 + $0xac] ss:$16 sps:$4 sm:$0xff]  }
 0x243   :  { %930 = vmatpush1.bf16.msra.mxu0 %v9563_v50  ;;  %971 = vmatpush1.bf16.msra.mxu1 %v9566_v51  ;;  %v9656_v50 = vld [vmem:[#allocation22 + $0xa8] ss:$16 sps:$4 sm:$0xff]   ;;  %v9661_v51 = vld [vmem:[#allocation22 + $0xcc] ss:$16 sps:$4 sm:$0xff]  }
 0x244   :  { %931 = vmatprep.subr.bf16.mxu0 %v9571_v52  ;;  %972 = vmatprep.subr.bf16.mxu1 %v9574_v53  ;;  %v9659_v52 = vld [vmem:[#allocation22 + $0xc8] ss:$16 sps:$4 sm:$0xff]   ;;  %v9664_v53 = vld [vmem:[#allocation22 + $0xec] ss:$16 sps:$4 sm:$0xff]  }
 0x247   :  { %932 = vmatpush1.bf16.msra.mxu0 %v9569_v54  ;;  %973 = vmatpush1.bf16.msra.mxu1 %v9572_v55  ;;  %v9662_v54 = vld [vmem:[#allocation22 + $0xe8] ss:$16 sps:$4 sm:$0xff]   ;;  %v451_v55 = vld [vmem:[#allocation5] sm:$0xf] }
 0x248   :  { %933 = vmatprep.subr.bf16.mxu0 %v9577_v56  ;;  %974 = vmatprep.subr.bf16.mxu1 %v9580_v57  ;;  %v9667_v56 = vld [vmem:[#allocation23 + $0xc] ss:$16 sps:$4 sm:$0xff]   ;;  %v9665_v57 = vld [vmem:[#allocation23 + $0x8] ss:$16 sps:$4 sm:$0xff]  }
 0x24b   :  { %934 = vmatpush1.bf16.msra.mxu0 %v9575_v58  ;;  %975 = vmatpush1.bf16.msra.mxu1 %v9578_v59  ;;  %v11646_v58 = vpack.c.bf16 %v451_v55, %v451_v55  ;;  %v9670_v59 = vld [vmem:[#allocation23 + $0x2c] ss:$16 sps:$4 sm:$0xff]  }
 0x24c   :  { %935 = vmatprep.subr.bf16.mxu0 %v9583_v60  ;;  %976 = vmatprep.subr.bf16.mxu1 %v9586_v61  ;;  %v9668_v60 = vld [vmem:[#allocation23 + $0x28] ss:$16 sps:$4 sm:$0xff]   ;;  %v9673_v61 = vld [vmem:[#allocation23 + $0x4c] ss:$16 sps:$4 sm:$0xff]  }
 0x24f   :  { %936 = vmatpush1.bf16.msra.mxu0 %v9581_v62  ;;  %977 = vmatpush1.bf16.msra.mxu1 %v9584_v63  ;;  %v9671_v62 = vld [vmem:[#allocation23 + $0x48] ss:$16 sps:$4 sm:$0xff]   ;;  %v9676_v63 = vld [vmem:[#allocation23 + $0x6c] ss:$16 sps:$4 sm:$0xff]  }
 0x250   :  { %937 = vmatprep.subr.bf16.mxu0 %v9589_v1  ;;  %978 = vmatprep.subr.bf16.mxu1 %v9592_v2  ;;  %v9674_v1 = vld [vmem:[#allocation23 + $0x68] ss:$16 sps:$4 sm:$0xff]   ;;  %v9679_v2 = vld [vmem:[#allocation23 + $0x8c] ss:$16 sps:$4 sm:$0xff]  }
 0x253   :  { %938 = vmatpush1.bf16.msra.mxu0 %v9587_v3  ;;  %979 = vmatpush1.bf16.msra.mxu1 %v9590_v4  ;;  %v9677_v3 = vld [vmem:[#allocation23 + $0x88] ss:$16 sps:$4 sm:$0xff]   ;;  %v9682_v4 = vld [vmem:[#allocation23 + $0xac] ss:$16 sps:$4 sm:$0xff]  }
 0x254   :  { %1197 = vmatprep.subr.bf16.mxu0 %v9595_v6  ;;  %1238 = vmatprep.subr.bf16.mxu1 %v9598_v7  ;;  %v9685_v6 = vld [vmem:[#allocation23 + $0xcc] ss:$16 sps:$4 sm:$0xff]   ;;  %v9683_v7 = vld [vmem:[#allocation23 + $0xc8] ss:$16 sps:$4 sm:$0xff]  }
 0x256   :  { %956 = vmatmul.mubr.bf16.vlgmr.msra.gmra.mrb[4].mxu0 %v11636_v8  ;;  %997 = vmatmul.mubr.bf16.vlgmr.msra.gmra.mrb[4].mxu1 %v11636_v8 }
 0x257   :  { %1198 = vmatpush1.bf16.msra.mxu0 %v9593_v9  ;;  %1239 = vmatpush1.bf16.msra.mxu1 %v9596_v10  ;;  %v9688_v9 = vld [vmem:[#allocation23 + $0xec] ss:$16 sps:$4 sm:$0xff]   ;;  %v9686_v10 = vld [vmem:[#allocation23 + $0xe8] ss:$16 sps:$4 sm:$0xff]  }
 0x258   :  { %1199 = vmatprep.subr.bf16.mxu0 %v9601_v11  ;;  %1240 = vmatprep.subr.bf16.mxu1 %v9604_v12  ;;  %v11314_v11 = vmov 0.0   ;;  %v9689_v12 = vld [vmem:[#allocation22] ss:$16 sps:$4 sm:$0xff]  }
 0x259   :  { %1229 = vmatprep.mubr.bf16.mxu0 %v11313_v0  ;;  %1270 = vmatprep.mubr.bf16.mxu1 %v11313_v0 }
 0x25b   :  { %1200 = vmatpush1.bf16.msra.mxu0 %v9599_v13  ;;  %1241 = vmatpush1.bf16.msra.mxu1 %v9602_v14  ;;  %v9691_v13 = vld [vmem:[#allocation22 + $0x4] ss:$16 sps:$4 sm:$0xff]  }
 0x25c   :  { %1201 = vmatprep.subr.bf16.mxu0 %v9607_v15  ;;  %1242 = vmatprep.subr.bf16.mxu1 %v9610_v16  ;;  %v9694_v14 = vld [vmem:[#allocation22 + $0x24] ss:$16 sps:$4 sm:$0xff]   ;;  %v9692_v15 = vld [vmem:[#allocation22 + $0x20] ss:$16 sps:$4 sm:$0xff]  }
 0x25d   :  { %v9697_v16 = vld [vmem:[#allocation22 + $0x44] ss:$16 sps:$4 sm:$0xff]  }
 0x25f   :  { %1202 = vmatpush1.bf16.msra.mxu0 %v9605_v17  ;;  %1243 = vmatpush1.bf16.msra.mxu1 %v9608_v18  ;;  %v9695_v17 = vld [vmem:[#allocation22 + $0x40] ss:$16 sps:$4 sm:$0xff]   ;;  %v9700_v18 = vld [vmem:[#allocation22 + $0x64] ss:$16 sps:$4 sm:$0xff]  }
 0x260   :  { %1203 = vmatprep.subr.bf16.mxu0 %v9613_v19  ;;  %1244 = vmatprep.subr.bf16.mxu1 %v9616_v20  ;;  %v9698_v19 = vld [vmem:[#allocation22 + $0x60] ss:$16 sps:$4 sm:$0xff]   ;;  %v9703_v20 = vld [vmem:[#allocation22 + $0x84] ss:$16 sps:$4 sm:$0xff]  }
 0x263   :  { %1204 = vmatpush1.bf16.msra.mxu0 %v9611_v21  ;;  %1245 = vmatpush1.bf16.msra.mxu1 %v9614_v22  ;;  %v9701_v21 = vld [vmem:[#allocation22 + $0x80] ss:$16 sps:$4 sm:$0xff]   ;;  %v9706_v22 = vld [vmem:[#allocation22 + $0xa4] ss:$16 sps:$4 sm:$0xff]  }
 0x264   :  { %1205 = vmatprep.subr.bf16.mxu0 %v9619_v23  ;;  %1246 = vmatprep.subr.bf16.mxu1 %v9622_v24  ;;  %v9704_v23 = vld [vmem:[#allocation22 + $0xa0] ss:$16 sps:$4 sm:$0xff]   ;;  %v9709_v24 = vld [vmem:[#allocation22 + $0xc4] ss:$16 sps:$4 sm:$0xff]  }
 0x267   :  { %1206 = vmatpush1.bf16.msra.mxu0 %v9617_v25  ;;  %1247 = vmatpush1.bf16.msra.mxu1 %v9620_v26  ;;  %v9707_v25 = vld [vmem:[#allocation22 + $0xc0] ss:$16 sps:$4 sm:$0xff]   ;;  %v9712_v26 = vld [vmem:[#allocation22 + $0xe4] ss:$16 sps:$4 sm:$0xff]  }
 0x268   :  { %1207 = vmatprep.subr.bf16.mxu0 %v9625_v27  ;;  %1248 = vmatprep.subr.bf16.mxu1 %v9628_v28  ;;  %v9710_v27 = vld [vmem:[#allocation22 + $0xe0] ss:$16 sps:$4 sm:$0xff]   ;;  %v9715_v28 = vld [vmem:[#allocation23 + $0x4] ss:$16 sps:$4 sm:$0xff]  }
 0x26b   :  { %1208 = vmatpush1.bf16.msra.mxu0 %v9623_v29  ;;  %1249 = vmatpush1.bf16.msra.mxu1 %v9626_v30  ;;  %v9713_v29 = vld [vmem:[#allocation23] ss:$16 sps:$4 sm:$0xff]   ;;  %v9718_v30 = vld [vmem:[#allocation23 + $0x24] ss:$16 sps:$4 sm:$0xff]  }
 0x26c   :  { %1209 = vmatprep.subr.bf16.mxu0 %v9631_v31  ;;  %1250 = vmatprep.subr.bf16.mxu1 %v9634_v32  ;;  %v9716_v31 = vld [vmem:[#allocation23 + $0x20] ss:$16 sps:$4 sm:$0xff]   ;;  %v9721_v32 = vld [vmem:[#allocation23 + $0x44] ss:$16 sps:$4 sm:$0xff]  }
 0x26f   :  { %1210 = vmatpush1.bf16.msra.mxu0 %v9629_v33  ;;  %1251 = vmatpush1.bf16.msra.mxu1 %v9632_v34  ;;  %v9719_v33 = vld [vmem:[#allocation23 + $0x40] ss:$16 sps:$4 sm:$0xff]   ;;  %v9724_v34 = vld [vmem:[#allocation23 + $0x64] ss:$16 sps:$4 sm:$0xff]  }
 0x270   :  { %1211 = vmatprep.subr.bf16.mxu0 %v9637_v35  ;;  %1252 = vmatprep.subr.bf16.mxu1 %v9640_v36  ;;  %v9722_v35 = vld [vmem:[#allocation23 + $0x60] ss:$16 sps:$4 sm:$0xff]   ;;  %v9727_v36 = vld [vmem:[#allocation23 + $0x84] ss:$16 sps:$4 sm:$0xff]  }
 0x273   :  { %1212 = vmatpush1.bf16.msra.mxu0 %v9635_v37  ;;  %1253 = vmatpush1.bf16.msra.mxu1 %v9638_v38  ;;  %v9725_v37 = vld [vmem:[#allocation23 + $0x80] ss:$16 sps:$4 sm:$0xff]   ;;  %v9730_v38 = vld [vmem:[#allocation23 + $0xa4] ss:$16 sps:$4 sm:$0xff]  }
 0x274   :  { %1512 = vmatprep.subr.bf16.mxu1 %v9643_v39  ;;  %1471 = vmatprep.subr.bf16.mxu0 %v9691_v13  ;;  %v9728_v39 = vld [vmem:[#allocation23 + $0xa0] ss:$16 sps:$4 sm:$0xff]  }
 0x276   :  { %1230 = vmatmul.mubr.bf16.vlgmr.msra.gmra.mrb[8].mxu0 %v11636_v8  ;;  %1271 = vmatmul.mubr.bf16.vlgmr.msra.gmra.mrb[8].mxu1 %v11636_v8 }
 0x277   :  { %1513 = vmatpush1.bf16.msra.mxu1 %v9641_v40  ;;  %1544 = vmatprep.mubr.bf16.mxu1 %v11313_v0  ;;  %v9733_v40 = vld [vmem:[#allocation23 + $0xc4] ss:$16 sps:$4 sm:$0xff]  }
 0x278   :  { %1514 = vmatprep.subr.bf16.mxu1 %v9646_v41  ;;  %1503 = vmatprep.mubr.bf16.mxu0 %v11313_v0  ;;  %v9731_v41 = vld [vmem:[#allocation23 + $0xc0] ss:$16 sps:$4 sm:$0xff]  }
 0x279   :  { %1472 = vmatpush1.bf16.msra.mxu0 %v9689_v12 }
 0x27a   :  { %1473 = vmatprep.subr.bf16.mxu0 %v9694_v14 }
 0x27b   :  { %1515 = vmatpush1.bf16.msra.mxu1 %v9644_v42  ;;  %v9736_v42 = vld [vmem:[#allocation23 + $0xe4] ss:$16 sps:$4 sm:$0xff]  }
 0x27c   :  { %1516 = vmatprep.subr.bf16.mxu1 %v9649_v43  ;;  %v11315_v43 = vmov 1983009808  }
 0x27d   :  { %1474 = vmatpush1.bf16.msra.mxu0 %v9692_v15  ;;  %v11698_v15 = vld [vmem:[#allocation11] sm:$0xf] }
 0x27e   :  { %1475 = vmatprep.subr.bf16.mxu0 %v9697_v16 }
 0x27f   :  { %1517 = vmatpush1.bf16.msra.mxu1 %v9647_v44  ;;  %v1834_v44 = vunpack.c.l.s4 %v11315_v43 }
 0x280   :  { %1518 = vmatprep.subr.bf16.mxu1 %v9652_v45  ;;  %v1836_v45 = vlaneseq }
 0x281   :  { %1476 = vmatpush1.bf16.msra.mxu0 %v9695_v17 }
 0x282   :  { %1477 = vmatprep.subr.bf16.mxu0 %v9700_v18 }
 0x283   :  { %1519 = vmatpush1.bf16.msra.mxu1 %v9650_v46  ;;  %v11316_v46 = vmov 1934713408  }
 0x284   :  { %1520 = vmatprep.subr.bf16.mxu1 %v9655_v47  ;;  %v1866_v47 = vunpack.c.l.s4 %v11316_v46 }
 0x285   :  { %1478 = vmatpush1.bf16.msra.mxu0 %v9698_v19 }
 0x286   :  { %1479 = vmatprep.subr.bf16.mxu0 %v9703_v20 }
 0x287   :  { %1521 = vmatpush1.bf16.msra.mxu1 %v9653_v48  ;;  %v1835_v48 = vunpack.c.0.s8 %v1834_v44 }
 0x288   :  { %1522 = vmatprep.subr.bf16.mxu1 %v9658_v49  ;;  %v11655_v49 = vshrl.u32 %v1836_v45, 7 }
 0x289   :  { %1480 = vmatpush1.bf16.msra.mxu0 %v9701_v21 }
 0x28a   :  { %1481 = vmatprep.subr.bf16.mxu0 %v9706_v22 }
 0x28b   :  { %1523 = vmatpush1.bf16.msra.mxu1 %v9656_v50  ;;  %v1867_v50 = vunpack.c.0.s8 %v1866_v47 }
 0x28c   :  { %1524 = vmatprep.subr.bf16.mxu1 %v9661_v51  ;;  %v11660_v51 = vsub.s32 %v1835_v48, %v11655_v49 }
 0x28d   :  { %1482 = vmatpush1.bf16.msra.mxu0 %v9704_v23 }
 0x28e   :  { %1483 = vmatprep.subr.bf16.mxu0 %v9709_v24 }
 0x28f   :  { %1525 = vmatpush1.bf16.msra.mxu1 %v9659_v52 }
 0x290   :  { %1526 = vmatprep.subr.bf16.mxu1 %v9664_v53 }
 0x291   :  { %1484 = vmatpush1.bf16.msra.mxu0 %v9707_v25 }
 0x292   :  { %1485 = vmatprep.subr.bf16.mxu0 %v9712_v26 }
 0x293   :  { %1527 = vmatpush1.bf16.msra.mxu1 %v9662_v54 }
 0x294   :  { %1786 = vmatprep.subr.bf16.mxu1 %v9667_v56 }
 0x295   :  { %1486 = vmatpush1.bf16.msra.mxu0 %v9710_v27 }
 0x296   :  { %1545 = vmatmul.mubr.bf16.vlgmr.msra.gmra.mrb[12].mxu1 %v11646_v58  ;;  %1745 = vmatprep.subr.bf16.mxu0 %v9715_v28 }
 0x297   :  { %1787 = vmatpush1.bf16.msra.mxu1 %v9665_v57  ;;  %1818 = vmatprep.mubr.bf16.mxu1 %v11313_v0 }
 0x298   :  { %1788 = vmatprep.subr.bf16.mxu1 %v9670_v59  ;;  %1504 = vmatmul.mubr.bf16.vlgmr.msra.gmra.mrb[12].mxu0 %v11646_v58 }
 0x299   :  { %1746 = vmatpush1.bf16.msra.mxu0 %v9713_v29  ;;  %1777 = vmatprep.mubr.bf16.mxu0 %v11313_v0  ;;  %v9734_v0 = vld [vmem:[#allocation23 + $0xe0] ss:$16 sps:$4 sm:$0xff]  }
 0x29a   :  { %1747 = vmatprep.subr.bf16.mxu0 %v9718_v30 }
 0x29b   :  { %1789 = vmatpush1.bf16.msra.mxu1 %v9668_v60 }
 0x29c   :  { %1790 = vmatprep.subr.bf16.mxu1 %v9673_v61  ;;  %v11677_v61 = vsub.s32 %v1867_v50, %v11655_v49 }
 0x29d   :  { %1748 = vmatpush1.bf16.msra.mxu0 %v9716_v31 }
 0x29e   :  { %1749 = vmatprep.subr.bf16.mxu0 %v9721_v32 }
 0x29f   :  { %1791 = vmatpush1.bf16.msra.mxu1 %v9671_v62 }
 0x2a0   :  { %1792 = vmatprep.subr.bf16.mxu1 %v9676_v63 }
 0x2a1   :  { %1750 = vmatpush1.bf16.msra.mxu0 %v9719_v33 }
 0x2a2   :  { %1751 = vmatprep.subr.bf16.mxu0 %v9724_v34 }
 0x2a3   :  { %1793 = vmatpush1.bf16.msra.mxu1 %v9674_v1 }
 0x2a4   :  { %1794 = vmatprep.subr.bf16.mxu1 %v9679_v2 }
 0x2a5   :  { %1752 = vmatpush1.bf16.msra.mxu0 %v9722_v35 }
 0x2a6   :  { %1753 = vmatprep.subr.bf16.mxu0 %v9727_v36 }
 0x2a7   :  { %1795 = vmatpush1.bf16.msra.mxu1 %v9677_v3 }
 0x2a8   :  { %1796 = vmatprep.subr.bf16.mxu1 %v9682_v4 }
 0x2a9   :  { %1754 = vmatpush1.bf16.msra.mxu0 %v9725_v37 }
 0x2aa   :  { %1755 = vmatprep.subr.bf16.mxu0 %v9730_v38 }
 0x2ab   :  { %1797 = vmatpush1.bf16.msra.mxu1 %v9680_v5 }
 0x2ac   :  { %1798 = vmatprep.subr.bf16.mxu1 %v9685_v6 }
 0x2ad   :  { %1756 = vmatpush1.bf16.msra.mxu0 %v9728_v39 }
 0x2ae   :  { %1757 = vmatprep.subr.bf16.mxu0 %v9733_v40 }
 0x2af   :  { %1799 = vmatpush1.bf16.msra.mxu1 %v9683_v7 }
 0x2b0   :  { %1800 = vmatprep.subr.bf16.mxu1 %v9688_v9 }
 0x2b1   :  { %1758 = vmatpush1.bf16.msra.mxu0 %v9731_v41 }
 0x2b2   :  { %1759 = vmatprep.subr.bf16.mxu0 %v9736_v42 }
 0x2b3   :  { %1801 = vmatpush1.bf16.msra.mxu1 %v9686_v10 }
 0x2b4   :  { %9335 = vmatprep.subr.bf16.mxu1 %v11314_v11 }
 0x2b5   :  { %1760 = vmatpush1.bf16.msra.mxu0 %v9734_v0 }
 0x2b6   :  { %1819 = vmatmul.mubr.bf16.vlgmr.msra.gmra.mrb[16].mxu1 %v11636_v8  ;;  %9359 = vmatprep.subr.bf16.mxu0 %v11314_v11 }
 0x2b8   :  { %1778 = vmatmul.mubr.bf16.vlgmr.msra.gmra.mrb[16].mxu0 %v11636_v8 }
 0x309   :  { %v679_v52 = vpop.f32.mrb[0].mxu0  ;;  %v11662_v53 = vpop.f32.mrb[0].mxu1 }
 0x30a   :  { %v1831_v54 = vcombine.low %v679_v52, %v11662_v53  ;;  %v1832_v55 = vcombine.high %v679_v52, %v11662_v53  ;;  %v11666_v56 = vpop.f32.mrb[1].mxu0  ;;  %v11668_v57 = vpop.f32.mrb[1].mxu1 }
 0x30b   :  { %v1847_v58 = vcombine.low %v11666_v56, %v11668_v57  ;;  %v1848_v8 = vcombine.high %v11666_v56, %v11668_v57  ;;  %v683_v59 = vpop.f32.mrb[2].mxu0  ;;  %v11674_v60 = vpop.f32.mrb[2].mxu1 }
 0x30c   :  { %v1839_v62 = vrot.slane %v1831_v54, %v11660_v51  ;;  %v1846_v63 = vrot.slane %v1832_v55, %v11660_v51  ;;  %v2508_v1 = vpack.c.bf16 %v683_v59, %v679_v52  ;;  %v1899_v2 = vcombine.low %v683_v59, %v11674_v60  ;;  %v11682_v3 = vpop.f32.mrb[3].mxu0  ;;  %v11684_v4 = vpop.f32.mrb[3].mxu1 }
 0x30d   :  { %v1855_v5 = vrot.slane %v1847_v58, %v11660_v51  ;;  %v1862_v6 = vrot.slane %v1848_v8, %v11660_v51  ;;  %v1900_v7 = vcombine.high %v683_v59, %v11674_v60  ;;  %v2510_v9 = vpack.c.bf16 %v11674_v60, %v11662_v53 }
 0x30e   :  { %v1907_v10 = vrot.slane %v1899_v2, %v11660_v51  ;;  %v2509_v12 = vpack.c.bf16 %v11682_v3, %v11666_v56  ;;  %v1915_v13 = vcombine.low %v11682_v3, %v11684_v4  ;;  %v1916_v14 = vcombine.high %v11682_v3, %v11684_v4  ;;  %9336 = vmatpush3.bf16.msra.mxu1 %v2508_v1 }
 0x30f   :  { %v1914_v16 = vrot.slane %v1900_v7, %v11660_v51  ;;  %v2511_v17 = vpack.c.bf16 %v11684_v4, %v11668_v57  ;;  %v1863_v18 = vcombine.low %v1839_v62, %v1855_v5  ;;  %v1864_v19 = vcombine.high %v1839_v62, %v1855_v5  ;;  %9341 = vmatprep.subr.bf16.mxu1 %v11314_v11 }
 0x310   :  { %v1923_v20 = vrot.slane %v1915_v13, %v11660_v51  ;;  %v1930_v21 = vrot.slane %v1916_v14, %v11660_v51  ;;  %v1879_v22 = vcombine.low %v1846_v63, %v1862_v6  ;;  %v1880_v23 = vcombine.high %v1846_v63, %v1862_v6 }
 0x311   :  { %v1871_v24 = vrot.slane %v1863_v18, %v11677_v61  ;;  %v1878_v25 = vrot.slane %v1864_v19, %v11677_v61 }
 0x312   :  { %v1932_v26 = vcombine.high %v1907_v10, %v1923_v20  ;;  %v1947_v27 = vcombine.low %v1914_v16, %v1930_v21  ;;  %v1887_v34 = vrot.slane %v1879_v22, %v11677_v61  ;;  %v1931_v38 = vcombine.low %v1907_v10, %v1923_v20 }
 0x313   :  { %v1967_v28 = vmul.f32 %v1871_v24, %v11698_v15  ;;  %v1895_v29 = vcombine.high %v1871_v24, %v11314_v11  ;;  %v1896_v30 = vcombine.high %v1878_v25, %v11314_v11  ;;  %v1969_v33 = vmul.f32 %v1878_v25, %v11698_v15 }
 0x314   :  { %v1946_v37 = vrot.slane %v1932_v26, %v11677_v61  ;;  %v1971_v40 = vmul.f32 %v1887_v34, %v11698_v15  ;;  %v1894_v41 = vrot.slane %v1880_v23, %v11677_v61  ;;  %v1948_v42 = vcombine.high %v1914_v16, %v1930_v21 }
 0x315   :  { %v1984_v31 = vsel %vm1983_vm0, %v1967_v28, 0.0  ;;  %v1968_v32 = vmul.f32 %v1895_v29, %v11698_v15  ;;  %v1970_v36 = vmul.f32 %v1896_v30, %v11698_v15  ;;  %v1990_v39 = vsel %vm1983_vm0, %v1969_v33, 0.0 }
 0x316   :  { %1985 = vadd.xlane.f32.xlu0 %v1984_v31  ;;  %v1977_v43 = vmul.f32 %v1946_v37, %v11698_v15  ;;  %v1955_v44 = vrot.slane %v1947_v27, %v11677_v61  ;;  %v1939_v46 = vrot.slane %v1931_v38, %v11677_v61  ;;  %v1996_v47 = vsel %vm1983_vm0, %v1971_v40, 0.0 }
 0x317   :  { %v1987_v35 = vsel %vm1983_vm0, %v1968_v32, 0.0  ;;  %v1993_v0 = vsel %vm1983_vm0, %v1970_v36, 0.0  ;;  %v1973_v48 = vmul.f32 %v1894_v41, %v11698_v15  ;;  %v1897_v55 = vcombine.high %v1887_v34, %v11314_v11 }
 0x318   :  { %1988 = vadd.xlane.f32.xlu1 %v1987_v35  ;;  %v2014_v50 = vsel %vm1983_vm0, %v1977_v43, 0.0  ;;  %v1979_v52 = vmul.f32 %v1955_v44, %v11698_v15  ;;  %v1963_v54 = vcombine.high %v1939_v46, %v11314_v11  ;;  %v1964_v58 = vcombine.high %v1946_v37, %v11314_v11 }
 0x319   :  { %v1962_v8 = vrot.slane %v1948_v42, %v11677_v61  ;;  %v2002_v59 = vsel %vm1983_vm0, %v1973_v48, 0.0  ;;  %v1975_v62 = vmul.f32 %v1939_v46, %v11698_v15  ;;  %v1898_v63 = vcombine.high %v1894_v41, %v11314_v11  ;;  %v1828_v42 = vld [vmem:[#allocation13] sm:$0xf] }
 0x31a   :  { %1991 = vadd.xlane.f32.xlu0 %v1990_v39  ;;  %v1965_v1 = vcombine.high %v1955_v44, %v11314_v11  ;;  %v2020_v2 = vsel %vm1983_vm0, %v1979_v52, 0.0  ;;  %v1976_v5 = vmul.f32 %v1963_v54, %v11698_v15  ;;  %v1972_v6 = vmul.f32 %v1897_v55, %v11698_v15 }
 0x31b   :  { %v1978_v7 = vmul.f32 %v1964_v58, %v11698_v15  ;;  %v1966_v10 = vcombine.high %v1962_v8, %v11314_v11  ;;  %v2008_v13 = vsel %vm1983_vm0, %v1975_v62, 0.0  ;;  %v1974_v14 = vmul.f32 %v1898_v63, %v11698_v15 }
 0x31c   :  { %1994 = vadd.xlane.f32.xlu1 %v1993_v0  ;;  %v1980_v16 = vmul.f32 %v1965_v1, %v11698_v15  ;;  %v2011_v18 = vsel %vm1983_vm0, %v1976_v5, 0.0  ;;  %v1999_v19 = vsel %vm1983_vm0, %v1972_v6, 0.0  ;;  %v1981_v21 = vmul.f32 %v1962_v8, %v11698_v15 }
 0x31d   :  { %v2017_v20 = vsel %vm1983_vm0, %v1978_v7, 0.0  ;;  %v1982_v22 = vmul.f32 %v1966_v10, %v11698_v15  ;;  %v2005_v25 = vsel %vm1983_vm0, %v1974_v14, 0.0 }
 0x31e   :  { %1997 = vadd.xlane.f32.xlu0 %v1996_v47  ;;  %v2023_v30 = vsel %vm1983_vm0, %v1980_v16, 0.0  ;;  %v2026_v38 = vsel %vm1983_vm0, %v1981_v21, 0.0 }
 0x31f   :  { %v2029_v39 = vsel %vm1983_vm0, %v1982_v22, 0.0 }
 0x320   :  { %2015 = vadd.xlane.f32.xlu1 %v2014_v50 }
 0x322   :  { %2003 = vadd.xlane.f32.xlu0 %v2002_v59 }
 0x324   :  { %2021 = vadd.xlane.f32.xlu1 %v2020_v2 }
 0x326   :  { %2009 = vadd.xlane.f32.xlu0 %v2008_v13 }
 0x328   :  { %2012 = vadd.xlane.f32.xlu1 %v2011_v18 }
 0x329   :  { %v957_v23 = vpop.f32.mrb[4].mxu0  ;;  %v998_v24 = vpop.f32.mrb[4].mxu1 }
 0x32a   :  { %v2032_v26 = vcombine.low %v957_v23, %v998_v24  ;;  %v2033_v27 = vcombine.high %v957_v23, %v998_v24  ;;  %2000 = vadd.xlane.f32.xlu0 %v1999_v19  ;;  %v959_v28 = vpop.f32.mrb[5].mxu0  ;;  %v1000_v29 = vpop.f32.mrb[5].mxu1 }
 0x32b   :  { %v2048_v31 = vcombine.low %v959_v28, %v1000_v29  ;;  %v2049_v32 = vcombine.high %v959_v28, %v1000_v29  ;;  %v961_v33 = vpop.f32.mrb[6].mxu0  ;;  %v1002_v34 = vpop.f32.mrb[6].mxu1 }
 0x32c   :  { %v2040_v35 = vrot.slane %v2032_v26, %v11660_v51  ;;  %v2047_v36 = vrot.slane %v2033_v27, %v11660_v51  ;;  %2018 = vadd.xlane.f32.xlu1 %v2017_v20  ;;  %v962_v15 = vpop.f32.mrb[7].mxu0  ;;  %v1003_v37 = vpop.f32.mrb[7].mxu1 }
 0x32d   :  { %v2056_v40 = vrot.slane %v2048_v31, %v11660_v51  ;;  %v2063_v41 = vrot.slane %v2049_v32, %v11660_v51 }
 0x32e   :  { %2006 = vadd.xlane.f32.xlu0 %v2005_v25 }
 0x32f   :  { %v2064_v0 = vcombine.low %v2040_v35, %v2056_v40  ;;  %v2065_v43 = vcombine.high %v2040_v35, %v2056_v40  ;;  %v2080_v44 = vcombine.low %v2047_v36, %v2063_v41  ;;  %v2081_v46 = vcombine.high %v2047_v36, %v2063_v41 }
 0x330   :  { %2024 = vadd.xlane.f32.xlu1 %v2023_v30 }
 0x331   :  { %v2072_v47 = vrot.slane %v2064_v0, %v11677_v61  ;;  %v2079_v48 = vrot.slane %v2065_v43, %v11677_v61  ;;  %v2088_v50 = vrot.slane %v2080_v44, %v11677_v61  ;;  %v2095_v52 = vrot.slane %v2081_v46, %v11677_v61  ;;  %v2733_v0 = vld [vmem:[#allocation17] sm:$0xf] }
 0x332   :  { %2027 = vadd.xlane.f32.xlu0 %v2026_v38 }
 0x333   :  { %v2100_v54 = vmul.f32 %v2072_v47, %v1828_v42  ;;  %v2102_v55 = vmul.f32 %v2079_v48, %v1828_v42  ;;  %v2097_v58 = vcombine.high %v2079_v48, %v11314_v11  ;;  %v2104_v8 = vmul.f32 %v2088_v50, %v1828_v42 }
 0x334   :  { %2030 = vadd.xlane.f32.xlu1 %v2029_v39  ;;  %v2106_v59 = vmul.f32 %v2095_v52, %v1828_v42  ;;  %v2098_v62 = vcombine.high %v2088_v50, %v11314_v11  ;;  %v2096_v6 = vcombine.high %v2072_v47, %v11314_v11  ;;  %v2099_v7 = vcombine.high %v2095_v52, %v11314_v11  ;;  %v2734_v50 = vld [vmem:[#allocation19] sm:$0xf] }
 0x335   :  { %v2108_v63 = vsel %vm1983_vm0, %v2100_v54, 0.0  ;;  %v2103_v1 = vmul.f32 %v2097_v58, %v1828_v42  ;;  %v2114_v5 = vsel %vm1983_vm0, %v2102_v55, 0.0  ;;  %v2120_v10 = vsel %vm1983_vm0, %v2104_v8, 0.0 }
 0x336   :  { %2109 = vadd.xlane.f32.xlu0 %v2108_v63  ;;  %v2105_v2 = vmul.f32 %v2098_v62, %v1828_v42  ;;  %v2126_v14 = vsel %vm1983_vm0, %v2106_v59, 0.0  ;;  %v2101_v18 = vmul.f32 %v2096_v6, %v1828_v42  ;;  %v2107_v19 = vmul.f32 %v2099_v7, %v1828_v42 }
 0x337   :  { %v2117_v13 = vsel %vm1983_vm0, %v2103_v1, 0.0 }
 0x338   :  { %2115 = vadd.xlane.f32.xlu1 %v2114_v5  ;;  %v2123_v16 = vsel %vm1983_vm0, %v2105_v2, 0.0  ;;  %v2111_v20 = vsel %vm1983_vm0, %v2101_v18, 0.0  ;;  %v2129_v21 = vsel %vm1983_vm0, %v2107_v19, 0.0 }
 0x33a   :  { %2121 = vadd.xlane.f32.xlu0 %v2120_v10 }
 0x33c   :  { %2118 = vadd.xlane.f32.xlu1 %v2117_v13 }
 0x33e   :  { %2127 = vadd.xlane.f32.xlu0 %v2126_v14 }
 0x340   :  { %2124 = vadd.xlane.f32.xlu1 %v2123_v16 }
 0x342   :  { %2112 = vadd.xlane.f32.xlu0 %v2111_v20 }
 0x344   :  { %2130 = vadd.xlane.f32.xlu1 %v2129_v21 }
 0x349   :  { %v1231_v22 = vpop.f32.mrb[8].mxu0  ;;  %v11774_v23 = vpop.f32.mrb[8].mxu1 }
 0x34a   :  { %v3188_v24 = vpack.c.bf16 %v1231_v22, %v1231_v22  ;;  %v2737_v25 = vcombine.low %v1231_v22, %v11774_v23  ;;  %v2738_v26 = vcombine.high %v1231_v22, %v11774_v23  ;;  %v11778_v27 = vpop.f32.mrb[9].mxu0  ;;  %v11780_v28 = vpop.f32.mrb[9].mxu1 }
 0x34b   :  { %v2753_v29 = vcombine.low %v11778_v27, %v11780_v28  ;;  %v2754_v30 = vcombine.high %v11778_v27, %v11780_v28  ;;  %v1276_v31 = vpop.f32.mrb[10].mxu1  ;;  %v1235_v32 = vpop.f32.mrb[10].mxu0 }
 0x34c   :  { %v2745_v33 = vrot.slane %v2737_v25, %v11660_v51  ;;  %v2752_v34 = vrot.slane %v2738_v26, %v11660_v51  ;;  %v1236_v35 = vpop.f32.mrb[11].mxu0  ;;  %v1277_v36 = vpop.f32.mrb[11].mxu1  ;;  %v3196_v15 = vsel %vm1983_vm0, %v3188_v24, 0 }
 0x34d   :  { %v2761_v37 = vrot.slane %v2753_v29, %v11660_v51  ;;  %v2768_v38 = vrot.slane %v2754_v30, %v11660_v51  ;;  %9360 = vmatpush3.bf16.msra.mxu0 %v3196_v15 }
 0x34e   :  { %9371 = vmatprep.subr.bf16.mxu0 %v11314_v11 }
 0x34f   :  { %v2769_v39 = vcombine.low %v2745_v33, %v2761_v37  ;;  %v2770_v40 = vcombine.high %v2745_v33, %v2761_v37  ;;  %v2785_v41 = vcombine.low %v2752_v34, %v2768_v38  ;;  %v2786_v42 = vcombine.high %v2752_v34, %v2768_v38 }
 0x350   :  { %v2141_v38 = vand.u32 127, %v1836_v45 }
 0x351   :  { %v2777_v43 = vrot.slane %v2769_v39, %v11677_v61  ;;  %v2784_v44 = vrot.slane %v2770_v40, %v11677_v61  ;;  %v2793_v48 = vrot.slane %v2785_v41, %v11677_v61  ;;  %v2800_v62 = vrot.slane %v2786_v42, %v11677_v61 }
 0x352   :  { %v11818_v39 = vsub.s32 %v2141_v38, %v11655_v49 }
 0x353   :  { %v2805_v46 = vmul.f32 %v2777_v43, %v2733_v0  ;;  %v2807_v47 = vmul.f32 %v2784_v44, %v2733_v0  ;;  %v2837_v52 = vmul.f32 %v2777_v43, %v2734_v50  ;;  %v2839_v54 = vmul.f32 %v2784_v44, %v2734_v50 }
 0x354   :  { %v2809_v59 = vmul.f32 %v2793_v48, %v2733_v0  ;;  %v2841_v1 = vmul.f32 %v2793_v48, %v2734_v50  ;;  %v2811_v5 = vmul.f32 %v2800_v62, %v2733_v0  ;;  %v2801_v6 = vcombine.high %v2777_v43, %v11314_v11 }
 0x355   :  { %v2813_v55 = vsel %vm1983_vm0, %v2805_v46, 0.0  ;;  %v2845_v58 = vsel %vm1983_vm0, %v2837_v52, 0.0  ;;  %v2819_v8 = vsel %vm1983_vm0, %v2807_v47, 0.0  ;;  %v2851_v63 = vsel %vm1983_vm0, %v2839_v54, 0.0 }
 0x356   :  { %2814 = vadd.xlane.f32.xlu1 %v2813_v55  ;;  %2846 = vadd.xlane.f32.xlu0 %v2845_v58  ;;  %v2825_v2 = vsel %vm1983_vm0, %v2809_v59, 0.0  ;;  %v2857_v7 = vsel %vm1983_vm0, %v2841_v1, 0.0  ;;  %v2843_v10 = vmul.f32 %v2800_v62, %v2734_v50  ;;  %v2831_v13 = vsel %vm1983_vm0, %v2811_v5, 0.0 }
 0x357   :  { %v2838_v14 = vmul.f32 %v2801_v6, %v2734_v50  ;;  %v2802_v16 = vcombine.high %v2784_v44, %v11314_v11  ;;  %v2803_v21 = vcombine.high %v2793_v48, %v11314_v11  ;;  %v2804_v25 = vcombine.high %v2800_v62, %v11314_v11 }
 0x358   :  { %v2863_v18 = vsel %vm1983_vm0, %v2843_v10, 0.0  ;;  %v2806_v31 = vmul.f32 %v2801_v6, %v2733_v0 }
 0x359   :  { %v2848_v19 = vsel %vm1983_vm0, %v2838_v14, 0.0  ;;  %v2840_v20 = vmul.f32 %v2802_v16, %v2734_v50  ;;  %v2842_v24 = vmul.f32 %v2803_v21, %v2734_v50  ;;  %v2844_v29 = vmul.f32 %v2804_v25, %v2734_v50 }
 0x35a   :  { %2820 = vadd.xlane.f32.xlu1 %v2819_v8  ;;  %2852 = vadd.xlane.f32.xlu0 %v2851_v63  ;;  %v2816_v32 = vsel %vm1983_vm0, %v2806_v31, 0.0  ;;  %v2808_v33 = vmul.f32 %v2802_v16, %v2733_v0  ;;  %v2810_v35 = vmul.f32 %v2803_v21, %v2733_v0  ;;  %v2812_v15 = vmul.f32 %v2804_v25, %v2733_v0 }
 0x35b   :  { %v2854_v22 = vsel %vm1983_vm0, %v2840_v20, 0.0  ;;  %v2860_v26 = vsel %vm1983_vm0, %v2842_v24, 0.0  ;;  %v2866_v30 = vsel %vm1983_vm0, %v2844_v29, 0.0 }
 0x35c   :  { %v2822_v34 = vsel %vm1983_vm0, %v2808_v33, 0.0  ;;  %v2828_v36 = vsel %vm1983_vm0, %v2810_v35, 0.0  ;;  %v2834_v37 = vsel %vm1983_vm0, %v2812_v15, 0.0 }
 0x35e   :  { %2826 = vadd.xlane.f32.xlu1 %v2825_v2  ;;  %2858 = vadd.xlane.f32.xlu0 %v2857_v7 }
 0x362   :  { %2832 = vadd.xlane.f32.xlu1 %v2831_v13  ;;  %2864 = vadd.xlane.f32.xlu0 %v2863_v18 }
 0x366   :  { %2849 = vadd.xlane.f32.xlu1 %v2848_v19 }
 0x36a   :  { %2855 = vadd.xlane.f32.xlu1 %v2854_v22 }
 0x36e   :  { %2861 = vadd.xlane.f32.xlu1 %v2860_v26 }
 0x372   :  { %2867 = vadd.xlane.f32.xlu1 %v2866_v30 }
 0x376   :  { %2817 = vadd.xlane.f32.xlu1 %v2816_v32 }
 0x37a   :  { %2823 = vadd.xlane.f32.xlu1 %v2822_v34 }
 0x37e   :  { %2829 = vadd.xlane.f32.xlu1 %v2828_v36 }
 0x382   :  { %2835 = vadd.xlane.f32.xlu1 %v2834_v37 }
 0x3a3   :  { %v1986_v40 = vpop.xlane.xlu0 %1985 }
 0x3a4   :  { %v2268_v42 = vrot.slane %v1986_v40, %v11818_v39 }
 0x3a5   :  { %v1989_v41 = vpop.xlane.xlu1 %1988 }
 0x3a6   :  { %v2272_v43 = vrot.slane %v1989_v41, %v11818_v39 }
 0x3a7   :  { %v1992_v44 = vpop.xlane.xlu0 %1991 }
 0x3a8   :  { %v2329_v0 = vsel %vm2174_vm1, %v2272_v43, %v2268_v42  ;;  %v2276_v46 = vrot.slane %v1992_v44, %v11818_v39 }
 0x3a9   :  { %v1995_v47 = vpop.xlane.xlu1 %1994 }
 0x3aa   :  { %v2330_v45 = vsel %vm2176_vm2, %v2276_v46, %v2329_v0  ;;  %v2280_v48 = vrot.slane %v1995_v47, %v11818_v39 }
 0x3ab   :  { %v1998_v50 = vpop.xlane.xlu0 %1997 }
 0x3ac   :  { %v2331_v52 = vsel %vm2178_vm3, %v2280_v48, %v2330_v45  ;;  %v2284_v54 = vrot.slane %v1998_v50, %v11818_v39 }
 0x3ad   :  { %v2016_v55 = vpop.xlane.xlu1 %2015 }
 0x3ae   :  { %v2332_v58 = vsel %vm2180_vm4, %v2284_v54, %v2331_v52  ;;  %v2308_v10 = vrot.slane %v2016_v55, %v11818_v39 }
 0x3af   :  { %v2004_v8 = vpop.xlane.xlu0 %2003 }
 0x3b0   :  { %v2292_v13 = vrot.slane %v2004_v8, %v11818_v39 }
 0x3b1   :  { %v2022_v59 = vpop.xlane.xlu1 %2021 }
 0x3b2   :  { %v2316_v25 = vrot.slane %v2022_v59, %v11818_v39 }
 0x3b3   :  { %v2010_v62 = vpop.xlane.xlu0 %2009 }
 0x3b4   :  { %v2300_v1 = vrot.slane %v2010_v62, %v11818_v39 }
 0x3b5   :  { %v2013_v63 = vpop.xlane.xlu1 %2012 }
 0x3b6   :  { %v2304_v2 = vrot.slane %v2013_v63, %v11818_v39 }
 0x3b7   :  { %v2001_v5 = vpop.xlane.xlu0 %2000 }
 0x3b8   :  { %v2336_v6 = vsel %vm2174_vm1, %v2304_v2, %v2300_v1  ;;  %v2288_v7 = vrot.slane %v2001_v5, %v11818_v39 }
 0x3b9   :  { %v2019_v14 = vpop.xlane.xlu1 %2018  ;;  %v2337_v19 = vsel %vm2176_vm2, %v2308_v10, %v2336_v6 }
 0x3ba   :  { %v2333_v16 = vsel %vm2182_vm5, %v2288_v7, %v2332_v58  ;;  %v2312_v18 = vrot.slane %v2019_v14, %v11818_v39 }
 0x3bb   :  { %v2007_v20 = vpop.xlane.xlu0 %2006  ;;  %v2334_v21 = vsel %vm2184_vm6, %v2292_v13, %v2333_v16 }
 0x3bc   :  { %v2338_v22 = vsel %vm2178_vm3, %v2312_v18, %v2337_v19  ;;  %v2296_v24 = vrot.slane %v2007_v20, %v11818_v39 }
 0x3bd   :  { %v2025_v26 = vpop.xlane.xlu1 %2024  ;;  %v2339_v31 = vsel %vm2180_vm4, %v2316_v25, %v2338_v22 }
 0x3be   :  { %v2320_v29 = vrot.slane %v2025_v26, %v11818_v39  ;;  %v11844_v30 = vsel %vm2186_vm7, %v2296_v24, %v2334_v21 }
 0x3bf   :  { %v2028_v32 = vpop.xlane.xlu0 %2027 }
 0x3c0   :  { %v2340_v33 = vsel %vm2182_vm5, %v2320_v29, %v2339_v31  ;;  %v2324_v34 = vrot.slane %v2028_v32, %v11818_v39 }
 0x3c1   :  { %v2031_v35 = vpop.xlane.xlu1 %2030 }
 0x3c2   :  { %v2341_v36 = vsel %vm2184_vm6, %v2324_v34, %v2340_v33  ;;  %v2328_v15 = vrot.slane %v2031_v35, %v11818_v39 }
 0x3c3   :  { %v2110_v37 = vpop.xlane.xlu0 %2109 }
 0x3c4   :  { %v11852_v38 = vsel %vm2186_vm7, %v2328_v15, %v2341_v36  ;;  %v2145_v46 = vrot.slane %v2110_v37, %v11818_v39 }
 0x3c5   :  { %v2116_v40 = vpop.xlane.xlu1 %2115 }
 0x3c6   :  { %v2153_v45 = vrot.slane %v2116_v40, %v11818_v39 }
 0x3c7   :  { %v2122_v41 = vpop.xlane.xlu0 %2121 }
 0x3c8   :  { %v2161_v52 = vrot.slane %v2122_v41, %v11818_v39 }
 0x3c9   :  { %v2119_v42 = vpop.xlane.xlu1 %2118 }
 0x3ca   :  { %v2157_v48 = vrot.slane %v2119_v42, %v11818_v39 }
 0x3cb   :  { %v2128_v43 = vpop.xlane.xlu0 %2127 }
 0x3cc   :  { %v2169_v59 = vrot.slane %v2128_v43, %v11818_v39 }
 0x3cd   :  { %v2125_v44 = vpop.xlane.xlu1 %2124 }
 0x3ce   :  { %v2165_v58 = vrot.slane %v2125_v44, %v11818_v39 }
 0x3cf   :  { %v2113_v0 = vpop.xlane.xlu0 %2112 }
 0x3d0   :  { %v2149_v47 = vrot.slane %v2113_v0, %v11818_v39 }
 0x3d1   :  { %v2131_v55 = vpop.xlane.xlu1 %2130 }
 0x3d2   :  { %v2175_v50 = vsel %vm2174_vm1, %v2149_v47, %v2145_v46  ;;  %v2173_v63 = vrot.slane %v2131_v55, %v11818_v39 }
 0x3d3   :  { %v2177_v54 = vsel %vm2176_vm2, %v2153_v45, %v2175_v50 }
 0x3d4   :  { %v2179_v8 = vsel %vm2178_vm3, %v2157_v48, %v2177_v54 }
 0x3d5   :  { %v2181_v62 = vsel %vm2180_vm4, %v2161_v52, %v2179_v8 }
 0x3d6   :  { %v2183_v1 = vsel %vm2182_vm5, %v2165_v58, %v2181_v62 }
 0x3d7   :  { %v2185_v2 = vsel %vm2184_vm6, %v2169_v59, %v2183_v1 }
 0x3d8   :  { %v2187_v5 = vsel %vm2186_vm7, %v2173_v63, %v2185_v2  ;;  %v11897_v2 = vpop.f32.mrb[12].mxu0 }
 0x3d9   :  { %2189 = vxpose.xlu0.b32.start.end [1/1] (short) (narrow) %v2187_v5, 8  ;;  %v1546_v5 = vpop.f32.mrb[12].mxu1 }
 0x3e3   :  { %v2815_v6 = vpop.xlane.xlu1 %2814  ;;  %v2847_v7 = vpop.xlane.xlu0 %2846 }
 0x3e4   :  { %v2880_v18 = vrot.slane %v2847_v7, %v11818_v39  ;;  %v2988_v43 = vrot.slane %v2815_v6, %v11818_v39  ;;  %v3429_v6 = vcombine.low %v11897_v2, %v1546_v5  ;;  %v11900_v7 = vpop.f32.mrb[13].mxu0 }
 0x3e7   :  { %v2821_v10 = vpop.xlane.xlu1 %2820  ;;  %v2853_v14 = vpop.xlane.xlu0 %2852 }
 0x3e8   :  { %v2888_v21 = vrot.slane %v2853_v14, %v11818_v39  ;;  %v2996_v0 = vrot.slane %v2821_v10, %v11818_v39  ;;  %v1548_v10 = vpop.f32.mrb[13].mxu1  ;;  %v1509_v14 = vpop.f32.mrb[14].mxu0 }
 0x3eb   :  { %v2827_v13 = vpop.xlane.xlu1 %2826  ;;  %v2859_v19 = vpop.xlane.xlu0 %2858 }
 0x3ec   :  { %v2896_v29 = vrot.slane %v2859_v19, %v11818_v39  ;;  %v3004_v48 = vrot.slane %v2827_v13, %v11818_v39  ;;  %v3437_v13 = vcombine.low %v11900_v7, %v1548_v10  ;;  %v1510_v19 = vpop.f32.mrb[15].mxu0 }
 0x3ef   :  { %v2833_v16 = vpop.xlane.xlu1 %2832  ;;  %v2865_v32 = vpop.xlane.xlu0 %2864 }
 0x3f0   :  { %v2904_v36 = vrot.slane %v2865_v32, %v11818_v39  ;;  %v3012_v58 = vrot.slane %v2833_v16, %v11818_v39  ;;  %v1550_v16 = vpop.f32.mrb[14].mxu1 }
 0x3f3   :  { %v2850_v20 = vpop.xlane.xlu1 %2849 }
 0x3f4   :  { %v2884_v22 = vrot.slane %v2850_v20, %v11818_v39  ;;  %v1551_v20 = vpop.f32.mrb[15].mxu1 }
 0x3f5   :  { %v3426_v20 = vld [vmem:[#allocation26] sm:$0xf] }
 0x3f6   :  { %v2909_v24 = vsel %vm2174_vm1, %v2884_v22, %v2880_v18  ;;  %v11904_v18 = vrot.slane %v3429_v6, %v11660_v51  ;;  %v11910_v22 = vsub.s32 1, %v11655_v49 }
 0x3f7   :  { %v2856_v25 = vpop.xlane.xlu1 %2855  ;;  %v2910_v26 = vsel %vm2176_vm2, %v2888_v21, %v2909_v24  ;;  %v11907_v21 = vsub.s32 0, %v11655_v49  ;;  %v11913_v24 = vrot.slane %v3437_v13, %v11660_v51 }
 0x3f8   :  { %v2892_v31 = vrot.slane %v2856_v25, %v11818_v39  ;;  %v1779_v25 = vpop.f32.mrb[16].mxu0 }
 0x3f9   :  { %v1781_v32 = vpop.f32.mrb[17].mxu0 }
 0x3fa   :  { %v2911_v33 = vsel %vm2178_vm3, %v2892_v31, %v2910_v26  ;;  %v1820_v26 = vpop.f32.mrb[16].mxu1 }
 0x3fb   :  { %v2862_v34 = vpop.xlane.xlu1 %2861  ;;  %v2912_v35 = vsel %vm2180_vm4, %v2896_v29, %v2911_v33  ;;  %v3479_v29 = vcombine.low %v1779_v25, %v1820_v26  ;;  %v3480_v31 = vcombine.high %v1779_v25, %v1820_v26  ;;  %v1822_v33 = vpop.f32.mrb[17].mxu1 }
 0x3fc   :  { %v2900_v15 = vrot.slane %v2862_v34, %v11818_v39  ;;  %v3445_v34 = vcombine.low %v11904_v18, %v11913_v24 }
 0x3fe   :  { %v2913_v37 = vsel %vm2182_vm5, %v2900_v15, %v2912_v35  ;;  %v3446_v35 = vcombine.high %v11904_v18, %v11913_v24  ;;  %v3496_v15 = vcombine.high %v1781_v32, %v1822_v33 }
 0x3ff   :  { %v2868_v40 = vpop.xlane.xlu1 %2867  ;;  %v2914_v41 = vsel %vm2184_vm6, %v2904_v36, %v2913_v37  ;;  %v3495_v36 = vcombine.low %v1781_v32, %v1822_v33  ;;  %v1783_v37 = vpop.f32.mrb[18].mxu0  ;;  %v11954_v32 = vsub.s32 3, %v11655_v49 }
 0x400   :  { %v2908_v42 = vrot.slane %v2868_v40, %v11818_v39  ;;  %v1824_v40 = vpop.f32.mrb[18].mxu1 }
 0x402   :  { %v2915_v44 = vsel %vm2186_vm7, %v2908_v42, %v2914_v41  ;;  %v3487_v42 = vrot.slane %v3479_v29, %v11660_v51 }
 0x403   :  { %v2818_v46 = vpop.xlane.xlu1 %2817  ;;  %2917 = vxpose.xlu1.b32.start.end [1/1] (short) (narrow) %v2915_v44, 8  ;;  %v1784_v44 = vpop.f32.mrb[19].mxu0 }
 0x404   :  { %v2992_v47 = vrot.slane %v2818_v46, %v11818_v39 }
 0x406   :  { %v3017_v45 = vsel %vm2174_vm1, %v2992_v47, %v2988_v43  ;;  %v3494_v43 = vrot.slane %v3480_v31, %v11660_v51  ;;  %v11924_v47 = vsub.s32 2, %v11655_v49 }
 0x407   :  { %v3018_v50 = vsel %vm2176_vm2, %v2996_v0, %v3017_v45  ;;  %v2824_v52 = vpop.xlane.xlu1 %2823  ;;  %v1825_v45 = vpop.f32.mrb[19].mxu1 }
 0x408   :  { %v3000_v54 = vrot.slane %v2824_v52, %v11818_v39 }
 0x40a   :  { %v3019_v55 = vsel %vm2178_vm3, %v3000_v54, %v3018_v50  ;;  %v3510_v50 = vrot.slane %v3496_v15, %v11660_v51 }
 0x40b   :  { %v3020_v8 = vsel %vm2180_vm4, %v3004_v48, %v3019_v55  ;;  %v2830_v59 = vpop.xlane.xlu1 %2829  ;;  %v3503_v48 = vrot.slane %v3495_v36, %v11660_v51 }
 0x40c   :  { %v3008_v62 = vrot.slane %v2830_v59, %v11818_v39  ;;  %v3527_v55 = vcombine.low %v3494_v43, %v3510_v50  ;;  %v3876_v59 = vpack.c.bf16 %v1546_v5, %v1546_v5 }
 0x40d   :  { %v3511_v52 = vcombine.low %v3487_v42, %v3503_v48  ;;  %v3512_v54 = vcombine.high %v3487_v42, %v3503_v48 }
 0x40e   :  { %v3021_v63 = vsel %vm2182_vm5, %v3008_v62, %v3020_v8  ;;  %v3877_v62 = vpack.c.bf16 %v1548_v10, %v1548_v10  ;;  %v3535_v10 = vrot.slane %v3527_v55, %v11677_v61 }
 0x40f   :  { %v3022_v1 = vsel %vm2184_vm6, %v3012_v58, %v3021_v63  ;;  %v3528_v58 = vcombine.high %v3494_v43, %v3510_v50  ;;  %v11930_v63 = vsel %vm3881_vm8, %v3876_v59, 0  ;;  %v2836_v13 = vpop.xlane.xlu1 %2835  ;;  %v3519_v5 = vrot.slane %v3511_v52, %v11677_v61 }
 0x410   :  { %v11933_v6 = vsel %vm3881_vm8, %v3877_v62, 0  ;;  %v3016_v51 = vrot.slane %v2836_v13, %v11818_v39  ;;  %v3526_v19 = vrot.slane %v3512_v54, %v11677_v61  ;;  %v11317_v52 = vmov 1966171168  }
 0x411   :  { %v3542_v16 = vrot.slane %v3528_v58, %v11677_v61  ;;  %v3543_v25 = vcombine.high %v3519_v5, %v11314_v11  ;;  %v3547_v43 = vmul.f32 %v3519_v5, %v3426_v20  ;;  %v2379_v54 = vunpack.c.l.s4 %v11317_v52 }
 0x412   :  { %v3023_v14 = vsel %vm2186_vm7, %v3016_v51, %v3022_v1  ;;  %v11944_v26 = vmul.f32 %v3526_v19, %v3426_v20 }
 0x413   :  { %v11948_v29 = vmul.f32 %v3542_v16, %v3426_v20  ;;  %v3548_v1 = vmul.f32 %v3543_v25, %v3426_v20  ;;  %v3555_v44 = vsel %vm1983_vm0, %v3547_v43, 0.0  ;;  %v2380_v58 = vunpack.c.0.s8 %v2379_v54 }
 0x415   :  { %v11967_v59 = vsub.s32 %v2380_v58, %v11655_v49  ;;  %v3561_v58 = vsel %vm1983_vm0, %v11944_v26, 0.0 }
 0x459   :  { %v2205_v41 = vpop.trf.xlu0 }
 0x45a   :  { %v2224_v0 = vrot.slane %v2205_v41, %v11907_v21  ;;  %v2231_v46 = vrot.slane %v2205_v41, %v11910_v22  ;;  %v2238_v8 = vrot.slane %v2205_v41, %v11924_v47  ;;  %v2245_v36 = vrot.slane %v2205_v41, %v11954_v32 }
 0x45c   :  { %2226 = vbcast.lane.b32.xlu0 %v2224_v0, 256  ;;  %2233 = vbcast.lane.b32.xlu1 %v2231_v46, 256  ;;  %v3544_v0 = vcombine.high %v3526_v19, %v11314_v11  ;;  %v3545_v46 = vcombine.high %v3535_v10, %v11314_v11  ;;  %v11974_v19 = vld [vmem:[%s12626_s9] sm:$0xff] }
 0x45d   :  { %vm2438_vm10 = vcmp.gt.f32.partialorder %v11974_v19, 0.0 }
 0x45e   :  { %v3550_v41 = vmul.f32 %v3544_v0, %v3426_v20  ;;  %v3552_v48 = vmul.f32 %v3545_v46, %v3426_v20 }
 0x460   :  { %2240 = vbcast.lane.b32.xlu0 %v2238_v8, 256  ;;  %v3564_v45 = vsel %vm1983_vm0, %v3550_v41, 0.0  ;;  %v3570_v50 = vsel %vm1983_vm0, %v3552_v48, 0.0 }
 0x47e   :  { %2345 = vxpose.xlu0.b32.start [1/2] (short) (narrow) %v11844_v30, 8  ;;  %v11946_v30 = vmul.f32 %v3535_v10, %v3426_v20 }
 0x482   :  { %2346 = vxpose.xlu0.b32.end [2/2] (short) (narrow) %v11852_v38, 8  ;;  %v3546_v38 = vcombine.high %v3542_v16, %v11314_v11 }
 0x483   :  { %v2933_v33 = vpop.trf.xlu1 }
 0x484   :  { %v11951_v31 = vmul.f32 %v3546_v38, %v3426_v20  ;;  %v2959_v15 = vrot.slane %v2933_v33, %v11910_v22  ;;  %v2952_v37 = vrot.slane %v2933_v33, %v11907_v21  ;;  %v2973_v40 = vrot.slane %v2933_v33, %v11954_v32 }
 0x485   :  { %3025 = vxpose.xlu1.b32.start.end [1/1] (short) (narrow) %v3023_v14, 8  ;;  %v2966_v42 = vrot.slane %v2933_v33, %v11924_v47 }
 0x4a3   :  { %2247 = vbcast.lane.b32.xlu1 %v2245_v36, 256 }
 0x4a7   :  { %2961 = vbcast.lane.b32.xlu1 %v2959_v15, 256 }
 0x4ab   :  { %2954 = vbcast.lane.b32.xlu1 %v2952_v37, 256  ;;  %2975 = vbcast.lane.b32.xlu0 %v2973_v40, 256 }
 0x4af   :  { %2968 = vbcast.lane.b32.xlu1 %v2966_v42, 256 }
 0x4ca   :  { %3556 = vadd.xlane.f32.xlu0 %v3555_v44 }
 0x4ce   :  { %v2227_v55 = vpop.permute.xlu0 %2226  ;;  %v2234_v5 = vpop.permute.xlu1 %2233 }
 0x4d2   :  { %v2241_v8 = vpop.permute.xlu0 %2240 }
 0x4d3   :  { %3565 = vadd.xlane.f32.xlu1 %v3564_v45 }
 0x4d7   :  { %3571 = vadd.xlane.f32.xlu1 %v3570_v50  ;;  %v3558_v50 = vsel %vm1983_vm0, %v3548_v1, 0.0 }
 0x4fe   :  { %v2361_v62 = vpop.trf.xlu0 }
 0x4ff   :  { %v2384_v13 = vrot.slane %v2361_v62, %v11967_v59 }
 0x501   :  { %v2385_v51 = vcombine.high %v2384_v13, %v2384_v13  ;;  %v2392_v14 = vrot.slane %v2384_v13, %v11967_v59 }
 0x503   :  { %v2399_v10 = vrot.slane %v2385_v51, %v11967_v59  ;;  %v2405_v16 = vrot.slane %v2392_v14, %v11907_v21  ;;  %v2400_v20 = vcombine.high %v2392_v14, %v2392_v14 }
 0x505   :  { %v2409_v25 = vrot.slane %v2399_v10, %v11907_v21  ;;  %v2422_v38 = vadd.f32 %v2405_v16, %v2227_v55  ;;  %v3041_v36 = vpop.trf.xlu1  ;;  %v2413_v15 = vrot.slane %v2400_v20, %v11907_v21  ;;  %v2401_v52 = vcombine.high %v2399_v10, %v2399_v10 }
 0x506   :  { %v3064_v43 = vrot.slane %v3041_v36, %v11967_v59  ;;  %v3567_v10 = vsel %vm1983_vm0, %v11946_v30, 0.0 }
 0x507   :  { %vm2426_vm9 = vcmp.gt.f32.partialorder %v2422_v38, 0.0  ;;  %v2430_v49 = vmul.f32 0.2, %v2422_v38  ;;  %v2423_v33 = vadd.f32 %v2409_v25, %v2234_v5  ;;  %v2424_v45 = vadd.f32 %v2413_v15, %v2241_v8 }
 0x508   :  { %v3065_v48 = vcombine.high %v3064_v43, %v3064_v43  ;;  %v2417_v62 = vrot.slane %v2401_v52, %v11907_v21  ;;  %v3072_v13 = vrot.slane %v3064_v43, %v11967_v59  ;;  %v3453_v43 = vrot.slane %v3445_v34, %v11677_v61 }
 0x509   :  { %v2434_v37 = vsel %vm2426_vm9, %v2422_v38, %v2430_v49  ;;  %vm2427_vm12 = vcmp.gt.f32.partialorder %v2423_v33, 0.0  ;;  %v2431_v40 = vmul.f32 0.2, %v2423_v33  ;;  %v2432_v54 = vmul.f32 0.2, %v2424_v45  ;;  %v12006_v38 = vld [vmem:[#allocation7] sm:$0xff] }
 0x50a   :  { %v11981_v42 = vsel %vm2438_vm10, %v2434_v37, -1e+30  ;;  %v3079_v55 = vrot.slane %v3065_v48, %v11967_v59  ;;  %vm2428_vm13 = vcmp.gt.f32.partialorder %v2424_v45, 0.0  ;;  %v3085_v25 = vrot.slane %v3072_v13, %v11907_v21 }
 0x50b   :  { %v2446_v44 = vsel %vm2445_vm11, %v11981_v42, -inf  ;;  %v2435_v0 = vsel %vm2427_vm12, %v2423_v33, %v2431_v40  ;;  %v2436_v8 = vsel %vm2428_vm13, %v2424_v45, %v2432_v54  ;;  %v3080_v15 = vcombine.high %v3072_v13, %v3072_v13  ;;  %v3425_v40 = vld [vmem:[#allocation25] sm:$0xf] }
 0x50c   :  { %2447 = vmax.xlane.f32.xlu0 %v2446_v44  ;;  %v11988_v41 = vsel %vm2438_vm10, %v2435_v0, -1e+30  ;;  %v3089_v5 = vrot.slane %v3079_v55, %v11907_v21  ;;  %v3081_v1 = vcombine.high %v3079_v55, %v3079_v55  ;;  %v12003_v20 = vsel %vm2438_vm10, %v2436_v8, -1e+30 }
 0x50d   :  { %v2449_v46 = vsel %vm2445_vm11, %v11988_v41, -inf  ;;  %v2452_v30 = vsel %vm2445_vm11, %v12003_v20, -inf  ;;  %vm3118_vm9 = vcmp.gt.f32.partialorder %v12006_v38, 0.0  ;;  %vm3125_vm12 = vcmask 64512  }
 0x50e   :  { %2450 = vmax.xlane.f32.xlu1 %v2449_v46  ;;  %v3097_v36 = vrot.slane %v3081_v1, %v11907_v21  ;;  %v3093_v54 = vrot.slane %v3080_v15, %v11907_v21  ;;  %v3573_v34 = vsel %vm1983_vm0, %v11948_v29, 0.0  ;;  %v3576_v29 = vsel %vm1983_vm0, %v11951_v31, 0.0 }
 0x510   :  { %3559 = vadd.xlane.f32.xlu0 %v3558_v50 }
 0x514   :  { %3562 = vadd.xlane.f32.xlu0 %v3561_v58  ;;  %v3463_v58 = vmul.f32 %v3453_v43, %v3425_v40 }
 0x515   :  { %v2248_v51 = vpop.permute.xlu1 %2247 }
 0x516   :  { %v2425_v14 = vadd.f32 %v2417_v62, %v2248_v51 }
 0x518   :  { %v2433_v16 = vmul.f32 0.2, %v2425_v14  ;;  %3568 = vadd.xlane.f32.xlu0 %v3567_v10  ;;  %vm2429_vm14 = vcmp.gt.f32.partialorder %v2425_v14, 0.0 }
 0x519   :  { %v2962_v26 = vpop.permute.xlu1 %2961 }
 0x51a   :  { %v3103_v49 = vadd.f32 %v3089_v5, %v2962_v26  ;;  %v2437_v33 = vsel %vm2429_vm14, %v2425_v14, %v2433_v16 }
 0x51b   :  { %v12013_v37 = vsel %vm2438_vm10, %v2437_v33, -1e+30 }
 0x51c   :  { %v3111_v44 = vmul.f32 0.2, %v3103_v49  ;;  %2453 = vmax.xlane.f32.xlu0 %v2452_v30  ;;  %v2455_v0 = vsel %vm2445_vm11, %v12013_v37, -inf  ;;  %vm3107_vm15 = vcmp.gt.f32.partialorder %v3103_v49, 0.0  ;;  %v3461_v30 = vcombine.high %v3453_v43, %v11314_v11 }
 0x51d   :  { %2456 = vmax.xlane.f32.xlu1 %v2455_v0  ;;  %v2955_v46 = vpop.permute.xlu1 %2954  ;;  %v2976_v45 = vpop.permute.xlu0 %2975  ;;  %v2482_v0 = vsel %vm2445_vm11, %v11974_v19, 0.0 }
 0x51e   :  { %v3102_v48 = vadd.f32 %v3085_v25, %v2955_v46  ;;  %v3105_v50 = vadd.f32 %v3097_v36, %v2976_v45  ;;  %v3115_v52 = vsel %vm3107_vm15, %v3103_v49, %v3111_v44  ;;  %v3467_v25 = vsel %vm1983_vm0, %v3463_v58, 0.0 }
 0x51f   :  { %v12027_v55 = vsel %vm3118_vm9, %v3115_v52, -1e+30  ;;  %v3460_v49 = vrot.slane %v3446_v35, %v11677_v61  ;;  %v3464_v18 = vmul.f32 %v3461_v30, %v3425_v40  ;;  %vm11318_vm15 = vmmov 0  }
 0x520   :  { %v3110_v62 = vmul.f32 0.2, %v3102_v48  ;;  %3574 = vadd.xlane.f32.xlu0 %v3573_v34  ;;  %v3113_v13 = vmul.f32 0.2, %v3105_v50  ;;  %v3129_v51 = vsel %vm3125_vm12, %v12027_v55, -inf  ;;  %vm3106_vm10 = vcmp.gt.f32.partialorder %v3102_v48, 0.0  ;;  %9337 = vmatprep.mubr.msk.bf16.mxu1 %vm11318_vm15, %v11314_v11 }
 0x521   :  { %3130 = vmax.xlane.f32.xlu1 %v3129_v51  ;;  %v2969_v8 = vpop.permute.xlu1 %2968  ;;  %vm3109_vm13 = vcmp.gt.f32.partialorder %v3105_v50, 0.0  ;;  %v3465_v44 = vmul.f32 %v3460_v49, %v3425_v40  ;;  %v3462_v24 = vcombine.high %v3460_v49, %v11314_v11  ;;  %v3470_v46 = vsel %vm1983_vm0, %v3464_v18, 0.0  ;;  %9361 = vmatprep.mubr.msk.bf16.mxu0 %vm11318_vm15, %v11314_v11 }
 0x522   :  { %v3104_v14 = vadd.f32 %v3093_v54, %v2969_v8  ;;  %v3114_v5 = vsel %vm3106_vm10, %v3102_v48, %v3110_v62  ;;  %v3117_v1 = vsel %vm3109_vm13, %v3105_v50, %v3113_v13 }
 0x523   :  { %v12035_v10 = vsel %vm3118_vm9, %v3114_v5, -1e+30  ;;  %v12039_v16 = vsel %vm3118_vm9, %v3117_v1, -1e+30  ;;  %v3473_v35 = vsel %vm1983_vm0, %v3465_v44, 0.0  ;;  %v3466_v45 = vmul.f32 %v3462_v24, %v3425_v40 }
 0x524   :  { %v3112_v26 = vmul.f32 0.2, %v3104_v14  ;;  %3577 = vadd.xlane.f32.xlu0 %v3576_v29  ;;  %vm3108_vm14 = vcmp.gt.f32.partialorder %v3104_v14, 0.0  ;;  %v3126_v31 = vsel %vm3125_vm12, %v12035_v10, -inf  ;;  %v3135_v33 = vsel %vm3125_vm12, %v12039_v16, -inf }
 0x525   :  { %3468 = vadd.xlane.f32.xlu1 %v3467_v25  ;;  %v3476_v43 = vsel %vm1983_vm0, %v3466_v45, 0.0  ;;  %v3162_v45 = vsel %vm3125_vm12, %v12006_v38, 0.0 }
 0x526   :  { %v3116_v36 = vsel %vm3108_vm14, %v3104_v14, %v3112_v26 }
 0x527   :  { %v12052_v15 = vsel %vm3118_vm9, %v3116_v36, -1e+30 }
 0x528   :  { %3127 = vmax.xlane.f32.xlu0 %v3126_v31  ;;  %v3132_v61 = vsel %vm3125_vm12, %v12052_v15, -inf }
 0x529   :  { %3136 = vmax.xlane.f32.xlu1 %v3135_v33 }
 0x52c   :  { %3133 = vmax.xlane.f32.xlu0 %v3132_v61 }
 0x52d   :  { %3474 = vadd.xlane.f32.xlu1 %v3473_v35 }
 0x530   :  { %3471 = vadd.xlane.f32.xlu0 %v3470_v46 }
 0x531   :  { %2483 = vadd.xlane.f32.xlu1 %v2482_v0 }
 0x534   :  { %3477 = vadd.xlane.f32.xlu0 %v3476_v43 }
 0x557   :  { %v3557_v50 = vpop.xlane.xlu0 %3556 }
 0x560   :  { %v3566_v48 = vpop.xlane.xlu1 %3565 }
 0x564   :  { %v3572_v52 = vpop.xlane.xlu1 %3571 }
 0x599   :  { %v2448_v54 = vpop.xlane.xlu0 %2447 }
 0x59a   :  { %v2458_v34 = vsub.f32 %v11981_v42, %v2448_v54 }
 0x59b   :  { %v2451_v58 = vpop.xlane.xlu1 %2450 }
 0x59c   :  { %v2462_v62 = vmul.f32 1.442695, %v2458_v34  ;;  %v2459_v13 = vsub.f32 %v11988_v41, %v2451_v58  ;;  %v3590_v34 = vrot.slane %v3557_v50, %v11818_v39 }
 0x59d   :  { %v3560_v51 = vpop.xlane.xlu0 %3559 }
 0x59e   :  { %10545 = vpow2.f32 %v2462_v62  ;;  %v2464_v19 = vmul.f32 1.442695, %v2459_v13  ;;  %v3594_v43 = vrot.slane %v3560_v51, %v11818_v39  ;;  %v3602_v13 = vrot.slane %v3566_v48, %v11818_v39 }
 0x59f   :  { %v3610_v51 = vrot.slane %v3572_v52, %v11818_v39 }
 0x5a0   :  { %10547 = vpow2.f32 %v2464_v19  ;;  %v3619_v58 = vsel %vm2174_vm1, %v3594_v43, %v3590_v34 }
 0x5a1   :  { %v3563_v40 = vpop.xlane.xlu0 %3562 }
 0x5a2   :  { %v3598_v54 = vrot.slane %v3563_v40, %v11818_v39 }
 0x5a4   :  { %v3620_v62 = vsel %vm2176_vm2, %v3598_v54, %v3619_v58 }
 0x5a5   :  { %v3569_v8 = vpop.xlane.xlu0 %3568  ;;  %v3621_v19 = vsel %vm2178_vm3, %v3602_v13, %v3620_v62 }
 0x5a6   :  { %v3606_v38 = vrot.slane %v3569_v8, %v11818_v39 }
 0x5a8   :  { %v10546_v14 = vpop.eup %10545 }
 0x5a9   :  { %v12065_v5 = vpop.xlane.xlu0 %2453  ;;  %v2470_v1 = vsel %vm2445_vm11, %v10546_v14, 0.0 }
 0x5aa   :  { %v10548_v29 = vpop.eup %10547  ;;  %v12068_v26 = vpop.xlane.xlu1 %2456  ;;  %2471 = vadd.xlane.f32.xlu1 %v2470_v1  ;;  %v3622_v1 = vsel %vm2180_vm4, %v3606_v38, %v3621_v19  ;;  %v2460_v53 = vsub.f32 %v12003_v20, %v12065_v5  ;;  %vm3811_vm4 = vcmask 31744  }
 0x5ab   :  { %v2473_v42 = vsel %vm2445_vm11, %v10548_v29, 0.0  ;;  %v3623_v50 = vsel %vm2182_vm5, %v3610_v51, %v3622_v1 }
 0x5ac   :  { %2474 = vadd.xlane.f32.xlu0 %v2473_v42  ;;  %v2466_v60 = vmul.f32 1.442695, %v2460_v53 }
 0x5ad   :  { %v3575_v25 = vpop.xlane.xlu0 %3574 }
 0x5ae   :  { %v12071_v41 = vpop.xlane.xlu1 %3130  ;;  %3163 = vadd.xlane.f32.xlu1 %v3162_v45  ;;  %v3614_v42 = vrot.slane %v3575_v25, %v11818_v39 }
 0x5af   :  { %v3139_v34 = vsub.f32 %v12027_v55, %v12071_v41 }
 0x5b1   :  { %v3578_v49 = vpop.xlane.xlu0 %3577  ;;  %v3144_v58 = vmul.f32 1.442695, %v3139_v34 }
 0x5b2   :  { %v3469_v31 = vpop.xlane.xlu1 %3468  ;;  %v3618_v40 = vrot.slane %v3578_v49, %v11818_v39 }
 0x5b3   :  { %v3694_v18 = vrot.slane %v3469_v31, %v11818_v39  ;;  %v3624_v31 = vsel %vm2184_vm6, %v3614_v42, %v3623_v50 }
 0x5b5   :  { %v12073_v33 = vpop.xlane.xlu0 %3127 }
 0x5b6   :  { %v12075_v36 = vpop.xlane.xlu1 %3136  ;;  %v3138_v62 = vsub.f32 %v12035_v10, %v12073_v33 }
 0x5b7   :  { %v3141_v13 = vsub.f32 %v12039_v16, %v12075_v36 }
 0x5b8   :  { %v3142_v38 = vmul.f32 1.442695, %v3138_v62 }
 0x5b9   :  { %v12077_v30 = vpop.xlane.xlu0 %3133  ;;  %v3148_v5 = vmul.f32 1.442695, %v3141_v13 }
 0x5ba   :  { %v3475_v44 = vpop.xlane.xlu1 %3474 }
 0x5bb   :  { %v3702_v35 = vrot.slane %v3475_v44, %v11818_v39  ;;  %v3625_v44 = vsel %vm2186_vm7, %v3618_v40, %v3624_v31 }
 0x5bd   :  { %v3472_v61 = vpop.xlane.xlu0 %3471 }
 0x5be   :  { %v3698_v24 = vrot.slane %v3472_v61, %v11818_v39  ;;  %v12107_v8 = vpop.xlane.xlu1 %2483 }
 0x5c0   :  { %v3707_v0 = vsel %vm2174_vm1, %v3698_v24, %v3694_v18  ;;  %vm2485_vm1 = vcmp.gt.f32.partialorder %v12107_v8, 0.0  ;;  %v3189_v8 = vpack.c.bf16 %v11778_v27, %v11778_v27 }
 0x5c1   :  { %v12084_v46 = vsel %vm2176_vm2, %v3702_v35, %v3707_v0  ;;  %v12109_v48 = vpop.xlane.xlu0 %3477 }
 0x5c2   :  { %v3706_v51 = vrot.slane %v12109_v48, %v11818_v39  ;;  %v3242_v4 = vsel %vm1983_vm0, %v3189_v8, 0 }
 0x5c4   :  { %v3709_v40 = vsel %vm2178_vm3, %v3706_v51, %v12084_v46 }
 0x5d9   :  { %3627 = vxpose.xlu0.b32.start.end [1/1] (short) (narrow) %v3625_v44, 8 }
 0x637   :  { %v2472_v61 = vpop.xlane.xlu1 %2471 }
 0x638   :  { %10549 = vrcp.f32 %v2472_v61 }
 0x639   :  { %v2475_v18 = vpop.xlane.xlu0 %2474 }
 0x63a   :  { %10551 = vrcp.f32 %v2475_v18 }
 0x63b   :  { %10553 = vpow2.f32 %v2466_v60  ;;  %v3164_v50 = vpop.xlane.xlu1 %3163 }
 0x63c   :  { %vm3165_vm2 = vcmp.gt.f32.partialorder %v3164_v50, 0.0 }
 0x642   :  { %v10550_v52 = vpop.eup %10549 }
 0x643   :  { %v2496_v25 = vsel %vm2485_vm1, %v10550_v52, 0.0 }
 0x644   :  { %v10552_v49 = vpop.eup %10551  ;;  %v2500_v24 = vmul.f32 %v10546_v14, %v2496_v25 }
 0x645   :  { %v2497_v0 = vsel %vm2485_vm1, %v10552_v49, 0.0  ;;  %v10554_v20 = vpop.eup %10553 }
 0x646   :  { %v2504_v35 = vpack.c.bf16 %v2500_v24, %v2500_v24  ;;  %v2501_v45 = vmul.f32 %v10548_v29, %v2497_v0 }
 0x648   :  { %9338 = vmatmul.mubr.msk.bf16.vlgmr.msra.gmra.mrb[20].mxu1 %vm2445_vm11, %v2504_v35  ;;  %v2505_v43 = vpack.c.bf16 %v2501_v45, %v2501_v45 }
 0x649   :  { %9342 = vmatpush3.bf16.msra.mxu1 %v2509_v12  ;;  %9343 = vmatprep.mubr.msk.bf16.mxu1 %vm11318_vm15, %v11314_v11 }
 0x64a   :  { %9347 = vmatprep.subr.bf16.mxu1 %v11314_v11 }
 0x650   :  { %9344 = vmatmul.mubr.msk.bf16.vlgmr.msra.gmra.mrb[24].mxu1 %vm2445_vm11, %v2505_v43 }
 0x651   :  { %9348 = vmatpush3.bf16.msra.mxu1 %v2510_v9  ;;  %9349 = vmatprep.mubr.msk.bf16.mxu1 %vm11318_vm15, %v11314_v11  ;;  %v2461_v9 = vsub.f32 %v12013_v37, %v12068_v26  ;;  %v3140_v37 = vsub.f32 %v12052_v15, %v12077_v30  ;;  %v2476_v26 = vsel %vm2445_vm11, %v10554_v20, 0.0 }
 0x652   :  { %9353 = vmatprep.subr.bf16.mxu1 %v11314_v11 }
 0x653   :  { %v2468_v54 = vmul.f32 1.442695, %v2461_v9  ;;  %v3146_v55 = vmul.f32 1.442695, %v3140_v37  ;;  %v3191_v37 = vpack.c.bf16 %v11780_v28, %v11780_v28 }
 0x655   :  { %10555 = vpow2.f32 %v2468_v54  ;;  %v3334_v28 = vsel %vm1983_vm0, %v3191_v37, 0 }
 0x656   :  { %10557 = vpow2.f32 %v3144_v58 }
 0x657   :  { %10559 = vpow2.f32 %v3142_v38 }
 0x658   :  { %10561 = vpow2.f32 %v3148_v5 }
 0x659   :  { %v3643_v56 = vpop.trf.xlu0  ;;  %10563 = vpow2.f32 %v3146_v55 }
 0x65a   :  { %v3669_v3 = vrot.slane %v3643_v56, %v11910_v22  ;;  %v3662_v12 = vrot.slane %v3643_v56, %v11907_v21  ;;  %v3676_v14 = vrot.slane %v3643_v56, %v11924_v47  ;;  %v3683_v29 = vrot.slane %v3643_v56, %v11954_v32 }
 0x65c   :  { %3671 = vbcast.lane.b32.xlu0 %v3669_v3, 256  ;;  %3664 = vbcast.lane.b32.xlu1 %v3662_v12, 256 }
 0x65f   :  { %v10556_v19 = vpop.eup %10555 }
 0x660   :  { %3678 = vbcast.lane.b32.xlu1 %v3676_v14, 256  ;;  %v2479_v41 = vsel %vm2445_vm11, %v10556_v19, 0.0  ;;  %v12148_v10 = vpop.eup %10557 }
 0x661   :  { %v3153_v16 = vsel %vm3125_vm12, %v12148_v10, 0.0  ;;  %v10560_v33 = vpop.eup %10559 }
 0x662   :  { %v3150_v36 = vsel %vm3125_vm12, %v10560_v33, 0.0  ;;  %v12153_v15 = vpop.eup %10561 }
 0x663   :  { %v3159_v30 = vsel %vm3125_vm12, %v12153_v15, 0.0  ;;  %v12157_v1 = vpop.eup %10563 }
 0x664   :  { %3685 = vbcast.lane.b32.xlu1 %v3683_v29, 256  ;;  %v3156_v42 = vsel %vm3125_vm12, %v12157_v1, 0.0 }
 0x688   :  { %2477 = vadd.xlane.f32.xlu1 %v2476_v26 }
 0x68c   :  { %2480 = vadd.xlane.f32.xlu1 %v2479_v41 }
 0x690   :  { %3154 = vadd.xlane.f32.xlu1 %v3153_v16 }
 0x694   :  { %3151 = vadd.xlane.f32.xlu1 %v3150_v36 }
 0x698   :  { %3160 = vadd.xlane.f32.xlu1 %v3159_v30  ;;  %v3875_v30 = vpack.c.bf16 %v11900_v7, %v11900_v7 }
 0x69c   :  { %3157 = vadd.xlane.f32.xlu1 %v3156_v42 }
 0x6ce   :  { %v12165_v31 = vpop.permute.xlu1 %3664 }
 0x6cf   :  { %3711 = vxpose.xlu1.b32.start.end [1/1] (short) (narrow) %v3709_v40, 8 }
 0x6d2   :  { %v12167_v44 = vpop.permute.xlu1 %3678 }
 0x6d6   :  { %v12169_v61 = vpop.permute.xlu1 %3685 }
 0x715   :  { %v2478_v18 = vpop.xlane.xlu1 %2477 }
 0x716   :  { %10565 = vrcp.f32 %v2478_v18 }
 0x719   :  { %v2481_v52 = vpop.xlane.xlu1 %2480 }
 0x71a   :  { %10567 = vrcp.f32 %v2481_v52 }
 0x71b   :  { %v12171_v25 = vpop.f32.mrb[20].mxu1 }
 0x71c   :  { %v9339_v49 = vpop.f32.mrb[21].mxu1 }
 0x71d   :  { %v2552_v24 = vpop.f32.mrb[22].mxu1  ;;  %v3155_v39 = vpop.xlane.xlu1 %3154  ;;  %v12233_v49 = vld [vmem:[%s12627_s15] sm:$0xff] }
 0x71e   :  { %v9340_v48 = vpop.f32.mrb[23].mxu1  ;;  %10569 = vrcp.f32 %v3155_v39 }
 0x720   :  { %v10566_v35 = vpop.eup %10565 }
 0x721   :  { %v2498_v46 = vsel %vm2485_vm1, %v10566_v35, 0.0  ;;  %v3152_v0 = vpop.xlane.xlu1 %3151 }
 0x722   :  { %v2502_v45 = vmul.f32 %v10554_v20, %v2498_v46  ;;  %10571 = vrcp.f32 %v3152_v0  ;;  %v3672_v46 = vpop.permute.xlu0 %3671 }
 0x723   :  { %v12175_v43 = vpop.f32.mrb[24].mxu1 }
 0x724   :  { %v10568_v56 = vpop.eup %10567  ;;  %v9345_v3 = vpop.f32.mrb[25].mxu1  ;;  %v2506_v12 = vpack.c.bf16 %v2502_v45, %v2502_v45 }
 0x725   :  { %v2499_v14 = vsel %vm2485_vm1, %v10568_v56, 0.0  ;;  %v2595_v29 = vpop.f32.mrb[26].mxu1  ;;  %v3161_v53 = vpop.xlane.xlu1 %3160 }
 0x726   :  { %v9346_v60 = vpop.f32.mrb[27].mxu1  ;;  %9350 = vmatmul.mubr.msk.bf16.vlgmr.msra.gmra.mrb[28].mxu1 %vm2445_vm11, %v2506_v12  ;;  %10573 = vrcp.f32 %v3161_v53  ;;  %v2503_v9 = vmul.f32 %v10556_v19, %v2499_v14 }
 0x727   :  { %9354 = vmatpush3.bf16.msra.mxu1 %v2511_v17  ;;  %9355 = vmatprep.mubr.msk.bf16.mxu1 %vm11318_vm15, %v11314_v11  ;;  %v3190_v17 = vpack.c.bf16 %v11774_v23, %v11774_v23 }
 0x728   :  { %9365 = vmatprep.subr.bf16.mxu1 %v11314_v11  ;;  %v10570_v34 = vpop.eup %10569  ;;  %v2507_v58 = vpack.c.bf16 %v2503_v9, %v2503_v9 }
 0x729   :  { %v3158_v54 = vpop.xlane.xlu1 %3157  ;;  %v3177_v38 = vsel %vm3165_vm2, %v10570_v34, 0.0  ;;  %v3288_v26 = vsel %vm1983_vm0, %v3190_v17, 0  ;;  %vm3804_vm0 = vcmp.gt.f32.partialorder %v12233_v49, 0.0 }
 0x72a   :  { %10575 = vrcp.f32 %v3158_v54  ;;  %v3181_v27 = vmul.f32 %v12148_v10, %v3177_v38  ;;  %v3874_v10 = vpack.c.bf16 %v11897_v2, %v11897_v2 }
 0x72c   :  { %v10572_v62 = vpop.eup %10571  ;;  %v3185_v23 = vpack.c.bf16 %v3181_v27, %v3181_v27  ;;  %v3883_v42 = vsel %vm3881_vm8, %v3874_v10, 0 }
 0x72d   :  { %v3176_v57 = vsel %vm3165_vm2, %v10572_v62, 0.0 }
 0x72e   :  { %9356 = vmatmul.mubr.msk.bf16.vlgmr.msra.gmra.mrb[32].mxu1 %vm2445_vm11, %v2507_v58  ;;  %v3180_v13 = vmul.f32 %v10560_v33, %v3176_v57 }
 0x72f   :  { %9366 = vmatpush3.bf16.msra.mxu1 %v3242_v4  ;;  %9367 = vmatprep.mubr.msk.bf16.mxu1 %vm11318_vm15, %v11314_v11 }
 0x730   :  { %9377 = vmatprep.subr.bf16.mxu1 %v11314_v11  ;;  %v3184_v20 = vpack.c.bf16 %v3180_v13, %v3180_v13  ;;  %v10574_v5 = vpop.eup %10573 }
 0x731   :  { %v3179_v55 = vsel %vm3165_vm2, %v10574_v5, 0.0 }
 0x732   :  { %9362 = vmatmul.mubr.msk.bf16.vlgmr.msra.gmra.mrb[20].mxu0 %vm3125_vm12, %v3184_v20  ;;  %v3183_v33 = vmul.f32 %v12153_v15, %v3179_v55  ;;  %v3929_v15 = vsel %vm3881_vm8, %v3875_v30, 0 }
 0x733   :  { %9372 = vmatpush3.bf16.msra.mxu0 %v3288_v26  ;;  %9373 = vmatprep.mubr.msk.bf16.mxu0 %vm11318_vm15, %v11314_v11 }
 0x734   :  { %v10576_v19 = vpop.eup %10575  ;;  %9383 = vmatprep.subr.bf16.mxu0 %v11314_v11  ;;  %v3187_v2 = vpack.c.bf16 %v3183_v33, %v3183_v33 }
 0x735   :  { %v3178_v41 = vsel %vm3165_vm2, %v10576_v19, 0.0 }
 0x736   :  { %9368 = vmatmul.mubr.msk.bf16.vlgmr.msra.gmra.mrb[36].mxu1 %vm3125_vm12, %v3185_v23  ;;  %v3182_v16 = vmul.f32 %v12157_v1, %v3178_v41 }
 0x737   :  { %9378 = vmatpush3.bf16.msra.mxu1 %v3334_v28  ;;  %9379 = vmatprep.mubr.msk.bf16.mxu1 %vm11318_vm15, %v11314_v11 }
 0x738   :  { %9389 = vmatprep.subr.bf16.mxu1 %v11314_v11  ;;  %v3186_v36 = vpack.c.bf16 %v3182_v16, %v3182_v16 }
 0x73a   :  { %9374 = vmatmul.mubr.msk.bf16.vlgmr.msra.gmra.mrb[24].mxu0 %vm3125_vm12, %v3186_v36 }
 0x73b   :  { %9384 = vmatpush3.bf16.msra.mxu0 %v3883_v42  ;;  %9385 = vmatprep.mubr.msk.bf16.mxu0 %vm11318_vm15, %v11314_v11 }
 0x73c   :  { %9395 = vmatprep.subr.bf16.mxu0 %v11314_v11 }
 0x73e   :  { %9380 = vmatmul.mubr.msk.bf16.vlgmr.msra.gmra.mrb[40].mxu1 %vm3125_vm12, %v3187_v2 }
 0x73f   :  { %9390 = vmatpush3.bf16.msra.mxu1 %v3929_v15  ;;  %9391 = vmatprep.mubr.msk.bf16.mxu1 %vm11318_vm15, %v11314_v11 }
 0x740   :  { %9401 = vmatprep.subr.bf16.mxu1 %v11314_v11 }
 0x74f   :  { %v3727_v7 = vpop.trf.xlu1 }
 0x750   :  { %v3750_v1 = vrot.slane %v3727_v7, %v11967_v59 }
 0x752   :  { %v3751_v51 = vcombine.high %v3750_v1, %v3750_v1  ;;  %v3758_v40 = vrot.slane %v3750_v1, %v11967_v59 }
 0x754   :  { %v3765_v50 = vrot.slane %v3751_v51, %v11967_v59  ;;  %v3766_v18 = vcombine.high %v3758_v40, %v3758_v40  ;;  %v3771_v52 = vrot.slane %v3758_v40, %v11907_v21 }
 0x756   :  { %v3767_v24 = vcombine.high %v3765_v50, %v3765_v50  ;;  %v3775_v39 = vrot.slane %v3765_v50, %v11907_v21  ;;  %v3779_v48 = vrot.slane %v3766_v18, %v11907_v21  ;;  %v3788_v35 = vadd.f32 %v3771_v52, %v12165_v31 }
 0x757   :  { %v3848_v52 = vsel %vm3811_vm4, %v12233_v49, 0.0 }
 0x758   :  { %v3783_v0 = vrot.slane %v3767_v24, %v11907_v21  ;;  %vm3792_vm3 = vcmp.gt.f32.partialorder %v3788_v35, 0.0  ;;  %v3796_v45 = vmul.f32 0.2, %v3788_v35  ;;  %v3789_v59 = vadd.f32 %v3775_v39, %v3672_v46 }
 0x759   :  { %v3790_v56 = vadd.f32 %v3779_v48, %v12167_v44 }
 0x75a   :  { %v3800_v3 = vsel %vm3792_vm3, %v3788_v35, %v3796_v45  ;;  %vm3793_vm5 = vcmp.gt.f32.partialorder %v3789_v59, 0.0  ;;  %v3797_v12 = vmul.f32 0.2, %v3789_v59  ;;  %v3791_v14 = vadd.f32 %v3783_v0, %v12169_v61  ;;  %v12278_v0 = vld [vmem:[#allocation20] sm:$0xf] }
 0x75b   :  { %v3807_v29 = vsel %vm3804_vm0, %v3800_v3, -1e+30  ;;  %vm3794_vm6 = vcmp.gt.f32.partialorder %v3790_v56, 0.0  ;;  %v3798_v31 = vmul.f32 0.2, %v3790_v56 }
 0x75c   :  { %v3812_v53 = vsel %vm3811_vm4, %v3807_v29, -inf  ;;  %v3801_v60 = vsel %vm3793_vm5, %v3789_v59, %v3797_v12  ;;  %vm3795_vm7 = vcmp.gt.f32.partialorder %v3791_v14, 0.0  ;;  %v3799_v9 = vmul.f32 0.2, %v3791_v14 }
 0x75d   :  { %3813 = vmax.xlane.f32.xlu0 %v3812_v53  ;;  %v3808_v54 = vsel %vm3804_vm0, %v3801_v60, -1e+30  ;;  %v3802_v44 = vsel %vm3794_vm6, %v3790_v56, %v3798_v31  ;;  %v3388_v56 = vrot.slane %v12278_v0, %v11924_v47 }
 0x75e   :  { %v3815_v34 = vsel %vm3811_vm4, %v3808_v54, -inf  ;;  %v3809_v61 = vsel %vm3804_vm0, %v3802_v44, -1e+30  ;;  %v3803_v8 = vsel %vm3795_vm7, %v3791_v14, %v3799_v9  ;;  %v3384_v44 = vrot.slane %v12278_v0, %v11910_v22 }
 0x75f   :  { %3816 = vmax.xlane.f32.xlu1 %v3815_v34  ;;  %v3818_v58 = vsel %vm3811_vm4, %v3809_v61, -inf  ;;  %v3810_v62 = vsel %vm3804_vm0, %v3803_v8, -1e+30  ;;  %v3392_v34 = vrot.slane %v12278_v0, %v11954_v32 }
 0x760   :  { %v3821_v38 = vsel %vm3811_vm4, %v3810_v62, -inf }
 0x761   :  { %3819 = vmax.xlane.f32.xlu0 %v3818_v58 }
 0x765   :  { %3822 = vmax.xlane.f32.xlu0 %v3821_v38 }
 0x7ea   :  { %v3814_v57 = vpop.xlane.xlu0 %3813 }
 0x7eb   :  { %v3824_v4 = vsub.f32 %v3807_v29, %v3814_v57 }
 0x7ec   :  { %v3817_v17 = vpop.xlane.xlu1 %3816 }
 0x7ed   :  { %v3828_v13 = vmul.f32 1.442695, %v3824_v4  ;;  %v3825_v27 = vsub.f32 %v3808_v54, %v3817_v17 }
 0x7ee   :  { %v3820_v20 = vpop.xlane.xlu0 %3819 }
 0x7ef   :  { %10577 = vpow2.f32 %v3828_v13  ;;  %v3830_v5 = vmul.f32 1.442695, %v3825_v27  ;;  %v3826_v37 = vsub.f32 %v3809_v61, %v3820_v20 }
 0x7f1   :  { %10579 = vpow2.f32 %v3830_v5  ;;  %v3832_v26 = vmul.f32 1.442695, %v3826_v37 }
 0x7f2   :  { %v3823_v23 = vpop.xlane.xlu0 %3822 }
 0x7f3   :  { %v3827_v19 = vsub.f32 %v3810_v62, %v3823_v23  ;;  %10581 = vpow2.f32 %v3832_v26 }
 0x7f5   :  { %v3834_v55 = vmul.f32 1.442695, %v3827_v19 }
 0x7f7   :  { %10583 = vpow2.f32 %v3834_v55 }
 0x7f9   :  { %v12254_v41 = vpop.eup %10577  ;;  %v12256_v28 = vpop.f32.mrb[28].mxu1 }
 0x7fa   :  { %v9351_v10 = vpop.f32.mrb[29].mxu1  ;;  %v3836_v16 = vsel %vm3811_vm4, %v12254_v41, 0.0 }
 0x7fb   :  { %v12260_v33 = vpop.eup %10579  ;;  %v2638_v36 = vpop.f32.mrb[30].mxu1  ;;  %3837 = vadd.xlane.f32.xlu0 %v3836_v16 }
 0x7fc   :  { %v9352_v30 = vpop.f32.mrb[31].mxu1  ;;  %v3839_v42 = vsel %vm3811_vm4, %v12260_v33, 0.0  ;;  %v9739_v36 = vld [vmem:[#allocation31 + $0x4] ss:$16 sps:$4 sm:$0xff]  }
 0x7fd   :  { %v12264_v2 = vpop.eup %10581 }
 0x7fe   :  { %v3842_v51 = vsel %vm3811_vm4, %v12264_v2, 0.0 }
 0x7ff   :  { %3840 = vadd.xlane.f32.xlu0 %v3839_v42 }
 0x801   :  { %v12266_v15 = vpop.eup %10583  ;;  %v12268_v7 = vpop.f32.mrb[32].mxu1 }
 0x802   :  { %v9357_v1 = vpop.f32.mrb[33].mxu1  ;;  %v3845_v40 = vsel %vm3811_vm4, %v12266_v15, 0.0 }
 0x803   :  { %v2681_v50 = vpop.f32.mrb[34].mxu1  ;;  %3843 = vadd.xlane.f32.xlu0 %v3842_v51  ;;  %3846 = vadd.xlane.f32.xlu1 %v3845_v40  ;;  %v9742_v40 = vld [vmem:[#allocation31 + $0x204] ss:$16 sps:$4 sm:$0xff]  }
 0x804   :  { %v9358_v18 = vpop.f32.mrb[35].mxu1 }
 0x805   :  { %v12276_v24 = vpop.f32.mrb[20].mxu0 }
 0x806   :  { %v9363_v39 = vpop.f32.mrb[21].mxu0 }
 0x807   :  { %3849 = vadd.xlane.f32.xlu0 %v3848_v52  ;;  %v3235_v48 = vpop.f32.mrb[22].mxu0 }
 0x808   :  { %v9364_v35 = vpop.f32.mrb[23].mxu0  ;;  %v9737_v48 = vld [vmem:[#allocation31] ss:$16 sps:$4 sm:$0xff]  }
 0x809   :  { %v3278_v46 = vpop.f32.mrb[36].mxu1 }
 0x80a   :  { %v9369_v45 = vpop.f32.mrb[37].mxu1  ;;  %v3398_v61 = vadd.f32 %v3384_v44, %v3278_v46  ;;  %v9745_v46 = vld [vmem:[#allocation31 + $0x24] ss:$16 sps:$4 sm:$0xff]  }
 0x80b   :  { %v3281_v59 = vpop.f32.mrb[38].mxu1  ;;  %v9763_v44 = vld [vmem:[#allocation31 + $0x84] ss:$16 sps:$4 sm:$0xff]  }
 0x80c   :  { %v9370_v3 = vpop.f32.mrb[39].mxu1  ;;  %v3406_v58 = vmin.f32 %v3398_v61, 0.0  ;;  %vm3402_vm11 = vcmp.gt.f32.partialorder %v3398_v61, 0.0 }
 0x80d   :  { %v3324_v12 = vpop.f32.mrb[24].mxu0 }
 0x80e   :  { %v12282_v14 = vadd.f32 %v3388_v56, %v3324_v12  ;;  %v9375_v29 = vpop.f32.mrb[25].mxu0  ;;  %v3411_v57 = vmul.f32 1.442695, %v3406_v58  ;;  %v9748_v56 = vld [vmem:[#allocation31 + $0x224] ss:$16 sps:$4 sm:$0xff]  }
 0x80f   :  { %v3327_v49 = vpop.f32.mrb[26].mxu0  ;;  %v9751_v12 = vld [vmem:[#allocation31 + $0x44] ss:$16 sps:$4 sm:$0xff]   ;;  %v9746_v29 = vld [vmem:[#allocation31 + $0x220] ss:$16 sps:$4 sm:$0xff]  }
 0x810   :  { %v9376_v31 = vpop.f32.mrb[27].mxu0  ;;  %v9754_v49 = vld [vmem:[#allocation31 + $0x244] ss:$16 sps:$4 sm:$0xff]   ;;  %vm3403_vm10 = vcmp.gt.f32.partialorder %v12282_v14, 0.0 }
 0x811   :  { %v3370_v53 = vpop.f32.mrb[40].mxu1  ;;  %v9749_v31 = vld [vmem:[#allocation31 + $0x40] ss:$16 sps:$4 sm:$0xff]   ;;  %v9769_v58 = vld [vmem:[#allocation31 + $0xa4] ss:$16 sps:$4 sm:$0xff]  }
 0x812   :  { %v9381_v60 = vpop.f32.mrb[41].mxu1  ;;  %v3400_v8 = vadd.f32 %v3392_v34, %v3370_v53  ;;  %v9757_v53 = vld [vmem:[#allocation31 + $0x64] ss:$16 sps:$4 sm:$0xff]   ;;  %v9758_v34 = vld [vmem:[#allocation31 + $0x260] ss:$16 sps:$4 sm:$0xff]  }
 0x813   :  { %v3373_v9 = vpop.f32.mrb[42].mxu1  ;;  %v9752_v60 = vld [vmem:[#allocation31 + $0x240] ss:$16 sps:$4 sm:$0xff]  }
 0x814   :  { %v9382_v54 = vpop.f32.mrb[43].mxu1  ;;  %v3408_v62 = vmin.f32 %v3400_v8, 0.0  ;;  %vm3404_vm9 = vcmp.gt.f32.partialorder %v3400_v8, 0.0  ;;  %v9760_v9 = vld [vmem:[#allocation31 + $0x264] ss:$16 sps:$4 sm:$0xff]  }
 0x815   :  { %v9755_v54 = vld [vmem:[#allocation31 + $0x60] ss:$16 sps:$4 sm:$0xff]  }
 0x816   :  { %v3415_v4 = vmul.f32 1.442695, %v3408_v62  ;;  %v9764_v62 = vld [vmem:[#allocation31 + $0x280] ss:$16 sps:$4 sm:$0xff]  }
 0x888   :  { %v3838_v38 = vpop.xlane.xlu0 %3837 }
 0x889   :  { %10585 = vrcp.f32 %v3838_v38  ;;  %v9772_v38 = vld [vmem:[#allocation31 + $0x2a4] ss:$16 sps:$4 sm:$0xff]  }
 0x88c   :  { %v3841_v17 = vpop.xlane.xlu0 %3840 }
 0x88d   :  { %10587 = vrcp.f32 %v3841_v17  ;;  %v9770_v17 = vld [vmem:[#allocation31 + $0x2a0] ss:$16 sps:$4 sm:$0xff]  }
 0x88e   :  { %10589 = vpow2.f32 %v3411_v57  ;;  %v9767_v57 = vld [vmem:[#allocation31 + $0xa0] ss:$16 sps:$4 sm:$0xff]  }
 0x88f   :  { %10591 = vpow2.f32 %v3415_v4  ;;  %v9775_v4 = vld [vmem:[#allocation31 + $0xc4] ss:$16 sps:$4 sm:$0xff]  }
 0x890   :  { %v3847_v13 = vpop.xlane.xlu1 %3846  ;;  %v3844_v27 = vpop.xlane.xlu0 %3843 }
 0x891   :  { %10593 = vrcp.f32 %v3847_v13  ;;  %v9778_v13 = vld [vmem:[#allocation31 + $0x2c4] ss:$16 sps:$4 sm:$0xff]  }
 0x892   :  { %10595 = vrcp.f32 %v3844_v27  ;;  %v9773_v27 = vld [vmem:[#allocation31 + $0xc0] ss:$16 sps:$4 sm:$0xff]  }
 0x893   :  { %v10586_v5 = vpop.eup %10585 }
 0x894   :  { %v3850_v20 = vpop.xlane.xlu0 %3849 }
 0x895   :  { %vm3851_vm8 = vcmp.gt.f32.partialorder %v3850_v20, 0.0  ;;  %v9781_v20 = vld [vmem:[#allocation31 + $0xe4] ss:$16 sps:$4 sm:$0xff]  }
 0x896   :  { %v3862_v37 = vsel %vm3851_vm8, %v10586_v5, 0.0  ;;  %v9776_v5 = vld [vmem:[#allocation31 + $0x2c0] ss:$16 sps:$4 sm:$0xff]  }
 0x897   :  { %v10588_v26 = vpop.eup %10587  ;;  %v3866_v23 = vmul.f32 %v12254_v41, %v3862_v37  ;;  %v9784_v37 = vld [vmem:[#allocation31 + $0x2e4] ss:$16 sps:$4 sm:$0xff]  }
 0x898   :  { %v10590_v19 = vpop.eup %10589  ;;  %v3863_v55 = vsel %vm3851_vm8, %v10588_v26, 0.0  ;;  %v9779_v26 = vld [vmem:[#allocation31 + $0xe0] ss:$16 sps:$4 sm:$0xff]  }
 0x899   :  { %v3867_v10 = vmul.f32 %v12260_v33, %v3863_v55  ;;  %v3870_v16 = vpack.c.bf16 %v3866_v23, %v3866_v23  ;;  %v10592_v30 = vpop.eup %10591  ;;  %v8693_v1 = vadd.f32 -1.0, %v10590_v19  ;;  %v3380_v23 = vrot.slane %v12278_v0, %v11907_v21  ;;  %v9787_v19 = vld [vmem:[#allocation31 + $0x104] ss:$16 sps:$4 sm:$0xff]   ;;  %v9782_v55 = vld [vmem:[#allocation31 + $0x2e0] ss:$16 sps:$4 sm:$0xff]  }
 0x89a   :  { %v8695_v41 = vadd.f32 -1.0, %v10592_v30  ;;  %v9793_v30 = vld [vmem:[#allocation31 + $0x124] ss:$16 sps:$4 sm:$0xff]  }
 0x89b   :  { %v10594_v42 = vpop.eup %10593  ;;  %v3871_v51 = vpack.c.bf16 %v3867_v10, %v3867_v10  ;;  %9386 = vmatmul.mubr.msk.bf16.vlgmr.msra.gmra.mrb[28].mxu0 %vm3811_vm4, %v3870_v16  ;;  %v9790_v10 = vld [vmem:[#allocation31 + $0x304] ss:$16 sps:$4 sm:$0xff]   ;;  %v9785_v16 = vld [vmem:[#allocation31 + $0x100] ss:$16 sps:$4 sm:$0xff]  }
 0x89c   :  { %v10596_v50 = vpop.eup %10595  ;;  %v3865_v18 = vsel %vm3851_vm8, %v10594_v42, 0.0  ;;  %9396 = vmatpush3.bf16.msra.mxu0 %v11930_v63  ;;  %9397 = vmatprep.mubr.msk.bf16.mxu0 %vm11318_vm15, %v11314_v11  ;;  %v12304_v63 = vsel %vm3402_vm11, %v3398_v61, %v8693_v1  ;;  %v12306_v45 = vsel %vm3404_vm9, %v3400_v8, %v8695_v41  ;;  %v9766_v61 = vld [vmem:[#allocation31 + $0x284] ss:$16 sps:$4 sm:$0xff]   ;;  %v9761_v8 = vld [vmem:[#allocation31 + $0x80] ss:$16 sps:$4 sm:$0xff]  }
 0x89d   :  { %v3864_v33 = vsel %vm3851_vm8, %v10596_v50, 0.0  ;;  %9392 = vmatmul.mubr.msk.bf16.vlgmr.msra.gmra.mrb[44].mxu1 %vm3811_vm4, %v3871_v51  ;;  %5017 = vmatprep.subr.bf16.mxu0 %v9739_v36  ;;  %v3869_v39 = vmul.f32 %v12266_v15, %v3865_v18  ;;  %v12310_v59 = vpack.c.bf16 %v12304_v63, %v12304_v63  ;;  %v9743_v15 = vld [vmem:[#allocation31 + $0x20] ss:$16 sps:$4 sm:$0xff]   ;;  %v12316_v3 = vpack.c.bf16 %v12306_v45, %v12306_v45  ;;  %v9796_v1 = vld [vmem:[#allocation31 + $0x324] ss:$16 sps:$4 sm:$0xff]  }
 0x89e   :  { %v3868_v52 = vmul.f32 %v12264_v2, %v3864_v33  ;;  %9402 = vmatpush3.bf16.msra.mxu1 %v11933_v6  ;;  %9403 = vmatprep.mubr.msk.bf16.mxu1 %vm11318_vm15, %v11314_v11  ;;  %v9740_v2 = vld [vmem:[#allocation31 + $0x200] ss:$16 sps:$4 sm:$0xff]   ;;  %v12323_v36 = vadd.f32 %v3380_v23, %v12276_v24  ;;  %v3407_v18 = vmin.f32 %v12282_v14, 0.0  ;;  %v9802_v41 = vld [vmem:[#allocation31 + $0x344] ss:$16 sps:$4 sm:$0xff]  }
 0x89f   :  { %5058 = vmatprep.subr.bf16.mxu1 %v9742_v40  ;;  %v3873_v6 = vpack.c.bf16 %v3869_v39, %v3869_v39  ;;  %v9788_v42 = vld [vmem:[#allocation31 + $0x300] ss:$16 sps:$4 sm:$0xff]   ;;  %v9799_v40 = vld [vmem:[#allocation31 + $0x144] ss:$16 sps:$4 sm:$0xff]   ;;  %v9836_v23 = vld [vmem:[#allocation31 + $0x208] ss:$16 sps:$4 sm:$0xff]  }
 0x8a0   :  { %v3872_v35 = vpack.c.bf16 %v3868_v52, %v3868_v52  ;;  %v9791_v51 = vld [vmem:[#allocation31 + $0x120] ss:$16 sps:$4 sm:$0xff]   ;;  %v3405_v0 = vmin.f32 %v12323_v36, 0.0  ;;  %v9805_v52 = vld [vmem:[#allocation31 + $0x164] ss:$16 sps:$4 sm:$0xff]   ;;  %vm3401_vm12 = vcmp.gt.f32.partialorder %v12323_v36, 0.0 }
 0x8a1   :  { %v9794_v50 = vld [vmem:[#allocation31 + $0x320] ss:$16 sps:$4 sm:$0xff]  }
 0x8a2   :  { %v9797_v24 = vld [vmem:[#allocation31 + $0x140] ss:$16 sps:$4 sm:$0xff]   ;;  %v3409_v33 = vmul.f32 1.442695, %v3405_v0  ;;  %v9859_v0 = vld [vmem:[#allocation31 + $0x8c] ss:$16 sps:$4 sm:$0xff]  }
 0x8a3   :  { %9398 = vmatmul.mubr.msk.bf16.vlgmr.msra.gmra.mrb[32].mxu0 %vm3811_vm4, %v3872_v35  ;;  %v9800_v39 = vld [vmem:[#allocation31 + $0x340] ss:$16 sps:$4 sm:$0xff]   ;;  %v9808_v35 = vld [vmem:[#allocation31 + $0x364] ss:$16 sps:$4 sm:$0xff]  }
 0x8a4   :  { %5018 = vmatpush1.bf16.msra.mxu0 %v9737_v48  ;;  %5049 = vmatprep.mubr.bf16.mxu0 %v12310_v59  ;;  %v3413_v48 = vmul.f32 1.442695, %v3407_v18  ;;  %10597 = vpow2.f32 %v3409_v33  ;;  %v9865_v18 = vld [vmem:[#allocation31 + $0xac] ss:$16 sps:$4 sm:$0xff]   ;;  %v9863_v33 = vld [vmem:[#allocation31 + $0xa8] ss:$16 sps:$4 sm:$0xff]  }
 0x8a5   :  { %9404 = vmatmul.mubr.msk.bf16.vlgmr.msra.gmra.mrb[48].mxu1 %vm3811_vm4, %v3873_v6  ;;  %5019 = vmatprep.subr.bf16.mxu0 %v9745_v46  ;;  %v9803_v46 = vld [vmem:[#allocation31 + $0x160] ss:$16 sps:$4 sm:$0xff]  }
 0x8a6   :  { %5059 = vmatpush1.bf16.msra.mxu1 %v9740_v2  ;;  %5090 = vmatprep.mubr.bf16.mxu1 %v12316_v3  ;;  %v9811_v2 = vld [vmem:[#allocation31 + $0x184] ss:$16 sps:$4 sm:$0xff]   ;;  %v9806_v6 = vld [vmem:[#allocation31 + $0x360] ss:$16 sps:$4 sm:$0xff]   ;;  %10599 = vpow2.f32 %v3413_v48  ;;  %v9874_v48 = vld [vmem:[#allocation31 + $0x2cc] ss:$16 sps:$4 sm:$0xff]  }
 0x8a7   :  { %5060 = vmatprep.subr.bf16.mxu1 %v9748_v56  ;;  %v9814_v56 = vld [vmem:[#allocation31 + $0x384] ss:$16 sps:$4 sm:$0xff]  }
 0x8a8   :  { %5020 = vmatpush1.bf16.msra.mxu0 %v9743_v15  ;;  %v9809_v15 = vld [vmem:[#allocation31 + $0x180] ss:$16 sps:$4 sm:$0xff]  }
 0x8a9   :  { %5021 = vmatprep.subr.bf16.mxu0 %v9751_v12  ;;  %v9817_v12 = vld [vmem:[#allocation31 + $0x1a4] ss:$16 sps:$4 sm:$0xff]  }
 0x8aa   :  { %5061 = vmatpush1.bf16.msra.mxu1 %v9746_v29  ;;  %v9812_v29 = vld [vmem:[#allocation31 + $0x380] ss:$16 sps:$4 sm:$0xff]  }
 0x8ab   :  { %5062 = vmatprep.subr.bf16.mxu1 %v9754_v49  ;;  %v9820_v49 = vld [vmem:[#allocation31 + $0x3a4] ss:$16 sps:$4 sm:$0xff]  }
 0x8ac   :  { %5022 = vmatpush1.bf16.msra.mxu0 %v9749_v31  ;;  %v9815_v31 = vld [vmem:[#allocation31 + $0x1a0] ss:$16 sps:$4 sm:$0xff]  }
 0x8ad   :  { %5023 = vmatprep.subr.bf16.mxu0 %v9757_v53  ;;  %v9823_v53 = vld [vmem:[#allocation31 + $0x1c4] ss:$16 sps:$4 sm:$0xff]  }
 0x8ae   :  { %5063 = vmatpush1.bf16.msra.mxu1 %v9752_v60  ;;  %v9818_v60 = vld [vmem:[#allocation31 + $0x3a0] ss:$16 sps:$4 sm:$0xff]  }
 0x8af   :  { %5064 = vmatprep.subr.bf16.mxu1 %v9760_v9  ;;  %v10598_v9 = vpop.eup %10597 }
 0x8b0   :  { %5024 = vmatpush1.bf16.msra.mxu0 %v9755_v54  ;;  %v9826_v54 = vld [vmem:[#allocation31 + $0x3c4] ss:$16 sps:$4 sm:$0xff]  }
 0x8b1   :  { %5025 = vmatprep.subr.bf16.mxu0 %v9763_v44  ;;  %v9821_v44 = vld [vmem:[#allocation31 + $0x1c0] ss:$16 sps:$4 sm:$0xff]  }
 0x8b2   :  { %5065 = vmatpush1.bf16.msra.mxu1 %v9758_v34  ;;  %v10600_v34 = vpop.eup %10599 }
 0x8b3   :  { %5066 = vmatprep.subr.bf16.mxu1 %v9766_v61  ;;  %v9829_v61 = vld [vmem:[#allocation31 + $0x1e4] ss:$16 sps:$4 sm:$0xff]  }
 0x8b4   :  { %5026 = vmatpush1.bf16.msra.mxu0 %v9761_v8  ;;  %v8692_v8 = vadd.f32 -1.0, %v10598_v9  ;;  %v9889_v9 = vld [vmem:[#allocation31 + $0x12c] ss:$16 sps:$4 sm:$0xff]  }
 0x8b5   :  { %5027 = vmatprep.subr.bf16.mxu0 %v9769_v58  ;;  %v9824_v58 = vld [vmem:[#allocation31 + $0x3c0] ss:$16 sps:$4 sm:$0xff]  }
 0x8b6   :  { %5067 = vmatpush1.bf16.msra.mxu1 %v9764_v62  ;;  %v9832_v62 = vld [vmem:[#allocation31 + $0x3e4] ss:$16 sps:$4 sm:$0xff]  }
 0x8b7   :  { %5068 = vmatprep.subr.bf16.mxu1 %v9772_v38  ;;  %v8694_v38 = vadd.f32 -1.0, %v10600_v34  ;;  %v9892_v34 = vld [vmem:[#allocation31 + $0x32c] ss:$16 sps:$4 sm:$0xff]  }
 0x8b8   :  { %5028 = vmatpush1.bf16.msra.mxu0 %v9767_v57  ;;  %v9827_v57 = vld [vmem:[#allocation31 + $0x1e0] ss:$16 sps:$4 sm:$0xff]  }
 0x8b9   :  { %5029 = vmatprep.subr.bf16.mxu0 %v9775_v4  ;;  %v9835_v4 = vld [vmem:[#allocation31 + $0xc] ss:$16 sps:$4 sm:$0xff]  }
 0x8ba   :  { %5069 = vmatpush1.bf16.msra.mxu1 %v9770_v17  ;;  %v12329_v17 = vsel %vm3401_vm12, %v12323_v36, %v8692_v8  ;;  %v9850_v36 = vld [vmem:[#allocation31 + $0x24c] ss:$16 sps:$4 sm:$0xff]   ;;  %v9887_v8 = vld [vmem:[#allocation31 + $0x128] ss:$16 sps:$4 sm:$0xff]  }
 0x8bb   :  { %5070 = vmatprep.subr.bf16.mxu1 %v9778_v13  ;;  %v9830_v13 = vld [vmem:[#allocation31 + $0x3e0] ss:$16 sps:$4 sm:$0xff]  }
 0x8bc   :  { %5030 = vmatpush1.bf16.msra.mxu0 %v9773_v27  ;;  %v9838_v27 = vld [vmem:[#allocation31 + $0x20c] ss:$16 sps:$4 sm:$0xff]  }
 0x8bd   :  { %5031 = vmatprep.subr.bf16.mxu0 %v9781_v20  ;;  %v12333_v20 = vsel %vm3403_vm10, %v12282_v14, %v8694_v38  ;;  %v9839_v14 = vld [vmem:[#allocation31 + $0x28] ss:$16 sps:$4 sm:$0xff]  }
 0x8be   :  { %5071 = vmatpush1.bf16.msra.mxu1 %v9776_v5  ;;  %v9833_v5 = vld [vmem:[#allocation31 + $0x8] ss:$16 sps:$4 sm:$0xff]  }
 0x8bf   :  { %5072 = vmatprep.subr.bf16.mxu1 %v9784_v37  ;;  %v12337_v37 = vpack.c.bf16 %v12329_v17, %v12329_v17  ;;  %v9890_v38 = vld [vmem:[#allocation31 + $0x328] ss:$16 sps:$4 sm:$0xff]  }
 0x8c0   :  { %5032 = vmatpush1.bf16.msra.mxu0 %v9779_v26  ;;  %v9841_v26 = vld [vmem:[#allocation31 + $0x2c] ss:$16 sps:$4 sm:$0xff]  }
 0x8c1   :  { %5033 = vmatprep.subr.bf16.mxu0 %v9787_v19  ;;  %v12341_v19 = vpack.c.bf16 %v12333_v20, %v12333_v20 }
 0x8c2   :  { %5073 = vmatpush1.bf16.msra.mxu1 %v9782_v55  ;;  %v9844_v55 = vld [vmem:[#allocation31 + $0x22c] ss:$16 sps:$4 sm:$0xff]  }
 0x8c3   :  { %5074 = vmatprep.subr.bf16.mxu1 %v9790_v10  ;;  %v9847_v10 = vld [vmem:[#allocation31 + $0x4c] ss:$16 sps:$4 sm:$0xff]  }
 0x8c4   :  { %5034 = vmatpush1.bf16.msra.mxu0 %v9785_v16  ;;  %v9842_v16 = vld [vmem:[#allocation31 + $0x228] ss:$16 sps:$4 sm:$0xff]  }
 0x8c5   :  { %5035 = vmatprep.subr.bf16.mxu0 %v9793_v30  ;;  %v9845_v30 = vld [vmem:[#allocation31 + $0x48] ss:$16 sps:$4 sm:$0xff]  }
 0x8c6   :  { %5075 = vmatpush1.bf16.msra.mxu1 %v9788_v42  ;;  %v9853_v42 = vld [vmem:[#allocation31 + $0x6c] ss:$16 sps:$4 sm:$0xff]  }
 0x8c7   :  { %5076 = vmatprep.subr.bf16.mxu1 %v9796_v1  ;;  %v9848_v1 = vld [vmem:[#allocation31 + $0x248] ss:$16 sps:$4 sm:$0xff]  }
 0x8c8   :  { %5036 = vmatpush1.bf16.msra.mxu0 %v9791_v51  ;;  %v9856_v51 = vld [vmem:[#allocation31 + $0x26c] ss:$16 sps:$4 sm:$0xff]  }
 0x8c9   :  { %5037 = vmatprep.subr.bf16.mxu0 %v9799_v40  ;;  %v9854_v40 = vld [vmem:[#allocation31 + $0x268] ss:$16 sps:$4 sm:$0xff]  }
 0x8ca   :  { %5077 = vmatpush1.bf16.msra.mxu1 %v9794_v50  ;;  %v9862_v50 = vld [vmem:[#allocation31 + $0x28c] ss:$16 sps:$4 sm:$0xff]  }
 0x8cb   :  { %5078 = vmatprep.subr.bf16.mxu1 %v9802_v41  ;;  %v9860_v41 = vld [vmem:[#allocation31 + $0x288] ss:$16 sps:$4 sm:$0xff]  }
 0x8cc   :  { %5038 = vmatpush1.bf16.msra.mxu0 %v9797_v24  ;;  %v9868_v24 = vld [vmem:[#allocation31 + $0x2ac] ss:$16 sps:$4 sm:$0xff]  }
 0x8cd   :  { %5039 = vmatprep.subr.bf16.mxu0 %v9805_v52  ;;  %v9871_v52 = vld [vmem:[#allocation31 + $0xcc] ss:$16 sps:$4 sm:$0xff]  }
 0x8ce   :  { %5079 = vmatpush1.bf16.msra.mxu1 %v9800_v39  ;;  %v9866_v39 = vld [vmem:[#allocation31 + $0x2a8] ss:$16 sps:$4 sm:$0xff]  }
 0x8cf   :  { %5080 = vmatprep.subr.bf16.mxu1 %v9808_v35  ;;  %v9869_v35 = vld [vmem:[#allocation31 + $0xc8] ss:$16 sps:$4 sm:$0xff]  }
 0x8d0   :  { %5040 = vmatpush1.bf16.msra.mxu0 %v9803_v46  ;;  %v9877_v46 = vld [vmem:[#allocation31 + $0xec] ss:$16 sps:$4 sm:$0xff]  }
 0x8d1   :  { %5041 = vmatprep.subr.bf16.mxu0 %v9811_v2  ;;  %v9872_v2 = vld [vmem:[#allocation31 + $0x2c8] ss:$16 sps:$4 sm:$0xff]  }
 0x8d2   :  { %5081 = vmatpush1.bf16.msra.mxu1 %v9806_v6  ;;  %v9880_v6 = vld [vmem:[#allocation31 + $0x2ec] ss:$16 sps:$4 sm:$0xff]  }
 0x8d3   :  { %5082 = vmatprep.subr.bf16.mxu1 %v9814_v56  ;;  %v9875_v56 = vld [vmem:[#allocation31 + $0xe8] ss:$16 sps:$4 sm:$0xff]  }
 0x8d4   :  { %5042 = vmatpush1.bf16.msra.mxu0 %v9809_v15  ;;  %v12347_v15 = vld [vmem:[#allocation14] sm:$0xf] }
 0x8d5   :  { %5043 = vmatprep.subr.bf16.mxu0 %v9817_v12  ;;  %v9883_v12 = vld [vmem:[#allocation31 + $0x10c] ss:$16 sps:$4 sm:$0xff]  }
 0x8d6   :  { %5083 = vmatpush1.bf16.msra.mxu1 %v9812_v29  ;;  %v2692_v29 = vrot.slane %v12347_v15, %v11910_v22 }
 0x8d7   :  { %5084 = vmatprep.subr.bf16.mxu1 %v9820_v49  ;;  %v9878_v49 = vld [vmem:[#allocation31 + $0x2e8] ss:$16 sps:$4 sm:$0xff]  }
 0x8d8   :  { %5044 = vmatpush1.bf16.msra.mxu0 %v9815_v31  ;;  %v9886_v31 = vld [vmem:[#allocation31 + $0x30c] ss:$16 sps:$4 sm:$0xff]  }
 0x8d9   :  { %5045 = vmatprep.subr.bf16.mxu0 %v9823_v53  ;;  %v2700_v53 = vrot.slane %v12347_v15, %v11954_v32 }
 0x8da   :  { %5085 = vmatpush1.bf16.msra.mxu1 %v9818_v60  ;;  %v9881_v60 = vld [vmem:[#allocation31 + $0x108] ss:$16 sps:$4 sm:$0xff]  }
 0x8db   :  { %5086 = vmatprep.subr.bf16.mxu1 %v9826_v54  ;;  %v12354_v54 = vadd.f32 %v2692_v29, %v12175_v43 }
 0x8dc   :  { %5046 = vmatpush1.bf16.msra.mxu0 %v9821_v44  ;;  %v9884_v44 = vld [vmem:[#allocation31 + $0x308] ss:$16 sps:$4 sm:$0xff]  }
 0x8dd   :  { %5047 = vmatprep.subr.bf16.mxu0 %v9829_v61  ;;  %v12357_v61 = vadd.f32 %v2700_v53, %v12268_v7  ;;  %v9896_v7 = vld [vmem:[#allocation31 + $0x348] ss:$16 sps:$4 sm:$0xff]   ;;  %vm2710_vm13 = vcmp.gt.f32.partialorder %v12354_v54, 0.0 }
 0x8de   :  { %5087 = vmatpush1.bf16.msra.mxu1 %v9824_v58  ;;  %v9895_v58 = vld [vmem:[#allocation31 + $0x14c] ss:$16 sps:$4 sm:$0xff]  }
 0x8df   :  { %5088 = vmatprep.subr.bf16.mxu1 %v9832_v62  ;;  %v2714_v62 = vmin.f32 %v12354_v54, 0.0  ;;  %v2716_v43 = vmin.f32 %v12357_v61, 0.0  ;;  %vm2712_vm14 = vcmp.gt.f32.partialorder %v12357_v61, 0.0 }
 0x8e0   :  { %5048 = vmatpush1.bf16.msra.mxu0 %v9827_v57  ;;  %v9898_v57 = vld [vmem:[#allocation31 + $0x34c] ss:$16 sps:$4 sm:$0xff]  }
 0x8e1   :  { %5099 = vmatprep.subr.bf16.mxu0 %v9835_v4  ;;  %v9893_v4 = vld [vmem:[#allocation31 + $0x148] ss:$16 sps:$4 sm:$0xff]  }
 0x8e2   :  { %5089 = vmatpush1.bf16.msra.mxu1 %v9830_v13  ;;  %v9901_v13 = vld [vmem:[#allocation31 + $0x16c] ss:$16 sps:$4 sm:$0xff]  }
 0x8e3   :  { %5050 = vmatmul.mubr.bf16.vlgmr.msra.gmra.mrb[36].mxu0 %v12337_v37  ;;  %5140 = vmatprep.subr.bf16.mxu1 %v9838_v27  ;;  %v2719_v27 = vmul.f32 1.442695, %v2714_v62  ;;  %v9950_v62 = vld [vmem:[#allocation29 + $0x260] ss:$16 sps:$4 sm:$0xff]  }
 0x8e4   :  { %5100 = vmatpush1.bf16.msra.mxu0 %v9833_v5  ;;  %5131 = vmatprep.mubr.bf16.mxu0 %v12310_v59  ;;  %v9851_v59 = vld [vmem:[#allocation31 + $0x68] ss:$16 sps:$4 sm:$0xff]   ;;  %v9904_v5 = vld [vmem:[#allocation31 + $0x36c] ss:$16 sps:$4 sm:$0xff]  }
 0x8e5   :  { %5091 = vmatmul.mubr.bf16.vlgmr.msra.gmra.mrb[52].mxu1 %v12341_v19  ;;  %5101 = vmatprep.subr.bf16.mxu0 %v9841_v26  ;;  %v2723_v26 = vmul.f32 1.442695, %v2716_v43  ;;  %10601 = vpow2.f32 %v2719_v27  ;;  %v9961_v43 = vld [vmem:[#allocation29 + $0xa4] ss:$16 sps:$4 sm:$0xff]   ;;  %v9959_v27 = vld [vmem:[#allocation29 + $0xa0] ss:$16 sps:$4 sm:$0xff]  }
 0x8e6   :  { %5141 = vmatpush1.bf16.msra.mxu1 %v9836_v23  ;;  %5172 = vmatprep.mubr.bf16.mxu1 %v12316_v3  ;;  %v9857_v3 = vld [vmem:[#allocation31 + $0x88] ss:$16 sps:$4 sm:$0xff]  }
 0x8e7   :  { %5142 = vmatprep.subr.bf16.mxu1 %v9844_v55  ;;  %v9899_v23 = vld [vmem:[#allocation31 + $0x168] ss:$16 sps:$4 sm:$0xff]   ;;  %v9907_v55 = vld [vmem:[#allocation31 + $0x18c] ss:$16 sps:$4 sm:$0xff]   ;;  %10603 = vpow2.f32 %v2723_v26  ;;  %v9970_v26 = vld [vmem:[#allocation29 + $0x2c4] ss:$16 sps:$4 sm:$0xff]  }
 0x8e8   :  { %5102 = vmatpush1.bf16.msra.mxu0 %v9839_v14  ;;  %v9902_v14 = vld [vmem:[#allocation31 + $0x368] ss:$16 sps:$4 sm:$0xff]  }
 0x8e9   :  { %5103 = vmatprep.subr.bf16.mxu0 %v9847_v10  ;;  %v9910_v10 = vld [vmem:[#allocation31 + $0x38c] ss:$16 sps:$4 sm:$0xff]  }
 0x8ea   :  { %5143 = vmatpush1.bf16.msra.mxu1 %v9842_v16  ;;  %v9905_v16 = vld [vmem:[#allocation31 + $0x188] ss:$16 sps:$4 sm:$0xff]  }
 0x8eb   :  { %5144 = vmatprep.subr.bf16.mxu1 %v9850_v36  ;;  %v9913_v36 = vld [vmem:[#allocation31 + $0x1ac] ss:$16 sps:$4 sm:$0xff]  }
 0x8ec   :  { %5104 = vmatpush1.bf16.msra.mxu0 %v9845_v30  ;;  %v9908_v30 = vld [vmem:[#allocation31 + $0x388] ss:$16 sps:$4 sm:$0xff]  }
 0x8ed   :  { %5105 = vmatprep.subr.bf16.mxu0 %v9853_v42  ;;  %v9916_v42 = vld [vmem:[#allocation31 + $0x3ac] ss:$16 sps:$4 sm:$0xff]  }
 0x8ee   :  { %5145 = vmatpush1.bf16.msra.mxu1 %v9848_v1  ;;  %v9911_v1 = vld [vmem:[#allocation31 + $0x1a8] ss:$16 sps:$4 sm:$0xff]  }
 0x8ef   :  { %5146 = vmatprep.subr.bf16.mxu1 %v9856_v51  ;;  %v9919_v51 = vld [vmem:[#allocation31 + $0x1cc] ss:$16 sps:$4 sm:$0xff]  }
 0x8f0   :  { %5106 = vmatpush1.bf16.msra.mxu0 %v9851_v59  ;;  %v9914_v59 = vld [vmem:[#allocation31 + $0x3a8] ss:$16 sps:$4 sm:$0xff]  }
 0x8f1   :  { %5107 = vmatprep.subr.bf16.mxu0 %v9859_v0  ;;  %v9922_v0 = vld [vmem:[#allocation31 + $0x3cc] ss:$16 sps:$4 sm:$0xff]  }
 0x8f2   :  { %5147 = vmatpush1.bf16.msra.mxu1 %v9854_v40  ;;  %v10602_v40 = vpop.eup %10601 }
 0x8f3   :  { %5148 = vmatprep.subr.bf16.mxu1 %v9862_v50  ;;  %v9917_v50 = vld [vmem:[#allocation31 + $0x1c8] ss:$16 sps:$4 sm:$0xff]  }
 0x8f4   :  { %5108 = vmatpush1.bf16.msra.mxu0 %v9857_v3  ;;  %v9925_v3 = vld [vmem:[#allocation31 + $0x1ec] ss:$16 sps:$4 sm:$0xff]  }
 0x8f5   :  { %5109 = vmatprep.subr.bf16.mxu0 %v9865_v18  ;;  %v10604_v18 = vpop.eup %10603 }
 0x8f6   :  { %5149 = vmatpush1.bf16.msra.mxu1 %v9860_v41  ;;  %v9920_v41 = vld [vmem:[#allocation31 + $0x3c8] ss:$16 sps:$4 sm:$0xff]  }
 0x8f7   :  { %5150 = vmatprep.subr.bf16.mxu1 %v9868_v24  ;;  %v8685_v24 = vadd.f32 -1.0, %v10602_v40  ;;  %v9985_v40 = vld [vmem:[#allocation29 + $0x124] ss:$16 sps:$4 sm:$0xff]  }
 0x8f8   :  { %5110 = vmatpush1.bf16.msra.mxu0 %v9863_v33  ;;  %v9928_v33 = vld [vmem:[#allocation31 + $0x3ec] ss:$16 sps:$4 sm:$0xff]  }
 0x8f9   :  { %5111 = vmatprep.subr.bf16.mxu0 %v9871_v52  ;;  %v9923_v52 = vld [vmem:[#allocation31 + $0x1e8] ss:$16 sps:$4 sm:$0xff]  }
 0x8fa   :  { %5151 = vmatpush1.bf16.msra.mxu1 %v9866_v39  ;;  %v8687_v39 = vadd.f32 -1.0, %v10604_v18  ;;  %v9988_v18 = vld [vmem:[#allocation29 + $0x324] ss:$16 sps:$4 sm:$0xff]  }
 0x8fb   :  { %5152 = vmatprep.subr.bf16.mxu1 %v9874_v48  ;;  %v9931_v48 = vld [vmem:[#allocation29 + $0x4] ss:$16 sps:$4 sm:$0xff]  }
 0x8fc   :  { %5112 = vmatpush1.bf16.msra.mxu0 %v9869_v35  ;;  %v9926_v35 = vld [vmem:[#allocation31 + $0x3e8] ss:$16 sps:$4 sm:$0xff]  }
 0x8fd   :  { %5113 = vmatprep.subr.bf16.mxu0 %v9877_v46  ;;  %v12363_v46 = vsel %vm2710_vm13, %v12354_v54, %v8685_v24  ;;  %v9938_v54 = vld [vmem:[#allocation29 + $0x220] ss:$16 sps:$4 sm:$0xff]   ;;  %v9991_v24 = vld [vmem:[#allocation29 + $0x144] ss:$16 sps:$4 sm:$0xff]  }
 0x8fe   :  { %5153 = vmatpush1.bf16.msra.mxu1 %v9872_v2  ;;  %v9934_v2 = vld [vmem:[#allocation29 + $0x204] ss:$16 sps:$4 sm:$0xff]   ;;  %v12371_v29 = vpack.c.bf16 %v12363_v46, %v12363_v46 }
 0x8ff   :  { %5154 = vmatprep.subr.bf16.mxu1 %v9880_v6  ;;  %v9929_v6 = vld [vmem:[#allocation29] ss:$16 sps:$4 sm:$0xff]  }
 0x900   :  { %5114 = vmatpush1.bf16.msra.mxu0 %v9875_v56  ;;  %v12367_v56 = vsel %vm2712_vm14, %v12357_v61, %v8687_v39  ;;  %v9944_v61 = vld [vmem:[#allocation29 + $0x240] ss:$16 sps:$4 sm:$0xff]  }
 0x901   :  { %5115 = vmatprep.subr.bf16.mxu0 %v9883_v12  ;;  %v9937_v12 = vld [vmem:[#allocation29 + $0x24] ss:$16 sps:$4 sm:$0xff]   ;;  %v12377_v53 = vpack.c.bf16 %v12367_v56, %v12367_v56  ;;  %v9989_v39 = vld [vmem:[#allocation29 + $0x140] ss:$16 sps:$4 sm:$0xff]  }
 0x902   :  { %5155 = vmatpush1.bf16.msra.mxu1 %v9878_v49  ;;  %v9932_v49 = vld [vmem:[#allocation29 + $0x200] ss:$16 sps:$4 sm:$0xff]  }
 0x903   :  { %5156 = vmatprep.subr.bf16.mxu1 %v9886_v31  ;;  %v9940_v31 = vld [vmem:[#allocation29 + $0x224] ss:$16 sps:$4 sm:$0xff]  }
 0x904   :  { %5116 = vmatpush1.bf16.msra.mxu0 %v9881_v60  ;;  %v9935_v60 = vld [vmem:[#allocation29 + $0x20] ss:$16 sps:$4 sm:$0xff]  }
 0x905   :  { %5117 = vmatprep.subr.bf16.mxu0 %v9889_v9  ;;  %v9943_v9 = vld [vmem:[#allocation29 + $0x44] ss:$16 sps:$4 sm:$0xff]  }
 0x906   :  { %5157 = vmatpush1.bf16.msra.mxu1 %v9884_v44  ;;  %v9941_v44 = vld [vmem:[#allocation29 + $0x40] ss:$16 sps:$4 sm:$0xff]  }
 0x907   :  { %5158 = vmatprep.subr.bf16.mxu1 %v9892_v34  ;;  %v9949_v34 = vld [vmem:[#allocation29 + $0x64] ss:$16 sps:$4 sm:$0xff]  }
 0x908   :  { %5118 = vmatpush1.bf16.msra.mxu0 %v9887_v8  ;;  %v9952_v8 = vld [vmem:[#allocation29 + $0x264] ss:$16 sps:$4 sm:$0xff]  }
 0x909   :  { %5119 = vmatprep.subr.bf16.mxu0 %v9895_v58  ;;  %v9947_v58 = vld [vmem:[#allocation29 + $0x60] ss:$16 sps:$4 sm:$0xff]  }
 0x90a   :  { %5159 = vmatpush1.bf16.msra.mxu1 %v9890_v38  ;;  %v9958_v38 = vld [vmem:[#allocation29 + $0x284] ss:$16 sps:$4 sm:$0xff]  }
 0x90b   :  { %5160 = vmatprep.subr.bf16.mxu1 %v9898_v57  ;;  %v9953_v57 = vld [vmem:[#allocation29 + $0x80] ss:$16 sps:$4 sm:$0xff]  }
 0x90c   :  { %5120 = vmatpush1.bf16.msra.mxu0 %v9893_v4  ;;  %v9956_v4 = vld [vmem:[#allocation29 + $0x280] ss:$16 sps:$4 sm:$0xff]  }
 0x90d   :  { %5121 = vmatprep.subr.bf16.mxu0 %v9901_v13  ;;  %v9964_v13 = vld [vmem:[#allocation29 + $0x2a4] ss:$16 sps:$4 sm:$0xff]  }
 0x90e   :  { %5161 = vmatpush1.bf16.msra.mxu1 %v9896_v7  ;;  %v9967_v7 = vld [vmem:[#allocation29 + $0xc4] ss:$16 sps:$4 sm:$0xff]  }
 0x90f   :  { %5162 = vmatprep.subr.bf16.mxu1 %v9904_v5  ;;  %v9962_v5 = vld [vmem:[#allocation29 + $0x2a0] ss:$16 sps:$4 sm:$0xff]  }
 0x910   :  { %5122 = vmatpush1.bf16.msra.mxu0 %v9899_v23  ;;  %v9965_v23 = vld [vmem:[#allocation29 + $0xc0] ss:$16 sps:$4 sm:$0xff]  }
 0x911   :  { %5123 = vmatprep.subr.bf16.mxu0 %v9907_v55  ;;  %v9973_v55 = vld [vmem:[#allocation29 + $0xe4] ss:$16 sps:$4 sm:$0xff]  }
 0x912   :  { %5163 = vmatpush1.bf16.msra.mxu1 %v9902_v14  ;;  %v9968_v14 = vld [vmem:[#allocation29 + $0x2c0] ss:$16 sps:$4 sm:$0xff]  }
 0x913   :  { %5164 = vmatprep.subr.bf16.mxu1 %v9910_v10  ;;  %v9976_v10 = vld [vmem:[#allocation29 + $0x2e4] ss:$16 sps:$4 sm:$0xff]  }
 0x914   :  { %5124 = vmatpush1.bf16.msra.mxu0 %v9905_v16  ;;  %v9971_v16 = vld [vmem:[#allocation29 + $0xe0] ss:$16 sps:$4 sm:$0xff]  }
 0x915   :  { %5125 = vmatprep.subr.bf16.mxu0 %v9913_v36  ;;  %v2688_v36 = vrot.slane %v12347_v15, %v11907_v21 }
 0x916   :  { %5165 = vmatpush1.bf16.msra.mxu1 %v9908_v30  ;;  %v9979_v30 = vld [vmem:[#allocation29 + $0x104] ss:$16 sps:$4 sm:$0xff]  }
 0x917   :  { %5166 = vmatprep.subr.bf16.mxu1 %v9916_v42  ;;  %v9974_v42 = vld [vmem:[#allocation29 + $0x2e0] ss:$16 sps:$4 sm:$0xff]  }
 0x918   :  { %5126 = vmatpush1.bf16.msra.mxu0 %v9911_v1  ;;  %v2696_v1 = vrot.slane %v12347_v15, %v11924_v47 }
 0x919   :  { %5127 = vmatprep.subr.bf16.mxu0 %v9919_v51  ;;  %v9982_v51 = vld [vmem:[#allocation29 + $0x304] ss:$16 sps:$4 sm:$0xff]  }
 0x91a   :  { %5167 = vmatpush1.bf16.msra.mxu1 %v9914_v59  ;;  %v9977_v59 = vld [vmem:[#allocation29 + $0x100] ss:$16 sps:$4 sm:$0xff]  }
 0x91b   :  { %5168 = vmatprep.subr.bf16.mxu1 %v9922_v0  ;;  %v12386_v0 = vadd.f32 %v2688_v36, %v12171_v25  ;;  %v10033_v36 = vld [vmem:[#allocation29 + $0x2c] ss:$16 sps:$4 sm:$0xff]  }
 0x91c   :  { %5128 = vmatpush1.bf16.msra.mxu0 %v9917_v50  ;;  %v9980_v50 = vld [vmem:[#allocation29 + $0x300] ss:$16 sps:$4 sm:$0xff]  }
 0x91d   :  { %5129 = vmatprep.subr.bf16.mxu0 %v9925_v3  ;;  %v12389_v3 = vadd.f32 %v2696_v1, %v12256_v28  ;;  %v2713_v15 = vmin.f32 %v12386_v0, 0.0  ;;  %v9997_v28 = vld [vmem:[#allocation29 + $0x164] ss:$16 sps:$4 sm:$0xff]   ;;  %vm2709_vm1 = vcmp.gt.f32.partialorder %v12386_v0, 0.0  ;;  %v10036_v1 = vld [vmem:[#allocation29 + $0x22c] ss:$16 sps:$4 sm:$0xff]  }
 0x91e   :  { %5169 = vmatpush1.bf16.msra.mxu1 %v9920_v41  ;;  %v9983_v41 = vld [vmem:[#allocation29 + $0x120] ss:$16 sps:$4 sm:$0xff]  }
 0x91f   :  { %5170 = vmatprep.subr.bf16.mxu1 %v9928_v33  ;;  %v9986_v33 = vld [vmem:[#allocation29 + $0x320] ss:$16 sps:$4 sm:$0xff]   ;;  %v2715_v25 = vmin.f32 %v12389_v3, 0.0  ;;  %vm2711_vm2 = vcmp.gt.f32.partialorder %v12389_v3, 0.0 }
 0x920   :  { %5130 = vmatpush1.bf16.msra.mxu0 %v9923_v52  ;;  %v9994_v52 = vld [vmem:[#allocation29 + $0x344] ss:$16 sps:$4 sm:$0xff]  }
 0x921   :  { %5821 = vmatprep.subr.bf16.mxu0 %v9931_v48  ;;  %v2717_v48 = vmul.f32 1.442695, %v2713_v15  ;;  %v10051_v15 = vld [vmem:[#allocation29 + $0x8c] ss:$16 sps:$4 sm:$0xff]  }
 0x922   :  { %5171 = vmatpush1.bf16.msra.mxu1 %v9926_v35  ;;  %v9992_v35 = vld [vmem:[#allocation29 + $0x340] ss:$16 sps:$4 sm:$0xff]  }
 0x923   :  { %5132 = vmatmul.mubr.bf16.vlgmr.msra.gmra.mrb[40].mxu0 %v12337_v37  ;;  %5862 = vmatprep.subr.bf16.mxu1 %v9934_v2  ;;  %v9946_v37 = vld [vmem:[#allocation29 + $0x244] ss:$16 sps:$4 sm:$0xff]   ;;  %v2721_v2 = vmul.f32 1.442695, %v2715_v25  ;;  %10605 = vpow2.f32 %v2717_v48  ;;  %v10054_v25 = vld [vmem:[#allocation29 + $0x28c] ss:$16 sps:$4 sm:$0xff]  }
 0x924   :  { %5822 = vmatpush1.bf16.msra.mxu0 %v9929_v6  ;;  %5853 = vmatprep.mubr.bf16.mxu0 %v12371_v29  ;;  %v10000_v6 = vld [vmem:[#allocation29 + $0x364] ss:$16 sps:$4 sm:$0xff]   ;;  %v10049_v48 = vld [vmem:[#allocation29 + $0x88] ss:$16 sps:$4 sm:$0xff]  }
 0x925   :  { %5173 = vmatmul.mubr.bf16.vlgmr.msra.gmra.mrb[56].mxu1 %v12341_v19  ;;  %5823 = vmatprep.subr.bf16.mxu0 %v9937_v12  ;;  %v9955_v19 = vld [vmem:[#allocation29 + $0x84] ss:$16 sps:$4 sm:$0xff]   ;;  %v9995_v12 = vld [vmem:[#allocation29 + $0x160] ss:$16 sps:$4 sm:$0xff]   ;;  %10607 = vpow2.f32 %v2721_v2  ;;  %v10057_v2 = vld [vmem:[#allocation29 + $0xac] ss:$16 sps:$4 sm:$0xff]  }
 0x926   :  { %5863 = vmatpush1.bf16.msra.mxu1 %v9932_v49  ;;  %5894 = vmatprep.mubr.bf16.mxu1 %v12377_v53  ;;  %v10003_v49 = vld [vmem:[#allocation29 + $0x184] ss:$16 sps:$4 sm:$0xff]  }
 0x927   :  { %5864 = vmatprep.subr.bf16.mxu1 %v9940_v31  ;;  %v9998_v31 = vld [vmem:[#allocation29 + $0x360] ss:$16 sps:$4 sm:$0xff]  }
 0x928   :  { %5824 = vmatpush1.bf16.msra.mxu0 %v9935_v60  ;;  %v10006_v60 = vld [vmem:[#allocation29 + $0x384] ss:$16 sps:$4 sm:$0xff]  }
 0x929   :  { %5825 = vmatprep.subr.bf16.mxu0 %v9943_v9  ;;  %v10001_v9 = vld [vmem:[#allocation29 + $0x180] ss:$16 sps:$4 sm:$0xff]  }
 0x92a   :  { %5865 = vmatpush1.bf16.msra.mxu1 %v9938_v54  ;;  %v10009_v54 = vld [vmem:[#allocation29 + $0x1a4] ss:$16 sps:$4 sm:$0xff]  }
 0x92b   :  { %5866 = vmatprep.subr.bf16.mxu1 %v9946_v37  ;;  %v10004_v37 = vld [vmem:[#allocation29 + $0x380] ss:$16 sps:$4 sm:$0xff]  }
 0x92c   :  { %5826 = vmatpush1.bf16.msra.mxu0 %v9941_v44  ;;  %v10012_v44 = vld [vmem:[#allocation29 + $0x3a4] ss:$16 sps:$4 sm:$0xff]  }
 0x92d   :  { %5827 = vmatprep.subr.bf16.mxu0 %v9949_v34  ;;  %v10007_v34 = vld [vmem:[#allocation29 + $0x1a0] ss:$16 sps:$4 sm:$0xff]  }
 0x92e   :  { %5867 = vmatpush1.bf16.msra.mxu1 %v9944_v61  ;;  %v10015_v61 = vld [vmem:[#allocation29 + $0x1c4] ss:$16 sps:$4 sm:$0xff]  }
 0x92f   :  { %5868 = vmatprep.subr.bf16.mxu1 %v9952_v8  ;;  %v10010_v8 = vld [vmem:[#allocation29 + $0x3a0] ss:$16 sps:$4 sm:$0xff]  }
 0x930   :  { %5828 = vmatpush1.bf16.msra.mxu0 %v9947_v58  ;;  %v10606_v58 = vpop.eup %10605 }
 0x931   :  { %5829 = vmatprep.subr.bf16.mxu0 %v9955_v19  ;;  %v10018_v19 = vld [vmem:[#allocation29 + $0x3c4] ss:$16 sps:$4 sm:$0xff]  }
 0x932   :  { %5869 = vmatpush1.bf16.msra.mxu1 %v9950_v62  ;;  %v10013_v62 = vld [vmem:[#allocation29 + $0x1c0] ss:$16 sps:$4 sm:$0xff]  }
 0x933   :  { %5870 = vmatprep.subr.bf16.mxu1 %v9958_v38  ;;  %v10608_v38 = vpop.eup %10607 }
 0x934   :  { %5830 = vmatpush1.bf16.msra.mxu0 %v9953_v57  ;;  %v10021_v57 = vld [vmem:[#allocation29 + $0x1e4] ss:$16 sps:$4 sm:$0xff]  }
 0x935   :  { %5831 = vmatprep.subr.bf16.mxu0 %v9961_v43  ;;  %v8684_v43 = vadd.f32 -1.0, %v10606_v58  ;;  %v10066_v58 = vld [vmem:[#allocation29 + $0x2cc] ss:$16 sps:$4 sm:$0xff]  }
 0x936   :  { %5871 = vmatpush1.bf16.msra.mxu1 %v9956_v4  ;;  %v10016_v4 = vld [vmem:[#allocation29 + $0x3c0] ss:$16 sps:$4 sm:$0xff]  }
 0x937   :  { %5872 = vmatprep.subr.bf16.mxu1 %v9964_v13  ;;  %v10024_v13 = vld [vmem:[#allocation29 + $0x3e4] ss:$16 sps:$4 sm:$0xff]  }
 0x938   :  { %5832 = vmatpush1.bf16.msra.mxu0 %v9959_v27  ;;  %v8686_v27 = vadd.f32 -1.0, %v10608_v38  ;;  %v10061_v38 = vld [vmem:[#allocation29 + $0xc8] ss:$16 sps:$4 sm:$0xff]  }
 0x939   :  { %5833 = vmatprep.subr.bf16.mxu0 %v9967_v7  ;;  %v10019_v7 = vld [vmem:[#allocation29 + $0x1e0] ss:$16 sps:$4 sm:$0xff]  }
 0x93a   :  { %5873 = vmatpush1.bf16.msra.mxu1 %v9962_v5  ;;  %v10027_v5 = vld [vmem:[#allocation29 + $0xc] ss:$16 sps:$4 sm:$0xff]  }
 0x93b   :  { %5874 = vmatprep.subr.bf16.mxu1 %v9970_v26  ;;  %v12395_v26 = vsel %vm2709_vm1, %v12386_v0, %v8684_v43  ;;  %v10034_v0 = vld [vmem:[#allocation29 + $0x228] ss:$16 sps:$4 sm:$0xff]  }
 0x93c   :  { %5834 = vmatpush1.bf16.msra.mxu0 %v9965_v23  ;;  %v10022_v23 = vld [vmem:[#allocation29 + $0x3e0] ss:$16 sps:$4 sm:$0xff]  }
 0x93d   :  { %5835 = vmatprep.subr.bf16.mxu0 %v9973_v55  ;;  %v10030_v55 = vld [vmem:[#allocation29 + $0x20c] ss:$16 sps:$4 sm:$0xff]  }
 0x93e   :  { %5875 = vmatpush1.bf16.msra.mxu1 %v9968_v14  ;;  %v12399_v14 = vsel %vm2711_vm2, %v12389_v3, %v8686_v27  ;;  %v10045_v3 = vld [vmem:[#allocation29 + $0x6c] ss:$16 sps:$4 sm:$0xff]   ;;  %v10064_v27 = vld [vmem:[#allocation29 + $0x2c8] ss:$16 sps:$4 sm:$0xff]  }
 0x93f   :  { %5876 = vmatprep.subr.bf16.mxu1 %v9976_v10  ;;  %v10025_v10 = vld [vmem:[#allocation29 + $0x8] ss:$16 sps:$4 sm:$0xff]  }
 0x940   :  { %5836 = vmatpush1.bf16.msra.mxu0 %v9971_v16  ;;  %v12403_v16 = vpack.c.bf16 %v12395_v26, %v12395_v26 }
 0x941   :  { %5837 = vmatprep.subr.bf16.mxu0 %v9979_v30  ;;  %v10028_v30 = vld [vmem:[#allocation29 + $0x208] ss:$16 sps:$4 sm:$0xff]  }
 0x942   :  { %5877 = vmatpush1.bf16.msra.mxu1 %v9974_v42  ;;  %v12407_v42 = vpack.c.bf16 %v12399_v14, %v12399_v14 }
 0x943   :  { %5878 = vmatprep.subr.bf16.mxu1 %v9982_v51  ;;  %v10031_v51 = vld [vmem:[#allocation29 + $0x28] ss:$16 sps:$4 sm:$0xff]  }
 0x944   :  { %5838 = vmatpush1.bf16.msra.mxu0 %v9977_v59  ;;  %v10039_v59 = vld [vmem:[#allocation29 + $0x4c] ss:$16 sps:$4 sm:$0xff]  }
 0x945   :  { %5839 = vmatprep.subr.bf16.mxu0 %v9985_v40  ;;  %v10042_v40 = vld [vmem:[#allocation29 + $0x24c] ss:$16 sps:$4 sm:$0xff]  }
 0x946   :  { %5879 = vmatpush1.bf16.msra.mxu1 %v9980_v50  ;;  %v10037_v50 = vld [vmem:[#allocation29 + $0x48] ss:$16 sps:$4 sm:$0xff]  }
 0x947   :  { %5880 = vmatprep.subr.bf16.mxu1 %v9988_v18  ;;  %v10040_v18 = vld [vmem:[#allocation29 + $0x248] ss:$16 sps:$4 sm:$0xff]  }
 0x948   :  { %5840 = vmatpush1.bf16.msra.mxu0 %v9983_v41  ;;  %v10048_v41 = vld [vmem:[#allocation29 + $0x26c] ss:$16 sps:$4 sm:$0xff]  }
 0x949   :  { %5841 = vmatprep.subr.bf16.mxu0 %v9991_v24 }
 0x94a   :  { %5881 = vmatpush1.bf16.msra.mxu1 %v9986_v33  ;;  %v10046_v33 = vld [vmem:[#allocation29 + $0x268] ss:$16 sps:$4 sm:$0xff]  }
 0x94b   :  { %5882 = vmatprep.subr.bf16.mxu1 %v9994_v52 }
 0x94c   :  { %5842 = vmatpush1.bf16.msra.mxu0 %v9989_v39 }
 0x94d   :  { %5843 = vmatprep.subr.bf16.mxu0 %v9997_v28 }
 0x94e   :  { %5883 = vmatpush1.bf16.msra.mxu1 %v9992_v35 }
 0x94f   :  { %5884 = vmatprep.subr.bf16.mxu1 %v10000_v6  ;;  %v12415_v6 = vld [vmem:[#allocation28] sm:$0xf] }
 0x950   :  { %5844 = vmatpush1.bf16.msra.mxu0 %v9995_v12 }
 0x951   :  { %5845 = vmatprep.subr.bf16.mxu0 %v10003_v49  ;;  %v10052_v49 = vld [vmem:[#allocation29 + $0x288] ss:$16 sps:$4 sm:$0xff]  }
 0x952   :  { %5885 = vmatpush1.bf16.msra.mxu1 %v9998_v31 }
 0x953   :  { %5886 = vmatprep.subr.bf16.mxu1 %v10006_v60  ;;  %v4075_v60 = vrot.slane %v12415_v6, %v11924_v47 }
 0x954   :  { %5846 = vmatpush1.bf16.msra.mxu0 %v10001_v9  ;;  %v10060_v9 = vld [vmem:[#allocation29 + $0x2ac] ss:$16 sps:$4 sm:$0xff]  }
 0x955   :  { %5847 = vmatprep.subr.bf16.mxu0 %v10009_v54  ;;  %v10055_v54 = vld [vmem:[#allocation29 + $0xa8] ss:$16 sps:$4 sm:$0xff]  }
 0x956   :  { %5887 = vmatpush1.bf16.msra.mxu1 %v10004_v37  ;;  %v10063_v37 = vld [vmem:[#allocation29 + $0xcc] ss:$16 sps:$4 sm:$0xff]  }
 0x957   :  { %5888 = vmatprep.subr.bf16.mxu1 %v10012_v44 }
 0x958   :  { %5848 = vmatpush1.bf16.msra.mxu0 %v10007_v34  ;;  %v10058_v34 = vld [vmem:[#allocation29 + $0x2a8] ss:$16 sps:$4 sm:$0xff]  }
 0x959   :  { %5849 = vmatprep.subr.bf16.mxu0 %v10015_v61 }
 0x95a   :  { %5889 = vmatpush1.bf16.msra.mxu1 %v10010_v8 }
 0x95b   :  { %5890 = vmatprep.subr.bf16.mxu1 %v10018_v19 }
 0x95c   :  { %5850 = vmatpush1.bf16.msra.mxu0 %v10013_v62 }
 0x95d   :  { %5851 = vmatprep.subr.bf16.mxu0 %v10021_v57 }
 0x95e   :  { %5891 = vmatpush1.bf16.msra.mxu1 %v10016_v4  ;;  %v10069_v4 = vld [vmem:[#allocation29 + $0xec] ss:$16 sps:$4 sm:$0xff]  }
 0x95f   :  { %5892 = vmatprep.subr.bf16.mxu1 %v10024_v13 }
 0x960   :  { %5852 = vmatpush1.bf16.msra.mxu0 %v10019_v7 }
 0x961   :  { %5903 = vmatprep.subr.bf16.mxu0 %v10027_v5  ;;  %v10072_v5 = vld [vmem:[#allocation29 + $0x2ec] ss:$16 sps:$4 sm:$0xff]  }
 0x962   :  { %5893 = vmatpush1.bf16.msra.mxu1 %v10022_v23  ;;  %v10067_v23 = vld [vmem:[#allocation29 + $0xe8] ss:$16 sps:$4 sm:$0xff]  }
 0x963   :  { %5854 = vmatmul.mubr.bf16.vlgmr.msra.gmra.mrb[44].mxu0 %v12403_v16  ;;  %5944 = vmatprep.subr.bf16.mxu1 %v10030_v55  ;;  %v10075_v55 = vld [vmem:[#allocation29 + $0x10c] ss:$16 sps:$4 sm:$0xff]  }
 0x964   :  { %5904 = vmatpush1.bf16.msra.mxu0 %v10025_v10  ;;  %5935 = vmatprep.mubr.bf16.mxu0 %v12371_v29  ;;  %v10043_v29 = vld [vmem:[#allocation29 + $0x68] ss:$16 sps:$4 sm:$0xff]   ;;  %v4071_v10 = vrot.slane %v12415_v6, %v11910_v22 }
 0x965   :  { %5895 = vmatmul.mubr.bf16.vlgmr.msra.gmra.mrb[60].mxu1 %v12407_v42  ;;  %5905 = vmatprep.subr.bf16.mxu0 %v10033_v36  ;;  %v10070_v36 = vld [vmem:[#allocation29 + $0x2e8] ss:$16 sps:$4 sm:$0xff]  }
 0x966   :  { %5945 = vmatpush1.bf16.msra.mxu1 %v10028_v30  ;;  %5976 = vmatprep.mubr.bf16.mxu1 %v12377_v53  ;;  %v10078_v30 = vld [vmem:[#allocation29 + $0x30c] ss:$16 sps:$4 sm:$0xff]  }
 0x967   :  { %5946 = vmatprep.subr.bf16.mxu1 %v10036_v1  ;;  %v4079_v1 = vrot.slane %v12415_v6, %v11954_v32 }
 0x968   :  { %5906 = vmatpush1.bf16.msra.mxu0 %v10031_v51  ;;  %v10073_v51 = vld [vmem:[#allocation29 + $0x108] ss:$16 sps:$4 sm:$0xff]  }
 0x969   :  { %5907 = vmatprep.subr.bf16.mxu0 %v10039_v59  ;;  %v10081_v59 = vld [vmem:[#allocation29 + $0x12c] ss:$16 sps:$4 sm:$0xff]  }
 0x96a   :  { %5947 = vmatpush1.bf16.msra.mxu1 %v10034_v0 }
 0x96b   :  { %5948 = vmatprep.subr.bf16.mxu1 %v10042_v40  ;;  %v10076_v40 = vld [vmem:[#allocation29 + $0x308] ss:$16 sps:$4 sm:$0xff]  }
 0x96c   :  { %5908 = vmatpush1.bf16.msra.mxu0 %v10037_v50  ;;  %v10084_v50 = vld [vmem:[#allocation29 + $0x32c] ss:$16 sps:$4 sm:$0xff]  }
 0x96d   :  { %5909 = vmatprep.subr.bf16.mxu0 %v10045_v3 }
 0x96e   :  { %5949 = vmatpush1.bf16.msra.mxu1 %v10040_v18  ;;  %v12413_v24 = vpop.f32.mrb[28].mxu0  ;;  %v10079_v18 = vld [vmem:[#allocation29 + $0x128] ss:$16 sps:$4 sm:$0xff]  }
 0x96f   :  { %v9387_v53 = vpop.f32.mrb[29].mxu0  ;;  %5950 = vmatprep.subr.bf16.mxu1 %v10048_v41  ;;  %v10087_v41 = vld [vmem:[#allocation29 + $0x14c] ss:$16 sps:$4 sm:$0xff]  }
 0x970   :  { %5910 = vmatpush1.bf16.msra.mxu0 %v10043_v29  ;;  %v3922_v52 = vpop.f32.mrb[30].mxu0  ;;  %v3965_v39 = vpop.f32.mrb[44].mxu1 }
 0x971   :  { %v9388_v28 = vpop.f32.mrb[31].mxu0  ;;  %v9393_v35 = vpop.f32.mrb[45].mxu1  ;;  %5911 = vmatprep.subr.bf16.mxu0 %v10051_v15  ;;  %v12425_v0 = vadd.f32 %v4071_v10, %v3965_v39  ;;  %v10082_v15 = vld [vmem:[#allocation29 + $0x328] ss:$16 sps:$4 sm:$0xff]   ;;  %v10093_v52 = vld [vmem:[#allocation29 + $0x16c] ss:$16 sps:$4 sm:$0xff]  }
 0x972   :  { %5951 = vmatpush1.bf16.msra.mxu1 %v10046_v33  ;;  %v3968_v12 = vpop.f32.mrb[46].mxu1  ;;  %v10090_v33 = vld [vmem:[#allocation29 + $0x34c] ss:$16 sps:$4 sm:$0xff]   ;;  %v10126_v10 = vld [vmem:[#allocation35 + $0x204] ss:$16 sps:$4 sm:$0xff]  }
 0x973   :  { %v9394_v31 = vpop.f32.mrb[47].mxu1  ;;  %5952 = vmatprep.subr.bf16.mxu1 %v10054_v25  ;;  %v4093_v29 = vmin.f32 %v12425_v0, 0.0  ;;  %v10085_v25 = vld [vmem:[#allocation29 + $0x148] ss:$16 sps:$4 sm:$0xff]   ;;  %v10096_v28 = vld [vmem:[#allocation29 + $0x36c] ss:$16 sps:$4 sm:$0xff]  }
 0x974   :  { %5912 = vmatpush1.bf16.msra.mxu0 %v10049_v48  ;;  %v10088_v48 = vld [vmem:[#allocation29 + $0x348] ss:$16 sps:$4 sm:$0xff]   ;;  %v10099_v12 = vld [vmem:[#allocation29 + $0x18c] ss:$16 sps:$4 sm:$0xff]   ;;  %vm4089_vm0 = vcmp.gt.f32.partialorder %v12425_v0, 0.0 }
 0x975   :  { %5913 = vmatprep.subr.bf16.mxu0 %v10057_v2  ;;  %v4098_v39 = vmul.f32 1.442695, %v4093_v29  ;;  %v10091_v2 = vld [vmem:[#allocation29 + $0x168] ss:$16 sps:$4 sm:$0xff]   ;;  %v10102_v31 = vld [vmem:[#allocation29 + $0x38c] ss:$16 sps:$4 sm:$0xff]  }
 0x976   :  { %5953 = vmatpush1.bf16.msra.mxu1 %v10052_v49  ;;  %v4011_v44 = vpop.f32.mrb[32].mxu0  ;;  %v10094_v49 = vld [vmem:[#allocation29 + $0x368] ss:$16 sps:$4 sm:$0xff]  }
 0x977   :  { %v12419_v61 = vadd.f32 %v4075_v60, %v4011_v44  ;;  %v9399_v8 = vpop.f32.mrb[33].mxu0  ;;  %5954 = vmatprep.subr.bf16.mxu1 %v10060_v9  ;;  %10609 = vpow2.f32 %v4098_v39  ;;  %v10097_v60 = vld [vmem:[#allocation29 + $0x188] ss:$16 sps:$4 sm:$0xff]   ;;  %v10105_v9 = vld [vmem:[#allocation29 + $0x1ac] ss:$16 sps:$4 sm:$0xff]  }
 0x978   :  { %5914 = vmatpush1.bf16.msra.mxu0 %v10055_v54  ;;  %v4014_v19 = vpop.f32.mrb[34].mxu0  ;;  %v4057_v62 = vpop.f32.mrb[48].mxu1  ;;  %v10100_v54 = vld [vmem:[#allocation29 + $0x388] ss:$16 sps:$4 sm:$0xff]   ;;  %v10145_v39 = vld [vmem:[#allocation35 + $0x80] ss:$16 sps:$4 sm:$0xff]  }
 0x979   :  { %v9400_v57 = vpop.f32.mrb[35].mxu0  ;;  %v9405_v43 = vpop.f32.mrb[49].mxu1  ;;  %5915 = vmatprep.subr.bf16.mxu0 %v10063_v37  ;;  %v12427_v3 = vadd.f32 %v4079_v1, %v4057_v62  ;;  %v10108_v37 = vld [vmem:[#allocation29 + $0x3ac] ss:$16 sps:$4 sm:$0xff]   ;;  %v10103_v44 = vld [vmem:[#allocation29 + $0x1a8] ss:$16 sps:$4 sm:$0xff]  }
 0x97a   :  { %5955 = vmatpush1.bf16.msra.mxu1 %v10058_v34  ;;  %v4060_v13 = vpop.f32.mrb[50].mxu1  ;;  %v10111_v34 = vld [vmem:[#allocation29 + $0x1cc] ss:$16 sps:$4 sm:$0xff]   ;;  %v10106_v8 = vld [vmem:[#allocation29 + $0x3a8] ss:$16 sps:$4 sm:$0xff]   ;;  %vm4090_vm5 = vcmp.gt.f32.partialorder %v12419_v61, 0.0 }
 0x97b   :  { %v9406_v7 = vpop.f32.mrb[51].mxu1  ;;  %5956 = vmatprep.subr.bf16.mxu1 %v10066_v58  ;;  %v4095_v53 = vmin.f32 %v12427_v3, 0.0  ;;  %v10114_v58 = vld [vmem:[#allocation29 + $0x3cc] ss:$16 sps:$4 sm:$0xff]   ;;  %v10109_v62 = vld [vmem:[#allocation29 + $0x1c8] ss:$16 sps:$4 sm:$0xff]  }
 0x97c   :  { %5916 = vmatpush1.bf16.msra.mxu0 %v10061_v38  ;;  %v10117_v38 = vld [vmem:[#allocation29 + $0x1ec] ss:$16 sps:$4 sm:$0xff]   ;;  %v10112_v43 = vld [vmem:[#allocation29 + $0x3c8] ss:$16 sps:$4 sm:$0xff]   ;;  %vm4091_vm3 = vcmp.gt.f32.partialorder %v12427_v3, 0.0 }
 0x97d   :  { %5917 = vmatprep.subr.bf16.mxu0 %v10069_v4  ;;  %v4102_v35 = vmul.f32 1.442695, %v4095_v53  ;;  %v10120_v13 = vld [vmem:[#allocation29 + $0x3ec] ss:$16 sps:$4 sm:$0xff]   ;;  %v10129_v1 = vld [vmem:[#allocation35 + $0x24] ss:$16 sps:$4 sm:$0xff]  }
 0x97e   :  { %5957 = vmatpush1.bf16.msra.mxu1 %v10064_v27  ;;  %v10115_v27 = vld [vmem:[#allocation29 + $0x1e8] ss:$16 sps:$4 sm:$0xff]   ;;  %v10139_v53 = vld [vmem:[#allocation35 + $0x60] ss:$16 sps:$4 sm:$0xff]  }
 0x97f   :  { %5958 = vmatprep.subr.bf16.mxu1 %v10072_v5  ;;  %10611 = vpow2.f32 %v4102_v35  ;;  %v10123_v5 = vld [vmem:[#allocation35 + $0x4] ss:$16 sps:$4 sm:$0xff]  }
 0x980   :  { %5918 = vmatpush1.bf16.msra.mxu0 %v10067_v23  ;;  %v10118_v23 = vld [vmem:[#allocation29 + $0x3e8] ss:$16 sps:$4 sm:$0xff]  }
 0x981   :  { %5919 = vmatprep.subr.bf16.mxu0 %v10075_v55  ;;  %v10610_v19 = vpop.eup %10609  ;;  %v10141_v29 = vld [vmem:[#allocation35 + $0x64] ss:$16 sps:$4 sm:$0xff]  }
 0x982   :  { %5959 = vmatpush1.bf16.msra.mxu1 %v10070_v36  ;;  %v8701_v4 = vadd.f32 -1.0, %v10610_v19  ;;  %v10121_v36 = vld [vmem:[#allocation35] ss:$16 sps:$4 sm:$0xff]   ;;  %v10156_v35 = vld [vmem:[#allocation35 + $0x2a4] ss:$16 sps:$4 sm:$0xff]  }
 0x983   :  { %5960 = vmatprep.subr.bf16.mxu1 %v10078_v30  ;;  %v10165_v19 = vld [vmem:[#allocation35 + $0xe4] ss:$16 sps:$4 sm:$0xff]  }
 0x984   :  { %5920 = vmatpush1.bf16.msra.mxu0 %v10073_v51  ;;  %v12433_v55 = vsel %vm4089_vm0, %v12425_v0, %v8701_v4  ;;  %v10132_v0 = vld [vmem:[#allocation35 + $0x224] ss:$16 sps:$4 sm:$0xff]  }
 0x985   :  { %5921 = vmatprep.subr.bf16.mxu0 %v10081_v59  ;;  %v12441_v51 = vpack.c.bf16 %v12433_v55, %v12433_v55  ;;  %v10124_v59 = vld [vmem:[#allocation35 + $0x200] ss:$16 sps:$4 sm:$0xff]   ;;  %v10168_v4 = vld [vmem:[#allocation35 + $0x2e4] ss:$16 sps:$4 sm:$0xff]  }
 0x986   :  { %5961 = vmatpush1.bf16.msra.mxu1 %v10076_v40 }
 0x987   :  { %5962 = vmatprep.subr.bf16.mxu1 %v10084_v50  ;;  %v10127_v50 = vld [vmem:[#allocation35 + $0x20] ss:$16 sps:$4 sm:$0xff]  }
 0x988   :  { %5922 = vmatpush1.bf16.msra.mxu0 %v10079_v18  ;;  %v10130_v18 = vld [vmem:[#allocation35 + $0x220] ss:$16 sps:$4 sm:$0xff]  }
 0x989   :  { %5923 = vmatprep.subr.bf16.mxu0 %v10087_v41  ;;  %v10612_v57 = vpop.eup %10611  ;;  %v10133_v41 = vld [vmem:[#allocation35 + $0x40] ss:$16 sps:$4 sm:$0xff]  }
 0x98a   :  { %5963 = vmatpush1.bf16.msra.mxu1 %v10082_v15  ;;  %v8703_v7 = vadd.f32 -1.0, %v10612_v57  ;;  %v10136_v15 = vld [vmem:[#allocation35 + $0x240] ss:$16 sps:$4 sm:$0xff]  }
 0x98b   :  { %5964 = vmatprep.subr.bf16.mxu1 %v10090_v33  ;;  %v10144_v33 = vld [vmem:[#allocation35 + $0x264] ss:$16 sps:$4 sm:$0xff]   ;;  %v10160_v57 = vld [vmem:[#allocation35 + $0x2c0] ss:$16 sps:$4 sm:$0xff]  }
 0x98c   :  { %5924 = vmatpush1.bf16.msra.mxu0 %v10085_v25  ;;  %v12437_v30 = vsel %vm4091_vm3, %v12427_v3, %v8703_v7  ;;  %v10135_v3 = vld [vmem:[#allocation35 + $0x44] ss:$16 sps:$4 sm:$0xff]   ;;  %v10142_v25 = vld [vmem:[#allocation35 + $0x260] ss:$16 sps:$4 sm:$0xff]  }
 0x98d   :  { %5925 = vmatprep.subr.bf16.mxu0 %v10093_v52  ;;  %v12447_v40 = vpack.c.bf16 %v12437_v30, %v12437_v30  ;;  %v10150_v52 = vld [vmem:[#allocation35 + $0x284] ss:$16 sps:$4 sm:$0xff]  }
 0x98e   :  { %5965 = vmatpush1.bf16.msra.mxu1 %v10088_v48  ;;  %v10153_v48 = vld [vmem:[#allocation35 + $0xa4] ss:$16 sps:$4 sm:$0xff]  }
 0x98f   :  { %5966 = vmatprep.subr.bf16.mxu1 %v10096_v28  ;;  %v10148_v28 = vld [vmem:[#allocation35 + $0x280] ss:$16 sps:$4 sm:$0xff]   ;;  %v10171_v7 = vld [vmem:[#allocation35 + $0x104] ss:$16 sps:$4 sm:$0xff]  }
 0x990   :  { %5926 = vmatpush1.bf16.msra.mxu0 %v10091_v2  ;;  %v10151_v2 = vld [vmem:[#allocation35 + $0xa0] ss:$16 sps:$4 sm:$0xff]  }
 0x991   :  { %5927 = vmatprep.subr.bf16.mxu0 %v10099_v12  ;;  %v10159_v12 = vld [vmem:[#allocation35 + $0xc4] ss:$16 sps:$4 sm:$0xff]  }
 0x992   :  { %5967 = vmatpush1.bf16.msra.mxu1 %v10094_v49 }
 0x993   :  { %5968 = vmatprep.subr.bf16.mxu1 %v10102_v31  ;;  %v10154_v31 = vld [vmem:[#allocation35 + $0x2a0] ss:$16 sps:$4 sm:$0xff]  }
 0x994   :  { %5928 = vmatpush1.bf16.msra.mxu0 %v10097_v60 }
 0x995   :  { %5929 = vmatprep.subr.bf16.mxu0 %v10105_v9  ;;  %v10162_v9 = vld [vmem:[#allocation35 + $0x2c4] ss:$16 sps:$4 sm:$0xff]  }
 0x996   :  { %5969 = vmatpush1.bf16.msra.mxu1 %v10100_v54 }
 0x997   :  { %5970 = vmatprep.subr.bf16.mxu1 %v10108_v37 }
 0x998   :  { %5930 = vmatpush1.bf16.msra.mxu0 %v10103_v44  ;;  %v10157_v44 = vld [vmem:[#allocation35 + $0xc0] ss:$16 sps:$4 sm:$0xff]  }
 0x999   :  { %5931 = vmatprep.subr.bf16.mxu0 %v10111_v34 }
 0x99a   :  { %5971 = vmatpush1.bf16.msra.mxu1 %v10106_v8 }
 0x99b   :  { %5972 = vmatprep.subr.bf16.mxu1 %v10114_v58 }
 0x99c   :  { %5932 = vmatpush1.bf16.msra.mxu0 %v10109_v62 }
 0x99d   :  { %5933 = vmatprep.subr.bf16.mxu0 %v10117_v38 }
 0x99e   :  { %5973 = vmatpush1.bf16.msra.mxu1 %v10112_v43 }
 0x99f   :  { %5974 = vmatprep.subr.bf16.mxu1 %v10120_v13  ;;  %v10163_v13 = vld [vmem:[#allocation35 + $0xe0] ss:$16 sps:$4 sm:$0xff]  }
 0x9a0   :  { %5934 = vmatpush1.bf16.msra.mxu0 %v10115_v27  ;;  %v4067_v27 = vrot.slane %v12415_v6, %v11907_v21 }
 0x9a1   :  { %6955 = vmatprep.subr.bf16.mxu0 %v10123_v5  ;;  %v10166_v5 = vld [vmem:[#allocation35 + $0x2e0] ss:$16 sps:$4 sm:$0xff]  }
 0x9a2   :  { %5975 = vmatpush1.bf16.msra.mxu1 %v10118_v23  ;;  %v10174_v23 = vld [vmem:[#allocation35 + $0x304] ss:$16 sps:$4 sm:$0xff]  }
 0x9a3   :  { %5936 = vmatmul.mubr.bf16.vlgmr.msra.gmra.mrb[48].mxu0 %v12403_v16  ;;  %6996 = vmatprep.subr.bf16.mxu1 %v10126_v10  ;;  %v10138_v16 = vld [vmem:[#allocation35 + $0x244] ss:$16 sps:$4 sm:$0xff]   ;;  %v10169_v10 = vld [vmem:[#allocation35 + $0x100] ss:$16 sps:$4 sm:$0xff]  }
 0x9a4   :  { %6956 = vmatpush1.bf16.msra.mxu0 %v10121_v36  ;;  %6987 = vmatprep.mubr.bf16.mxu0 %v12441_v51  ;;  %v12458_v36 = vadd.f32 %v4067_v27, %v12413_v24  ;;  %v10181_v24 = vld [vmem:[#allocation35 + $0x140] ss:$16 sps:$4 sm:$0xff]  }
 0x9a5   :  { %5977 = vmatmul.mubr.bf16.vlgmr.msra.gmra.mrb[64].mxu1 %v12407_v42  ;;  %6957 = vmatprep.subr.bf16.mxu0 %v10129_v1  ;;  %v10147_v42 = vld [vmem:[#allocation35 + $0x84] ss:$16 sps:$4 sm:$0xff]   ;;  %v10214_v27 = vld [vmem:[#allocation35 + $0x3e0] ss:$16 sps:$4 sm:$0xff]  }
 0x9a6   :  { %6997 = vmatpush1.bf16.msra.mxu1 %v10124_v59  ;;  %7028 = vmatprep.mubr.bf16.mxu1 %v12447_v40  ;;  %v10177_v1 = vld [vmem:[#allocation35 + $0x124] ss:$16 sps:$4 sm:$0xff]   ;;  %v10172_v59 = vld [vmem:[#allocation35 + $0x300] ss:$16 sps:$4 sm:$0xff]   ;;  %v4092_v6 = vmin.f32 %v12458_v36, 0.0  ;;  %vm4088_vm4 = vcmp.gt.f32.partialorder %v12458_v36, 0.0 }
 0x9a7   :  { %6998 = vmatprep.subr.bf16.mxu1 %v10132_v0  ;;  %v10180_v0 = vld [vmem:[#allocation35 + $0x324] ss:$16 sps:$4 sm:$0xff]  }
 0x9a8   :  { %6958 = vmatpush1.bf16.msra.mxu0 %v10127_v50  ;;  %v10175_v50 = vld [vmem:[#allocation35 + $0x120] ss:$16 sps:$4 sm:$0xff]  }
 0x9a9   :  { %6959 = vmatprep.subr.bf16.mxu0 %v10135_v3  ;;  %v10183_v3 = vld [vmem:[#allocation35 + $0x144] ss:$16 sps:$4 sm:$0xff]  }
 0x9aa   :  { %6999 = vmatpush1.bf16.msra.mxu1 %v10130_v18  ;;  %v10178_v18 = vld [vmem:[#allocation35 + $0x320] ss:$16 sps:$4 sm:$0xff]  }
 0x9ab   :  { %7000 = vmatprep.subr.bf16.mxu1 %v10138_v16  ;;  %v4094_v16 = vmin.f32 %v12419_v61, 0.0 }
 0x9ac   :  { %6960 = vmatpush1.bf16.msra.mxu0 %v10133_v41  ;;  %v10186_v41 = vld [vmem:[#allocation35 + $0x344] ss:$16 sps:$4 sm:$0xff]  }
 0x9ad   :  { %6961 = vmatprep.subr.bf16.mxu0 %v10141_v29  ;;  %v4096_v29 = vmul.f32 1.442695, %v4092_v6  ;;  %v10226_v6 = vld [vmem:[#allocation35 + $0x228] ss:$16 sps:$4 sm:$0xff]  }
 0x9ae   :  { %7001 = vmatpush1.bf16.msra.mxu1 %v10136_v15  ;;  %v10189_v15 = vld [vmem:[#allocation35 + $0x164] ss:$16 sps:$4 sm:$0xff]  }
 0x9af   :  { %7002 = vmatprep.subr.bf16.mxu1 %v10144_v33  ;;  %v10184_v33 = vld [vmem:[#allocation35 + $0x340] ss:$16 sps:$4 sm:$0xff]   ;;  %10613 = vpow2.f32 %v4096_v29  ;;  %v10243_v29 = vld [vmem:[#allocation35 + $0x8c] ss:$16 sps:$4 sm:$0xff]  }
 0x9b0   :  { %6962 = vmatpush1.bf16.msra.mxu0 %v10139_v53  ;;  %v4100_v53 = vmul.f32 1.442695, %v4094_v16  ;;  %v10237_v16 = vld [vmem:[#allocation35 + $0x6c] ss:$16 sps:$4 sm:$0xff]  }
 0x9b1   :  { %6963 = vmatprep.subr.bf16.mxu0 %v10147_v42  ;;  %v10192_v42 = vld [vmem:[#allocation35 + $0x364] ss:$16 sps:$4 sm:$0xff]  }
 0x9b2   :  { %7003 = vmatpush1.bf16.msra.mxu1 %v10142_v25  ;;  %v10187_v25 = vld [vmem:[#allocation35 + $0x160] ss:$16 sps:$4 sm:$0xff]   ;;  %10615 = vpow2.f32 %v4100_v53  ;;  %v10249_v53 = vld [vmem:[#allocation35 + $0xac] ss:$16 sps:$4 sm:$0xff]  }
 0x9b3   :  { %7004 = vmatprep.subr.bf16.mxu1 %v10150_v52  ;;  %v10195_v52 = vld [vmem:[#allocation35 + $0x184] ss:$16 sps:$4 sm:$0xff]  }
 0x9b4   :  { %6964 = vmatpush1.bf16.msra.mxu0 %v10145_v39  ;;  %v10190_v39 = vld [vmem:[#allocation35 + $0x360] ss:$16 sps:$4 sm:$0xff]  }
 0x9b5   :  { %6965 = vmatprep.subr.bf16.mxu0 %v10153_v48  ;;  %v10198_v48 = vld [vmem:[#allocation35 + $0x384] ss:$16 sps:$4 sm:$0xff]  }
 0x9b6   :  { %v5051_v49 = vpop.f32.mrb[36].mxu0  ;;  %7005 = vmatpush1.bf16.msra.mxu1 %v10148_v28  ;;  %v10193_v28 = vld [vmem:[#allocation35 + $0x180] ss:$16 sps:$4 sm:$0xff]  }
 0x9b7   :  { %v5053_v60 = vpop.f32.mrb[37].mxu0  ;;  %7006 = vmatprep.subr.bf16.mxu1 %v10156_v35  ;;  %v10201_v35 = vld [vmem:[#allocation35 + $0x1a4] ss:$16 sps:$4 sm:$0xff]  }
 0x9b8   :  { %v5055_v54 = vpop.f32.mrb[38].mxu0  ;;  %v5092_v37 = vpop.f32.mrb[52].mxu1  ;;  %6966 = vmatpush1.bf16.msra.mxu0 %v10151_v2  ;;  %v10196_v2 = vld [vmem:[#allocation35 + $0x380] ss:$16 sps:$4 sm:$0xff]  }
 0x9b9   :  { %v12451_v34 = vadd.f32 %v5092_v37, %v5051_v49  ;;  %v5056_v8 = vpop.f32.mrb[39].mxu0  ;;  %v5094_v58 = vpop.f32.mrb[53].mxu1  ;;  %6967 = vmatprep.subr.bf16.mxu0 %v10159_v12  ;;  %v10204_v12 = vld [vmem:[#allocation35 + $0x3a4] ss:$16 sps:$4 sm:$0xff]   ;;  %v10199_v49 = vld [vmem:[#allocation35 + $0x1a0] ss:$16 sps:$4 sm:$0xff]  }
 0x9ba   :  { %v12453_v62 = vadd.f32 %v5094_v58, %v5053_v60  ;;  %v5096_v38 = vpop.f32.mrb[54].mxu1  ;;  %7007 = vmatpush1.bf16.msra.mxu1 %v10154_v31  ;;  %v10207_v31 = vld [vmem:[#allocation35 + $0x1c4] ss:$16 sps:$4 sm:$0xff]   ;;  %v10202_v60 = vld [vmem:[#allocation35 + $0x3a0] ss:$16 sps:$4 sm:$0xff]  }
 0x9bb   :  { %v5097_v43 = vpop.f32.mrb[55].mxu1  ;;  %7008 = vmatprep.subr.bf16.mxu1 %v10162_v9  ;;  %v10614_v9 = vpop.eup %10613  ;;  %v10210_v54 = vld [vmem:[#allocation35 + $0x3c4] ss:$16 sps:$4 sm:$0xff]   ;;  %v10205_v37 = vld [vmem:[#allocation35 + $0x1c0] ss:$16 sps:$4 sm:$0xff]  }
 0x9bc   :  { %6968 = vmatpush1.bf16.msra.mxu0 %v10157_v44  ;;  %v10616_v44 = vpop.eup %10615  ;;  %v10213_v8 = vld [vmem:[#allocation35 + $0x1e4] ss:$16 sps:$4 sm:$0xff]   ;;  %v8700_v58 = vadd.f32 -1.0, %v10614_v9  ;;  %v10211_v43 = vld [vmem:[#allocation35 + $0x1e0] ss:$16 sps:$4 sm:$0xff]  }
 0x9bd   :  { %6969 = vmatprep.subr.bf16.mxu0 %v10165_v19  ;;  %v10208_v19 = vld [vmem:[#allocation35 + $0x3c0] ss:$16 sps:$4 sm:$0xff]   ;;  %v10216_v38 = vld [vmem:[#allocation35 + $0x3e4] ss:$16 sps:$4 sm:$0xff]  }
 0x9be   :  { %7009 = vmatpush1.bf16.msra.mxu1 %v10160_v57  ;;  %v8702_v57 = vadd.f32 -1.0, %v10616_v44 }
 0x9bf   :  { %7010 = vmatprep.subr.bf16.mxu1 %v10168_v4  ;;  %v10219_v4 = vld [vmem:[#allocation35 + $0xc] ss:$16 sps:$4 sm:$0xff]  }
 0x9c0   :  { %6970 = vmatpush1.bf16.msra.mxu0 %v10163_v13  ;;  %v12464_v13 = vsel %vm4088_vm4, %v12458_v36, %v8700_v58  ;;  %v10220_v36 = vld [vmem:[#allocation35 + $0x208] ss:$16 sps:$4 sm:$0xff]  }
 0x9c1   :  { %6971 = vmatprep.subr.bf16.mxu0 %v10171_v7  ;;  %v10222_v7 = vld [vmem:[#allocation35 + $0x20c] ss:$16 sps:$4 sm:$0xff]   ;;  %v10256_v58 = vld [vmem:[#allocation35 + $0x2c8] ss:$16 sps:$4 sm:$0xff]  }
 0x9c2   :  { %7011 = vmatpush1.bf16.msra.mxu1 %v10166_v5  ;;  %v12468_v5 = vsel %vm4090_vm5, %v12419_v61, %v8702_v57  ;;  %v10223_v61 = vld [vmem:[#allocation35 + $0x28] ss:$16 sps:$4 sm:$0xff]  }
 0x9c3   :  { %7012 = vmatprep.subr.bf16.mxu1 %v10174_v23  ;;  %v10217_v23 = vld [vmem:[#allocation35 + $0x8] ss:$16 sps:$4 sm:$0xff]  }
 0x9c4   :  { %6972 = vmatpush1.bf16.msra.mxu0 %v10169_v10  ;;  %v12472_v10 = vpack.c.bf16 %v12464_v13, %v12464_v13  ;;  %v10259_v57 = vld [vmem:[#allocation35 + $0xe8] ss:$16 sps:$4 sm:$0xff]  }
 0x9c5   :  { %6973 = vmatprep.subr.bf16.mxu0 %v10177_v1  ;;  %v10225_v1 = vld [vmem:[#allocation35 + $0x2c] ss:$16 sps:$4 sm:$0xff]  }
 0x9c6   :  { %7013 = vmatpush1.bf16.msra.mxu1 %v10172_v59  ;;  %v12476_v59 = vpack.c.bf16 %v12468_v5, %v12468_v5 }
 0x9c7   :  { %7014 = vmatprep.subr.bf16.mxu1 %v10180_v0  ;;  %v10228_v0 = vld [vmem:[#allocation35 + $0x22c] ss:$16 sps:$4 sm:$0xff]  }
 0x9c8   :  { %6974 = vmatpush1.bf16.msra.mxu0 %v10175_v50  ;;  %v10231_v50 = vld [vmem:[#allocation35 + $0x4c] ss:$16 sps:$4 sm:$0xff]  }
 0x9c9   :  { %6975 = vmatprep.subr.bf16.mxu0 %v10183_v3  ;;  %v10234_v3 = vld [vmem:[#allocation35 + $0x24c] ss:$16 sps:$4 sm:$0xff]  }
 0x9ca   :  { %7015 = vmatpush1.bf16.msra.mxu1 %v10178_v18  ;;  %v10229_v18 = vld [vmem:[#allocation35 + $0x48] ss:$16 sps:$4 sm:$0xff]  }
 0x9cb   :  { %7016 = vmatprep.subr.bf16.mxu1 %v10186_v41  ;;  %v10232_v41 = vld [vmem:[#allocation35 + $0x248] ss:$16 sps:$4 sm:$0xff]  }
 0x9cc   :  { %6976 = vmatpush1.bf16.msra.mxu0 %v10181_v24  ;;  %v10240_v24 = vld [vmem:[#allocation35 + $0x26c] ss:$16 sps:$4 sm:$0xff]  }
 0x9cd   :  { %6977 = vmatprep.subr.bf16.mxu0 %v10189_v15  ;;  %v10238_v15 = vld [vmem:[#allocation35 + $0x268] ss:$16 sps:$4 sm:$0xff]  }
 0x9ce   :  { %7017 = vmatpush1.bf16.msra.mxu1 %v10184_v33  ;;  %v10246_v33 = vld [vmem:[#allocation35 + $0x28c] ss:$16 sps:$4 sm:$0xff]  }
 0x9cf   :  { %7018 = vmatprep.subr.bf16.mxu1 %v10192_v42  ;;  %v10244_v42 = vld [vmem:[#allocation35 + $0x288] ss:$16 sps:$4 sm:$0xff]  }
 0x9d0   :  { %6978 = vmatpush1.bf16.msra.mxu0 %v10187_v25  ;;  %v10252_v25 = vld [vmem:[#allocation35 + $0x2ac] ss:$16 sps:$4 sm:$0xff]  }
 0x9d1   :  { %6979 = vmatprep.subr.bf16.mxu0 %v10195_v52  ;;  %v10247_v52 = vld [vmem:[#allocation35 + $0xa8] ss:$16 sps:$4 sm:$0xff]  }
 0x9d2   :  { %7019 = vmatpush1.bf16.msra.mxu1 %v10190_v39  ;;  %v10255_v39 = vld [vmem:[#allocation35 + $0xcc] ss:$16 sps:$4 sm:$0xff]  }
 0x9d3   :  { %7020 = vmatprep.subr.bf16.mxu1 %v10198_v48 }
 0x9d4   :  { %6980 = vmatpush1.bf16.msra.mxu0 %v10193_v28  ;;  %v10250_v28 = vld [vmem:[#allocation35 + $0x2a8] ss:$16 sps:$4 sm:$0xff]  }
 0x9d5   :  { %6981 = vmatprep.subr.bf16.mxu0 %v10201_v35 }
 0x9d6   :  { %7021 = vmatpush1.bf16.msra.mxu1 %v10196_v2  ;;  %v10258_v2 = vld [vmem:[#allocation35 + $0x2cc] ss:$16 sps:$4 sm:$0xff]  }
 0x9d7   :  { %7022 = vmatprep.subr.bf16.mxu1 %v10204_v12 }
 0x9d8   :  { %6982 = vmatpush1.bf16.msra.mxu0 %v10199_v49 }
 0x9d9   :  { %6983 = vmatprep.subr.bf16.mxu0 %v10207_v31  ;;  %v10253_v31 = vld [vmem:[#allocation35 + $0xc8] ss:$16 sps:$4 sm:$0xff]  }
 0x9da   :  { %7023 = vmatpush1.bf16.msra.mxu1 %v10202_v60 }
 0x9db   :  { %7024 = vmatprep.subr.bf16.mxu1 %v10210_v54 }
 0x9dc   :  { %6984 = vmatpush1.bf16.msra.mxu0 %v10205_v37  ;;  %v10261_v37 = vld [vmem:[#allocation35 + $0xec] ss:$16 sps:$4 sm:$0xff]  }
 0x9dd   :  { %6985 = vmatprep.subr.bf16.mxu0 %v10213_v8 }
 0x9de   :  { %7025 = vmatpush1.bf16.msra.mxu1 %v10208_v19 }
 0x9df   :  { %7026 = vmatprep.subr.bf16.mxu1 %v10216_v38  ;;  %v10264_v38 = vld [vmem:[#allocation35 + $0x2ec] ss:$16 sps:$4 sm:$0xff]  }
 0x9e0   :  { %6986 = vmatpush1.bf16.msra.mxu0 %v10211_v43  ;;  %v10267_v43 = vld [vmem:[#allocation35 + $0x10c] ss:$16 sps:$4 sm:$0xff]  }
 0x9e1   :  { %7037 = vmatprep.subr.bf16.mxu0 %v10219_v4  ;;  %v10262_v4 = vld [vmem:[#allocation35 + $0x2e8] ss:$16 sps:$4 sm:$0xff]  }
 0x9e2   :  { %7027 = vmatpush1.bf16.msra.mxu1 %v10214_v27  ;;  %v10270_v27 = vld [vmem:[#allocation35 + $0x30c] ss:$16 sps:$4 sm:$0xff]  }
 0x9e3   :  { %6988 = vmatmul.mubr.bf16.vlgmr.msra.gmra.mrb[52].mxu0 %v12472_v10  ;;  %7078 = vmatprep.subr.bf16.mxu1 %v10222_v7  ;;  %v10265_v7 = vld [vmem:[#allocation35 + $0x108] ss:$16 sps:$4 sm:$0xff]  }
 0x9e4   :  { %7038 = vmatpush1.bf16.msra.mxu0 %v10217_v23  ;;  %7069 = vmatprep.mubr.bf16.mxu0 %v12441_v51  ;;  %v10235_v51 = vld [vmem:[#allocation35 + $0x68] ss:$16 sps:$4 sm:$0xff]   ;;  %v10273_v23 = vld [vmem:[#allocation35 + $0x12c] ss:$16 sps:$4 sm:$0xff]  }
 0x9e5   :  { %7029 = vmatmul.mubr.bf16.vlgmr.msra.gmra.mrb[68].mxu1 %v12476_v59  ;;  %7039 = vmatprep.subr.bf16.mxu0 %v10225_v1  ;;  %v10268_v1 = vld [vmem:[#allocation35 + $0x308] ss:$16 sps:$4 sm:$0xff]  }
 0x9e6   :  { %7079 = vmatpush1.bf16.msra.mxu1 %v10220_v36  ;;  %7110 = vmatprep.mubr.bf16.mxu1 %v12447_v40  ;;  %v10241_v40 = vld [vmem:[#allocation35 + $0x88] ss:$16 sps:$4 sm:$0xff]   ;;  %v10276_v36 = vld [vmem:[#allocation35 + $0x32c] ss:$16 sps:$4 sm:$0xff]  }
 0x9e7   :  { %7080 = vmatprep.subr.bf16.mxu1 %v10228_v0  ;;  %v10271_v0 = vld [vmem:[#allocation35 + $0x128] ss:$16 sps:$4 sm:$0xff]  }
 0x9e8   :  { %7040 = vmatpush1.bf16.msra.mxu0 %v10223_v61  ;;  %v10279_v61 = vld [vmem:[#allocation35 + $0x14c] ss:$16 sps:$4 sm:$0xff]  }
 0x9e9   :  { %7041 = vmatprep.subr.bf16.mxu0 %v10231_v50  ;;  %v10274_v50 = vld [vmem:[#allocation35 + $0x328] ss:$16 sps:$4 sm:$0xff]  }
 0x9ea   :  { %7081 = vmatpush1.bf16.msra.mxu1 %v10226_v6  ;;  %v10282_v6 = vld [vmem:[#allocation35 + $0x34c] ss:$16 sps:$4 sm:$0xff]  }
 0x9eb   :  { %7082 = vmatprep.subr.bf16.mxu1 %v10234_v3  ;;  %v10277_v3 = vld [vmem:[#allocation35 + $0x148] ss:$16 sps:$4 sm:$0xff]  }
 0x9ec   :  { %7042 = vmatpush1.bf16.msra.mxu0 %v10229_v18  ;;  %v10285_v18 = vld [vmem:[#allocation35 + $0x16c] ss:$16 sps:$4 sm:$0xff]  }
 0x9ed   :  { %7043 = vmatprep.subr.bf16.mxu0 %v10237_v16  ;;  %v10280_v16 = vld [vmem:[#allocation35 + $0x348] ss:$16 sps:$4 sm:$0xff]  }
 0x9ee   :  { %7083 = vmatpush1.bf16.msra.mxu1 %v10232_v41  ;;  %v10288_v41 = vld [vmem:[#allocation35 + $0x36c] ss:$16 sps:$4 sm:$0xff]  }
 0x9ef   :  { %7084 = vmatprep.subr.bf16.mxu1 %v10240_v24  ;;  %v10283_v24 = vld [vmem:[#allocation35 + $0x168] ss:$16 sps:$4 sm:$0xff]  }
 0x9f0   :  { %7044 = vmatpush1.bf16.msra.mxu0 %v10235_v51  ;;  %v10291_v51 = vld [vmem:[#allocation35 + $0x18c] ss:$16 sps:$4 sm:$0xff]  }
 0x9f1   :  { %7045 = vmatprep.subr.bf16.mxu0 %v10243_v29  ;;  %v10286_v29 = vld [vmem:[#allocation35 + $0x368] ss:$16 sps:$4 sm:$0xff]  }
 0x9f2   :  { %7085 = vmatpush1.bf16.msra.mxu1 %v10238_v15  ;;  %v10294_v15 = vld [vmem:[#allocation35 + $0x38c] ss:$16 sps:$4 sm:$0xff]  }
 0x9f3   :  { %7086 = vmatprep.subr.bf16.mxu1 %v10246_v33  ;;  %v10289_v33 = vld [vmem:[#allocation35 + $0x188] ss:$16 sps:$4 sm:$0xff]  }
 0x9f4   :  { %7046 = vmatpush1.bf16.msra.mxu0 %v10241_v40  ;;  %v10297_v40 = vld [vmem:[#allocation35 + $0x1ac] ss:$16 sps:$4 sm:$0xff]  }
 0x9f5   :  { %7047 = vmatprep.subr.bf16.mxu0 %v10249_v53  ;;  %v10292_v53 = vld [vmem:[#allocation35 + $0x388] ss:$16 sps:$4 sm:$0xff]  }
 0x9f6   :  { %v5133_v48 = vpop.f32.mrb[40].mxu0  ;;  %7087 = vmatpush1.bf16.msra.mxu1 %v10244_v42  ;;  %v10300_v42 = vld [vmem:[#allocation35 + $0x3ac] ss:$16 sps:$4 sm:$0xff]  }
 0x9f7   :  { %v5135_v35 = vpop.f32.mrb[41].mxu0  ;;  %7088 = vmatprep.subr.bf16.mxu1 %v10252_v25  ;;  %v10295_v25 = vld [vmem:[#allocation35 + $0x1a8] ss:$16 sps:$4 sm:$0xff]  }
 0x9f8   :  { %v5137_v12 = vpop.f32.mrb[42].mxu0  ;;  %v5174_v49 = vpop.f32.mrb[56].mxu1  ;;  %7048 = vmatpush1.bf16.msra.mxu0 %v10247_v52  ;;  %v10303_v52 = vld [vmem:[#allocation35 + $0x1cc] ss:$16 sps:$4 sm:$0xff]  }
 0x9f9   :  { %v12482_v60 = vadd.f32 %v5174_v49, %v5133_v48  ;;  %v5138_v9 = vpop.f32.mrb[43].mxu0  ;;  %v5176_v54 = vpop.f32.mrb[57].mxu1  ;;  %7049 = vmatprep.subr.bf16.mxu0 %v10255_v39  ;;  %v10298_v39 = vld [vmem:[#allocation35 + $0x3a8] ss:$16 sps:$4 sm:$0xff]   ;;  %v10306_v48 = vld [vmem:[#allocation35 + $0x3cc] ss:$16 sps:$4 sm:$0xff]  }
 0x9fa   :  { %v12484_v44 = vadd.f32 %v5176_v54, %v5135_v35  ;;  %v5178_v8 = vpop.f32.mrb[58].mxu1  ;;  %7089 = vmatpush1.bf16.msra.mxu1 %v10250_v28  ;;  %v10301_v28 = vld [vmem:[#allocation35 + $0x1c8] ss:$16 sps:$4 sm:$0xff]   ;;  %v10309_v35 = vld [vmem:[#allocation35 + $0x1ec] ss:$16 sps:$4 sm:$0xff]  }
 0x9fb   :  { %v5179_v19 = vpop.f32.mrb[59].mxu1  ;;  %7090 = vmatprep.subr.bf16.mxu1 %v10258_v2  ;;  %v10304_v2 = vld [vmem:[#allocation35 + $0x3c8] ss:$16 sps:$4 sm:$0xff]   ;;  %v10312_v12 = vld [vmem:[#allocation35 + $0x3ec] ss:$16 sps:$4 sm:$0xff]  }
 0x9fc   :  { %7050 = vmatpush1.bf16.msra.mxu0 %v10253_v31  ;;  %v10307_v49 = vld [vmem:[#allocation35 + $0x1e8] ss:$16 sps:$4 sm:$0xff]   ;;  %v10315_v31 = vld [vmem:[#allocation34 + $0x4] ss:$16 sps:$4 sm:$0xff]  }
 0x9fd   :  { %7051 = vmatprep.subr.bf16.mxu0 %v10261_v37  ;;  %v10310_v9 = vld [vmem:[#allocation35 + $0x3e8] ss:$16 sps:$4 sm:$0xff]   ;;  %v10363_v54 = vld [vmem:[#allocation34 + $0x204] ss:$16 sps:$4 sm:$0xff]   ;;  %v10313_v37 = vld [vmem:[#allocation34] ss:$16 sps:$4 sm:$0xff]  }
 0x9fe   :  { %7091 = vmatpush1.bf16.msra.mxu1 %v10256_v58  ;;  %v10318_v8 = vld [vmem:[#allocation34 + $0x24] ss:$16 sps:$4 sm:$0xff]   ;;  %v10361_v58 = vld [vmem:[#allocation34 + $0x200] ss:$16 sps:$4 sm:$0xff]  }
 0x9ff   :  { %7092 = vmatprep.subr.bf16.mxu1 %v10264_v38  ;;  %v10369_v19 = vld [vmem:[#allocation34 + $0x224] ss:$16 sps:$4 sm:$0xff]   ;;  %v10316_v38 = vld [vmem:[#allocation34 + $0x20] ss:$16 sps:$4 sm:$0xff]  }
 0xa00   :  { %7052 = vmatpush1.bf16.msra.mxu0 %v10259_v57  ;;  %v10321_v57 = vld [vmem:[#allocation34 + $0x44] ss:$16 sps:$4 sm:$0xff]  }
 0xa01   :  { %7053 = vmatprep.subr.bf16.mxu0 %v10267_v43  ;;  %v10367_v43 = vld [vmem:[#allocation34 + $0x220] ss:$16 sps:$4 sm:$0xff]  }
 0xa02   :  { %7093 = vmatpush1.bf16.msra.mxu1 %v10262_v4  ;;  %v10375_v4 = vld [vmem:[#allocation34 + $0x244] ss:$16 sps:$4 sm:$0xff]  }
 0xa03   :  { %7094 = vmatprep.subr.bf16.mxu1 %v10270_v27  ;;  %v10319_v27 = vld [vmem:[#allocation34 + $0x40] ss:$16 sps:$4 sm:$0xff]  }
 0xa04   :  { %7054 = vmatpush1.bf16.msra.mxu0 %v10265_v7  ;;  %v10324_v7 = vld [vmem:[#allocation34 + $0x64] ss:$16 sps:$4 sm:$0xff]  }
 0xa05   :  { %7055 = vmatprep.subr.bf16.mxu0 %v10273_v23  ;;  %v10373_v23 = vld [vmem:[#allocation34 + $0x240] ss:$16 sps:$4 sm:$0xff]  }
 0xa06   :  { %7095 = vmatpush1.bf16.msra.mxu1 %v10268_v1  ;;  %v10322_v1 = vld [vmem:[#allocation34 + $0x60] ss:$16 sps:$4 sm:$0xff]  }
 0xa07   :  { %7096 = vmatprep.subr.bf16.mxu1 %v10276_v36  ;;  %v10327_v36 = vld [vmem:[#allocation34 + $0x84] ss:$16 sps:$4 sm:$0xff]  }
 0xa08   :  { %7056 = vmatpush1.bf16.msra.mxu0 %v10271_v0  ;;  %v10387_v0 = vld [vmem:[#allocation34 + $0x284] ss:$16 sps:$4 sm:$0xff]  }
 0xa09   :  { %7057 = vmatprep.subr.bf16.mxu0 %v10279_v61  ;;  %v10325_v61 = vld [vmem:[#allocation34 + $0x80] ss:$16 sps:$4 sm:$0xff]  }
 0xa0a   :  { %7097 = vmatpush1.bf16.msra.mxu1 %v10274_v50  ;;  %v10330_v50 = vld [vmem:[#allocation34 + $0xa4] ss:$16 sps:$4 sm:$0xff]  }
 0xa0b   :  { %7098 = vmatprep.subr.bf16.mxu1 %v10282_v6  ;;  %v10385_v6 = vld [vmem:[#allocation34 + $0x280] ss:$16 sps:$4 sm:$0xff]  }
 0xa0c   :  { %7058 = vmatpush1.bf16.msra.mxu0 %v10277_v3  ;;  %v10393_v3 = vld [vmem:[#allocation34 + $0x2a4] ss:$16 sps:$4 sm:$0xff]  }
 0xa0d   :  { %7059 = vmatprep.subr.bf16.mxu0 %v10285_v18  ;;  %v10328_v18 = vld [vmem:[#allocation34 + $0xa0] ss:$16 sps:$4 sm:$0xff]  }
 0xa0e   :  { %7099 = vmatpush1.bf16.msra.mxu1 %v10280_v16  ;;  %v12488_v16 = vld [vmem:[#allocation32] sm:$0xf] }
 0xa0f   :  { %7100 = vmatprep.subr.bf16.mxu1 %v10288_v41  ;;  %v10333_v41 = vld [vmem:[#allocation34 + $0xc4] ss:$16 sps:$4 sm:$0xff]  }
 0xa10   :  { %7060 = vmatpush1.bf16.msra.mxu0 %v10283_v24 }
 0xa11   :  { %7061 = vmatprep.subr.bf16.mxu0 %v10291_v51  ;;  %v10391_v51 = vld [vmem:[#allocation34 + $0x2a0] ss:$16 sps:$4 sm:$0xff]  }
 0xa12   :  { %7101 = vmatpush1.bf16.msra.mxu1 %v10286_v29 }
 0xa13   :  { %7102 = vmatprep.subr.bf16.mxu1 %v10294_v15 }
 0xa14   :  { %7062 = vmatpush1.bf16.msra.mxu0 %v10289_v33  ;;  %v5989_v33 = vrot.slane %v12488_v16, %v11907_v21 }
 0xa15   :  { %7063 = vmatprep.subr.bf16.mxu0 %v10297_v40  ;;  %v10399_v40 = vld [vmem:[#allocation34 + $0x2c4] ss:$16 sps:$4 sm:$0xff]  }
 0xa16   :  { %7103 = vmatpush1.bf16.msra.mxu1 %v10292_v53 }
 0xa17   :  { %7104 = vmatprep.subr.bf16.mxu1 %v10300_v42 }
 0xa18   :  { %7064 = vmatpush1.bf16.msra.mxu0 %v10295_v25 }
 0xa19   :  { %7065 = vmatprep.subr.bf16.mxu0 %v10303_v52  ;;  %v5993_v52 = vrot.slane %v12488_v16, %v11910_v22 }
 0xa1a   :  { %7105 = vmatpush1.bf16.msra.mxu1 %v10298_v39  ;;  %v10331_v39 = vld [vmem:[#allocation34 + $0xc0] ss:$16 sps:$4 sm:$0xff]  }
 0xa1b   :  { %7106 = vmatprep.subr.bf16.mxu1 %v10306_v48 }
 0xa1c   :  { %7066 = vmatpush1.bf16.msra.mxu0 %v10301_v28 }
 0xa1d   :  { %7067 = vmatprep.subr.bf16.mxu0 %v10309_v35 }
 0xa1e   :  { %7107 = vmatpush1.bf16.msra.mxu1 %v10304_v2 }
 0xa1f   :  { %7108 = vmatprep.subr.bf16.mxu1 %v10312_v12 }
 0xa20   :  { %7068 = vmatpush1.bf16.msra.mxu0 %v10307_v49  ;;  %v10397_v49 = vld [vmem:[#allocation34 + $0x2c0] ss:$16 sps:$4 sm:$0xff]  }
 0xa21   :  { %7759 = vmatprep.subr.bf16.mxu0 %v10315_v31 }
 0xa22   :  { %7109 = vmatpush1.bf16.msra.mxu1 %v10310_v9 }
 0xa23   :  { %7070 = vmatmul.mubr.bf16.vlgmr.msra.gmra.mrb[56].mxu0 %v12472_v10  ;;  %7800 = vmatprep.subr.bf16.mxu1 %v10363_v54  ;;  %v10381_v10 = vld [vmem:[#allocation34 + $0x264] ss:$16 sps:$4 sm:$0xff]  }
 0xa24   :  { %7760 = vmatpush1.bf16.msra.mxu0 %v10313_v37  ;;  %v10334_v37 = vld [vmem:[#allocation34 + $0xe0] ss:$16 sps:$4 sm:$0xff]  }
 0xa25   :  { %7111 = vmatmul.mubr.bf16.vlgmr.msra.gmra.mrb[72].mxu1 %v12476_v59  ;;  %7761 = vmatprep.subr.bf16.mxu0 %v10318_v8  ;;  %v10379_v59 = vld [vmem:[#allocation34 + $0x260] ss:$16 sps:$4 sm:$0xff]  }
 0xa26   :  { %7801 = vmatpush1.bf16.msra.mxu1 %v10361_v58  ;;  %v10339_v58 = vld [vmem:[#allocation34 + $0x104] ss:$16 sps:$4 sm:$0xff]  }
 0xa27   :  { %7802 = vmatprep.subr.bf16.mxu1 %v10369_v19 }
 0xa28   :  { %7762 = vmatpush1.bf16.msra.mxu0 %v10316_v38  ;;  %v10403_v38 = vld [vmem:[#allocation34 + $0x2e0] ss:$16 sps:$4 sm:$0xff]  }
 0xa29   :  { %7763 = vmatprep.subr.bf16.mxu0 %v10321_v57 }
 0xa2a   :  { %7803 = vmatpush1.bf16.msra.mxu1 %v10367_v43  ;;  %v10411_v43 = vld [vmem:[#allocation34 + $0x304] ss:$16 sps:$4 sm:$0xff]  }
 0xa2b   :  { %7804 = vmatprep.subr.bf16.mxu1 %v10375_v4 }
 0xa2c   :  { %7764 = vmatpush1.bf16.msra.mxu0 %v10319_v27  ;;  %v10337_v27 = vld [vmem:[#allocation34 + $0x100] ss:$16 sps:$4 sm:$0xff]  }
 0xa2d   :  { %7765 = vmatprep.subr.bf16.mxu0 %v10324_v7  ;;  %v10342_v7 = vld [vmem:[#allocation34 + $0x124] ss:$16 sps:$4 sm:$0xff]  }
 0xa2e   :  { %7805 = vmatpush1.bf16.msra.mxu1 %v10373_v23  ;;  %v10409_v23 = vld [vmem:[#allocation34 + $0x300] ss:$16 sps:$4 sm:$0xff]  }
 0xa2f   :  { %7806 = vmatprep.subr.bf16.mxu1 %v10381_v10  ;;  %v10417_v10 = vld [vmem:[#allocation34 + $0x324] ss:$16 sps:$4 sm:$0xff]  }
 0xa30   :  { %7766 = vmatpush1.bf16.msra.mxu0 %v10322_v1  ;;  %v10340_v1 = vld [vmem:[#allocation34 + $0x120] ss:$16 sps:$4 sm:$0xff]  }
 0xa31   :  { %7767 = vmatprep.subr.bf16.mxu0 %v10327_v36  ;;  %v10345_v36 = vld [vmem:[#allocation34 + $0x144] ss:$16 sps:$4 sm:$0xff]  }
 0xa32   :  { %7807 = vmatpush1.bf16.msra.mxu1 %v10379_v59  ;;  %v10415_v59 = vld [vmem:[#allocation34 + $0x320] ss:$16 sps:$4 sm:$0xff]  }
 0xa33   :  { %7808 = vmatprep.subr.bf16.mxu1 %v10387_v0  ;;  %v10423_v0 = vld [vmem:[#allocation34 + $0x344] ss:$16 sps:$4 sm:$0xff]  }
 0xa34   :  { %7768 = vmatpush1.bf16.msra.mxu0 %v10325_v61  ;;  %v10343_v61 = vld [vmem:[#allocation34 + $0x140] ss:$16 sps:$4 sm:$0xff]  }
 0xa35   :  { %7769 = vmatprep.subr.bf16.mxu0 %v10330_v50  ;;  %v10348_v50 = vld [vmem:[#allocation34 + $0x164] ss:$16 sps:$4 sm:$0xff]  }
 0xa36   :  { %v5855_v24 = vpop.f32.mrb[44].mxu0  ;;  %7809 = vmatpush1.bf16.msra.mxu1 %v10385_v6  ;;  %v10421_v6 = vld [vmem:[#allocation34 + $0x340] ss:$16 sps:$4 sm:$0xff]  }
 0xa37   :  { %v5856_v29 = vadd.f32 %v5855_v24, %v12451_v34  ;;  %v5857_v15 = vpop.f32.mrb[45].mxu0  ;;  %7810 = vmatprep.subr.bf16.mxu1 %v10393_v3  ;;  %v10336_v34 = vld [vmem:[#allocation34 + $0xe4] ss:$16 sps:$4 sm:$0xff]  }
 0xa38   :  { %v5858_v53 = vadd.f32 %v5857_v15, %v12453_v62  ;;  %v5859_v42 = vpop.f32.mrb[46].mxu0  ;;  %v5896_v25 = vpop.f32.mrb[60].mxu1  ;;  %7770 = vmatpush1.bf16.msra.mxu0 %v10328_v18  ;;  %v10405_v62 = vld [vmem:[#allocation34 + $0x2e4] ss:$16 sps:$4 sm:$0xff]  }
 0xa39   :  { %v5897_v48 = vadd.f32 %v5896_v25, %v5856_v29  ;;  %v5860_v28 = vpop.f32.mrb[47].mxu0  ;;  %v5898_v35 = vpop.f32.mrb[61].mxu1  ;;  %7771 = vmatprep.subr.bf16.mxu0 %v10333_v41  ;;  %v10429_v18 = vld [vmem:[#allocation34 + $0x364] ss:$16 sps:$4 sm:$0xff]   ;;  %v10433_v25 = vld [vmem:[#allocation34 + $0x380] ss:$16 sps:$4 sm:$0xff]  }
 0xa3a   :  { %v5899_v2 = vadd.f32 %v5898_v35, %v5858_v53  ;;  %v5900_v12 = vpop.f32.mrb[62].mxu1  ;;  %7811 = vmatpush1.bf16.msra.mxu1 %v10391_v51  ;;  %v10346_v51 = vld [vmem:[#allocation34 + $0x160] ss:$16 sps:$4 sm:$0xff]   ;;  %v10351_v15 = vld [vmem:[#allocation34 + $0x184] ss:$16 sps:$4 sm:$0xff]  }
 0xa3b   :  { %v6006_v31 = vadd.f32 %v5989_v33, %v5897_v48  ;;  %v5901_v9 = vpop.f32.mrb[63].mxu1  ;;  %7812 = vmatprep.subr.bf16.mxu1 %v10399_v40  ;;  %v10427_v33 = vld [vmem:[#allocation34 + $0x360] ss:$16 sps:$4 sm:$0xff]   ;;  %v10435_v40 = vld [vmem:[#allocation34 + $0x384] ss:$16 sps:$4 sm:$0xff]  }
 0xa3c   :  { %v6007_v54 = vadd.f32 %v5993_v52, %v5899_v2  ;;  %7772 = vmatpush1.bf16.msra.mxu0 %v10331_v39  ;;  %v10349_v53 = vld [vmem:[#allocation34 + $0x180] ss:$16 sps:$4 sm:$0xff]   ;;  %v10354_v42 = vld [vmem:[#allocation34 + $0x1a4] ss:$16 sps:$4 sm:$0xff]  }
 0xa3d   :  { %v6010_v8 = vsub.f32 0.0, %v6006_v31  ;;  %7773 = vmatprep.subr.bf16.mxu0 %v10336_v34  ;;  %v10441_v52 = vld [vmem:[#allocation34 + $0x3a4] ss:$16 sps:$4 sm:$0xff]   ;;  %v10352_v39 = vld [vmem:[#allocation34 + $0x1a0] ss:$16 sps:$4 sm:$0xff]  }
 0xa3e   :  { %v6011_v19 = vsub.f32 0.0, %v6007_v54  ;;  %7813 = vmatpush1.bf16.msra.mxu1 %v10397_v49  ;;  %v10357_v48 = vld [vmem:[#allocation34 + $0x1c4] ss:$16 sps:$4 sm:$0xff]   ;;  %v10439_v28 = vld [vmem:[#allocation34 + $0x3a0] ss:$16 sps:$4 sm:$0xff]  }
 0xa3f   :  { %v6014_v57 = vmul.f32 1.442695, %v6010_v8  ;;  %7814 = vmatprep.subr.bf16.mxu1 %v10405_v62  ;;  %v10447_v35 = vld [vmem:[#allocation34 + $0x3c4] ss:$16 sps:$4 sm:$0xff]   ;;  %v10355_v2 = vld [vmem:[#allocation34 + $0x1c0] ss:$16 sps:$4 sm:$0xff]  }
 0xa40   :  { %v6016_v4 = vmul.f32 1.442695, %v6011_v19  ;;  %7774 = vmatpush1.bf16.msra.mxu0 %v10334_v37  ;;  %v10360_v49 = vld [vmem:[#allocation34 + $0x1e4] ss:$16 sps:$4 sm:$0xff]   ;;  %v10445_v62 = vld [vmem:[#allocation34 + $0x3c0] ss:$16 sps:$4 sm:$0xff]  }
 0xa41   :  { %10617 = vpow2.f32 %v6014_v57  ;;  %7775 = vmatprep.subr.bf16.mxu0 %v10339_v58  ;;  %v10453_v8 = vld [vmem:[#allocation34 + $0x3e4] ss:$16 sps:$4 sm:$0xff]   ;;  %v10358_v58 = vld [vmem:[#allocation34 + $0x1e0] ss:$16 sps:$4 sm:$0xff]  }
 0xa42   :  { %10619 = vpow2.f32 %v6016_v4  ;;  %7815 = vmatpush1.bf16.msra.mxu1 %v10403_v38 }
 0xa43   :  { %7816 = vmatprep.subr.bf16.mxu1 %v10411_v43  ;;  %v10366_v43 = vld [vmem:[#allocation34 + $0xc] ss:$16 sps:$4 sm:$0xff]  }
 0xa44   :  { %7776 = vmatpush1.bf16.msra.mxu0 %v10337_v27  ;;  %v10451_v27 = vld [vmem:[#allocation34 + $0x3e0] ss:$16 sps:$4 sm:$0xff]  }
 0xa45   :  { %7777 = vmatprep.subr.bf16.mxu0 %v10342_v7  ;;  %v10364_v7 = vld [vmem:[#allocation34 + $0x8] ss:$16 sps:$4 sm:$0xff]  }
 0xa46   :  { %7817 = vmatpush1.bf16.msra.mxu1 %v10409_v23  ;;  %v10370_v23 = vld [vmem:[#allocation34 + $0x28] ss:$16 sps:$4 sm:$0xff]  }
 0xa47   :  { %7818 = vmatprep.subr.bf16.mxu1 %v10417_v10  ;;  %v10378_v10 = vld [vmem:[#allocation34 + $0x4c] ss:$16 sps:$4 sm:$0xff]  }
 0xa48   :  { %7778 = vmatpush1.bf16.msra.mxu0 %v10340_v1  ;;  %v10376_v1 = vld [vmem:[#allocation34 + $0x48] ss:$16 sps:$4 sm:$0xff]  }
 0xa49   :  { %7779 = vmatprep.subr.bf16.mxu0 %v10345_v36  ;;  %v10384_v36 = vld [vmem:[#allocation34 + $0x6c] ss:$16 sps:$4 sm:$0xff]  }
 0xa4a   :  { %7819 = vmatpush1.bf16.msra.mxu1 %v10415_v59  ;;  %v10382_v59 = vld [vmem:[#allocation34 + $0x68] ss:$16 sps:$4 sm:$0xff]  }
 0xa4b   :  { %v10618_v3 = vpop.eup %10617  ;;  %7820 = vmatprep.subr.bf16.mxu1 %v10423_v0  ;;  %v10390_v0 = vld [vmem:[#allocation34 + $0x8c] ss:$16 sps:$4 sm:$0xff]  }
 0xa4c   :  { %v10620_v41 = vpop.eup %10619  ;;  %v6022_v24 = vadd.f32 1.0, %v10618_v3  ;;  %7780 = vmatpush1.bf16.msra.mxu0 %v10343_v61  ;;  %v10388_v61 = vld [vmem:[#allocation34 + $0x88] ss:$16 sps:$4 sm:$0xff]   ;;  %v10402_v3 = vld [vmem:[#allocation34 + $0xcc] ss:$16 sps:$4 sm:$0xff]  }
 0xa4d   :  { %v6023_v29 = vadd.f32 1.0, %v10620_v41  ;;  %7781 = vmatprep.subr.bf16.mxu0 %v10348_v50  ;;  %v10396_v50 = vld [vmem:[#allocation34 + $0xac] ss:$16 sps:$4 sm:$0xff]  }
 0xa4e   :  { %10621 = vrcp.f32 %v6022_v24  ;;  %7821 = vmatpush1.bf16.msra.mxu1 %v10421_v6  ;;  %v10394_v6 = vld [vmem:[#allocation34 + $0xa8] ss:$16 sps:$4 sm:$0xff]  }
 0xa4f   :  { %10623 = vrcp.f32 %v6023_v29  ;;  %7822 = vmatprep.subr.bf16.mxu1 %v10429_v18 }
 0xa50   :  { %7782 = vmatpush1.bf16.msra.mxu0 %v10346_v51  ;;  %v5997_v51 = vrot.slane %v12488_v16, %v11924_v47 }
 0xa51   :  { %7783 = vmatprep.subr.bf16.mxu0 %v10351_v15 }
 0xa52   :  { %7823 = vmatpush1.bf16.msra.mxu1 %v10427_v33 }
 0xa53   :  { %7824 = vmatprep.subr.bf16.mxu1 %v10435_v40  ;;  %v6001_v40 = vrot.slane %v12488_v16, %v11954_v32  ;;  %v10412_v16 = vld [vmem:[#allocation34 + $0x108] ss:$16 sps:$4 sm:$0xff]  }
 0xa54   :  { %7784 = vmatpush1.bf16.msra.mxu0 %v10349_v53  ;;  %v10400_v53 = vld [vmem:[#allocation34 + $0xc8] ss:$16 sps:$4 sm:$0xff]  }
 0xa55   :  { %7785 = vmatprep.subr.bf16.mxu0 %v10354_v42 }
 0xa56   :  { %7825 = vmatpush1.bf16.msra.mxu1 %v10433_v25 }
 0xa57   :  { %7826 = vmatprep.subr.bf16.mxu1 %v10441_v52 }
 0xa58   :  { %v10622_v34 = vpop.eup %10621  ;;  %7786 = vmatpush1.bf16.msra.mxu0 %v10352_v39  ;;  %v10408_v39 = vld [vmem:[#allocation34 + $0xec] ss:$16 sps:$4 sm:$0xff]  }
 0xa59   :  { %v10624_v12 = vpop.eup %10623  ;;  %7787 = vmatprep.subr.bf16.mxu0 %v10357_v48  ;;  %v6038_v31 = vsub.f32 1.0, %v10622_v34  ;;  %v6034_v54 = vmul.f32 %v10622_v34, %v12395_v26  ;;  %v10459_v26 = vld [vmem:[#allocation34 + $0x20c] ss:$16 sps:$4 sm:$0xff]  }
 0xa5a   :  { %v6039_v9 = vsub.f32 1.0, %v10624_v12  ;;  %7827 = vmatpush1.bf16.msra.mxu1 %v10439_v28  ;;  %v6035_v19 = vmul.f32 %v10624_v12, %v12363_v46  ;;  %v10414_v12 = vld [vmem:[#allocation34 + $0x10c] ss:$16 sps:$4 sm:$0xff]  }
 0xa5b   :  { %v6042_v37 = vmul.f32 %v6038_v31, %v12329_v17  ;;  %7828 = vmatprep.subr.bf16.mxu1 %v10447_v35 }
 0xa5c   :  { %7788 = vmatpush1.bf16.msra.mxu0 %v10355_v2  ;;  %v6043_v38 = vmul.f32 %v6039_v9, %v12304_v63  ;;  %v10372_v63 = vld [vmem:[#allocation34 + $0x2c] ss:$16 sps:$4 sm:$0xff]   ;;  %v10406_v2 = vld [vmem:[#allocation34 + $0xe8] ss:$16 sps:$4 sm:$0xff]  }
 0xa5d   :  { %7789 = vmatprep.subr.bf16.mxu0 %v10360_v49  ;;  %v12500_v57 = vadd.f32 %v6042_v37, %v6034_v54  ;;  %v10418_v54 = vld [vmem:[#allocation34 + $0x128] ss:$16 sps:$4 sm:$0xff]   ;;  %v10426_v37 = vld [vmem:[#allocation34 + $0x14c] ss:$16 sps:$4 sm:$0xff]  }
 0xa5e   :  { %v12502_v4 = vadd.f32 %v6043_v38, %v6035_v19  ;;  %7829 = vmatpush1.bf16.msra.mxu1 %v10445_v62  ;;  %v10420_v62 = vld [vmem:[#allocation34 + $0x12c] ss:$16 sps:$4 sm:$0xff]  }
 0xa5f   :  { %7830 = vmatprep.subr.bf16.mxu1 %v10453_v8  ;;  %v12508_v46 = vpack.c.bf16 %v12500_v57, %v12500_v57  ;;  %v10424_v8 = vld [vmem:[#allocation34 + $0x148] ss:$16 sps:$4 sm:$0xff]  }
 0xa60   :  { %7790 = vmatpush1.bf16.msra.mxu0 %v10358_v58  ;;  %v6308_v17 = vpack.c.bf16 %v12502_v4, %v12502_v4  ;;  %v10432_v58 = vld [vmem:[#allocation34 + $0x16c] ss:$16 sps:$4 sm:$0xff]  }
 0xa61   :  { %7841 = vmatprep.subr.bf16.mxu0 %v10366_v43 }
 0xa62   :  { %7791 = vmatprep.mubr.bf16.mxu0 %v6308_v17  ;;  %7831 = vmatpush1.bf16.msra.mxu1 %v10451_v27  ;;  %v10430_v27 = vld [vmem:[#allocation34 + $0x168] ss:$16 sps:$4 sm:$0xff]  }
 0xa63   :  { %7792 = vmatmul.mubr.bf16.vlgmr.msra.gmra.mrb[60].mxu0 %v12508_v46  ;;  %7882 = vmatprep.subr.bf16.mxu1 %v10459_v26 }
 0xa64   :  { %7842 = vmatpush1.bf16.msra.mxu0 %v10364_v7  ;;  %7873 = vmatprep.mubr.bf16.mxu0 %v6308_v17  ;;  %v10438_v17 = vld [vmem:[#allocation34 + $0x18c] ss:$16 sps:$4 sm:$0xff]   ;;  %v10436_v7 = vld [vmem:[#allocation34 + $0x188] ss:$16 sps:$4 sm:$0xff]  }
 0xa65   :  { %7843 = vmatprep.subr.bf16.mxu0 %v10372_v63  ;;  %v10444_v63 = vld [vmem:[#allocation34 + $0x1ac] ss:$16 sps:$4 sm:$0xff]  }
 0xa68   :  { %7844 = vmatpush1.bf16.msra.mxu0 %v10370_v23  ;;  %v10442_v23 = vld [vmem:[#allocation34 + $0x1a8] ss:$16 sps:$4 sm:$0xff]  }
 0xa69   :  { %7845 = vmatprep.subr.bf16.mxu0 %v10378_v10  ;;  %v10450_v10 = vld [vmem:[#allocation34 + $0x1cc] ss:$16 sps:$4 sm:$0xff]  }
 0xa6c   :  { %7846 = vmatpush1.bf16.msra.mxu0 %v10376_v1 }
 0xa6d   :  { %7847 = vmatprep.subr.bf16.mxu0 %v10384_v36  ;;  %v10448_v36 = vld [vmem:[#allocation34 + $0x1c8] ss:$16 sps:$4 sm:$0xff]  }
 0xa70   :  { %7848 = vmatpush1.bf16.msra.mxu0 %v10382_v59 }
 0xa71   :  { %7849 = vmatprep.subr.bf16.mxu0 %v10390_v0  ;;  %v10456_v0 = vld [vmem:[#allocation34 + $0x1ec] ss:$16 sps:$4 sm:$0xff]  }
 0xa74   :  { %7850 = vmatpush1.bf16.msra.mxu0 %v10388_v61 }
 0xa75   :  { %7851 = vmatprep.subr.bf16.mxu0 %v10396_v50 }
 0xa76   :  { %v5937_v18 = vpop.f32.mrb[48].mxu0 }
 0xa77   :  { %v5938_v41 = vadd.f32 %v5937_v18, %v12482_v60  ;;  %v5939_v24 = vpop.f32.mrb[49].mxu0  ;;  %v10454_v18 = vld [vmem:[#allocation34 + $0x1e8] ss:$16 sps:$4 sm:$0xff]  }
 0xa78   :  { %v5940_v29 = vadd.f32 %v5939_v24, %v12484_v44  ;;  %v5941_v15 = vpop.f32.mrb[50].mxu0  ;;  %v5978_v33 = vpop.f32.mrb[64].mxu1  ;;  %7852 = vmatpush1.bf16.msra.mxu0 %v10394_v6 }
 0xa79   :  { %v5979_v42 = vadd.f32 %v5978_v33, %v5938_v41  ;;  %v5942_v25 = vpop.f32.mrb[51].mxu0  ;;  %v5980_v52 = vpop.f32.mrb[65].mxu1  ;;  %7853 = vmatprep.subr.bf16.mxu0 %v10402_v3  ;;  %v10457_v33 = vld [vmem:[#allocation34 + $0x208] ss:$16 sps:$4 sm:$0xff]  }
 0xa7a   :  { %v5981_v48 = vadd.f32 %v5980_v52, %v5940_v29  ;;  %v5982_v60 = vpop.f32.mrb[66].mxu1  ;;  %v10471_v25 = vld [vmem:[#allocation34 + $0x28c] ss:$16 sps:$4 sm:$0xff]   ;;  %v10469_v52 = vld [vmem:[#allocation34 + $0x288] ss:$16 sps:$4 sm:$0xff]  }
 0xa7b   :  { %v6008_v28 = vadd.f32 %v5997_v51, %v5979_v42  ;;  %v5983_v35 = vpop.f32.mrb[67].mxu1  ;;  %v10466_v42 = vld [vmem:[#allocation34 + $0x268] ss:$16 sps:$4 sm:$0xff]  }
 0xa7c   :  { %v6009_v34 = vadd.f32 %v6001_v40, %v5981_v48  ;;  %7854 = vmatpush1.bf16.msra.mxu0 %v10400_v53  ;;  %v10463_v40 = vld [vmem:[#allocation34 + $0x248] ss:$16 sps:$4 sm:$0xff]   ;;  %v10468_v53 = vld [vmem:[#allocation34 + $0x26c] ss:$16 sps:$4 sm:$0xff]  }
 0xa7d   :  { %v6012_v44 = vsub.f32 0.0, %v6008_v28  ;;  %7855 = vmatprep.subr.bf16.mxu0 %v10408_v39  ;;  %v10474_v39 = vld [vmem:[#allocation34 + $0x2ac] ss:$16 sps:$4 sm:$0xff]   ;;  %v10472_v48 = vld [vmem:[#allocation34 + $0x2a8] ss:$16 sps:$4 sm:$0xff]  }
 0xa7e   :  { %v6013_v49 = vsub.f32 0.0, %v6009_v34 }
 0xa7f   :  { %v6018_v31 = vmul.f32 1.442695, %v6012_v44 }
 0xa80   :  { %v6020_v9 = vmul.f32 1.442695, %v6013_v49  ;;  %7856 = vmatpush1.bf16.msra.mxu0 %v10406_v2  ;;  %v10475_v2 = vld [vmem:[#allocation34 + $0x2c8] ss:$16 sps:$4 sm:$0xff]  }
 0xa81   :  { %10625 = vpow2.f32 %v6018_v31  ;;  %7857 = vmatprep.subr.bf16.mxu0 %v10414_v12  ;;  %v10480_v31 = vld [vmem:[#allocation34 + $0x2ec] ss:$16 sps:$4 sm:$0xff]  }
 0xa82   :  { %10627 = vpow2.f32 %v6020_v9 }
 0xa84   :  { %7858 = vmatpush1.bf16.msra.mxu0 %v10412_v16 }
 0xa85   :  { %7859 = vmatprep.subr.bf16.mxu0 %v10420_v62 }
 0xa88   :  { %7860 = vmatpush1.bf16.msra.mxu0 %v10418_v54  ;;  %v10478_v54 = vld [vmem:[#allocation34 + $0x2e8] ss:$16 sps:$4 sm:$0xff]  }
 0xa89   :  { %7861 = vmatprep.subr.bf16.mxu0 %v10426_v37  ;;  %v10483_v37 = vld [vmem:[#allocation34 + $0x30c] ss:$16 sps:$4 sm:$0xff]  }
 0xa8b   :  { %v10626_v19 = vpop.eup %10625 }
 0xa8c   :  { %v10628_v38 = vpop.eup %10627  ;;  %v6024_v43 = vadd.f32 1.0, %v10626_v19  ;;  %7862 = vmatpush1.bf16.msra.mxu0 %v10424_v8  ;;  %v10481_v8 = vld [vmem:[#allocation34 + $0x308] ss:$16 sps:$4 sm:$0xff]  }
 0xa8d   :  { %v6025_v26 = vadd.f32 1.0, %v10628_v38  ;;  %7863 = vmatprep.subr.bf16.mxu0 %v10432_v58  ;;  %v10486_v58 = vld [vmem:[#allocation34 + $0x32c] ss:$16 sps:$4 sm:$0xff]   ;;  %v10484_v19 = vld [vmem:[#allocation34 + $0x328] ss:$16 sps:$4 sm:$0xff]  }
 0xa8e   :  { %10629 = vrcp.f32 %v6024_v43  ;;  %v10489_v38 = vld [vmem:[#allocation34 + $0x34c] ss:$16 sps:$4 sm:$0xff]   ;;  %v10487_v43 = vld [vmem:[#allocation34 + $0x348] ss:$16 sps:$4 sm:$0xff]  }
 0xa8f   :  { %10631 = vrcp.f32 %v6025_v26  ;;  %v10490_v26 = vld [vmem:[#allocation34 + $0x368] ss:$16 sps:$4 sm:$0xff]  }
 0xa90   :  { %7864 = vmatpush1.bf16.msra.mxu0 %v10430_v27  ;;  %v10492_v27 = vld [vmem:[#allocation34 + $0x36c] ss:$16 sps:$4 sm:$0xff]  }
 0xa91   :  { %7865 = vmatprep.subr.bf16.mxu0 %v10438_v17  ;;  %v10495_v17 = vld [vmem:[#allocation34 + $0x38c] ss:$16 sps:$4 sm:$0xff]  }
 0xa94   :  { %7866 = vmatpush1.bf16.msra.mxu0 %v10436_v7  ;;  %v10493_v7 = vld [vmem:[#allocation34 + $0x388] ss:$16 sps:$4 sm:$0xff]  }
 0xa95   :  { %7867 = vmatprep.subr.bf16.mxu0 %v10444_v63  ;;  %v10498_v63 = vld [vmem:[#allocation34 + $0x3ac] ss:$16 sps:$4 sm:$0xff]  }
 0xa98   :  { %v10630_v1 = vpop.eup %10629  ;;  %7868 = vmatpush1.bf16.msra.mxu0 %v10442_v23  ;;  %v10496_v23 = vld [vmem:[#allocation34 + $0x3a8] ss:$16 sps:$4 sm:$0xff]  }
 0xa99   :  { %v10632_v59 = vpop.eup %10631  ;;  %7869 = vmatprep.subr.bf16.mxu0 %v10450_v10  ;;  %v6040_v61 = vsub.f32 1.0, %v10630_v1  ;;  %v6036_v6 = vmul.f32 %v10630_v1, %v12399_v14  ;;  %v10501_v10 = vld [vmem:[#allocation34 + $0x3cc] ss:$16 sps:$4 sm:$0xff]   ;;  %v10499_v1 = vld [vmem:[#allocation34 + $0x3c8] ss:$16 sps:$4 sm:$0xff]  }
 0xa9a   :  { %v6041_v50 = vsub.f32 1.0, %v10632_v59  ;;  %v6037_v41 = vmul.f32 %v10632_v59, %v12367_v56  ;;  %v10465_v56 = vld [vmem:[#allocation34 + $0x24c] ss:$16 sps:$4 sm:$0xff]   ;;  %v10502_v59 = vld [vmem:[#allocation34 + $0x3e8] ss:$16 sps:$4 sm:$0xff]  }
 0xa9b   :  { %v6044_v3 = vmul.f32 %v6040_v61, %v12333_v20  ;;  %v10462_v20 = vld [vmem:[#allocation34 + $0x22c] ss:$16 sps:$4 sm:$0xff]  }
 0xa9c   :  { %7870 = vmatpush1.bf16.msra.mxu0 %v10448_v36  ;;  %v6045_v24 = vmul.f32 %v6041_v50, %v12306_v45  ;;  %v10460_v45 = vld [vmem:[#allocation34 + $0x228] ss:$16 sps:$4 sm:$0xff]   ;;  %v10504_v36 = vld [vmem:[#allocation34 + $0x3ec] ss:$16 sps:$4 sm:$0xff]  }
 0xa9d   :  { %7871 = vmatprep.subr.bf16.mxu0 %v10456_v0  ;;  %v12521_v51 = vadd.f32 %v6044_v3, %v6036_v6 }
 0xa9e   :  { %v12523_v29 = vadd.f32 %v6045_v24, %v6037_v41 }
 0xa9f   :  { %v12529_v14 = vpack.c.bf16 %v12521_v51, %v12521_v51 }
 0xaa0   :  { %7872 = vmatpush1.bf16.msra.mxu0 %v10454_v18  ;;  %v6310_v15 = vpack.c.bf16 %v12523_v29, %v12523_v29 }
 0xaa2   :  { %7832 = vmatprep.mubr.bf16.mxu1 %v6310_v15 }
 0xaa3   :  { %7833 = vmatmul.mubr.bf16.vlgmr.msra.gmra.mrb[76].mxu1 %v12529_v14  ;;  %7874 = vmatmul.mubr.bf16.vlgmr.msra.gmra.mrb[64].mxu0 %v12508_v46  ;;  %v10477_v46 = vld [vmem:[#allocation34 + $0x2cc] ss:$16 sps:$4 sm:$0xff]  }
 0xaa4   :  { %7883 = vmatpush1.bf16.msra.mxu1 %v10457_v33  ;;  %7914 = vmatprep.mubr.bf16.mxu1 %v6310_v15 }
 0xaa5   :  { %7884 = vmatprep.subr.bf16.mxu1 %v10462_v20  ;;  %v10505_v20 = vld [vmem:[#allocation38 + $0x40] sm:$0xff]  }
 0xaa6   :  { %9282 = vmatprep.subr.bf16.mxu0 %v10505_v20 }
 0xaa8   :  { %7885 = vmatpush1.bf16.msra.mxu1 %v10460_v45  ;;  %v10506_v45 = vld [vmem:[#allocation38] sm:$0xff]  }
 0xaa9   :  { %7886 = vmatprep.subr.bf16.mxu1 %v10465_v56  ;;  %9283 = vmatpush3.bf16.msra.mxu0 %v10506_v45  ;;  %v10507_v56 = vld [vmem:[#allocation38 + $0x48] sm:$0xff]  }
 0xaaa   :  { %9284 = vmatprep.subr.bf16.mxu0 %v10507_v56 }
 0xaac   :  { %7887 = vmatpush1.bf16.msra.mxu1 %v10463_v40  ;;  %v10508_v40 = vld [vmem:[#allocation38 + $0x8] sm:$0xff]  }
 0xaad   :  { %7888 = vmatprep.subr.bf16.mxu1 %v10468_v53  ;;  %v10509_v53 = vld [vmem:[#allocation38 + $0x50] sm:$0xff]   ;;  %9285 = vmatpush3.bf16.msra.mxu0 %v10508_v40 }
 0xaae   :  { %9286 = vmatprep.subr.bf16.mxu0 %v10509_v53 }
 0xab0   :  { %7889 = vmatpush1.bf16.msra.mxu1 %v10466_v42  ;;  %v10511_v42 = vld [vmem:[#allocation38 + $0x58] sm:$0xff]  }
 0xab1   :  { %7890 = vmatprep.subr.bf16.mxu1 %v10471_v25  ;;  %v10512_v25 = vld [vmem:[#allocation38 + $0x18] sm:$0xff]  }
 0xab4   :  { %7891 = vmatpush1.bf16.msra.mxu1 %v10469_v52  ;;  %v10513_v52 = vld [vmem:[#allocation38 + $0x60] sm:$0xff]  }
 0xab5   :  { %7892 = vmatprep.subr.bf16.mxu1 %v10474_v39  ;;  %v10514_v39 = vld [vmem:[#allocation38 + $0x20] sm:$0xff]  }
 0xab6   :  { %v6989_v60 = vpop.f32.mrb[52].mxu0 }
 0xab7   :  { %v6991_v28 = vpop.f32.mrb[53].mxu0 }
 0xab8   :  { %7893 = vmatpush1.bf16.msra.mxu1 %v10472_v48  ;;  %v6993_v35 = vpop.f32.mrb[54].mxu0  ;;  %v7030_v34 = vpop.f32.mrb[68].mxu1  ;;  %v10515_v48 = vld [vmem:[#allocation38 + $0x68] sm:$0xff]  }
 0xab9   :  { %v12533_v44 = vadd.f32 %v7030_v34, %v6989_v60  ;;  %v6994_v12 = vpop.f32.mrb[55].mxu0  ;;  %v7032_v49 = vpop.f32.mrb[69].mxu1  ;;  %7894 = vmatprep.subr.bf16.mxu1 %v10477_v46  ;;  %v10516_v46 = vld [vmem:[#allocation38 + $0x28] sm:$0xff]   ;;  %v10517_v60 = vld [vmem:[#allocation38 + $0x70] sm:$0xff]   ;;  %v10519_v35 = vld [vmem:[#allocation38 + $0x78] sm:$0xff]  }
 0xaba   :  { %v12535_v9 = vadd.f32 %v7032_v49, %v6991_v28  ;;  %v7034_v16 = vpop.f32.mrb[70].mxu1  ;;  %v10518_v28 = vld [vmem:[#allocation38 + $0x30] sm:$0xff]   ;;  %v10520_v34 = vld [vmem:[#allocation38 + $0x38] sm:$0xff]  }
 0xabb   :  { %v7035_v62 = vpop.f32.mrb[71].mxu1 }
 0xabc   :  { %7895 = vmatpush1.bf16.msra.mxu1 %v10475_v2 }
 0xabd   :  { %7896 = vmatprep.subr.bf16.mxu1 %v10480_v31 }
 0xac0   :  { %7897 = vmatpush1.bf16.msra.mxu1 %v10478_v54  ;;  %v10521_v54 = vld [vmem:[#allocation38 + $0xc0] sm:$0xff]  }
 0xac1   :  { %7898 = vmatprep.subr.bf16.mxu1 %v10483_v37  ;;  %v10522_v37 = vld [vmem:[#allocation38 + $0x80] sm:$0xff]  }
 0xac4   :  { %7899 = vmatpush1.bf16.msra.mxu1 %v10481_v8  ;;  %v10523_v8 = vld [vmem:[#allocation38 + $0xc8] sm:$0xff]  }
 0xac5   :  { %7900 = vmatprep.subr.bf16.mxu1 %v10486_v58  ;;  %v10524_v58 = vld [vmem:[#allocation38 + $0x88] sm:$0xff]  }
 0xac8   :  { %7901 = vmatpush1.bf16.msra.mxu1 %v10484_v19  ;;  %v10525_v19 = vld [vmem:[#allocation38 + $0xd0] sm:$0xff]  }
 0xac9   :  { %7902 = vmatprep.subr.bf16.mxu1 %v10489_v38  ;;  %v10526_v38 = vld [vmem:[#allocation38 + $0x90] sm:$0xff]  }
 0xacc   :  { %7903 = vmatpush1.bf16.msra.mxu1 %v10487_v43  ;;  %v10527_v43 = vld [vmem:[#allocation38 + $0xd8] sm:$0xff]  }
 0xacd   :  { %7904 = vmatprep.subr.bf16.mxu1 %v10492_v27  ;;  %v10528_v27 = vld [vmem:[#allocation38 + $0x98] sm:$0xff]  }
 0xad0   :  { %7905 = vmatpush1.bf16.msra.mxu1 %v10490_v26  ;;  %v10531_v26 = vld [vmem:[#allocation38 + $0xe8] sm:$0xff]  }
 0xad1   :  { %7906 = vmatprep.subr.bf16.mxu1 %v10495_v17  ;;  %v10532_v17 = vld [vmem:[#allocation38 + $0xa8] sm:$0xff]  }
 0xad4   :  { %7907 = vmatpush1.bf16.msra.mxu1 %v10493_v7  ;;  %v10533_v7 = vld [vmem:[#allocation38 + $0xf0] sm:$0xff]  }
 0xad5   :  { %7908 = vmatprep.subr.bf16.mxu1 %v10498_v63  ;;  %v10534_v63 = vld [vmem:[#allocation38 + $0xb0] sm:$0xff]  }
 0xad8   :  { %7909 = vmatpush1.bf16.msra.mxu1 %v10496_v23  ;;  %v10535_v23 = vld [vmem:[#allocation38 + $0xf8] sm:$0xff]  }
 0xad9   :  { %7910 = vmatprep.subr.bf16.mxu1 %v10501_v10  ;;  %v10536_v10 = vld [vmem:[#allocation38 + $0xb8] sm:$0xff]  }
 0xadc   :  { %7911 = vmatpush1.bf16.msra.mxu1 %v10499_v1  ;;  %v6306_v1 = vld [vmem:[#allocation37] sm:$0xf] }
 0xadd   :  { %7912 = vmatprep.subr.bf16.mxu1 %v10504_v36  ;;  %v7927_v36 = vrot.slane %v6306_v1, %v11907_v21 }
 0xae0   :  { %7913 = vmatpush1.bf16.msra.mxu1 %v10502_v59 }
 0xae1   :  { %9304 = vmatprep.subr.bf16.mxu1 %v10521_v54 }
 0xae3   :  { %7915 = vmatmul.mubr.bf16.vlgmr.msra.gmra.mrb[80].mxu1 %v12529_v14  ;;  %v10510_v14 = vld [vmem:[#allocation38 + $0x10] sm:$0xff]  }
 0xae4   :  { %9287 = vmatpush3.bf16.msra.mxu0 %v10510_v14  ;;  %9305 = vmatpush3.bf16.msra.mxu1 %v10522_v37 }
 0xae5   :  { %9288 = vmatprep.subr.bf16.mxu0 %v10511_v42  ;;  %9306 = vmatprep.subr.bf16.mxu1 %v10523_v8 }
 0xae8   :  { %9289 = vmatpush3.bf16.msra.mxu0 %v10512_v25  ;;  %9307 = vmatpush3.bf16.msra.mxu1 %v10524_v58 }
 0xae9   :  { %9290 = vmatprep.subr.bf16.mxu0 %v10513_v52  ;;  %9308 = vmatprep.subr.bf16.mxu1 %v10525_v19 }
 0xaec   :  { %9291 = vmatpush3.bf16.msra.mxu0 %v10514_v39  ;;  %9309 = vmatpush3.bf16.msra.mxu1 %v10526_v38 }
 0xaed   :  { %9292 = vmatprep.subr.bf16.mxu0 %v10515_v48  ;;  %9310 = vmatprep.subr.bf16.mxu1 %v10527_v43 }
 0xaf0   :  { %9293 = vmatpush3.bf16.msra.mxu0 %v10516_v46  ;;  %9311 = vmatpush3.bf16.msra.mxu1 %v10528_v27 }
 0xaf1   :  { %9294 = vmatprep.subr.bf16.mxu0 %v10517_v60 }
 0xaf4   :  { %9295 = vmatpush3.bf16.msra.mxu0 %v10518_v28 }
 0xaf5   :  { %9296 = vmatprep.subr.bf16.mxu0 %v10519_v35 }
 0xaf6   :  { %v7071_v0 = vpop.f32.mrb[56].mxu0 }
 0xaf7   :  { %v7073_v61 = vpop.f32.mrb[57].mxu0 }
 0xaf8   :  { %v7075_v50 = vpop.f32.mrb[58].mxu0  ;;  %v7112_v6 = vpop.f32.mrb[72].mxu1  ;;  %9297 = vmatpush3.bf16.msra.mxu0 %v10520_v34 }
 0xaf9   :  { %v12538_v3 = vadd.f32 %v7112_v6, %v7071_v0  ;;  %v7076_v18 = vpop.f32.mrb[59].mxu0  ;;  %v7114_v41 = vpop.f32.mrb[73].mxu1  ;;  %9407 = vmatprep.subr.bf16.mxu0 %v11314_v11 }
 0xafa   :  { %v12540_v24 = vadd.f32 %v7114_v41, %v7073_v61  ;;  %v7116_v15 = vpop.f32.mrb[74].mxu1  ;;  %v7931_v61 = vrot.slane %v6306_v1, %v11910_v22 }
 0xafb   :  { %v7117_v33 = vpop.f32.mrb[75].mxu1 }
 0xb36   :  { %v7793_v2 = vpop.f32.mrb[60].mxu0 }
 0xb37   :  { %v7794_v12 = vadd.f32 %v7793_v2, %v12533_v44  ;;  %v7795_v49 = vpop.f32.mrb[61].mxu0  ;;  %v10529_v44 = vld [vmem:[#allocation38 + $0xe0] sm:$0xff]  }
 0xb38   :  { %v7796_v31 = vadd.f32 %v7795_v49, %v12535_v9  ;;  %v7797_v16 = vpop.f32.mrb[62].mxu0  ;;  %v10530_v9 = vld [vmem:[#allocation38 + $0xa0] sm:$0xff]   ;;  %9312 = vmatprep.subr.bf16.mxu1 %v10529_v44  ;;  %v7988_v49 = vld [vmem:[%s11478_s3] sm:$0xff] }
 0xb39   :  { %v7798_v62 = vpop.f32.mrb[63].mxu0  ;;  %9313 = vmatpush3.bf16.msra.mxu1 %v10530_v9 }
 0xb3a   :  { %9314 = vmatprep.subr.bf16.mxu1 %v10531_v26 }
 0xb3d   :  { %9315 = vmatpush3.bf16.msra.mxu1 %v10532_v17 }
 0xb3e   :  { %9316 = vmatprep.subr.bf16.mxu1 %v10533_v7 }
 0xb41   :  { %9317 = vmatpush3.bf16.msra.mxu1 %v10534_v63 }
 0xb42   :  { %9318 = vmatprep.subr.bf16.mxu1 %v10535_v23 }
 0xb45   :  { %9319 = vmatpush3.bf16.msra.mxu1 %v10536_v10 }
 0xb76   :  { %v7834_v59 = vpop.f32.mrb[76].mxu1  ;;  %v7875_v0 = vpop.f32.mrb[64].mxu0 }
 0xb77   :  { %v7835_v50 = vadd.f32 %v7834_v59, %v7794_v12  ;;  %v7876_v6 = vadd.f32 %v7875_v0, %v12538_v3  ;;  %v7836_v18 = vpop.f32.mrb[77].mxu1  ;;  %v7877_v41 = vpop.f32.mrb[65].mxu0 }
 0xb78   :  { %v7837_v15 = vadd.f32 %v7836_v18, %v7796_v31  ;;  %v7878_v33 = vadd.f32 %v7877_v41, %v12540_v24  ;;  %v7838_v20 = vpop.f32.mrb[78].mxu1  ;;  %v7879_v45 = vpop.f32.mrb[66].mxu0  ;;  %v7989_v31 = vld [vmem:[%s11478_s3 + $0x8] sm:$0xff]  ;;  %v7990_v41 = vld [vmem:[%s11478_s3 + $0x10] sm:$0xff] }
 0xb79   :  { %v7944_v56 = vadd.f32 %v7927_v36, %v7835_v50  ;;  %v7839_v40 = vpop.f32.mrb[79].mxu1  ;;  %v7880_v53 = vpop.f32.mrb[67].mxu0 }
 0xb7a   :  { %v7945_v14 = vadd.f32 %v7931_v61, %v7837_v15  ;;  %v7991_v15 = vld [vmem:[%s11478_s3 + $0x18] sm:$0xff]  ;;  %s12629_s3 = sld [smem:[#allocation69_spill]] }
 0xb7b   :  { %v7948_v42 = vsub.f32 0.0, %v7944_v56 }
 0xb7c   :  { %v7949_v21 = vsub.f32 0.0, %v7945_v14  ;;  %v10541_v14 = vld [vmem:[%s12628_s19 + $0x20] sm:$0xff]  }
 0xb7d   :  { %v7952_v25 = vmul.f32 1.442695, %v7948_v42  ;;  %v10542_v42 = vld [vmem:[%s12628_s19 + $0x28] sm:$0xff]  }
 0xb7e   :  { %v7954_v52 = vmul.f32 1.442695, %v7949_v21  ;;  %v10543_v21 = vld [vmem:[%s12628_s19 + $0x30] sm:$0xff]  }
 0xb7f   :  { %10633 = vpow2.f32 %v7952_v25  ;;  %v10544_v25 = vld [vmem:[%s12628_s19 + $0x38] sm:$0xff]  }
 0xb80   :  { %10635 = vpow2.f32 %v7954_v52 }
 0xb89   :  { %v10634_v22 = vpop.eup %10633 }
 0xb8a   :  { %v10636_v3 = vpop.eup %10635  ;;  %v7960_v39 = vadd.f32 1.0, %v10634_v22 }
 0xb8b   :  { %v7961_v48 = vadd.f32 1.0, %v10636_v3 }
 0xb8c   :  { %10637 = vrcp.f32 %v7960_v39 }
 0xb8d   :  { %10639 = vrcp.f32 %v7961_v48 }
 0xb96   :  { %v10638_v24 = vpop.eup %10637 }
 0xb97   :  { %v10640_v46 = vpop.eup %10639  ;;  %v7976_v60 = vsub.f32 1.0, %v10638_v24  ;;  %v7972_v35 = vmul.f32 %v10638_v24, %v12500_v57  ;;  %v7935_v57 = vrot.slane %v6306_v1, %v11924_v47  ;;  %v9216_v24 = vld [vmem:[%s12629_s3] ss:$0 sm:$0xff] }
 0xb98   :  { %v7977_v28 = vsub.f32 1.0, %v10640_v46  ;;  %v7973_v2 = vmul.f32 %v10640_v46, %v12502_v4  ;;  %v7939_v4 = vrot.slane %v6306_v1, %v11954_v32 }
 0xb99   :  { %v7980_v34 = vmul.f32 %v7976_v60, %v12464_v13 }
 0xb9a   :  { %v7981_v12 = vmul.f32 %v7977_v28, %v12433_v55 }
 0xb9b   :  { %v7984_v16 = vadd.f32 %v7980_v34, %v7972_v35 }
 0xb9c   :  { %v7985_v62 = vadd.f32 %v7981_v12, %v7973_v2 }
 0xb9d   :  { %v7992_v54 = vmul.f32 %v7988_v49, %v7984_v16  ;;  %v8344_v49 = vld [vmem:[%s11483_s17] sm:$0xff] }
 0xb9e   :  { %v7993_v37 = vmul.f32 %v7989_v31, %v7985_v62 }
 0xb9f   :  { %v7996_v58 = vpack.c.bf16 %v7992_v54, %v7992_v54  ;;  %v9257_v54 = vld [vmem:[#allocation40] ss:$0 sm:$0xff] }
 0xba0   :  { %v7997_v8 = vpack.c.bf16 %v7993_v37, %v7993_v37  ;;  %v10649_v37 = vld [vmem:[%s12625_s4] sm:$0xff] }
 0xba2   :  { %8295 = vmatprep.mubr.bf16.mxu0 %v7997_v8 }
 0xba3   :  { %8296 = vmatmul.mubr.bf16.vlgmr.msra.gmra.mrb[68].mxu0 %v7996_v58 }
 0xba4   :  { %9423 = vmatprep.mubr.msk.bf16.mxu0 %vm11318_vm15, %v11314_v11 }
 0xbb6   :  { %v7916_v13 = vpop.f32.mrb[80].mxu1 }
 0xbb7   :  { %v7917_v19 = vadd.f32 %v7916_v13, %v7876_v6  ;;  %v7918_v55 = vpop.f32.mrb[81].mxu1 }
 0xbb8   :  { %v7919_v38 = vadd.f32 %v7918_v55, %v7878_v33  ;;  %v7920_v43 = vpop.f32.mrb[82].mxu1 }
 0xbb9   :  { %v7946_v27 = vadd.f32 %v7935_v57, %v7917_v19  ;;  %v7921_v44 = vpop.f32.mrb[83].mxu1 }
 0xbba   :  { %v7947_v9 = vadd.f32 %v7939_v4, %v7919_v38 }
 0xbbb   :  { %v7950_v26 = vsub.f32 0.0, %v7946_v27 }
 0xbbc   :  { %v7951_v17 = vsub.f32 0.0, %v7947_v9 }
 0xbbd   :  { %v7956_v7 = vmul.f32 1.442695, %v7950_v26 }
 0xbbe   :  { %v7958_v63 = vmul.f32 1.442695, %v7951_v17 }
 0xbbf   :  { %10641 = vpow2.f32 %v7956_v7 }
 0xbc0   :  { %10643 = vpow2.f32 %v7958_v63 }
 0xbc9   :  { %v10642_v23 = vpop.eup %10641 }
 0xbca   :  { %v10644_v47 = vpop.eup %10643  ;;  %v7962_v10 = vadd.f32 1.0, %v10642_v23 }
 0xbcb   :  { %v7963_v36 = vadd.f32 1.0, %v10644_v47 }
 0xbcc   :  { %10645 = vrcp.f32 %v7962_v10 }
 0xbcd   :  { %10647 = vrcp.f32 %v7963_v36 }
 0xbd6   :  { %v10646_v32 = vpop.eup %10645 }
 0xbd7   :  { %v10648_v1 = vpop.eup %10647  ;;  %v7978_v59 = vsub.f32 1.0, %v10646_v32  ;;  %v7974_v61 = vmul.f32 %v10646_v32, %v12521_v51  ;;  %v10537_v51 = vld [vmem:[%s12628_s19] sm:$0xff]  }
 0xbd8   :  { %v7979_v0 = vsub.f32 1.0, %v10648_v1  ;;  %v7975_v6 = vmul.f32 %v10648_v1, %v12523_v29  ;;  %9408 = vmatpush3.bf16.msra.mxu0 %v10537_v51  ;;  %v10540_v29 = vld [vmem:[%s12628_s19 + $0x18] sm:$0xff]  }
 0xbd9   :  { %v7982_v50 = vmul.f32 %v7978_v59, %v12468_v5  ;;  %v10538_v5 = vld [vmem:[%s12628_s19 + $0x8] sm:$0xff]   ;;  %9409 = vmatprep.subr.bf16.mxu0 %v11314_v11 }
 0xbda   :  { %v7983_v18 = vmul.f32 %v7979_v0, %v12437_v30  ;;  %v10539_v30 = vld [vmem:[%s12628_s19 + $0x10] sm:$0xff]  }
 0xbdb   :  { %v7986_v33 = vadd.f32 %v7982_v50, %v7974_v61 }
 0xbdc   :  { %v7987_v20 = vadd.f32 %v7983_v18, %v7975_v6  ;;  %9410 = vmatpush3.bf16.msra.mxu0 %v10538_v5 }
 0xbdd   :  { %v7994_v45 = vmul.f32 %v7990_v41, %v7986_v33  ;;  %9411 = vmatprep.subr.bf16.mxu0 %v11314_v11 }
 0xbde   :  { %v7995_v56 = vmul.f32 %v7991_v15, %v7987_v20 }
 0xbdf   :  { %v7998_v53 = vpack.c.bf16 %v7994_v45, %v7994_v45 }
 0xbe0   :  { %v7999_v40 = vpack.c.bf16 %v7995_v56, %v7995_v56  ;;  %9412 = vmatpush3.bf16.msra.mxu0 %v10539_v30 }
 0xbe1   :  { %9413 = vmatprep.subr.bf16.mxu0 %v11314_v11 }
 0xbe2   :  { %8335 = vmatprep.mubr.bf16.mxu1 %v7999_v40 }
 0xbe3   :  { %8336 = vmatmul.mubr.bf16.vlgmr.msra.gmra.mrb[84].mxu1 %v7998_v53 }
 0xbe4   :  { %9414 = vmatpush3.bf16.msra.mxu0 %v10540_v29 }
 0xbe5   :  { %9415 = vmatprep.subr.bf16.mxu0 %v11314_v11 }
 0xbe8   :  { %9416 = vmatpush3.bf16.msra.mxu0 %v10541_v14 }
 0xbe9   :  { %9417 = vmatprep.subr.bf16.mxu0 %v11314_v11 }
 0xbec   :  { %9418 = vmatpush3.bf16.msra.mxu0 %v10542_v42 }
 0xbed   :  { %9419 = vmatprep.subr.bf16.mxu0 %v11314_v11 }
 0xbf0   :  { %9420 = vmatpush3.bf16.msra.mxu0 %v10543_v21 }
 0xbf1   :  { %9421 = vmatprep.subr.bf16.mxu0 %v11314_v11 }
 0xbf4   :  { %9422 = vmatpush3.bf16.msra.mxu0 %v10544_v25 }
 0xc76   :  { %v9298_v52 = vpop.f32.mrb[68].mxu0 }
 0xc77   :  { %v9299_v22 = vpop.f32.mrb[69].mxu0 }
 0xc78   :  { %v9300_v3 = vadd.f32 %v9299_v22, %v9298_v52  ;;  %v9301_v39 = vpop.f32.mrb[70].mxu0 }
 0xc79   :  { %v9302_v48 = vpop.f32.mrb[71].mxu0 }
 0xc7a   :  { %v8298_v28 = vadd.f32 %v9300_v3, %v9216_v24 }
 0xcb6   :  { %v9320_v46 = vpop.f32.mrb[84].mxu1 }
 0xcb7   :  { %v9321_v60 = vpop.f32.mrb[85].mxu1 }
 0xcb8   :  { %v9322_v35 = vadd.f32 %v9321_v60, %v9320_v46  ;;  %v9323_v34 = vpop.f32.mrb[86].mxu1 }
 0xcb9   :  { %v9324_v2 = vpop.f32.mrb[87].mxu1 }
 0xcba   :  { %v8338_v12 = vadd.f32 %v9322_v35, %v8298_v28 }
 0xcbc   :  { %v8343_v31 = vmax.f32 %v8338_v12, 0.0 }
 0xcbe   :  { %v8345_v16 = vmul.f32 %v8344_v49, %v8343_v31 }
 0xcc0   :  { %v8346_v62 = vpack.c.bf16 %v8345_v16, %v8345_v16 }
 0xcc2   :  { %9424 = vmatmul.mubr.bf16.vlgmr.msra.gmra.mrb[72].mxu0 %v8346_v62 }
 0xd95   :  { %v8445_v11 = vpop.f32.mrb[72].mxu0 }
 0xd96   :  { %v8451_v8 = vadd.f32 %v10649_v37, %v8445_v11  ;;  %v9425_v58 = vpop.f32.mrb[73].mxu0 }
 0xd97   :  { %v8448_v57 = vpop.f32.mrb[74].mxu0 }
 0xd98   :  { %v8459_v13 = vadd.f32 %v9257_v54, %v8451_v8  ;;  %v9426_v4 = vpop.f32.mrb[75].mxu0 }
 0xd9a   :  { %8460 = vst [vmem:[#allocation41] sm:$0xff] %v8459_v13 }
 0xd9b   :  { %11211 = shalt.err (!%p11208_p8)
}
 0xd9c   :  { %s11212_s17 = scalar_lea.hbm %s11488_s14, 128 }
 0xd9d   :  { %p11213_p9 = scmp.ne.s32.totalorder %s11488_s14, %s11212_s17  ;;  %p11216_p10 = scmp.lt.u32.totalorder %s11212_s17, %s11488_s14 }
 0xd9f   :  { %p11218_p11 = pnand %p11216_p10, %p11213_p9 }
 0xda1   :  { %11221 = shalt.err (!%p11218_p11)
}
 0xda2   :  { %8470 = dma.vmem_to_hbm [thread:$0]  %s8468_s5, 128, %s11488_s14, [#allocation4]  }
 0xda3   :  { %11248 = dma.done.wait [#allocation4], 128  }
 0xda4   :  { %11249 = vsyncadd [#allocation4], 4294967168 }
 0xda5   :  { %8474 = vsyncpa [#allocation3], 1 }
 0xda6   :  { %8475 = vsyncpa [#allocation6], 1 }
 0xda7   :  { %8476 = vsyncpa [#allocation9], 1 }
 0xda8   :  { %8477 = vsyncpa [#allocation12], 1 }
 0xda9   :  { %8478 = vsyncpa [#allocation15], 1 }
 0xdaa   :  { %8479 = vsyncpa [#allocation18], 1 }
 0xdab   :  { %8480 = vsyncpa [#allocation21], 1 }
 0xdac   :  { %8481 = vsyncpa [#allocation24], 1 }
 0xdad   :  { %8482 = vsyncpa [#allocation27], 1 }
 0xdae   :  { %8483 = vsyncpa [#allocation30], 1 }
 0xdaf   :  { %8484 = vsyncpa [#allocation33], 1 }
 0xdb0   :  { %8485 = vsyncpa [#allocation36], 1 }
 0xdb1   :  { %8486 = vsyncpa [#allocation39], 1 }
 0xdb2   :  { %8487 = vsyncpa [#allocation4], 1 }

</bundles_post_ra>
